<compile_context>
chip_gen: v7x
topology: tpu7x:2x2x1
jax: 0.10.0
libtpu: 0.0.40
codegen_flags: <defaults>
</compile_context>

<pallas_src>
import functools
import math

import jax
import jax.numpy as jnp
from jax.experimental import pallas as pl
from jax.experimental.pallas import tpu as pltpu

_BN_EPS = 1e-5
_TM_CAP = 1024        # M-tile cap for the 1x1-conv matmul path
_TN_CAP = 1024        # N-tile cap for the 1x1-conv matmul path (full-N when OC <= cap)
_CONV_TN_CAP = 256    # OC-tile cap for the implicit 3x3/7x7 conv kernel


def _round_up(x, m):
    return ((x + m - 1) // m) * m


@functools.lru_cache(maxsize=None)
def _vmem_limit():
    # v7x: 64 MiB physical VMEM per core -> ~48 MiB budget; v5e/v6e: 128 MiB -> ~96 MiB.
    try:
        cap = int(pltpu.get_tpu_info().vmem_capacity_bytes)
    except Exception:
        cap = 64 * 1024 * 1024
    return max(32 * 1024 * 1024, min(100 * 1024 * 1024, (cap * 3) // 4))


# --------------------------------------------------------------------------
# 1x1 conv / pointwise matmul: single pass, weight-resident, fused bias(+res)(+ReLU)
# --------------------------------------------------------------------------
def _mm_kernel(*refs, relu, has_residual):
    if has_residual:
        a_ref, w_ref, b_ref, r_ref, o_ref = refs
    else:
        a_ref, w_ref, b_ref, o_ref = refs
        r_ref = None
    y = jnp.dot(a_ref[...], w_ref[...], preferred_element_type=jnp.float32)
    y = y + b_ref[...]                                   # bias (BN scale pre-folded into W)
    if r_ref is not None:
        y = y + r_ref[...].astype(jnp.float32)           # fused residual add
    if relu:
        y = jnp.maximum(y, 0.0)
    o_ref[...] = y.astype(o_ref.dtype)


@functools.lru_cache(maxsize=None)
def _build_matmul(mp, k, oc, tm, tn, relu, has_residual, out_dtype):
    grid = (mp // tm, oc // tn)
    in_specs = [
        pl.BlockSpec((tm, k), lambda i, j: (i, 0)),       # full-K A block
        pl.BlockSpec((k, tn), lambda i, j: (0, j)),       # weight stays VMEM-resident
        pl.BlockSpec((1, tn), lambda i, j: (0, j)),       # bias
    ]
    if has_residual:
        in_specs.append(pl.BlockSpec((tm, tn), lambda i, j: (i, j)))
    bytes_accessed = 2 * (mp * k + k * oc + mp * oc) + 4 * oc
    if has_residual:
        bytes_accessed += 2 * mp * oc
    return pl.pallas_call(
        functools.partial(_mm_kernel, relu=relu, has_residual=has_residual),
        out_shape=jax.ShapeDtypeStruct((mp, oc), out_dtype),
        grid=grid,
        in_specs=in_specs,
        out_specs=pl.BlockSpec((tm, tn), lambda i, j: (i, j)),
        compiler_params=pltpu.CompilerParams(
            dimension_semantics=("parallel", "parallel"),
            vmem_limit_bytes=_vmem_limit()),
        cost_estimate=pl.CostEstimate(flops=2 * mp * k * oc,
                                      transcendentals=0,
                                      bytes_accessed=bytes_accessed),
    )


def _pick_tm(m, cap=_TM_CAP):
    """Largest M tile <= cap that avoids padding when possible (16-row bf16 alignment)."""
    if m <= cap:
        return _round_up(m, 16)
    t = cap - cap % 16
    while t >= max(16, cap // 2):
        if m % t == 0:
            return t
        t -= 16
    return cap


def matmul_bias(a, w, b, relu=False, residual=None, out_dtype=jnp.bfloat16):
    m, k = a.shape
    k2, oc = w.shape
    assert k == k2
    tn = min(_TN_CAP, oc)
    tm = _pick_tm(m)
    mp = _round_up(m, tm)
    a_p = a.astype(jnp.bfloat16)
    if mp != m:
        a_p = jnp.pad(a_p, ((0, mp - m), (0, 0)))
    args = [a_p, w, b]
    if residual is not None:
        r = residual.astype(jnp.bfloat16)
        if mp != m:
            r = jnp.pad(r, ((0, mp - m), (0, 0)))
        args.append(r)
    y = _build_matmul(mp, k, oc, tm, tn, bool(relu),
                      residual is not None, out_dtype)(*args)
    return y[:m] if mp != m else y


# --------------------------------------------------------------------------
# Implicit (no-im2col) stencil conv / max-pool.
# The padded NHWC map is phase-split (stride) and flattened once in HBM; each tap is a
# constant-offset contiguous slice of the VMEM-resident image.  A few garbage columns
# per output row (the horizontal halo) are computed and sliced off outside.
# --------------------------------------------------------------------------
def _prepare_stencil(x, k, stride, padding):
    n, h, w, c = x.shape
    oh = (h + 2 * padding - k) // stride + 1
    ow = (w + 2 * padding - k) // stride + 1
    hh = oh + (k - 1) // stride                 # per-phase rows needed (incl. halo)
    wh = ow + (k - 1) // stride
    thp, twp = stride * hh, stride * wh         # padded spatial extents (>= h+2p, w+2p)
    xp = jnp.pad(x, ((0, 0),
                     (padding, thp - h - padding),
                     (padding, twp - w - padding),
                     (0, 0)))
    xp = xp.reshape(n, hh, stride, wh, stride, c)
    xp = jnp.transpose(xp, (0, 2, 4, 1, 3, 5)).reshape(n, stride * stride, hh * wh, c)
    extra = (k - 1) // stride                   # wrap-around guard rows for garbage cols
    if extra:
        xp = jnp.pad(xp, ((0, 0), (0, 0), (0, extra), (0, 0)))
    taps = tuple((i * k + j,
                  (i % stride) * stride + (j % stride),       # phase index
                  (i // stride) * wh + (j // stride))          # flat row offset
                 for i in range(k) for j in range(k))
    mo = oh * wh                                # flattened output rows (incl. garbage cols)
    return xp, taps, mo, oh, ow, wh


def _conv_kernel(x_ref, w_ref, b_ref, o_ref, acc_ref, *, taps, relu):
    # x_ref: [1, P, L, C]  w_ref: [T, C, tn]  b_ref: [1, tn]  o_ref: [1, Mo, tn]
    mo = acc_ref.shape[0]
    t0, ph0, off0 = taps[0]
    a0 = x_ref[0, ph0, pl.ds(off0, mo), :]
    acc_ref[...] = jnp.dot(a0, w_ref[t0], preferred_element_type=jnp.float32)
    for t, ph, off in taps[1:]:
        a = x_ref[0, ph, pl.ds(off, mo), :]
        acc_ref[...] += jnp.dot(a, w_ref[t], preferred_element_type=jnp.float32)
    y = acc_ref[...] + b_ref[...]
    if relu:
        y = jnp.maximum(y, 0.0)
    o_ref[...] = y.reshape(o_ref.shape).astype(o_ref.dtype)


@functools.lru_cache(maxsize=None)
def _build_conv(n, p, l, c, taps, mo, oc, tn, relu, out_dtype):
    ntaps = len(taps)
    grid = (n, oc // tn)
    bytes_accessed = 2 * (n * p * l * c + ntaps * c * oc + n * mo * oc) + 4 * oc
    return pl.pallas_call(
        functools.partial(_conv_kernel, taps=taps, relu=relu),
        out_shape=jax.ShapeDtypeStruct((n, mo, oc), out_dtype),
        grid=grid,
        in_specs=[
            pl.BlockSpec((1, p, l, c), lambda b, q: (b, 0, 0, 0)),   # whole padded image
            pl.BlockSpec((ntaps, c, tn), lambda b, q: (0, 0, q)),    # all taps of W
            pl.BlockSpec((1, tn), lambda b, q: (0, q)),
        ],
        out_specs=pl.BlockSpec((1, mo, tn), lambda b, q: (b, 0, q)),
        scratch_shapes=[pltpu.VMEM((mo, tn), jnp.float32)],
        compiler_params=pltpu.CompilerParams(
            dimension_semantics=("parallel", "parallel"),
            vmem_limit_bytes=_vmem_limit()),
        cost_estimate=pl.CostEstimate(flops=2 * n * mo * c * oc * ntaps,
                                      transcendentals=0,
                                      bytes_accessed=bytes_accessed),
    )


def conv_stencil(x, w, b, k, stride, padding, relu):
    n = x.shape[0]
    c = x.shape[-1]
    oc = w.shape[-1]
    xp, taps, mo, oh, ow, wh = _prepare_stencil(x.astype(jnp.bfloat16), k, stride, padding)
    tn = oc if oc <= _CONV_TN_CAP else _CONV_TN_CAP
    y = _build_conv(n, xp.shape[1], xp.shape[2], c, taps, mo, oc, tn,
                    bool(relu), jnp.bfloat16)(xp, w, b)
    return y.reshape(n, oh, wh, oc)[:, :, :ow, :]


def _maxpool_kernel(x_ref, o_ref, *, taps):
    mo = o_ref.shape[1]
    _, ph0, off0 = taps[0]
    r = x_ref[0, ph0, pl.ds(off0, mo), :]
    for _, ph, off in taps[1:]:
        r = jnp.maximum(r, x_ref[0, ph, pl.ds(off, mo), :])
    o_ref[...] = r.reshape(o_ref.shape)


@functools.lru_cache(maxsize=None)
def _build_maxpool(n, p, l, c, taps, mo, dtype):
    return pl.pallas_call(
        functools.partial(_maxpool_kernel, taps=taps),
        out_shape=jax.ShapeDtypeStruct((n, mo, c), dtype),
        grid=(n,),
        in_specs=[pl.BlockSpec((1, p, l, c), lambda b: (b, 0, 0, 0))],
        out_specs=pl.BlockSpec((1, mo, c), lambda b: (b, 0, 0)),
        compiler_params=pltpu.CompilerParams(
            dimension_semantics=("parallel",),
            vmem_limit_bytes=_vmem_limit()),
    )


def max_pool_3x3_s2(x):
    # Zero padding == -inf padding here: the input is post-ReLU (>= 0).
    n, h, w_, c = x.shape
    xp, taps, mo, oh, ow, wh = _prepare_stencil(x, 3, 2, 1)
    y = _build_maxpool(n, xp.shape[1], xp.shape[2], c, taps, mo, x.dtype)(xp)
    return y.reshape(n, oh, wh, c)[:, :, :ow, :]


# --------------------------------------------------------------------------
# Fused global average pool (VPU mean over HW) + Linear(2048, 2) (128-lane padded out)
# --------------------------------------------------------------------------
def _pool_fc_kernel(x_ref, w_ref, b_ref, o_ref, *, inv_hw):
    feat = jnp.sum(x_ref[...].astype(jnp.float32), axis=1) * inv_hw       # [N, C]
    o_ref[...] = jnp.dot(feat.astype(jnp.bfloat16), w_ref[...],
                         preferred_element_type=jnp.float32) + b_ref[...]


@functools.lru_cache(maxsize=None)
def _build_pool_fc(n, hw, c, no):
    return pl.pallas_call(
        functools.partial(_pool_fc_kernel, inv_hw=1.0 / hw),
        out_shape=jax.ShapeDtypeStruct((n, no), jnp.float32),
        grid=(1,),
        in_specs=[pl.BlockSpec((n, hw, c), lambda i: (0, 0, 0)),
                  pl.BlockSpec((c, no), lambda i: (0, 0)),
                  pl.BlockSpec((1, no), lambda i: (0, 0))],
        out_specs=pl.BlockSpec((n, no), lambda i: (0, 0)),
        compiler_params=pltpu.CompilerParams(vmem_limit_bytes=_vmem_limit()),
    )


def avgpool_fc(x, fc_w, fc_b, out_features):
    n, h, w_, c = x.shape
    hw = h * w_
    y = _build_pool_fc(n, hw, c, fc_w.shape[1])(x.reshape(n, hw, c), fc_w, fc_b)
    return y[:, :out_features]


# --------------------------------------------------------------------------
# Layer plumbing
# --------------------------------------------------------------------------
def conv_bn(x, p, stride, padding, relu, residual=None):
    """Conv2d(bias=False) + folded eval-mode BatchNorm (+ residual) (+ ReLU). x: NHWC bf16."""
    k = p["k"]
    n, h, w_, c = x.shape
    oc = p["w"].shape[-1]
    if k == 1:
        xs = x if stride == 1 else x[:, ::stride, ::stride, :]
        _, oh, ow, _ = xs.shape
        a = xs.reshape(n * oh * ow, c)
        r = None if residual is None else residual.reshape(n * oh * ow, oc)
        y = matmul_bias(a, p["w"], p["b"], relu=relu, residual=r)
        return y.reshape(n, oh, ow, oc)
    assert residual is None
    return conv_stencil(x, p["w"], p["b"], k, stride, padding, relu)


def bottleneck_forward(x, blk):
    stride = blk["stride"]
    if "down" in blk:
        identity = conv_bn(x, blk["down"], stride=stride, padding=0, relu=False)
    else:
        identity = x
    out = conv_bn(x, blk["conv1"], stride=1, padding=0, relu=True)
    out = conv_bn(out, blk["conv2"], stride=stride, padding=1, relu=True)
    # conv3 + BN + residual add + ReLU fused into one matmul epilogue.
    out = conv_bn(out, blk["conv3"], stride=1, padding=0, relu=True, residual=identity)
    return out


def gaze_network_forward(params, x_nchw):
    # Accepts NCHW (PyTorch convention); computes in NHWC bf16 internally.
    x = jnp.transpose(x_nchw.astype(jnp.float32), (0, 2, 3, 1)).astype(jnp.bfloat16)
    if x.shape[-1] < 8:                                   # pad RGB channels to 8 lanes
        x = jnp.pad(x, ((0, 0), (0, 0), (0, 0), (0, 8 - x.shape[-1])))
    x = conv_bn(x, params["stem"], stride=2, padding=3, relu=True)    # conv1 + bn1 + relu
    x = max_pool_3x3_s2(x)                                            # maxpool 3x3 s2 p1
    for layer in params["layers"]:                                    # layer1..layer4
        for blk in layer:
            x = bottleneck_forward(x, blk)
    gaze = avgpool_fc(x, params["fc_w"], params["fc_b"], params["fc_out"])
    return gaze                                                       # [N, 2] float32


# --------------------------------------------------------------------------
# Deterministic parameter construction (synthetic; no checkpoint loading).
# Weights are stored pre-transposed, bf16, with the BN scale already folded in.
# --------------------------------------------------------------------------
class _KeyGen:
    def __init__(self, key):
        self._key = key

    def __call__(self):
        self._key, sub = jax.random.split(self._key)
        return sub


def _make_conv(kg, in_c, out_c, k, pad_in_to=None):
    fan_in = in_c * k * k
    w = jax.random.normal(kg(), (out_c, in_c, k, k), jnp.float32) * math.sqrt(2.0 / fan_in)
    # Fresh eval-mode BN (gamma=1, beta=0, mean=0, var=1) folded in:
    # scale = gamma/sqrt(var+eps) (folded into W), bias = beta - mean*scale (stays separate).
    # TODO(synk): for real checkpoints fold per-channel (gamma, beta, mean, var) here.
    scale = 1.0 / math.sqrt(1.0 + _BN_EPS)
    bias = jnp.zeros((1, out_c), jnp.float32)
    w = w * scale
    if k == 1:
        wt = jnp.transpose(w[:, :, 0, 0], (1, 0))                        # [IC, OC]
    else:
        wt = jnp.transpose(w, (2, 3, 1, 0)).reshape(k * k, in_c, out_c)  # [K*K, IC, OC]
    if pad_in_to is not None and pad_in_to > in_c:
        wt = jnp.pad(wt, ((0, 0),) * (wt.ndim - 2) + ((0, pad_in_to - in_c), (0, 0)))
    return {"w": wt.astype(jnp.bfloat16), "b": bias, "k": k}


def _make_bottleneck(kg, inplanes, planes, stride):
    blk = {
        "conv1": _make_conv(kg, inplanes, planes, 1),
        "conv2": _make_conv(kg, planes, planes, 3),
        "conv3": _make_conv(kg, planes, planes * 4, 1),
        "stride": stride,
    }
    if stride != 1 or inplanes != planes * 4:
        blk["down"] = _make_conv(kg, inplanes, planes * 4, 1)
    return blk


def make_gaze_network_params(key):
    kg = _KeyGen(key)
    params = {"stem": _make_conv(kg, 3, 64, 7, pad_in_to=8)}
    layers = []
    inplanes = 64
    for planes, nblocks, stride in ((64, 3, 1), (128, 4, 2), (256, 6, 2), (512, 3, 2)):
        blocks = []
        for b in range(nblocks):
            s = stride if b == 0 else 1
            blocks.append(_make_bottleneck(kg, inplanes, planes, s))
            inplanes = planes * 4
        layers.append(blocks)
    params["layers"] = layers
    # gaze_fc = nn.Linear(2048, 2); stored transposed [2048, out] and 128-lane padded.
    bound = 1.0 / math.sqrt(2048.0)
    fc_w = jax.random.uniform(kg(), (2048, 2), jnp.float32, -bound, bound)
    fc_b = jax.random.uniform(kg(), (2,), jnp.float32, -bound, bound)
    no = 128
    params["fc_w"] = jnp.pad(fc_w, ((0, 0), (0, no - 2))).astype(jnp.bfloat16)
    params["fc_b"] = jnp.pad(fc_b.reshape(1, 2), ((0, 0), (0, no - 2)))
    params["fc_out"] = 2
    return params


if __name__ == "__main__":
    params = make_gaze_network_params(jax.random.PRNGKey(42))
    # Small NCHW input consistent with ResNet-50 (3 input channels).
    x = jax.random.normal(jax.random.PRNGKey(0), (2, 3, 16, 16), jnp.float32)
    gaze = gaze_network_forward(params, x)
    gaze = jax.block_until_ready(gaze)
    assert gaze.shape == (2, 2)
    assert bool(jnp.all(jnp.isfinite(gaze)))
    print("KERNEL_OK")
</pallas_src>

<mosaic_0001>
module attributes {stable_mosaic.version = 11 : i64} {
  func.func @_conv_kernel(%arg0: i32, %arg1: i32, %arg2: memref<1x4x124x8xbf16, #tpu.memory_space<vmem>>, %arg3: memref<49x8x64xbf16, #tpu.memory_space<vmem>>, %arg4: memref<1x64xf32, #tpu.memory_space<vmem>>, %arg5: memref<1x88x64xbf16, #tpu.memory_space<vmem>>, %arg6: memref<88x64xf32, #tpu.memory_space<vmem>>) attributes {dimension_semantics = [#tpu.dimension_semantics<parallel>, #tpu.dimension_semantics<parallel>], iteration_bounds = array<i64: 2, 1>, scalar_prefetch = 0 : i64, scratch_operands = 1 : i64, tpu.core_type = #tpu.core_type<tc>, window_params = [{transform_indices = @transform_0, window_bounds = array<i64: 1, 4, 124, 8>}, {transform_indices = @transform_1, window_bounds = array<i64: 49, 8, 64>}, {transform_indices = @transform_2, window_bounds = array<i64: 1, 64>}, {transform_indices = @transform_3, window_bounds = array<i64: 1, 88, 64>}]} {
    %c0 = arith.constant 0 : index
    %c0_0 = arith.constant 0 : index
    %c0_1 = arith.constant 0 : index
    %c0_2 = arith.constant 0 : index
    %0 = vector.load %arg2[%c0, %c0_0, %c0_1, %c0_2] : memref<1x4x124x8xbf16, #tpu.memory_space<vmem>>, vector<1x1x88x8xbf16>
    %1 = vector.shape_cast %0 : vector<1x1x88x8xbf16> to vector<88x8xbf16>
    %c0_3 = arith.constant 0 : index
    %c0_4 = arith.constant 0 : index
    %c0_5 = arith.constant 0 : index
    %2 = vector.load %arg3[%c0_3, %c0_4, %c0_5] : memref<49x8x64xbf16, #tpu.memory_space<vmem>>, vector<1x8x64xbf16>
    %3 = vector.shape_cast %2 : vector<1x8x64xbf16> to vector<8x64xbf16>
    %cst = arith.constant dense<0.000000e+00> : vector<88x64xf32>
    %4 = tpu.matmul %1, %3, %cst {dimension_numbers = #tpu.dot_dimension_numbers<[1], [0], [0], [1], [0, 0, 1, 1], [], []>} : vector<88x8xbf16>, vector<8x64xbf16>, vector<88x64xf32> -> vector<88x64xf32>
    %c0_6 = arith.constant 0 : index
    %c0_7 = arith.constant 0 : index
    %5 = vector.load %arg6[%c0_6, %c0_7] : memref<88x64xf32, #tpu.memory_space<vmem>>, vector<88x64xf32>
    tpu.vector_store %arg6[%c0_6, %c0_7], %4 {strides = array<i32>} : memref<88x64xf32, #tpu.memory_space<vmem>>, vector<88x64xf32>,
    %c0_8 = arith.constant 0 : index
    %c1 = arith.constant 1 : index
    %c0_9 = arith.constant 0 : index
    %c0_10 = arith.constant 0 : index
    %6 = vector.load %arg2[%c0_8, %c1, %c0_9, %c0_10] : memref<1x4x124x8xbf16, #tpu.memory_space<vmem>>, vector<1x1x88x8xbf16>
    %7 = vector.shape_cast %6 : vector<1x1x88x8xbf16> to vector<88x8xbf16>
    %c0_11 = arith.constant 0 : index
    %c0_12 = arith.constant 0 : index
    %8 = vector.load %arg6[%c0_11, %c0_12] : memref<88x64xf32, #tpu.memory_space<vmem>>, vector<88x64xf32>
    %c1_13 = arith.constant 1 : index
    %c0_14 = arith.constant 0 : index
    %c0_15 = arith.constant 0 : index
    %9 = vector.load %arg3[%c1_13, %c0_14, %c0_15] : memref<49x8x64xbf16, #tpu.memory_space<vmem>>, vector<1x8x64xbf16>
    %10 = vector.shape_cast %9 : vector<1x8x64xbf16> to vector<8x64xbf16>
    %cst_16 = arith.constant dense<0.000000e+00> : vector<88x64xf32>
    %11 = tpu.matmul %7, %10, %cst_16 {dimension_numbers = #tpu.dot_dimension_numbers<[1], [0], [0], [1], [0, 0, 1, 1], [], []>} : vector<88x8xbf16>, vector<8x64xbf16>, vector<88x64xf32> -> vector<88x64xf32>
    %12 = arith.addf %8, %11 : vector<88x64xf32>
    %c0_17 = arith.constant 0 : index
    %c0_18 = arith.constant 0 : index
    %13 = vector.load %arg6[%c0_17, %c0_18] : memref<88x64xf32, #tpu.memory_space<vmem>>, vector<88x64xf32>
    tpu.vector_store %arg6[%c0_17, %c0_18], %12 {strides = array<i32>} : memref<88x64xf32, #tpu.memory_space<vmem>>, vector<88x64xf32>,
    %c0_19 = arith.constant 0 : index
    %c0_20 = arith.constant 0 : index
    %c1_21 = arith.constant 1 : index
    %c0_22 = arith.constant 0 : index
    %14 = vector.load %arg2[%c0_19, %c0_20, %c1_21, %c0_22] : memref<1x4x124x8xbf16, #tpu.memory_space<vmem>>, vector<1x1x88x8xbf16>
    %15 = vector.shape_cast %14 : vector<1x1x88x8xbf16> to vector<88x8xbf16>
    %c0_23 = arith.constant 0 : index
    %c0_24 = arith.constant 0 : index
    %16 = vector.load %arg6[%c0_23, %c0_24] : memref<88x64xf32, #tpu.memory_space<vmem>>, vector<88x64xf32>
    %c2 = arith.constant 2 : index
    %c0_25 = arith.constant 0 : index
    %c0_26 = arith.constant 0 : index
    %17 = vector.load %arg3[%c2, %c0_25, %c0_26] : memref<49x8x64xbf16, #tpu.memory_space<vmem>>, vector<1x8x64xbf16>
    %18 = vector.shape_cast %17 : vector<1x8x64xbf16> to vector<8x64xbf16>
    %cst_27 = arith.constant dense<0.000000e+00> : vector<88x64xf32>
    %19 = tpu.matmul %15, %18, %cst_27 {dimension_numbers = #tpu.dot_dimension_numbers<[1], [0], [0], [1], [0, 0, 1, 1], [], []>} : vector<88x8xbf16>, vector<8x64xbf16>, vector<88x64xf32> -> vector<88x64xf32>
    %20 = arith.addf %16, %19 : vector<88x64xf32>
    %c0_28 = arith.constant 0 : index
    %c0_29 = arith.constant 0 : index
    %21 = vector.load %arg6[%c0_28, %c0_29] : memref<88x64xf32, #tpu.memory_space<vmem>>, vector<88x64xf32>
    tpu.vector_store %arg6[%c0_28, %c0_29], %20 {strides = array<i32>} : memref<88x64xf32, #tpu.memory_space<vmem>>, vector<88x64xf32>,
    %c0_30 = arith.constant 0 : index
    %c1_31 = arith.constant 1 : index
    %c1_32 = arith.constant 1 : index
    %c0_33 = arith.constant 0 : index
    %22 = vector.load %arg2[%c0_30, %c1_31, %c1_32, %c0_33] : memref<1x4x124x8xbf16, #tpu.memory_space<vmem>>, vector<1x1x88x8xbf16>
    %23 = vector.shape_cast %22 : vector<1x1x88x8xbf16> to vector<88x8xbf16>
    %c0_34 = arith.constant 0 : index
    %c0_35 = arith.constant 0 : index
    %24 = vector.load %arg6[%c0_34, %c0_35] : memref<88x64xf32, #tpu.memory_space<vmem>>, vector<88x64xf32>
    %c3 = arith.constant 3 : index
    %c0_36 = arith.constant 0 : index
    %c0_37 = arith.constant 0 : index
    %25 = vector.load %arg3[%c3, %c0_36, %c0_37] : memref<49x8x64xbf16, #tpu.memory_space<vmem>>, vector<1x8x64xbf16>
    %26 = vector.shape_cast %25 : vector<1x8x64xbf16> to vector<8x64xbf16>
    %cst_38 = arith.constant dense<0.000000e+00> : vector<88x64xf32>
    %27 = tpu.matmul %23, %26, %cst_38 {dimension_numbers = #tpu.dot_dimension_numbers<[1], [0], [0], [1], [0, 0, 1, 1], [], []>} : vector<88x8xbf16>, vector<8x64xbf16>, vector<88x64xf32> -> vector<88x64xf32>
    %28 = arith.addf %24, %27 : vector<88x64xf32>
    %c0_39 = arith.constant 0 : index
    %c0_40 = arith.constant 0 : index
    %29 = vector.load %arg6[%c0_39, %c0_40] : memref<88x64xf32, #tpu.memory_space<vmem>>, vector<88x64xf32>
    tpu.vector_store %arg6[%c0_39, %c0_40], %28 {strides = array<i32>} : memref<88x64xf32, #tpu.memory_space<vmem>>, vector<88x64xf32>,
    %c0_41 = arith.constant 0 : index
    %c0_42 = arith.constant 0 : index
    %c2_43 = arith.constant 2 : index
    %c0_44 = arith.constant 0 : index
    %30 = vector.load %arg2[%c0_41, %c0_42, %c2_43, %c0_44] : memref<1x4x124x8xbf16, #tpu.memory_space<vmem>>, vector<1x1x88x8xbf16>
    %31 = vector.shape_cast %30 : vector<1x1x88x8xbf16> to vector<88x8xbf16>
    %c0_45 = arith.constant 0 : index
    %c0_46 = arith.constant 0 : index
    %32 = vector.load %arg6[%c0_45, %c0_46] : memref<88x64xf32, #tpu.memory_space<vmem>>, vector<88x64xf32>
    %c4 = arith.constant 4 : index
    %c0_47 = arith.constant 0 : index
    %c0_48 = arith.constant 0 : index
    %33 = vector.load %arg3[%c4, %c0_47, %c0_48] : memref<49x8x64xbf16, #tpu.memory_space<vmem>>, vector<1x8x64xbf16>
    %34 = vector.shape_cast %33 : vector<1x8x64xbf16> to vector<8x64xbf16>
    %cst_49 = arith.constant dense<0.000000e+00> : vector<88x64xf32>
    %35 = tpu.matmul %31, %34, %cst_49 {dimension_numbers = #tpu.dot_dimension_numbers<[1], [0], [0], [1], [0, 0, 1, 1], [], []>} : vector<88x8xbf16>, vector<8x64xbf16>, vector<88x64xf32> -> vector<88x64xf32>
    %36 = arith.addf %32, %35 : vector<88x64xf32>
    %c0_50 = arith.constant 0 : index
    %c0_51 = arith.constant 0 : index
    %37 = vector.load %arg6[%c0_50, %c0_51] : memref<88x64xf32, #tpu.memory_space<vmem>>, vector<88x64xf32>
    tpu.vector_store %arg6[%c0_50, %c0_51], %36 {strides = array<i32>} : memref<88x64xf32, #tpu.memory_space<vmem>>, vector<88x64xf32>,
    %c0_52 = arith.constant 0 : index
    %c1_53 = arith.constant 1 : index
    %c2_54 = arith.constant 2 : index
    %c0_55 = arith.constant 0 : index
    %38 = vector.load %arg2[%c0_52, %c1_53, %c2_54, %c0_55] : memref<1x4x124x8xbf16, #tpu.memory_space<vmem>>, vector<1x1x88x8xbf16>
    %39 = vector.shape_cast %38 : vector<1x1x88x8xbf16> to vector<88x8xbf16>
    %c0_56 = arith.constant 0 : index
    %c0_57 = arith.constant 0 : index
    %40 = vector.load %arg6[%c0_56, %c0_57] : memref<88x64xf32, #tpu.memory_space<vmem>>, vector<88x64xf32>
    %c5 = arith.constant 5 : index
    %c0_58 = arith.constant 0 : index
    %c0_59 = arith.constant 0 : index
    %41 = vector.load %arg3[%c5, %c0_58, %c0_59] : memref<49x8x64xbf16, #tpu.memory_space<vmem>>, vector<1x8x64xbf16>
    %42 = vector.shape_cast %41 : vector<1x8x64xbf16> to vector<8x64xbf16>
    %cst_60 = arith.constant dense<0.000000e+00> : vector<88x64xf32>
    %43 = tpu.matmul %39, %42, %cst_60 {dimension_numbers = #tpu.dot_dimension_numbers<[1], [0], [0], [1], [0, 0, 1, 1], [], []>} : vector<88x8xbf16>, vector<8x64xbf16>, vector<88x64xf32> -> vector<88x64xf32>
    %44 = arith.addf %40, %43 : vector<88x64xf32>
    %c0_61 = arith.constant 0 : index
    %c0_62 = arith.constant 0 : index
    %45 = vector.load %arg6[%c0_61, %c0_62] : memref<88x64xf32, #tpu.memory_space<vmem>>, vector<88x64xf32>
    tpu.vector_store %arg6[%c0_61, %c0_62], %44 {strides = array<i32>} : memref<88x64xf32, #tpu.memory_space<vmem>>, vector<88x64xf32>,
    %c0_63 = arith.constant 0 : index
    %c0_64 = arith.constant 0 : index
    %c3_65 = arith.constant 3 : index
    %c0_66 = arith.constant 0 : index
    %46 = vector.load %arg2[%c0_63, %c0_64, %c3_65, %c0_66] : memref<1x4x124x8xbf16, #tpu.memory_space<vmem>>, vector<1x1x88x8xbf16>
    %47 = vector.shape_cast %46 : vector<1x1x88x8xbf16> to vector<88x8xbf16>
    %c0_67 = arith.constant 0 : index
    %c0_68 = arith.constant 0 : index
    %48 = vector.load %arg6[%c0_67, %c0_68] : memref<88x64xf32, #tpu.memory_space<vmem>>, vector<88x64xf32>
    %c6 = arith.constant 6 : index
    %c0_69 = arith.constant 0 : index
    %c0_70 = arith.constant 0 : index
    %49 = vector.load %arg3[%c6, %c0_69, %c0_70] : memref<49x8x64xbf16, #tpu.memory_space<vmem>>, vector<1x8x64xbf16>
    %50 = vector.shape_cast %49 : vector<1x8x64xbf16> to vector<8x64xbf16>
    %cst_71 = arith.constant dense<0.000000e+00> : vector<88x64xf32>
    %51 = tpu.matmul %47, %50, %cst_71 {dimension_numbers = #tpu.dot_dimension_numbers<[1], [0], [0], [1], [0, 0, 1, 1], [], []>} : vector<88x8xbf16>, vector<8x64xbf16>, vector<88x64xf32> -> vector<88x64xf32>
    %52 = arith.addf %48, %51 : vector<88x64xf32>
    %c0_72 = arith.constant 0 : index
    %c0_73 = arith.constant 0 : index
    %53 = vector.load %arg6[%c0_72, %c0_73] : memref<88x64xf32, #tpu.memory_space<vmem>>, vector<88x64xf32>
    tpu.vector_store %arg6[%c0_72, %c0_73], %52 {strides = array<i32>} : memref<88x64xf32, #tpu.memory_space<vmem>>, vector<88x64xf32>,
    %c0_74 = arith.constant 0 : index
    %c2_75 = arith.constant 2 : index
    %c0_76 = arith.constant 0 : index
    %c0_77 = arith.constant 0 : index
    %54 = vector.load %arg2[%c0_74, %c2_75, %c0_76, %c0_77] : memref<1x4x124x8xbf16, #tpu.memory_space<vmem>>, vector<1x1x88x8xbf16>
    %55 = vector.shape_cast %54 : vector<1x1x88x8xbf16> to vector<88x8xbf16>
    %c0_78 = arith.constant 0 : index
    %c0_79 = arith.constant 0 : index
    %56 = vector.load %arg6[%c0_78, %c0_79] : memref<88x64xf32, #tpu.memory_space<vmem>>, vector<88x64xf32>
    %c7 = arith.constant 7 : index
    %c0_80 = arith.constant 0 : index
    %c0_81 = arith.constant 0 : index
    %57 = vector.load %arg3[%c7, %c0_80, %c0_81] : memref<49x8x64xbf16, #tpu.memory_space<vmem>>, vector<1x8x64xbf16>
    %58 = vector.shape_cast %57 : vector<1x8x64xbf16> to vector<8x64xbf16>
    %cst_82 = arith.constant dense<0.000000e+00> : vector<88x64xf32>
    %59 = tpu.matmul %55, %58, %cst_82 {dimension_numbers = #tpu.dot_dimension_numbers<[1], [0], [0], [1], [0, 0, 1, 1], [], []>} : vector<88x8xbf16>, vector<8x64xbf16>, vector<88x64xf32> -> vector<88x64xf32>
    %60 = arith.addf %56, %59 : vector<88x64xf32>
    %c0_83 = arith.constant 0 : index
    %c0_84 = arith.constant 0 : index
    %61 = vector.load %arg6[%c0_83, %c0_84] : memref<88x64xf32, #tpu.memory_space<vmem>>, vector<88x64xf32>
    tpu.vector_store %arg6[%c0_83, %c0_84], %60 {strides = array<i32>} : memref<88x64xf32, #tpu.memory_space<vmem>>, vector<88x64xf32>,
    %c0_85 = arith.constant 0 : index
    %c3_86 = arith.constant 3 : index
    %c0_87 = arith.constant 0 : index
    %c0_88 = arith.constant 0 : index
    %62 = vector.load %arg2[%c0_85, %c3_86, %c0_87, %c0_88] : memref<1x4x124x8xbf16, #tpu.memory_space<vmem>>, vector<1x1x88x8xbf16>
    %63 = vector.shape_cast %62 : vector<1x1x88x8xbf16> to vector<88x8xbf16>
    %c0_89 = arith.constant 0 : index
    %c0_90 = arith.constant 0 : index
    %64 = vector.load %arg6[%c0_89, %c0_90] : memref<88x64xf32, #tpu.memory_space<vmem>>, vector<88x64xf32>
    %c8 = arith.constant 8 : index
    %c0_91 = arith.constant 0 : index
    %c0_92 = arith.constant 0 : index
    %65 = vector.load %arg3[%c8, %c0_91, %c0_92] : memref<49x8x64xbf16, #tpu.memory_space<vmem>>, vector<1x8x64xbf16>
    %66 = vector.shape_cast %65 : vector<1x8x64xbf16> to vector<8x64xbf16>
    %cst_93 = arith.constant dense<0.000000e+00> : vector<88x64xf32>
    %67 = tpu.matmul %63, %66, %cst_93 {dimension_numbers = #tpu.dot_dimension_numbers<[1], [0], [0], [1], [0, 0, 1, 1], [], []>} : vector<88x8xbf16>, vector<8x64xbf16>, vector<88x64xf32> -> vector<88x64xf32>
    %68 = arith.addf %64, %67 : vector<88x64xf32>
    %c0_94 = arith.constant 0 : index
    %c0_95 = arith.constant 0 : index
    %69 = vector.load %arg6[%c0_94, %c0_95] : memref<88x64xf32, #tpu.memory_space<vmem>>, vector<88x64xf32>
    tpu.vector_store %arg6[%c0_94, %c0_95], %68 {strides = array<i32>} : memref<88x64xf32, #tpu.memory_space<vmem>>, vector<88x64xf32>,
    %c0_96 = arith.constant 0 : index
    %c2_97 = arith.constant 2 : index
    %c1_98 = arith.constant 1 : index
    %c0_99 = arith.constant 0 : index
    %70 = vector.load %arg2[%c0_96, %c2_97, %c1_98, %c0_99] : memref<1x4x124x8xbf16, #tpu.memory_space<vmem>>, vector<1x1x88x8xbf16>
    %71 = vector.shape_cast %70 : vector<1x1x88x8xbf16> to vector<88x8xbf16>
    %c0_100 = arith.constant 0 : index
    %c0_101 = arith.constant 0 : index
    %72 = vector.load %arg6[%c0_100, %c0_101] : memref<88x64xf32, #tpu.memory_space<vmem>>, vector<88x64xf32>
    %c9 = arith.constant 9 : index
    %c0_102 = arith.constant 0 : index
    %c0_103 = arith.constant 0 : index
    %73 = vector.load %arg3[%c9, %c0_102, %c0_103] : memref<49x8x64xbf16, #tpu.memory_space<vmem>>, vector<1x8x64xbf16>
    %74 = vector.shape_cast %73 : vector<1x8x64xbf16> to vector<8x64xbf16>
    %cst_104 = arith.constant dense<0.000000e+00> : vector<88x64xf32>
    %75 = tpu.matmul %71, %74, %cst_104 {dimension_numbers = #tpu.dot_dimension_numbers<[1], [0], [0], [1], [0, 0, 1, 1], [], []>} : vector<88x8xbf16>, vector<8x64xbf16>, vector<88x64xf32> -> vector<88x64xf32>
    %76 = arith.addf %72, %75 : vector<88x64xf32>
    %c0_105 = arith.constant 0 : index
    %c0_106 = arith.constant 0 : index
    %77 = vector.load %arg6[%c0_105, %c0_106] : memref<88x64xf32, #tpu.memory_space<vmem>>, vector<88x64xf32>
    tpu.vector_store %arg6[%c0_105, %c0_106], %76 {strides = array<i32>} : memref<88x64xf32, #tpu.memory_space<vmem>>, vector<88x64xf32>,
    %c0_107 = arith.constant 0 : index
    %c3_108 = arith.constant 3 : index
    %c1_109 = arith.constant 1 : index
    %c0_110 = arith.constant 0 : index
    %78 = vector.load %arg2[%c0_107, %c3_108, %c1_109, %c0_110] : memref<1x4x124x8xbf16, #tpu.memory_space<vmem>>, vector<1x1x88x8xbf16>
    %79 = vector.shape_cast %78 : vector<1x1x88x8xbf16> to vector<88x8xbf16>
    %c0_111 = arith.constant 0 : index
    %c0_112 = arith.constant 0 : index
    %80 = vector.load %arg6[%c0_111, %c0_112] : memref<88x64xf32, #tpu.memory_space<vmem>>, vector<88x64xf32>
    %c10 = arith.constant 10 : index
    %c0_113 = arith.constant 0 : index
    %c0_114 = arith.constant 0 : index
    %81 = vector.load %arg3[%c10, %c0_113, %c0_114] : memref<49x8x64xbf16, #tpu.memory_space<vmem>>, vector<1x8x64xbf16>
    %82 = vector.shape_cast %81 : vector<1x8x64xbf16> to vector<8x64xbf16>
    %cst_115 = arith.constant dense<0.000000e+00> : vector<88x64xf32>
    %83 = tpu.matmul %79, %82, %cst_115 {dimension_numbers = #tpu.dot_dimension_numbers<[1], [0], [0], [1], [0, 0, 1, 1], [], []>} : vector<88x8xbf16>, vector<8x64xbf16>, vector<88x64xf32> -> vector<88x64xf32>
    %84 = arith.addf %80, %83 : vector<88x64xf32>
    %c0_116 = arith.constant 0 : index
    %c0_117 = arith.constant 0 : index
    %85 = vector.load %arg6[%c0_116, %c0_117] : memref<88x64xf32, #tpu.memory_space<vmem>>, vector<88x64xf32>
    tpu.vector_store %arg6[%c0_116, %c0_117], %84 {strides = array<i32>} : memref<88x64xf32, #tpu.memory_space<vmem>>, vector<88x64xf32>,
    %c0_118 = arith.constant 0 : index
    %c2_119 = arith.constant 2 : index
    %c2_120 = arith.constant 2 : index
    %c0_121 = arith.constant 0 : index
    %86 = vector.load %arg2[%c0_118, %c2_119, %c2_120, %c0_121] : memref<1x4x124x8xbf16, #tpu.memory_space<vmem>>, vector<1x1x88x8xbf16>
    %87 = vector.shape_cast %86 : vector<1x1x88x8xbf16> to vector<88x8xbf16>
    %c0_122 = arith.constant 0 : index
    %c0_123 = arith.constant 0 : index
    %88 = vector.load %arg6[%c0_122, %c0_123] : memref<88x64xf32, #tpu.memory_space<vmem>>, vector<88x64xf32>
    %c11 = arith.constant 11 : index
    %c0_124 = arith.constant 0 : index
    %c0_125 = arith.constant 0 : index
    %89 = vector.load %arg3[%c11, %c0_124, %c0_125] : memref<49x8x64xbf16, #tpu.memory_space<vmem>>, vector<1x8x64xbf16>
    %90 = vector.shape_cast %89 : vector<1x8x64xbf16> to vector<8x64xbf16>
    %cst_126 = arith.constant dense<0.000000e+00> : vector<88x64xf32>
    %91 = tpu.matmul %87, %90, %cst_126 {dimension_numbers = #tpu.dot_dimension_numbers<[1], [0], [0], [1], [0, 0, 1, 1], [], []>} : vector<88x8xbf16>, vector<8x64xbf16>, vector<88x64xf32> -> vector<88x64xf32>
    %92 = arith.addf %88, %91 : vector<88x64xf32>
    %c0_127 = arith.constant 0 : index
    %c0_128 = arith.constant 0 : index
    %93 = vector.load %arg6[%c0_127, %c0_128] : memref<88x64xf32, #tpu.memory_space<vmem>>, vector<88x64xf32>
    tpu.vector_store %arg6[%c0_127, %c0_128], %92 {strides = array<i32>} : memref<88x64xf32, #tpu.memory_space<vmem>>, vector<88x64xf32>,
    %c0_129 = arith.constant 0 : index
    %c3_130 = arith.constant 3 : index
    %c2_131 = arith.constant 2 : index
    %c0_132 = arith.constant 0 : index
    %94 = vector.load %arg2[%c0_129, %c3_130, %c2_131, %c0_132] : memref<1x4x124x8xbf16, #tpu.memory_space<vmem>>, vector<1x1x88x8xbf16>
    %95 = vector.shape_cast %94 : vector<1x1x88x8xbf16> to vector<88x8xbf16>
    %c0_133 = arith.constant 0 : index
    %c0_134 = arith.constant 0 : index
    %96 = vector.load %arg6[%c0_133, %c0_134] : memref<88x64xf32, #tpu.memory_space<vmem>>, vector<88x64xf32>
    %c12 = arith.constant 12 : index
    %c0_135 = arith.constant 0 : index
    %c0_136 = arith.constant 0 : index
    %97 = vector.load %arg3[%c12, %c0_135, %c0_136] : memref<49x8x64xbf16, #tpu.memory_space<vmem>>, vector<1x8x64xbf16>
    %98 = vector.shape_cast %97 : vector<1x8x64xbf16> to vector<8x64xbf16>
    %cst_137 = arith.constant dense<0.000000e+00> : vector<88x64xf32>
    %99 = tpu.matmul %95, %98, %cst_137 {dimension_numbers = #tpu.dot_dimension_numbers<[1], [0], [0], [1], [0, 0, 1, 1], [], []>} : vector<88x8xbf16>, vector<8x64xbf16>, vector<88x64xf32> -> vector<88x64xf32>
    %100 = arith.addf %96, %99 : vector<88x64xf32>
    %c0_138 = arith.constant 0 : index
    %c0_139 = arith.constant 0 : index
    %101 = vector.load %arg6[%c0_138, %c0_139] : memref<88x64xf32, #tpu.memory_space<vmem>>, vector<88x64xf32>
    tpu.vector_store %arg6[%c0_138, %c0_139], %100 {strides = array<i32>} : memref<88x64xf32, #tpu.memory_space<vmem>>, vector<88x64xf32>,
    %c0_140 = arith.constant 0 : index
    %c2_141 = arith.constant 2 : index
    %c3_142 = arith.constant 3 : index
    %c0_143 = arith.constant 0 : index
    %102 = vector.load %arg2[%c0_140, %c2_141, %c3_142, %c0_143] : memref<1x4x124x8xbf16, #tpu.memory_space<vmem>>, vector<1x1x88x8xbf16>
    %103 = vector.shape_cast %102 : vector<1x1x88x8xbf16> to vector<88x8xbf16>
    %c0_144 = arith.constant 0 : index
    %c0_145 = arith.constant 0 : index
    %104 = vector.load %arg6[%c0_144, %c0_145] : memref<88x64xf32, #tpu.memory_space<vmem>>, vector<88x64xf32>
    %c13 = arith.constant 13 : index
    %c0_146 = arith.constant 0 : index
    %c0_147 = arith.constant 0 : index
    %105 = vector.load %arg3[%c13, %c0_146, %c0_147] : memref<49x8x64xbf16, #tpu.memory_space<vmem>>, vector<1x8x64xbf16>
    %106 = vector.shape_cast %105 : vector<1x8x64xbf16> to vector<8x64xbf16>
    %cst_148 = arith.constant dense<0.000000e+00> : vector<88x64xf32>
    %107 = tpu.matmul %103, %106, %cst_148 {dimension_numbers = #tpu.dot_dimension_numbers<[1], [0], [0], [1], [0, 0, 1, 1], [], []>} : vector<88x8xbf16>, vector<8x64xbf16>, vector<88x64xf32> -> vector<88x64xf32>
    %108 = arith.addf %104, %107 : vector<88x64xf32>
    %c0_149 = arith.constant 0 : index
    %c0_150 = arith.constant 0 : index
    %109 = vector.load %arg6[%c0_149, %c0_150] : memref<88x64xf32, #tpu.memory_space<vmem>>, vector<88x64xf32>
    tpu.vector_store %arg6[%c0_149, %c0_150], %108 {strides = array<i32>} : memref<88x64xf32, #tpu.memory_space<vmem>>, vector<88x64xf32>,
    %c0_151 = arith.constant 0 : index
    %c0_152 = arith.constant 0 : index
    %c11_153 = arith.constant 11 : index
    %c0_154 = arith.constant 0 : index
    %110 = vector.load %arg2[%c0_151, %c0_152, %c11_153, %c0_154] : memref<1x4x124x8xbf16, #tpu.memory_space<vmem>>, vector<1x1x88x8xbf16>
    %111 = vector.shape_cast %110 : vector<1x1x88x8xbf16> to vector<88x8xbf16>
    %c0_155 = arith.constant 0 : index
    %c0_156 = arith.constant 0 : index
    %112 = vector.load %arg6[%c0_155, %c0_156] : memref<88x64xf32, #tpu.memory_space<vmem>>, vector<88x64xf32>
    %c14 = arith.constant 14 : index
    %c0_157 = arith.constant 0 : index
    %c0_158 = arith.constant 0 : index
    %113 = vector.load %arg3[%c14, %c0_157, %c0_158] : memref<49x8x64xbf16, #tpu.memory_space<vmem>>, vector<1x8x64xbf16>
    %114 = vector.shape_cast %113 : vector<1x8x64xbf16> to vector<8x64xbf16>
    %cst_159 = arith.constant dense<0.000000e+00> : vector<88x64xf32>
    %115 = tpu.matmul %111, %114, %cst_159 {dimension_numbers = #tpu.dot_dimension_numbers<[1], [0], [0], [1], [0, 0, 1, 1], [], []>} : vector<88x8xbf16>, vector<8x64xbf16>, vector<88x64xf32> -> vector<88x64xf32>
    %116 = arith.addf %112, %115 : vector<88x64xf32>
    %c0_160 = arith.constant 0 : index
    %c0_161 = arith.constant 0 : index
    %117 = vector.load %arg6[%c0_160, %c0_161] : memref<88x64xf32, #tpu.memory_space<vmem>>, vector<88x64xf32>
    tpu.vector_store %arg6[%c0_160, %c0_161], %116 {strides = array<i32>} : memref<88x64xf32, #tpu.memory_space<vmem>>, vector<88x64xf32>,
    %c0_162 = arith.constant 0 : index
    %c1_163 = arith.constant 1 : index
    %c11_164 = arith.constant 11 : index
    %c0_165 = arith.constant 0 : index
    %118 = vector.load %arg2[%c0_162, %c1_163, %c11_164, %c0_165] : memref<1x4x124x8xbf16, #tpu.memory_space<vmem>>, vector<1x1x88x8xbf16>
    %119 = vector.shape_cast %118 : vector<1x1x88x8xbf16> to vector<88x8xbf16>
    %c0_166 = arith.constant 0 : index
    %c0_167 = arith.constant 0 : index
    %120 = vector.load %arg6[%c0_166, %c0_167] : memref<88x64xf32, #tpu.memory_space<vmem>>, vector<88x64xf32>
    %c15 = arith.constant 15 : index
    %c0_168 = arith.constant 0 : index
    %c0_169 = arith.constant 0 : index
    %121 = vector.load %arg3[%c15, %c0_168, %c0_169] : memref<49x8x64xbf16, #tpu.memory_space<vmem>>, vector<1x8x64xbf16>
    %122 = vector.shape_cast %121 : vector<1x8x64xbf16> to vector<8x64xbf16>
    %cst_170 = arith.constant dense<0.000000e+00> : vector<88x64xf32>
    %123 = tpu.matmul %119, %122, %cst_170 {dimension_numbers = #tpu.dot_dimension_numbers<[1], [0], [0], [1], [0, 0, 1, 1], [], []>} : vector<88x8xbf16>, vector<8x64xbf16>, vector<88x64xf32> -> vector<88x64xf32>
    %124 = arith.addf %120, %123 : vector<88x64xf32>
    %c0_171 = arith.constant 0 : index
    %c0_172 = arith.constant 0 : index
    %125 = vector.load %arg6[%c0_171, %c0_172] : memref<88x64xf32, #tpu.memory_space<vmem>>, vector<88x64xf32>
    tpu.vector_store %arg6[%c0_171, %c0_172], %124 {strides = array<i32>} : memref<88x64xf32, #tpu.memory_space<vmem>>, vector<88x64xf32>,
    %c0_173 = arith.constant 0 : index
    %c0_174 = arith.constant 0 : index
    %c12_175 = arith.constant 12 : index
    %c0_176 = arith.constant 0 : index
    %126 = vector.load %arg2[%c0_173, %c0_174, %c12_175, %c0_176] : memref<1x4x124x8xbf16, #tpu.memory_space<vmem>>, vector<1x1x88x8xbf16>
    %127 = vector.shape_cast %126 : vector<1x1x88x8xbf16> to vector<88x8xbf16>
    %c0_177 = arith.constant 0 : index
    %c0_178 = arith.constant 0 : index
    %128 = vector.load %arg6[%c0_177, %c0_178] : memref<88x64xf32, #tpu.memory_space<vmem>>, vector<88x64xf32>
    %c16 = arith.constant 16 : index
    %c0_179 = arith.constant 0 : index
    %c0_180 = arith.constant 0 : index
    %129 = vector.load %arg3[%c16, %c0_179, %c0_180] : memref<49x8x64xbf16, #tpu.memory_space<vmem>>, vector<1x8x64xbf16>
    %130 = vector.shape_cast %129 : vector<1x8x64xbf16> to vector<8x64xbf16>
    %cst_181 = arith.constant dense<0.000000e+00> : vector<88x64xf32>
    %131 = tpu.matmul %127, %130, %cst_181 {dimension_numbers = #tpu.dot_dimension_numbers<[1], [0], [0], [1], [0, 0, 1, 1], [], []>} : vector<88x8xbf16>, vector<8x64xbf16>, vector<88x64xf32> -> vector<88x64xf32>
    %132 = arith.addf %128, %131 : vector<88x64xf32>
    %c0_182 = arith.constant 0 : index
    %c0_183 = arith.constant 0 : index
    %133 = vector.load %arg6[%c0_182, %c0_183] : memref<88x64xf32, #tpu.memory_space<vmem>>, vector<88x64xf32>
    tpu.vector_store %arg6[%c0_182, %c0_183], %132 {strides = array<i32>} : memref<88x64xf32, #tpu.memory_space<vmem>>, vector<88x64xf32>,
    %c0_184 = arith.constant 0 : index
    %c1_185 = arith.constant 1 : index
    %c12_186 = arith.constant 12 : index
    %c0_187 = arith.constant 0 : index
    %134 = vector.load %arg2[%c0_184, %c1_185, %c12_186, %c0_187] : memref<1x4x124x8xbf16, #tpu.memory_space<vmem>>, vector<1x1x88x8xbf16>
    %135 = vector.shape_cast %134 : vector<1x1x88x8xbf16> to vector<88x8xbf16>
    %c0_188 = arith.constant 0 : index
    %c0_189 = arith.constant 0 : index
    %136 = vector.load %arg6[%c0_188, %c0_189] : memref<88x64xf32, #tpu.memory_space<vmem>>, vector<88x64xf32>
    %c17 = arith.constant 17 : index
    %c0_190 = arith.constant 0 : index
    %c0_191 = arith.constant 0 : index
    %137 = vector.load %arg3[%c17, %c0_190, %c0_191] : memref<49x8x64xbf16, #tpu.memory_space<vmem>>, vector<1x8x64xbf16>
    %138 = vector.shape_cast %137 : vector<1x8x64xbf16> to vector<8x64xbf16>
    %cst_192 = arith.constant dense<0.000000e+00> : vector<88x64xf32>
    %139 = tpu.matmul %135, %138, %cst_192 {dimension_numbers = #tpu.dot_dimension_numbers<[1], [0], [0], [1], [0, 0, 1, 1], [], []>} : vector<88x8xbf16>, vector<8x64xbf16>, vector<88x64xf32> -> vector<88x64xf32>
    %140 = arith.addf %136, %139 : vector<88x64xf32>
    %c0_193 = arith.constant 0 : index
    %c0_194 = arith.constant 0 : index
    %141 = vector.load %arg6[%c0_193, %c0_194] : memref<88x64xf32, #tpu.memory_space<vmem>>, vector<88x64xf32>
    tpu.vector_store %arg6[%c0_193, %c0_194], %140 {strides = array<i32>} : memref<88x64xf32, #tpu.memory_space<vmem>>, vector<88x64xf32>,
    %c0_195 = arith.constant 0 : index
    %c0_196 = arith.constant 0 : index
    %c13_197 = arith.constant 13 : index
    %c0_198 = arith.constant 0 : index
    %142 = vector.load %arg2[%c0_195, %c0_196, %c13_197, %c0_198] : memref<1x4x124x8xbf16, #tpu.memory_space<vmem>>, vector<1x1x88x8xbf16>
    %143 = vector.shape_cast %142 : vector<1x1x88x8xbf16> to vector<88x8xbf16>
    %c0_199 = arith.constant 0 : index
    %c0_200 = arith.constant 0 : index
    %144 = vector.load %arg6[%c0_199, %c0_200] : memref<88x64xf32, #tpu.memory_space<vmem>>, vector<88x64xf32>
    %c18 = arith.constant 18 : index
    %c0_201 = arith.constant 0 : index
    %c0_202 = arith.constant 0 : index
    %145 = vector.load %arg3[%c18, %c0_201, %c0_202] : memref<49x8x64xbf16, #tpu.memory_space<vmem>>, vector<1x8x64xbf16>
    %146 = vector.shape_cast %145 : vector<1x8x64xbf16> to vector<8x64xbf16>
    %cst_203 = arith.constant dense<0.000000e+00> : vector<88x64xf32>
    %147 = tpu.matmul %143, %146, %cst_203 {dimension_numbers = #tpu.dot_dimension_numbers<[1], [0], [0], [1], [0, 0, 1, 1], [], []>} : vector<88x8xbf16>, vector<8x64xbf16>, vector<88x64xf32> -> vector<88x64xf32>
    %148 = arith.addf %144, %147 : vector<88x64xf32>
    %c0_204 = arith.constant 0 : index
    %c0_205 = arith.constant 0 : index
    %149 = vector.load %arg6[%c0_204, %c0_205] : memref<88x64xf32, #tpu.memory_space<vmem>>, vector<88x64xf32>
    tpu.vector_store %arg6[%c0_204, %c0_205], %148 {strides = array<i32>} : memref<88x64xf32, #tpu.memory_space<vmem>>, vector<88x64xf32>,
    %c0_206 = arith.constant 0 : index
    %c1_207 = arith.constant 1 : index
    %c13_208 = arith.constant 13 : index
    %c0_209 = arith.constant 0 : index
    %150 = vector.load %arg2[%c0_206, %c1_207, %c13_208, %c0_209] : memref<1x4x124x8xbf16, #tpu.memory_space<vmem>>, vector<1x1x88x8xbf16>
    %151 = vector.shape_cast %150 : vector<1x1x88x8xbf16> to vector<88x8xbf16>
    %c0_210 = arith.constant 0 : index
    %c0_211 = arith.constant 0 : index
    %152 = vector.load %arg6[%c0_210, %c0_211] : memref<88x64xf32, #tpu.memory_space<vmem>>, vector<88x64xf32>
    %c19 = arith.constant 19 : index
    %c0_212 = arith.constant 0 : index
    %c0_213 = arith.constant 0 : index
    %153 = vector.load %arg3[%c19, %c0_212, %c0_213] : memref<49x8x64xbf16, #tpu.memory_space<vmem>>, vector<1x8x64xbf16>
    %154 = vector.shape_cast %153 : vector<1x8x64xbf16> to vector<8x64xbf16>
    %cst_214 = arith.constant dense<0.000000e+00> : vector<88x64xf32>
    %155 = tpu.matmul %151, %154, %cst_214 {dimension_numbers = #tpu.dot_dimension_numbers<[1], [0], [0], [1], [0, 0, 1, 1], [], []>} : vector<88x8xbf16>, vector<8x64xbf16>, vector<88x64xf32> -> vector<88x64xf32>
    %156 = arith.addf %152, %155 : vector<88x64xf32>
    %c0_215 = arith.constant 0 : index
    %c0_216 = arith.constant 0 : index
    %157 = vector.load %arg6[%c0_215, %c0_216] : memref<88x64xf32, #tpu.memory_space<vmem>>, vector<88x64xf32>
    tpu.vector_store %arg6[%c0_215, %c0_216], %156 {strides = array<i32>} : memref<88x64xf32, #tpu.memory_space<vmem>>, vector<88x64xf32>,
    %c0_217 = arith.constant 0 : index
    %c0_218 = arith.constant 0 : index
    %c14_219 = arith.constant 14 : index
    %c0_220 = arith.constant 0 : index
    %158 = vector.load %arg2[%c0_217, %c0_218, %c14_219, %c0_220] : memref<1x4x124x8xbf16, #tpu.memory_space<vmem>>, vector<1x1x88x8xbf16>
    %159 = vector.shape_cast %158 : vector<1x1x88x8xbf16> to vector<88x8xbf16>
    %c0_221 = arith.constant 0 : index
    %c0_222 = arith.constant 0 : index
    %160 = vector.load %arg6[%c0_221, %c0_222] : memref<88x64xf32, #tpu.memory_space<vmem>>, vector<88x64xf32>
    %c20 = arith.constant 20 : index
    %c0_223 = arith.constant 0 : index
    %c0_224 = arith.constant 0 : index
    %161 = vector.load %arg3[%c20, %c0_223, %c0_224] : memref<49x8x64xbf16, #tpu.memory_space<vmem>>, vector<1x8x64xbf16>
    %162 = vector.shape_cast %161 : vector<1x8x64xbf16> to vector<8x64xbf16>
    %cst_225 = arith.constant dense<0.000000e+00> : vector<88x64xf32>
    %163 = tpu.matmul %159, %162, %cst_225 {dimension_numbers = #tpu.dot_dimension_numbers<[1], [0], [0], [1], [0, 0, 1, 1], [], []>} : vector<88x8xbf16>, vector<8x64xbf16>, vector<88x64xf32> -> vector<88x64xf32>
    %164 = arith.addf %160, %163 : vector<88x64xf32>
    %c0_226 = arith.constant 0 : index
    %c0_227 = arith.constant 0 : index
    %165 = vector.load %arg6[%c0_226, %c0_227] : memref<88x64xf32, #tpu.memory_space<vmem>>, vector<88x64xf32>
    tpu.vector_store %arg6[%c0_226, %c0_227], %164 {strides = array<i32>} : memref<88x64xf32, #tpu.memory_space<vmem>>, vector<88x64xf32>,
    %c0_228 = arith.constant 0 : index
    %c2_229 = arith.constant 2 : index
    %c11_230 = arith.constant 11 : index
    %c0_231 = arith.constant 0 : index
    %166 = vector.load %arg2[%c0_228, %c2_229, %c11_230, %c0_231] : memref<1x4x124x8xbf16, #tpu.memory_space<vmem>>, vector<1x1x88x8xbf16>
    %167 = vector.shape_cast %166 : vector<1x1x88x8xbf16> to vector<88x8xbf16>
    %c0_232 = arith.constant 0 : index
    %c0_233 = arith.constant 0 : index
    %168 = vector.load %arg6[%c0_232, %c0_233] : memref<88x64xf32, #tpu.memory_space<vmem>>, vector<88x64xf32>
    %c21 = arith.constant 21 : index
    %c0_234 = arith.constant 0 : index
    %c0_235 = arith.constant 0 : index
    %169 = vector.load %arg3[%c21, %c0_234, %c0_235] : memref<49x8x64xbf16, #tpu.memory_space<vmem>>, vector<1x8x64xbf16>
    %170 = vector.shape_cast %169 : vector<1x8x64xbf16> to vector<8x64xbf16>
    %cst_236 = arith.constant dense<0.000000e+00> : vector<88x64xf32>
    %171 = tpu.matmul %167, %170, %cst_236 {dimension_numbers = #tpu.dot_dimension_numbers<[1], [0], [0], [1], [0, 0, 1, 1], [], []>} : vector<88x8xbf16>, vector<8x64xbf16>, vector<88x64xf32> -> vector<88x64xf32>
    %172 = arith.addf %168, %171 : vector<88x64xf32>
    %c0_237 = arith.constant 0 : index
    %c0_238 = arith.constant 0 : index
    %173 = vector.load %arg6[%c0_237, %c0_238] : memref<88x64xf32, #tpu.memory_space<vmem>>, vector<88x64xf32>
    tpu.vector_store %arg6[%c0_237, %c0_238], %172 {strides = array<i32>} : memref<88x64xf32, #tpu.memory_space<vmem>>, vector<88x64xf32>,
    %c0_239 = arith.constant 0 : index
    %c3_240 = arith.constant 3 : index
    %c11_241 = arith.constant 11 : index
    %c0_242 = arith.constant 0 : index
    %174 = vector.load %arg2[%c0_239, %c3_240, %c11_241, %c0_242] : memref<1x4x124x8xbf16, #tpu.memory_space<vmem>>, vector<1x1x88x8xbf16>
    %175 = vector.shape_cast %174 : vector<1x1x88x8xbf16> to vector<88x8xbf16>
    %c0_243 = arith.constant 0 : index
    %c0_244 = arith.constant 0 : index
    %176 = vector.load %arg6[%c0_243, %c0_244] : memref<88x64xf32, #tpu.memory_space<vmem>>, vector<88x64xf32>
    %c22 = arith.constant 22 : index
    %c0_245 = arith.constant 0 : index
    %c0_246 = arith.constant 0 : index
    %177 = vector.load %arg3[%c22, %c0_245, %c0_246] : memref<49x8x64xbf16, #tpu.memory_space<vmem>>, vector<1x8x64xbf16>
    %178 = vector.shape_cast %177 : vector<1x8x64xbf16> to vector<8x64xbf16>
    %cst_247 = arith.constant dense<0.000000e+00> : vector<88x64xf32>
    %179 = tpu.matmul %175, %178, %cst_247 {dimension_numbers = #tpu.dot_dimension_numbers<[1], [0], [0], [1], [0, 0, 1, 1], [], []>} : vector<88x8xbf16>, vector<8x64xbf16>, vector<88x64xf32> -> vector<88x64xf32>
    %180 = arith.addf %176, %179 : vector<88x64xf32>
    %c0_248 = arith.constant 0 : index
    %c0_249 = arith.constant 0 : index
    %181 = vector.load %arg6[%c0_248, %c0_249] : memref<88x64xf32, #tpu.memory_space<vmem>>, vector<88x64xf32>
    tpu.vector_store %arg6[%c0_248, %c0_249], %180 {strides = array<i32>} : memref<88x64xf32, #tpu.memory_space<vmem>>, vector<88x64xf32>,
    %c0_250 = arith.constant 0 : index
    %c2_251 = arith.constant 2 : index
    %c12_252 = arith.constant 12 : index
    %c0_253 = arith.constant 0 : index
    %182 = vector.load %arg2[%c0_250, %c2_251, %c12_252, %c0_253] : memref<1x4x124x8xbf16, #tpu.memory_space<vmem>>, vector<1x1x88x8xbf16>
    %183 = vector.shape_cast %182 : vector<1x1x88x8xbf16> to vector<88x8xbf16>
    %c0_254 = arith.constant 0 : index
    %c0_255 = arith.constant 0 : index
    %184 = vector.load %arg6[%c0_254, %c0_255] : memref<88x64xf32, #tpu.memory_space<vmem>>, vector<88x64xf32>
    %c23 = arith.constant 23 : index
    %c0_256 = arith.constant 0 : index
    %c0_257 = arith.constant 0 : index
    %185 = vector.load %arg3[%c23, %c0_256, %c0_257] : memref<49x8x64xbf16, #tpu.memory_space<vmem>>, vector<1x8x64xbf16>
    %186 = vector.shape_cast %185 : vector<1x8x64xbf16> to vector<8x64xbf16>
    %cst_258 = arith.constant dense<0.000000e+00> : vector<88x64xf32>
    %187 = tpu.matmul %183, %186, %cst_258 {dimension_numbers = #tpu.dot_dimension_numbers<[1], [0], [0], [1], [0, 0, 1, 1], [], []>} : vector<88x8xbf16>, vector<8x64xbf16>, vector<88x64xf32> -> vector<88x64xf32>
    %188 = arith.addf %184, %187 : vector<88x64xf32>
    %c0_259 = arith.constant 0 : index
    %c0_260 = arith.constant 0 : index
    %189 = vector.load %arg6[%c0_259, %c0_260] : memref<88x64xf32, #tpu.memory_space<vmem>>, vector<88x64xf32>
    tpu.vector_store %arg6[%c0_259, %c0_260], %188 {strides = array<i32>} : memref<88x64xf32, #tpu.memory_space<vmem>>, vector<88x64xf32>,
    %c0_261 = arith.constant 0 : index
    %c3_262 = arith.constant 3 : index
    %c12_263 = arith.constant 12 : index
    %c0_264 = arith.constant 0 : index
    %190 = vector.load %arg2[%c0_261, %c3_262, %c12_263, %c0_264] : memref<1x4x124x8xbf16, #tpu.memory_space<vmem>>, vector<1x1x88x8xbf16>
    %191 = vector.shape_cast %190 : vector<1x1x88x8xbf16> to vector<88x8xbf16>
    %c0_265 = arith.constant 0 : index
    %c0_266 = arith.constant 0 : index
    %192 = vector.load %arg6[%c0_265, %c0_266] : memref<88x64xf32, #tpu.memory_space<vmem>>, vector<88x64xf32>
    %c24 = arith.constant 24 : index
    %c0_267 = arith.constant 0 : index
    %c0_268 = arith.constant 0 : index
    %193 = vector.load %arg3[%c24, %c0_267, %c0_268] : memref<49x8x64xbf16, #tpu.memory_space<vmem>>, vector<1x8x64xbf16>
    %194 = vector.shape_cast %193 : vector<1x8x64xbf16> to vector<8x64xbf16>
    %cst_269 = arith.constant dense<0.000000e+00> : vector<88x64xf32>
    %195 = tpu.matmul %191, %194, %cst_269 {dimension_numbers = #tpu.dot_dimension_numbers<[1], [0], [0], [1], [0, 0, 1, 1], [], []>} : vector<88x8xbf16>, vector<8x64xbf16>, vector<88x64xf32> -> vector<88x64xf32>
    %196 = arith.addf %192, %195 : vector<88x64xf32>
    %c0_270 = arith.constant 0 : index
    %c0_271 = arith.constant 0 : index
    %197 = vector.load %arg6[%c0_270, %c0_271] : memref<88x64xf32, #tpu.memory_space<vmem>>, vector<88x64xf32>
    tpu.vector_store %arg6[%c0_270, %c0_271], %196 {strides = array<i32>} : memref<88x64xf32, #tpu.memory_space<vmem>>, vector<88x64xf32>,
    %c0_272 = arith.constant 0 : index
    %c2_273 = arith.constant 2 : index
    %c13_274 = arith.constant 13 : index
    %c0_275 = arith.constant 0 : index
    %198 = vector.load %arg2[%c0_272, %c2_273, %c13_274, %c0_275] : memref<1x4x124x8xbf16, #tpu.memory_space<vmem>>, vector<1x1x88x8xbf16>
    %199 = vector.shape_cast %198 : vector<1x1x88x8xbf16> to vector<88x8xbf16>
    %c0_276 = arith.constant 0 : index
    %c0_277 = arith.constant 0 : index
    %200 = vector.load %arg6[%c0_276, %c0_277] : memref<88x64xf32, #tpu.memory_space<vmem>>, vector<88x64xf32>
    %c25 = arith.constant 25 : index
    %c0_278 = arith.constant 0 : index
    %c0_279 = arith.constant 0 : index
    %201 = vector.load %arg3[%c25, %c0_278, %c0_279] : memref<49x8x64xbf16, #tpu.memory_space<vmem>>, vector<1x8x64xbf16>
    %202 = vector.shape_cast %201 : vector<1x8x64xbf16> to vector<8x64xbf16>
    %cst_280 = arith.constant dense<0.000000e+00> : vector<88x64xf32>
    %203 = tpu.matmul %199, %202, %cst_280 {dimension_numbers = #tpu.dot_dimension_numbers<[1], [0], [0], [1], [0, 0, 1, 1], [], []>} : vector<88x8xbf16>, vector<8x64xbf16>, vector<88x64xf32> -> vector<88x64xf32>
    %204 = arith.addf %200, %203 : vector<88x64xf32>
    %c0_281 = arith.constant 0 : index
    %c0_282 = arith.constant 0 : index
    %205 = vector.load %arg6[%c0_281, %c0_282] : memref<88x64xf32, #tpu.memory_space<vmem>>, vector<88x64xf32>
    tpu.vector_store %arg6[%c0_281, %c0_282], %204 {strides = array<i32>} : memref<88x64xf32, #tpu.memory_space<vmem>>, vector<88x64xf32>,
    %c0_283 = arith.constant 0 : index
    %c3_284 = arith.constant 3 : index
    %c13_285 = arith.constant 13 : index
    %c0_286 = arith.constant 0 : index
    %206 = vector.load %arg2[%c0_283, %c3_284, %c13_285, %c0_286] : memref<1x4x124x8xbf16, #tpu.memory_space<vmem>>, vector<1x1x88x8xbf16>
    %207 = vector.shape_cast %206 : vector<1x1x88x8xbf16> to vector<88x8xbf16>
    %c0_287 = arith.constant 0 : index
    %c0_288 = arith.constant 0 : index
    %208 = vector.load %arg6[%c0_287, %c0_288] : memref<88x64xf32, #tpu.memory_space<vmem>>, vector<88x64xf32>
    %c26 = arith.constant 26 : index
    %c0_289 = arith.constant 0 : index
    %c0_290 = arith.constant 0 : index
    %209 = vector.load %arg3[%c26, %c0_289, %c0_290] : memref<49x8x64xbf16, #tpu.memory_space<vmem>>, vector<1x8x64xbf16>
    %210 = vector.shape_cast %209 : vector<1x8x64xbf16> to vector<8x64xbf16>
    %cst_291 = arith.constant dense<0.000000e+00> : vector<88x64xf32>
    %211 = tpu.matmul %207, %210, %cst_291 {dimension_numbers = #tpu.dot_dimension_numbers<[1], [0], [0], [1], [0, 0, 1, 1], [], []>} : vector<88x8xbf16>, vector<8x64xbf16>, vector<88x64xf32> -> vector<88x64xf32>
    %212 = arith.addf %208, %211 : vector<88x64xf32>
    %c0_292 = arith.constant 0 : index
    %c0_293 = arith.constant 0 : index
    %213 = vector.load %arg6[%c0_292, %c0_293] : memref<88x64xf32, #tpu.memory_space<vmem>>, vector<88x64xf32>
    tpu.vector_store %arg6[%c0_292, %c0_293], %212 {strides = array<i32>} : memref<88x64xf32, #tpu.memory_space<vmem>>, vector<88x64xf32>,
    %c0_294 = arith.constant 0 : index
    %c2_295 = arith.constant 2 : index
    %c14_296 = arith.constant 14 : index
    %c0_297 = arith.constant 0 : index
    %214 = vector.load %arg2[%c0_294, %c2_295, %c14_296, %c0_297] : memref<1x4x124x8xbf16, #tpu.memory_space<vmem>>, vector<1x1x88x8xbf16>
    %215 = vector.shape_cast %214 : vector<1x1x88x8xbf16> to vector<88x8xbf16>
    %c0_298 = arith.constant 0 : index
    %c0_299 = arith.constant 0 : index
    %216 = vector.load %arg6[%c0_298, %c0_299] : memref<88x64xf32, #tpu.memory_space<vmem>>, vector<88x64xf32>
    %c27 = arith.constant 27 : index
    %c0_300 = arith.constant 0 : index
    %c0_301 = arith.constant 0 : index
    %217 = vector.load %arg3[%c27, %c0_300, %c0_301] : memref<49x8x64xbf16, #tpu.memory_space<vmem>>, vector<1x8x64xbf16>
    %218 = vector.shape_cast %217 : vector<1x8x64xbf16> to vector<8x64xbf16>
    %cst_302 = arith.constant dense<0.000000e+00> : vector<88x64xf32>
    %219 = tpu.matmul %215, %218, %cst_302 {dimension_numbers = #tpu.dot_dimension_numbers<[1], [0], [0], [1], [0, 0, 1, 1], [], []>} : vector<88x8xbf16>, vector<8x64xbf16>, vector<88x64xf32> -> vector<88x64xf32>
    %220 = arith.addf %216, %219 : vector<88x64xf32>
    %c0_303 = arith.constant 0 : index
    %c0_304 = arith.constant 0 : index
    %221 = vector.load %arg6[%c0_303, %c0_304] : memref<88x64xf32, #tpu.memory_space<vmem>>, vector<88x64xf32>
    tpu.vector_store %arg6[%c0_303, %c0_304], %220 {strides = array<i32>} : memref<88x64xf32, #tpu.memory_space<vmem>>, vector<88x64xf32>,
    %c0_305 = arith.constant 0 : index
    %c0_306 = arith.constant 0 : index
    %c22_307 = arith.constant 22 : index
    %c0_308 = arith.constant 0 : index
    %222 = vector.load %arg2[%c0_305, %c0_306, %c22_307, %c0_308] : memref<1x4x124x8xbf16, #tpu.memory_space<vmem>>, vector<1x1x88x8xbf16>
    %223 = vector.shape_cast %222 : vector<1x1x88x8xbf16> to vector<88x8xbf16>
    %c0_309 = arith.constant 0 : index
    %c0_310 = arith.constant 0 : index
    %224 = vector.load %arg6[%c0_309, %c0_310] : memref<88x64xf32, #tpu.memory_space<vmem>>, vector<88x64xf32>
    %c28 = arith.constant 28 : index
    %c0_311 = arith.constant 0 : index
    %c0_312 = arith.constant 0 : index
    %225 = vector.load %arg3[%c28, %c0_311, %c0_312] : memref<49x8x64xbf16, #tpu.memory_space<vmem>>, vector<1x8x64xbf16>
    %226 = vector.shape_cast %225 : vector<1x8x64xbf16> to vector<8x64xbf16>
    %cst_313 = arith.constant dense<0.000000e+00> : vector<88x64xf32>
    %227 = tpu.matmul %223, %226, %cst_313 {dimension_numbers = #tpu.dot_dimension_numbers<[1], [0], [0], [1], [0, 0, 1, 1], [], []>} : vector<88x8xbf16>, vector<8x64xbf16>, vector<88x64xf32> -> vector<88x64xf32>
    %228 = arith.addf %224, %227 : vector<88x64xf32>
    %c0_314 = arith.constant 0 : index
    %c0_315 = arith.constant 0 : index
    %229 = vector.load %arg6[%c0_314, %c0_315] : memref<88x64xf32, #tpu.memory_space<vmem>>, vector<88x64xf32>
    tpu.vector_store %arg6[%c0_314, %c0_315], %228 {strides = array<i32>} : memref<88x64xf32, #tpu.memory_space<vmem>>, vector<88x64xf32>,
    %c0_316 = arith.constant 0 : index
    %c1_317 = arith.constant 1 : index
    %c22_318 = arith.constant 22 : index
    %c0_319 = arith.constant 0 : index
    %230 = vector.load %arg2[%c0_316, %c1_317, %c22_318, %c0_319] : memref<1x4x124x8xbf16, #tpu.memory_space<vmem>>, vector<1x1x88x8xbf16>
    %231 = vector.shape_cast %230 : vector<1x1x88x8xbf16> to vector<88x8xbf16>
    %c0_320 = arith.constant 0 : index
    %c0_321 = arith.constant 0 : index
    %232 = vector.load %arg6[%c0_320, %c0_321] : memref<88x64xf32, #tpu.memory_space<vmem>>, vector<88x64xf32>
    %c29 = arith.constant 29 : index
    %c0_322 = arith.constant 0 : index
    %c0_323 = arith.constant 0 : index
    %233 = vector.load %arg3[%c29, %c0_322, %c0_323] : memref<49x8x64xbf16, #tpu.memory_space<vmem>>, vector<1x8x64xbf16>
    %234 = vector.shape_cast %233 : vector<1x8x64xbf16> to vector<8x64xbf16>
    %cst_324 = arith.constant dense<0.000000e+00> : vector<88x64xf32>
    %235 = tpu.matmul %231, %234, %cst_324 {dimension_numbers = #tpu.dot_dimension_numbers<[1], [0], [0], [1], [0, 0, 1, 1], [], []>} : vector<88x8xbf16>, vector<8x64xbf16>, vector<88x64xf32> -> vector<88x64xf32>
    %236 = arith.addf %232, %235 : vector<88x64xf32>
    %c0_325 = arith.constant 0 : index
    %c0_326 = arith.constant 0 : index
    %237 = vector.load %arg6[%c0_325, %c0_326] : memref<88x64xf32, #tpu.memory_space<vmem>>, vector<88x64xf32>
    tpu.vector_store %arg6[%c0_325, %c0_326], %236 {strides = array<i32>} : memref<88x64xf32, #tpu.memory_space<vmem>>, vector<88x64xf32>,
    %c0_327 = arith.constant 0 : index
    %c0_328 = arith.constant 0 : index
    %c23_329 = arith.constant 23 : index
    %c0_330 = arith.constant 0 : index
    %238 = vector.load %arg2[%c0_327, %c0_328, %c23_329, %c0_330] : memref<1x4x124x8xbf16, #tpu.memory_space<vmem>>, vector<1x1x88x8xbf16>
    %239 = vector.shape_cast %238 : vector<1x1x88x8xbf16> to vector<88x8xbf16>
    %c0_331 = arith.constant 0 : index
    %c0_332 = arith.constant 0 : index
    %240 = vector.load %arg6[%c0_331, %c0_332] : memref<88x64xf32, #tpu.memory_space<vmem>>, vector<88x64xf32>
    %c30 = arith.constant 30 : index
    %c0_333 = arith.constant 0 : index
    %c0_334 = arith.constant 0 : index
    %241 = vector.load %arg3[%c30, %c0_333, %c0_334] : memref<49x8x64xbf16, #tpu.memory_space<vmem>>, vector<1x8x64xbf16>
    %242 = vector.shape_cast %241 : vector<1x8x64xbf16> to vector<8x64xbf16>
    %cst_335 = arith.constant dense<0.000000e+00> : vector<88x64xf32>
    %243 = tpu.matmul %239, %242, %cst_335 {dimension_numbers = #tpu.dot_dimension_numbers<[1], [0], [0], [1], [0, 0, 1, 1], [], []>} : vector<88x8xbf16>, vector<8x64xbf16>, vector<88x64xf32> -> vector<88x64xf32>
    %244 = arith.addf %240, %243 : vector<88x64xf32>
    %c0_336 = arith.constant 0 : index
    %c0_337 = arith.constant 0 : index
    %245 = vector.load %arg6[%c0_336, %c0_337] : memref<88x64xf32, #tpu.memory_space<vmem>>, vector<88x64xf32>
    tpu.vector_store %arg6[%c0_336, %c0_337], %244 {strides = array<i32>} : memref<88x64xf32, #tpu.memory_space<vmem>>, vector<88x64xf32>,
    %c0_338 = arith.constant 0 : index
    %c1_339 = arith.constant 1 : index
    %c23_340 = arith.constant 23 : index
    %c0_341 = arith.constant 0 : index
    %246 = vector.load %arg2[%c0_338, %c1_339, %c23_340, %c0_341] : memref<1x4x124x8xbf16, #tpu.memory_space<vmem>>, vector<1x1x88x8xbf16>
    %247 = vector.shape_cast %246 : vector<1x1x88x8xbf16> to vector<88x8xbf16>
    %c0_342 = arith.constant 0 : index
    %c0_343 = arith.constant 0 : index
    %248 = vector.load %arg6[%c0_342, %c0_343] : memref<88x64xf32, #tpu.memory_space<vmem>>, vector<88x64xf32>
    %c31 = arith.constant 31 : index
    %c0_344 = arith.constant 0 : index
    %c0_345 = arith.constant 0 : index
    %249 = vector.load %arg3[%c31, %c0_344, %c0_345] : memref<49x8x64xbf16, #tpu.memory_space<vmem>>, vector<1x8x64xbf16>
    %250 = vector.shape_cast %249 : vector<1x8x64xbf16> to vector<8x64xbf16>
    %cst_346 = arith.constant dense<0.000000e+00> : vector<88x64xf32>
    %251 = tpu.matmul %247, %250, %cst_346 {dimension_numbers = #tpu.dot_dimension_numbers<[1], [0], [0], [1], [0, 0, 1, 1], [], []>} : vector<88x8xbf16>, vector<8x64xbf16>, vector<88x64xf32> -> vector<88x64xf32>
    %252 = arith.addf %248, %251 : vector<88x64xf32>
    %c0_347 = arith.constant 0 : index
    %c0_348 = arith.constant 0 : index
    %253 = vector.load %arg6[%c0_347, %c0_348] : memref<88x64xf32, #tpu.memory_space<vmem>>, vector<88x64xf32>
    tpu.vector_store %arg6[%c0_347, %c0_348], %252 {strides = array<i32>} : memref<88x64xf32, #tpu.memory_space<vmem>>, vector<88x64xf32>,
    %c0_349 = arith.constant 0 : index
    %c0_350 = arith.constant 0 : index
    %c24_351 = arith.constant 24 : index
    %c0_352 = arith.constant 0 : index
    %254 = vector.load %arg2[%c0_349, %c0_350, %c24_351, %c0_352] : memref<1x4x124x8xbf16, #tpu.memory_space<vmem>>, vector<1x1x88x8xbf16>
    %255 = vector.shape_cast %254 : vector<1x1x88x8xbf16> to vector<88x8xbf16>
    %c0_353 = arith.constant 0 : index
    %c0_354 = arith.constant 0 : index
    %256 = vector.load %arg6[%c0_353, %c0_354] : memref<88x64xf32, #tpu.memory_space<vmem>>, vector<88x64xf32>
    %c32 = arith.constant 32 : index
    %c0_355 = arith.constant 0 : index
    %c0_356 = arith.constant 0 : index
    %257 = vector.load %arg3[%c32, %c0_355, %c0_356] : memref<49x8x64xbf16, #tpu.memory_space<vmem>>, vector<1x8x64xbf16>
    %258 = vector.shape_cast %257 : vector<1x8x64xbf16> to vector<8x64xbf16>
    %cst_357 = arith.constant dense<0.000000e+00> : vector<88x64xf32>
    %259 = tpu.matmul %255, %258, %cst_357 {dimension_numbers = #tpu.dot_dimension_numbers<[1], [0], [0], [1], [0, 0, 1, 1], [], []>} : vector<88x8xbf16>, vector<8x64xbf16>, vector<88x64xf32> -> vector<88x64xf32>
    %260 = arith.addf %256, %259 : vector<88x64xf32>
    %c0_358 = arith.constant 0 : index
    %c0_359 = arith.constant 0 : index
    %261 = vector.load %arg6[%c0_358, %c0_359] : memref<88x64xf32, #tpu.memory_space<vmem>>, vector<88x64xf32>
    tpu.vector_store %arg6[%c0_358, %c0_359], %260 {strides = array<i32>} : memref<88x64xf32, #tpu.memory_space<vmem>>, vector<88x64xf32>,
    %c0_360 = arith.constant 0 : index
    %c1_361 = arith.constant 1 : index
    %c24_362 = arith.constant 24 : index
    %c0_363 = arith.constant 0 : index
    %262 = vector.load %arg2[%c0_360, %c1_361, %c24_362, %c0_363] : memref<1x4x124x8xbf16, #tpu.memory_space<vmem>>, vector<1x1x88x8xbf16>
    %263 = vector.shape_cast %262 : vector<1x1x88x8xbf16> to vector<88x8xbf16>
    %c0_364 = arith.constant 0 : index
    %c0_365 = arith.constant 0 : index
    %264 = vector.load %arg6[%c0_364, %c0_365] : memref<88x64xf32, #tpu.memory_space<vmem>>, vector<88x64xf32>
    %c33 = arith.constant 33 : index
    %c0_366 = arith.constant 0 : index
    %c0_367 = arith.constant 0 : index
    %265 = vector.load %arg3[%c33, %c0_366, %c0_367] : memref<49x8x64xbf16, #tpu.memory_space<vmem>>, vector<1x8x64xbf16>
    %266 = vector.shape_cast %265 : vector<1x8x64xbf16> to vector<8x64xbf16>
    %cst_368 = arith.constant dense<0.000000e+00> : vector<88x64xf32>
    %267 = tpu.matmul %263, %266, %cst_368 {dimension_numbers = #tpu.dot_dimension_numbers<[1], [0], [0], [1], [0, 0, 1, 1], [], []>} : vector<88x8xbf16>, vector<8x64xbf16>, vector<88x64xf32> -> vector<88x64xf32>
    %268 = arith.addf %264, %267 : vector<88x64xf32>
    %c0_369 = arith.constant 0 : index
    %c0_370 = arith.constant 0 : index
    %269 = vector.load %arg6[%c0_369, %c0_370] : memref<88x64xf32, #tpu.memory_space<vmem>>, vector<88x64xf32>
    tpu.vector_store %arg6[%c0_369, %c0_370], %268 {strides = array<i32>} : memref<88x64xf32, #tpu.memory_space<vmem>>, vector<88x64xf32>,
    %c0_371 = arith.constant 0 : index
    %c0_372 = arith.constant 0 : index
    %c25_373 = arith.constant 25 : index
    %c0_374 = arith.constant 0 : index
    %270 = vector.load %arg2[%c0_371, %c0_372, %c25_373, %c0_374] : memref<1x4x124x8xbf16, #tpu.memory_space<vmem>>, vector<1x1x88x8xbf16>
    %271 = vector.shape_cast %270 : vector<1x1x88x8xbf16> to vector<88x8xbf16>
    %c0_375 = arith.constant 0 : index
    %c0_376 = arith.constant 0 : index
    %272 = vector.load %arg6[%c0_375, %c0_376] : memref<88x64xf32, #tpu.memory_space<vmem>>, vector<88x64xf32>
    %c34 = arith.constant 34 : index
    %c0_377 = arith.constant 0 : index
    %c0_378 = arith.constant 0 : index
    %273 = vector.load %arg3[%c34, %c0_377, %c0_378] : memref<49x8x64xbf16, #tpu.memory_space<vmem>>, vector<1x8x64xbf16>
    %274 = vector.shape_cast %273 : vector<1x8x64xbf16> to vector<8x64xbf16>
    %cst_379 = arith.constant dense<0.000000e+00> : vector<88x64xf32>
    %275 = tpu.matmul %271, %274, %cst_379 {dimension_numbers = #tpu.dot_dimension_numbers<[1], [0], [0], [1], [0, 0, 1, 1], [], []>} : vector<88x8xbf16>, vector<8x64xbf16>, vector<88x64xf32> -> vector<88x64xf32>
    %276 = arith.addf %272, %275 : vector<88x64xf32>
    %c0_380 = arith.constant 0 : index
    %c0_381 = arith.constant 0 : index
    %277 = vector.load %arg6[%c0_380, %c0_381] : memref<88x64xf32, #tpu.memory_space<vmem>>, vector<88x64xf32>
    tpu.vector_store %arg6[%c0_380, %c0_381], %276 {strides = array<i32>} : memref<88x64xf32, #tpu.memory_space<vmem>>, vector<88x64xf32>,
    %c0_382 = arith.constant 0 : index
    %c2_383 = arith.constant 2 : index
    %c22_384 = arith.constant 22 : index
    %c0_385 = arith.constant 0 : index
    %278 = vector.load %arg2[%c0_382, %c2_383, %c22_384, %c0_385] : memref<1x4x124x8xbf16, #tpu.memory_space<vmem>>, vector<1x1x88x8xbf16>
    %279 = vector.shape_cast %278 : vector<1x1x88x8xbf16> to vector<88x8xbf16>
    %c0_386 = arith.constant 0 : index
    %c0_387 = arith.constant 0 : index
    %280 = vector.load %arg6[%c0_386, %c0_387] : memref<88x64xf32, #tpu.memory_space<vmem>>, vector<88x64xf32>
    %c35 = arith.constant 35 : index
    %c0_388 = arith.constant 0 : index
    %c0_389 = arith.constant 0 : index
    %281 = vector.load %arg3[%c35, %c0_388, %c0_389] : memref<49x8x64xbf16, #tpu.memory_space<vmem>>, vector<1x8x64xbf16>
    %282 = vector.shape_cast %281 : vector<1x8x64xbf16> to vector<8x64xbf16>
    %cst_390 = arith.constant dense<0.000000e+00> : vector<88x64xf32>
    %283 = tpu.matmul %279, %282, %cst_390 {dimension_numbers = #tpu.dot_dimension_numbers<[1], [0], [0], [1], [0, 0, 1, 1], [], []>} : vector<88x8xbf16>, vector<8x64xbf16>, vector<88x64xf32> -> vector<88x64xf32>
    %284 = arith.addf %280, %283 : vector<88x64xf32>
    %c0_391 = arith.constant 0 : index
    %c0_392 = arith.constant 0 : index
    %285 = vector.load %arg6[%c0_391, %c0_392] : memref<88x64xf32, #tpu.memory_space<vmem>>, vector<88x64xf32>
    tpu.vector_store %arg6[%c0_391, %c0_392], %284 {strides = array<i32>} : memref<88x64xf32, #tpu.memory_space<vmem>>, vector<88x64xf32>,
    %c0_393 = arith.constant 0 : index
    %c3_394 = arith.constant 3 : index
    %c22_395 = arith.constant 22 : index
    %c0_396 = arith.constant 0 : index
    %286 = vector.load %arg2[%c0_393, %c3_394, %c22_395, %c0_396] : memref<1x4x124x8xbf16, #tpu.memory_space<vmem>>, vector<1x1x88x8xbf16>
    %287 = vector.shape_cast %286 : vector<1x1x88x8xbf16> to vector<88x8xbf16>
    %c0_397 = arith.constant 0 : index
    %c0_398 = arith.constant 0 : index
    %288 = vector.load %arg6[%c0_397, %c0_398] : memref<88x64xf32, #tpu.memory_space<vmem>>, vector<88x64xf32>
    %c36 = arith.constant 36 : index
    %c0_399 = arith.constant 0 : index
    %c0_400 = arith.constant 0 : index
    %289 = vector.load %arg3[%c36, %c0_399, %c0_400] : memref<49x8x64xbf16, #tpu.memory_space<vmem>>, vector<1x8x64xbf16>
    %290 = vector.shape_cast %289 : vector<1x8x64xbf16> to vector<8x64xbf16>
    %cst_401 = arith.constant dense<0.000000e+00> : vector<88x64xf32>
    %291 = tpu.matmul %287, %290, %cst_401 {dimension_numbers = #tpu.dot_dimension_numbers<[1], [0], [0], [1], [0, 0, 1, 1], [], []>} : vector<88x8xbf16>, vector<8x64xbf16>, vector<88x64xf32> -> vector<88x64xf32>
    %292 = arith.addf %288, %291 : vector<88x64xf32>
    %c0_402 = arith.constant 0 : index
    %c0_403 = arith.constant 0 : index
    %293 = vector.load %arg6[%c0_402, %c0_403] : memref<88x64xf32, #tpu.memory_space<vmem>>, vector<88x64xf32>
    tpu.vector_store %arg6[%c0_402, %c0_403], %292 {strides = array<i32>} : memref<88x64xf32, #tpu.memory_space<vmem>>, vector<88x64xf32>,
    %c0_404 = arith.constant 0 : index
    %c2_405 = arith.constant 2 : index
    %c23_406 = arith.constant 23 : index
    %c0_407 = arith.constant 0 : index
    %294 = vector.load %arg2[%c0_404, %c2_405, %c23_406, %c0_407] : memref<1x4x124x8xbf16, #tpu.memory_space<vmem>>, vector<1x1x88x8xbf16>
    %295 = vector.shape_cast %294 : vector<1x1x88x8xbf16> to vector<88x8xbf16>
    %c0_408 = arith.constant 0 : index
    %c0_409 = arith.constant 0 : index
    %296 = vector.load %arg6[%c0_408, %c0_409] : memref<88x64xf32, #tpu.memory_space<vmem>>, vector<88x64xf32>
    %c37 = arith.constant 37 : index
    %c0_410 = arith.constant 0 : index
    %c0_411 = arith.constant 0 : index
    %297 = vector.load %arg3[%c37, %c0_410, %c0_411] : memref<49x8x64xbf16, #tpu.memory_space<vmem>>, vector<1x8x64xbf16>
    %298 = vector.shape_cast %297 : vector<1x8x64xbf16> to vector<8x64xbf16>
    %cst_412 = arith.constant dense<0.000000e+00> : vector<88x64xf32>
    %299 = tpu.matmul %295, %298, %cst_412 {dimension_numbers = #tpu.dot_dimension_numbers<[1], [0], [0], [1], [0, 0, 1, 1], [], []>} : vector<88x8xbf16>, vector<8x64xbf16>, vector<88x64xf32> -> vector<88x64xf32>
    %300 = arith.addf %296, %299 : vector<88x64xf32>
    %c0_413 = arith.constant 0 : index
    %c0_414 = arith.constant 0 : index
    %301 = vector.load %arg6[%c0_413, %c0_414] : memref<88x64xf32, #tpu.memory_space<vmem>>, vector<88x64xf32>
    tpu.vector_store %arg6[%c0_413, %c0_414], %300 {strides = array<i32>} : memref<88x64xf32, #tpu.memory_space<vmem>>, vector<88x64xf32>,
    %c0_415 = arith.constant 0 : index
    %c3_416 = arith.constant 3 : index
    %c23_417 = arith.constant 23 : index
    %c0_418 = arith.constant 0 : index
    %302 = vector.load %arg2[%c0_415, %c3_416, %c23_417, %c0_418] : memref<1x4x124x8xbf16, #tpu.memory_space<vmem>>, vector<1x1x88x8xbf16>
    %303 = vector.shape_cast %302 : vector<1x1x88x8xbf16> to vector<88x8xbf16>
    %c0_419 = arith.constant 0 : index
    %c0_420 = arith.constant 0 : index
    %304 = vector.load %arg6[%c0_419, %c0_420] : memref<88x64xf32, #tpu.memory_space<vmem>>, vector<88x64xf32>
    %c38 = arith.constant 38 : index
    %c0_421 = arith.constant 0 : index
    %c0_422 = arith.constant 0 : index
    %305 = vector.load %arg3[%c38, %c0_421, %c0_422] : memref<49x8x64xbf16, #tpu.memory_space<vmem>>, vector<1x8x64xbf16>
    %306 = vector.shape_cast %305 : vector<1x8x64xbf16> to vector<8x64xbf16>
    %cst_423 = arith.constant dense<0.000000e+00> : vector<88x64xf32>
    %307 = tpu.matmul %303, %306, %cst_423 {dimension_numbers = #tpu.dot_dimension_numbers<[1], [0], [0], [1], [0, 0, 1, 1], [], []>} : vector<88x8xbf16>, vector<8x64xbf16>, vector<88x64xf32> -> vector<88x64xf32>
    %308 = arith.addf %304, %307 : vector<88x64xf32>
    %c0_424 = arith.constant 0 : index
    %c0_425 = arith.constant 0 : index
    %309 = vector.load %arg6[%c0_424, %c0_425] : memref<88x64xf32, #tpu.memory_space<vmem>>, vector<88x64xf32>
    tpu.vector_store %arg6[%c0_424, %c0_425], %308 {strides = array<i32>} : memref<88x64xf32, #tpu.memory_space<vmem>>, vector<88x64xf32>,
    %c0_426 = arith.constant 0 : index
    %c2_427 = arith.constant 2 : index
    %c24_428 = arith.constant 24 : index
    %c0_429 = arith.constant 0 : index
    %310 = vector.load %arg2[%c0_426, %c2_427, %c24_428, %c0_429] : memref<1x4x124x8xbf16, #tpu.memory_space<vmem>>, vector<1x1x88x8xbf16>
    %311 = vector.shape_cast %310 : vector<1x1x88x8xbf16> to vector<88x8xbf16>
    %c0_430 = arith.constant 0 : index
    %c0_431 = arith.constant 0 : index
    %312 = vector.load %arg6[%c0_430, %c0_431] : memref<88x64xf32, #tpu.memory_space<vmem>>, vector<88x64xf32>
    %c39 = arith.constant 39 : index
    %c0_432 = arith.constant 0 : index
    %c0_433 = arith.constant 0 : index
    %313 = vector.load %arg3[%c39, %c0_432, %c0_433] : memref<49x8x64xbf16, #tpu.memory_space<vmem>>, vector<1x8x64xbf16>
    %314 = vector.shape_cast %313 : vector<1x8x64xbf16> to vector<8x64xbf16>
    %cst_434 = arith.constant dense<0.000000e+00> : vector<88x64xf32>
    %315 = tpu.matmul %311, %314, %cst_434 {dimension_numbers = #tpu.dot_dimension_numbers<[1], [0], [0], [1], [0, 0, 1, 1], [], []>} : vector<88x8xbf16>, vector<8x64xbf16>, vector<88x64xf32> -> vector<88x64xf32>
    %316 = arith.addf %312, %315 : vector<88x64xf32>
    %c0_435 = arith.constant 0 : index
    %c0_436 = arith.constant 0 : index
    %317 = vector.load %arg6[%c0_435, %c0_436] : memref<88x64xf32, #tpu.memory_space<vmem>>, vector<88x64xf32>
    tpu.vector_store %arg6[%c0_435, %c0_436], %316 {strides = array<i32>} : memref<88x64xf32, #tpu.memory_space<vmem>>, vector<88x64xf32>,
    %c0_437 = arith.constant 0 : index
    %c3_438 = arith.constant 3 : index
    %c24_439 = arith.constant 24 : index
    %c0_440 = arith.constant 0 : index
    %318 = vector.load %arg2[%c0_437, %c3_438, %c24_439, %c0_440] : memref<1x4x124x8xbf16, #tpu.memory_space<vmem>>, vector<1x1x88x8xbf16>
    %319 = vector.shape_cast %318 : vector<1x1x88x8xbf16> to vector<88x8xbf16>
    %c0_441 = arith.constant 0 : index
    %c0_442 = arith.constant 0 : index
    %320 = vector.load %arg6[%c0_441, %c0_442] : memref<88x64xf32, #tpu.memory_space<vmem>>, vector<88x64xf32>
    %c40 = arith.constant 40 : index
    %c0_443 = arith.constant 0 : index
    %c0_444 = arith.constant 0 : index
    %321 = vector.load %arg3[%c40, %c0_443, %c0_444] : memref<49x8x64xbf16, #tpu.memory_space<vmem>>, vector<1x8x64xbf16>
    %322 = vector.shape_cast %321 : vector<1x8x64xbf16> to vector<8x64xbf16>
    %cst_445 = arith.constant dense<0.000000e+00> : vector<88x64xf32>
    %323 = tpu.matmul %319, %322, %cst_445 {dimension_numbers = #tpu.dot_dimension_numbers<[1], [0], [0], [1], [0, 0, 1, 1], [], []>} : vector<88x8xbf16>, vector<8x64xbf16>, vector<88x64xf32> -> vector<88x64xf32>
    %324 = arith.addf %320, %323 : vector<88x64xf32>
    %c0_446 = arith.constant 0 : index
    %c0_447 = arith.constant 0 : index
    %325 = vector.load %arg6[%c0_446, %c0_447] : memref<88x64xf32, #tpu.memory_space<vmem>>, vector<88x64xf32>
    tpu.vector_store %arg6[%c0_446, %c0_447], %324 {strides = array<i32>} : memref<88x64xf32, #tpu.memory_space<vmem>>, vector<88x64xf32>,
    %c0_448 = arith.constant 0 : index
    %c2_449 = arith.constant 2 : index
    %c25_450 = arith.constant 25 : index
    %c0_451 = arith.constant 0 : index
    %326 = vector.load %arg2[%c0_448, %c2_449, %c25_450, %c0_451] : memref<1x4x124x8xbf16, #tpu.memory_space<vmem>>, vector<1x1x88x8xbf16>
    %327 = vector.shape_cast %326 : vector<1x1x88x8xbf16> to vector<88x8xbf16>
    %c0_452 = arith.constant 0 : index
    %c0_453 = arith.constant 0 : index
    %328 = vector.load %arg6[%c0_452, %c0_453] : memref<88x64xf32, #tpu.memory_space<vmem>>, vector<88x64xf32>
    %c41 = arith.constant 41 : index
    %c0_454 = arith.constant 0 : index
    %c0_455 = arith.constant 0 : index
    %329 = vector.load %arg3[%c41, %c0_454, %c0_455] : memref<49x8x64xbf16, #tpu.memory_space<vmem>>, vector<1x8x64xbf16>
    %330 = vector.shape_cast %329 : vector<1x8x64xbf16> to vector<8x64xbf16>
    %cst_456 = arith.constant dense<0.000000e+00> : vector<88x64xf32>
    %331 = tpu.matmul %327, %330, %cst_456 {dimension_numbers = #tpu.dot_dimension_numbers<[1], [0], [0], [1], [0, 0, 1, 1], [], []>} : vector<88x8xbf16>, vector<8x64xbf16>, vector<88x64xf32> -> vector<88x64xf32>
    %332 = arith.addf %328, %331 : vector<88x64xf32>
    %c0_457 = arith.constant 0 : index
    %c0_458 = arith.constant 0 : index
    %333 = vector.load %arg6[%c0_457, %c0_458] : memref<88x64xf32, #tpu.memory_space<vmem>>, vector<88x64xf32>
    tpu.vector_store %arg6[%c0_457, %c0_458], %332 {strides = array<i32>} : memref<88x64xf32, #tpu.memory_space<vmem>>, vector<88x64xf32>,
    %c0_459 = arith.constant 0 : index
    %c0_460 = arith.constant 0 : index
    %c33_461 = arith.constant 33 : index
    %c0_462 = arith.constant 0 : index
    %334 = vector.load %arg2[%c0_459, %c0_460, %c33_461, %c0_462] : memref<1x4x124x8xbf16, #tpu.memory_space<vmem>>, vector<1x1x88x8xbf16>
    %335 = vector.shape_cast %334 : vector<1x1x88x8xbf16> to vector<88x8xbf16>
    %c0_463 = arith.constant 0 : index
    %c0_464 = arith.constant 0 : index
    %336 = vector.load %arg6[%c0_463, %c0_464] : memref<88x64xf32, #tpu.memory_space<vmem>>, vector<88x64xf32>
    %c42 = arith.constant 42 : index
    %c0_465 = arith.constant 0 : index
    %c0_466 = arith.constant 0 : index
    %337 = vector.load %arg3[%c42, %c0_465, %c0_466] : memref<49x8x64xbf16, #tpu.memory_space<vmem>>, vector<1x8x64xbf16>
    %338 = vector.shape_cast %337 : vector<1x8x64xbf16> to vector<8x64xbf16>
    %cst_467 = arith.constant dense<0.000000e+00> : vector<88x64xf32>
    %339 = tpu.matmul %335, %338, %cst_467 {dimension_numbers = #tpu.dot_dimension_numbers<[1], [0], [0], [1], [0, 0, 1, 1], [], []>} : vector<88x8xbf16>, vector<8x64xbf16>, vector<88x64xf32> -> vector<88x64xf32>
    %340 = arith.addf %336, %339 : vector<88x64xf32>
    %c0_468 = arith.constant 0 : index
    %c0_469 = arith.constant 0 : index
    %341 = vector.load %arg6[%c0_468, %c0_469] : memref<88x64xf32, #tpu.memory_space<vmem>>, vector<88x64xf32>
    tpu.vector_store %arg6[%c0_468, %c0_469], %340 {strides = array<i32>} : memref<88x64xf32, #tpu.memory_space<vmem>>, vector<88x64xf32>,
    %c0_470 = arith.constant 0 : index
    %c1_471 = arith.constant 1 : index
    %c33_472 = arith.constant 33 : index
    %c0_473 = arith.constant 0 : index
    %342 = vector.load %arg2[%c0_470, %c1_471, %c33_472, %c0_473] : memref<1x4x124x8xbf16, #tpu.memory_space<vmem>>, vector<1x1x88x8xbf16>
    %343 = vector.shape_cast %342 : vector<1x1x88x8xbf16> to vector<88x8xbf16>
    %c0_474 = arith.constant 0 : index
    %c0_475 = arith.constant 0 : index
    %344 = vector.load %arg6[%c0_474, %c0_475] : memref<88x64xf32, #tpu.memory_space<vmem>>, vector<88x64xf32>
    %c43 = arith.constant 43 : index
    %c0_476 = arith.constant 0 : index
    %c0_477 = arith.constant 0 : index
    %345 = vector.load %arg3[%c43, %c0_476, %c0_477] : memref<49x8x64xbf16, #tpu.memory_space<vmem>>, vector<1x8x64xbf16>
    %346 = vector.shape_cast %345 : vector<1x8x64xbf16> to vector<8x64xbf16>
    %cst_478 = arith.constant dense<0.000000e+00> : vector<88x64xf32>
    %347 = tpu.matmul %343, %346, %cst_478 {dimension_numbers = #tpu.dot_dimension_numbers<[1], [0], [0], [1], [0, 0, 1, 1], [], []>} : vector<88x8xbf16>, vector<8x64xbf16>, vector<88x64xf32> -> vector<88x64xf32>
    %348 = arith.addf %344, %347 : vector<88x64xf32>
    %c0_479 = arith.constant 0 : index
    %c0_480 = arith.constant 0 : index
    %349 = vector.load %arg6[%c0_479, %c0_480] : memref<88x64xf32, #tpu.memory_space<vmem>>, vector<88x64xf32>
    tpu.vector_store %arg6[%c0_479, %c0_480], %348 {strides = array<i32>} : memref<88x64xf32, #tpu.memory_space<vmem>>, vector<88x64xf32>,
    %c0_481 = arith.constant 0 : index
    %c0_482 = arith.constant 0 : index
    %c34_483 = arith.constant 34 : index
    %c0_484 = arith.constant 0 : index
    %350 = vector.load %arg2[%c0_481, %c0_482, %c34_483, %c0_484] : memref<1x4x124x8xbf16, #tpu.memory_space<vmem>>, vector<1x1x88x8xbf16>
    %351 = vector.shape_cast %350 : vector<1x1x88x8xbf16> to vector<88x8xbf16>
    %c0_485 = arith.constant 0 : index
    %c0_486 = arith.constant 0 : index
    %352 = vector.load %arg6[%c0_485, %c0_486] : memref<88x64xf32, #tpu.memory_space<vmem>>, vector<88x64xf32>
    %c44 = arith.constant 44 : index
    %c0_487 = arith.constant 0 : index
    %c0_488 = arith.constant 0 : index
    %353 = vector.load %arg3[%c44, %c0_487, %c0_488] : memref<49x8x64xbf16, #tpu.memory_space<vmem>>, vector<1x8x64xbf16>
    %354 = vector.shape_cast %353 : vector<1x8x64xbf16> to vector<8x64xbf16>
    %cst_489 = arith.constant dense<0.000000e+00> : vector<88x64xf32>
    %355 = tpu.matmul %351, %354, %cst_489 {dimension_numbers = #tpu.dot_dimension_numbers<[1], [0], [0], [1], [0, 0, 1, 1], [], []>} : vector<88x8xbf16>, vector<8x64xbf16>, vector<88x64xf32> -> vector<88x64xf32>
    %356 = arith.addf %352, %355 : vector<88x64xf32>
    %c0_490 = arith.constant 0 : index
    %c0_491 = arith.constant 0 : index
    %357 = vector.load %arg6[%c0_490, %c0_491] : memref<88x64xf32, #tpu.memory_space<vmem>>, vector<88x64xf32>
    tpu.vector_store %arg6[%c0_490, %c0_491], %356 {strides = array<i32>} : memref<88x64xf32, #tpu.memory_space<vmem>>, vector<88x64xf32>,
    %c0_492 = arith.constant 0 : index
    %c1_493 = arith.constant 1 : index
    %c34_494 = arith.constant 34 : index
    %c0_495 = arith.constant 0 : index
    %358 = vector.load %arg2[%c0_492, %c1_493, %c34_494, %c0_495] : memref<1x4x124x8xbf16, #tpu.memory_space<vmem>>, vector<1x1x88x8xbf16>
    %359 = vector.shape_cast %358 : vector<1x1x88x8xbf16> to vector<88x8xbf16>
    %c0_496 = arith.constant 0 : index
    %c0_497 = arith.constant 0 : index
    %360 = vector.load %arg6[%c0_496, %c0_497] : memref<88x64xf32, #tpu.memory_space<vmem>>, vector<88x64xf32>
    %c45 = arith.constant 45 : index
    %c0_498 = arith.constant 0 : index
    %c0_499 = arith.constant 0 : index
    %361 = vector.load %arg3[%c45, %c0_498, %c0_499] : memref<49x8x64xbf16, #tpu.memory_space<vmem>>, vector<1x8x64xbf16>
    %362 = vector.shape_cast %361 : vector<1x8x64xbf16> to vector<8x64xbf16>
    %cst_500 = arith.constant dense<0.000000e+00> : vector<88x64xf32>
    %363 = tpu.matmul %359, %362, %cst_500 {dimension_numbers = #tpu.dot_dimension_numbers<[1], [0], [0], [1], [0, 0, 1, 1], [], []>} : vector<88x8xbf16>, vector<8x64xbf16>, vector<88x64xf32> -> vector<88x64xf32>
    %364 = arith.addf %360, %363 : vector<88x64xf32>
    %c0_501 = arith.constant 0 : index
    %c0_502 = arith.constant 0 : index
    %365 = vector.load %arg6[%c0_501, %c0_502] : memref<88x64xf32, #tpu.memory_space<vmem>>, vector<88x64xf32>
    tpu.vector_store %arg6[%c0_501, %c0_502], %364 {strides = array<i32>} : memref<88x64xf32, #tpu.memory_space<vmem>>, vector<88x64xf32>,
    %c0_503 = arith.constant 0 : index
    %c0_504 = arith.constant 0 : index
    %c35_505 = arith.constant 35 : index
    %c0_506 = arith.constant 0 : index
    %366 = vector.load %arg2[%c0_503, %c0_504, %c35_505, %c0_506] : memref<1x4x124x8xbf16, #tpu.memory_space<vmem>>, vector<1x1x88x8xbf16>
    %367 = vector.shape_cast %366 : vector<1x1x88x8xbf16> to vector<88x8xbf16>
    %c0_507 = arith.constant 0 : index
    %c0_508 = arith.constant 0 : index
    %368 = vector.load %arg6[%c0_507, %c0_508] : memref<88x64xf32, #tpu.memory_space<vmem>>, vector<88x64xf32>
    %c46 = arith.constant 46 : index
    %c0_509 = arith.constant 0 : index
    %c0_510 = arith.constant 0 : index
    %369 = vector.load %arg3[%c46, %c0_509, %c0_510] : memref<49x8x64xbf16, #tpu.memory_space<vmem>>, vector<1x8x64xbf16>
    %370 = vector.shape_cast %369 : vector<1x8x64xbf16> to vector<8x64xbf16>
    %cst_511 = arith.constant dense<0.000000e+00> : vector<88x64xf32>
    %371 = tpu.matmul %367, %370, %cst_511 {dimension_numbers = #tpu.dot_dimension_numbers<[1], [0], [0], [1], [0, 0, 1, 1], [], []>} : vector<88x8xbf16>, vector<8x64xbf16>, vector<88x64xf32> -> vector<88x64xf32>
    %372 = arith.addf %368, %371 : vector<88x64xf32>
    %c0_512 = arith.constant 0 : index
    %c0_513 = arith.constant 0 : index
    %373 = vector.load %arg6[%c0_512, %c0_513] : memref<88x64xf32, #tpu.memory_space<vmem>>, vector<88x64xf32>
    tpu.vector_store %arg6[%c0_512, %c0_513], %372 {strides = array<i32>} : memref<88x64xf32, #tpu.memory_space<vmem>>, vector<88x64xf32>,
    %c0_514 = arith.constant 0 : index
    %c1_515 = arith.constant 1 : index
    %c35_516 = arith.constant 35 : index
    %c0_517 = arith.constant 0 : index
    %374 = vector.load %arg2[%c0_514, %c1_515, %c35_516, %c0_517] : memref<1x4x124x8xbf16, #tpu.memory_space<vmem>>, vector<1x1x88x8xbf16>
    %375 = vector.shape_cast %374 : vector<1x1x88x8xbf16> to vector<88x8xbf16>
    %c0_518 = arith.constant 0 : index
    %c0_519 = arith.constant 0 : index
    %376 = vector.load %arg6[%c0_518, %c0_519] : memref<88x64xf32, #tpu.memory_space<vmem>>, vector<88x64xf32>
    %c47 = arith.constant 47 : index
    %c0_520 = arith.constant 0 : index
    %c0_521 = arith.constant 0 : index
    %377 = vector.load %arg3[%c47, %c0_520, %c0_521] : memref<49x8x64xbf16, #tpu.memory_space<vmem>>, vector<1x8x64xbf16>
    %378 = vector.shape_cast %377 : vector<1x8x64xbf16> to vector<8x64xbf16>
    %cst_522 = arith.constant dense<0.000000e+00> : vector<88x64xf32>
    %379 = tpu.matmul %375, %378, %cst_522 {dimension_numbers = #tpu.dot_dimension_numbers<[1], [0], [0], [1], [0, 0, 1, 1], [], []>} : vector<88x8xbf16>, vector<8x64xbf16>, vector<88x64xf32> -> vector<88x64xf32>
    %380 = arith.addf %376, %379 : vector<88x64xf32>
    %c0_523 = arith.constant 0 : index
    %c0_524 = arith.constant 0 : index
    %381 = vector.load %arg6[%c0_523, %c0_524] : memref<88x64xf32, #tpu.memory_space<vmem>>, vector<88x64xf32>
    tpu.vector_store %arg6[%c0_523, %c0_524], %380 {strides = array<i32>} : memref<88x64xf32, #tpu.memory_space<vmem>>, vector<88x64xf32>,
    %c0_525 = arith.constant 0 : index
    %c0_526 = arith.constant 0 : index
    %c36_527 = arith.constant 36 : index
    %c0_528 = arith.constant 0 : index
    %382 = vector.load %arg2[%c0_525, %c0_526, %c36_527, %c0_528] : memref<1x4x124x8xbf16, #tpu.memory_space<vmem>>, vector<1x1x88x8xbf16>
    %383 = vector.shape_cast %382 : vector<1x1x88x8xbf16> to vector<88x8xbf16>
    %c0_529 = arith.constant 0 : index
    %c0_530 = arith.constant 0 : index
    %384 = vector.load %arg6[%c0_529, %c0_530] : memref<88x64xf32, #tpu.memory_space<vmem>>, vector<88x64xf32>
    %c48 = arith.constant 48 : index
    %c0_531 = arith.constant 0 : index
    %c0_532 = arith.constant 0 : index
    %385 = vector.load %arg3[%c48, %c0_531, %c0_532] : memref<49x8x64xbf16, #tpu.memory_space<vmem>>, vector<1x8x64xbf16>
    %386 = vector.shape_cast %385 : vector<1x8x64xbf16> to vector<8x64xbf16>
    %cst_533 = arith.constant dense<0.000000e+00> : vector<88x64xf32>
    %387 = tpu.matmul %383, %386, %cst_533 {dimension_numbers = #tpu.dot_dimension_numbers<[1], [0], [0], [1], [0, 0, 1, 1], [], []>} : vector<88x8xbf16>, vector<8x64xbf16>, vector<88x64xf32> -> vector<88x64xf32>
    %388 = arith.addf %384, %387 : vector<88x64xf32>
    %c0_534 = arith.constant 0 : index
    %c0_535 = arith.constant 0 : index
    %389 = vector.load %arg6[%c0_534, %c0_535] : memref<88x64xf32, #tpu.memory_space<vmem>>, vector<88x64xf32>
    tpu.vector_store %arg6[%c0_534, %c0_535], %388 {strides = array<i32>} : memref<88x64xf32, #tpu.memory_space<vmem>>, vector<88x64xf32>,
    %c0_536 = arith.constant 0 : index
    %c0_537 = arith.constant 0 : index
    %390 = vector.load %arg6[%c0_536, %c0_537] : memref<88x64xf32, #tpu.memory_space<vmem>>, vector<88x64xf32>
    %c0_538 = arith.constant 0 : index
    %c0_539 = arith.constant 0 : index
    %391 = vector.load %arg4[%c0_538, %c0_539] : memref<1x64xf32, #tpu.memory_space<vmem>>, vector<1x64xf32>
    %392 = vector.broadcast %391 : vector<1x64xf32> to vector<88x64xf32>
    %393 = arith.addf %390, %392 : vector<88x64xf32>
    %cst_540 = arith.constant 0.000000e+00 : f32
    %394 = vector.broadcast %cst_540 : f32 to vector<88x64xf32>
    %395 = arith.maximumf %393, %394 : vector<88x64xf32>
    %396 = vector.shape_cast %395 : vector<88x64xf32> to vector<1x88x64xf32>
    %397 = arith.truncf %396 : vector<1x88x64xf32> to vector<1x88x64xbf16>
    %c0_541 = arith.constant 0 : index
    %c0_542 = arith.constant 0 : index
    %c0_543 = arith.constant 0 : index
    %398 = vector.load %arg5[%c0_541, %c0_542, %c0_543] : memref<1x88x64xbf16, #tpu.memory_space<vmem>>, vector<1x88x64xbf16>
    tpu.vector_store %arg5[%c0_541, %c0_542, %c0_543], %397 {strides = array<i32>} : memref<1x88x64xbf16, #tpu.memory_space<vmem>>, vector<1x88x64xbf16>,
    return
  }
  func.func @transform_0(%arg0: i32, %arg1: i32) -> (i32, i32, i32, i32) {
    %c0_i32 = arith.constant 0 : i32
    %c0_i32_0 = arith.constant 0 : i32
    %c0_i32_1 = arith.constant 0 : i32
    %c0_i32_2 = arith.constant 0 : i32
    return %arg0, %c0_i32, %c0_i32_0, %c0_i32_1 : i32, i32, i32, i32
  }
  func.func @transform_1(%arg0: i32, %arg1: i32) -> (i32, i32, i32) {
    %c0_i32 = arith.constant 0 : i32
    %c0_i32_0 = arith.constant 0 : i32
    %c0_i32_1 = arith.constant 0 : i32
    return %c0_i32, %c0_i32_0, %arg1 : i32, i32, i32
  }
  func.func @transform_2(%arg0: i32, %arg1: i32) -> (i32, i32) {
    %c0_i32 = arith.constant 0 : i32
    %c0_i32_0 = arith.constant 0 : i32
    return %c0_i32, %arg1 : i32, i32
  }
  func.func @transform_3(%arg0: i32, %arg1: i32) -> (i32, i32, i32) {
    %c0_i32 = arith.constant 0 : i32
    %c0_i32_0 = arith.constant 0 : i32
    return %arg0, %c0_i32, %arg1 : i32, i32, i32
  }
}

</mosaic_0001>

<bundles_post_ra>
// kernel: tpu_custom_call.1
= control target key start
LH: loop header
LB: loop body
LE: loop exit
PB: predicated region body
PF: predicated region fallthrough
CT: control target
= control target key end

     0   :  { %s13030_s12 = smov 0   ;;  %s13032_s13 = smov 0   ;;  %s16209_s0 = inlined_call_operand.vmem [shape: bf16[2,4,124,8], index: 0, kind: input, shape index: {}]   ;;  %s16210_s1 = inlined_call_operand.vmem [shape: bf16[49,8,64], index: 1, kind: input, shape index: {}]   ;;  %s16211_s2 = inlined_call_operand.vmem [shape: f32[1,64], index: 2, kind: input, shape index: {}]   ;;  %s16212_s3 = inlined_call_operand.vmem [shape: bf16[2,88,64], index: 3, kind: output, shape index: {}]  }
   0x1   :  { %s13034_s14 = smov 0  }
   0x2 LB: > { %s25_s15 = sadd.s32 1, %s13004_s13  ;;  %p10530_p0 = scmp.ge.s32.totalorder %s13008_s14, 1  ;;  %s13008_s14 = sphi %s13034_s14, %s13_s14   ;;  %s13004_s13 = sphi %s13032_s13, %s16214_s13   ;;  %s13000_s12 = sphi %s13030_s12, %s16213_s12  }
   0x3   : > { %p27_p1 = scmp.ge.s32.totalorder %s25_s15, 2  ;;  %p168_p2 = scmp.lt.s32.totalorder %s13008_s14, 3 }
   0x5   : > { %s16216_s15 = smov (%p27_p1, %s25_s15), 0  ;;  %p169_p3 = pnand %p10530_p0, %p168_p2 }
   0x6   : > { %v234_v0 = vld [vmem:[%s16210_s1] sm:$0xf] (!%p169_p3)  ;;  %vm282_vm0 = vcmask (!%p169_p3), 1043456   ;;  %p202_p4 = scmp.lt.s32.totalorder (!%p169_p3), %s13000_s12, 1  ;;  %v10557_v2 = vld [vmem:[%s16210_s1 + $0x4] sm:$0xf] (!%p169_p3) }
   0x7   : > { %172 = sbr.rel (%p169_p3) target bundleno = 845 (0x34d), region = 32  ;;  %12618 = vmatprep.subr.msk.bf16.mxu1 (!%p169_p3), %vm282_vm0, %v234_v0  ;;  %v284_v1 = vsel (!%p169_p3), %vm282_vm0, %v234_v0, 0  ;;  %12617 = vmatprep.subr.msk.bf16.mxu0 (!%p169_p3), %vm282_vm0, %v234_v0  ;;  %v10570_v3 = vld [vmem:[%s16210_s1 + $0x8] sm:$0xf] (!%p169_p3)  ;;  %vm263_vm1 = vcmask (!%p169_p3), 64512   ;;  %v450_v7 = vsel (!%p169_p3), %vm282_vm0, %v10557_v2, 0 }
   0x8   : > { %12616 = vmatpush3.bf16.msra.mxu1 (!%p169_p3), %v284_v1  ;;  %11930 = vmatpush3.bf16.msra.mxu0 (!%p169_p3), %v284_v1  ;;  %v10595_v5 = vld [vmem:[%s16210_s1 + $0xc] sm:$0xf] (!%p169_p3)  ;;  %v676_v11 = vsel (!%p169_p3), %vm282_vm0, %v10570_v3, 0  ;;  %v10608_v12 = vld [vmem:[%s16210_s1 + $0x10] sm:$0xf] (!%p169_p3)  ;;  %vm1060_vm3 = vcmask (!%p169_p3), 1046528  }
   0x9   : > { %12619 = vmatprep.subr.msk.bf16.mxu1 (!%p169_p3), %vm282_vm0, %v10557_v2  ;;  %12620 = vmatprep.subr.msk.bf16.mxu0 (!%p169_p3), %vm282_vm0, %v10570_v3  ;;  %vm609_vm2 = vsmask.f32 (!%p169_p3), 7424  ;;  %v901_v22 = vsel (!%p169_p3), %vm282_vm0, %v10595_v5, 0  ;;  %v1091_v37 = vsel (!%p169_p3), %vm282_vm0, %v10608_v12, 0  ;;  %v13109_v41 = vld [vmem:[%s16210_s1 + $0x14] sm:$0xf] (!%p169_p3) }
   0xa   : > { %v13114_v42 = vld [vmem:[%s16210_s1 + $0x18] sm:$0xf] (!%p169_p3)  ;;  %vm1439_vm4 = vsmask.f32 (!%p169_p3), 6400  ;;  %vm3544_vm5 = vcmask (!%p169_p3), 1045504   ;;  %vm366_vm7 = vcmask (!%p169_p3), 523264  }
   0xb   : > { %vm3923_vm6 = vsmask.f32 (!%p169_p3), 5376  ;;  %vm4386_vm8 = vcmask (!%p169_p3), 1044480   ;;  %vm6445_vm9 = vsmask.f32 (!%p169_p3), 4352  ;;  %vm10407_vm10 = vcmask (!%p169_p3), 519168  }
   0xe   : > { %s16218_s12 = smov (!%p202_p4, %s13000_s12), 1 }
   0xf   : > { %s11574_s22 = sshll.u32 %s16218_s12, 8  ;;  %s12667_s4 = smul.u32 44, %s16218_s12 }
  0x10   : > { %s13068_s25 = scalar_lea.vmem %s16209_s0, %s11574_s22 }
  0x11   : > { %v12692_v4 = vld [vmem:[%s13068_s25 + $0x10] sm:$0xff]   ;;  %v12693_v6 = vld [vmem:[%s13068_s25 + $0x18] sm:$0xff]   ;;  %v12694_v8 = vld [vmem:[%s13068_s25] sm:$0xff]   ;;  %s16164_s6 = scalar_lea.vmem %s16212_s3, %s12667_s4 }
  0x12   : > { %11935 = vmatprep.mubr.msk.bf16.mxu1 %vm263_vm1, %v12692_v4  ;;  %v12695_v9 = vld [vmem:[%s13068_s25 + $0x20] sm:$0xff]   ;;  %11931 = vmatprep.mubr.msk.bf16.mxu0 %vm263_vm1, %v12694_v8  ;;  %v12696_v10 = vld [vmem:[%s13068_s25 + $0x8] sm:$0xff]   ;;  %v12703_v21 = vld [vmem:[%s13068_s25 + $0x10] sm:$0xff]  }
  0x13   : > { %11936 = vmatmul.mubr.msk.bf16.vlgmr.msra.gmra.mrb[0].mxu1 %vm263_vm1, %v12693_v6  ;;  %11932 = vmatmul.mubr.msk.bf16.vlgmr.msra.gmra.mrb[0].mxu0 %vm263_vm1, %v12696_v10  ;;  %v12697_v13 = vld [vmem:[%s13068_s25 + $0x28] ss:$0 sps:$4 sm:$0xff]   ;;  %v12698_v14 = vld [vmem:[%s13068_s25 + $0x40] sm:$0xff]   ;;  %v12705_v25 = vld [vmem:[%s13068_s25 + $0x18] sm:$0xff]   ;;  %v626_v26 = vshll.u32 %v12703_v21, 16  ;;  %v630_v27 = vshrl.u32 %v12703_v21, 16 }
  0x14   : > { %11944 = vmatpush3.bf16.msra.mxu1 %v450_v7  ;;  %11939 = vmatprep.mubr.msk.bf16.mxu1 %vm263_vm1, %v12695_v9  ;;  %v12700_v15 = vld [vmem:[%s13068_s25] sm:$0xff]   ;;  %v12701_v16 = vld [vmem:[%s13068_s25 + $0x8] sm:$0xff]   ;;  %v634_v31 = vshll.u32 %v12705_v25, 16  ;;  %v12702_v32 = vld [vmem:[%s13068_s25 + $0x50] sm:$0xff]   ;;  %v638_v35 = vshrl.u32 %v12705_v25, 16 }
  0x15   : > { %12621 = vmatprep.subr.msk.bf16.mxu1 %vm282_vm0, %v10595_v5  ;;  %11958 = vmatpush3.bf16.msra.mxu0 %v676_v11  ;;  %v611_v17 = vshrl.u32 %v12700_v15, 16  ;;  %v613_v18 = vshll.u32 %v12700_v15, 16  ;;  %v618_v19 = vshll.u32 %v12701_v16, 16  ;;  %v622_v20 = vshrl.u32 %v12701_v16, 16  ;;  %v12699_v28 = vld [vmem:[%s13068_s25 + $0x48] sm:$0xff]   ;;  %v12707_v34 = vld [vmem:[%s13068_s25 + $0x20] sm:$0xff]  }
  0x16   : > { %12622 = vmatprep.subr.msk.bf16.mxu0 %vm282_vm0, %v10608_v12  ;;  %v628_v33 = vrot.slane %v626_v26, 1  ;;  %v636_v38 = vrot.slane %v634_v31, 1  ;;  %v12710_v39 = vld [vmem:[%s13068_s25 + $0x40] sm:$0xff]   ;;  %v12711_v40 = vld [vmem:[%s13068_s25 + $0x48] sm:$0xff]   ;;  %v642_v45 = vshll.u32 %v12707_v34, 16  ;;  %v646_v46 = vshrl.u32 %v12707_v34, 16 }
  0x17   : > { %v615_v23 = vrot.slane %v613_v18, 1  ;;  %v620_v24 = vrot.slane %v618_v19, 1  ;;  %v12709_v47 = vld [vmem:[%s13068_s25 + $0x28] sm:$0x1f]   ;;  %v838_v52 = vshll.u32 %v12710_v39, 16  ;;  %v12704_v53 = vld [vmem:[%s13068_s25 + $0x58] sm:$0xff]  }
  0x18   : > { %v632_v44 = vor.u32 %v630_v27, %v628_v33  ;;  %v640_v49 = vor.u32 %v638_v35, %v636_v38  ;;  %v644_v50 = vrot.slane %v642_v45, 1  ;;  %v650_v51 = vshll.u32 %v12709_v47, 16  ;;  %v12706_v55 = vld [vmem:[%s13068_s25 + $0x60] sm:$0xff]   ;;  %v12714_v61 = vld [vmem:[%s13068_s25 + $0x8] sm:$0xff]   ;;  %v12712_v1 = vld [vmem:[%s13068_s25 + $0x50] sm:$0xff]  }
  0x19   : > { %v616_v29 = vor.u32 %v615_v23, %v611_v17  ;;  %v624_v30 = vor.u32 %v622_v20, %v620_v24  ;;  %v836_v57 = vshrl.u32 %v12710_v39, 16  ;;  %v843_v58 = vshll.u32 %v12711_v40, 16  ;;  %v12713_v63 = vld [vmem:[%s13068_s25] sm:$0xfe]   ;;  %v12715_v3 = vld [vmem:[%s13068_s25 + $0x58] sm:$0xff]   ;;  %v12716_v10 = vld [vmem:[%s13068_s25 + $0x10] sm:$0xff]  }
  0x1a   : > { %v637_v48 = vsel %vm609_vm2, %v632_v44, %v636_v38  ;;  %v648_v54 = vor.u32 %v646_v46, %v644_v50  ;;  %v652_v56 = vrot.slane %v650_v51, 1  ;;  %v645_v59 = vsel %vm609_vm2, %v640_v49, %v644_v50  ;;  %v12708_v7 = vld [vmem:[%s13068_s25 + $0x68] ss:$0 sps:$4 sm:$0xff]   ;;  %v12717_v16 = vld [vmem:[%s13068_s25 + $0x60] sm:$0xff]   ;;  %v12718_v17 = vld [vmem:[%s13068_s25 + $0x18] sm:$0xff]  }
  0x1b   : > { %11940 = vmatmul.mubr.msk.bf16.gmra.mrb[4].mxu1 %vm263_vm1, %v12697_v13  ;;  %v621_v36 = vsel %vm609_vm2, %v616_v29, %v620_v24  ;;  %v629_v43 = vsel %vm609_vm2, %v624_v30, %v628_v33  ;;  %v840_v60 = vrot.slane %v838_v52, 1  ;;  %v654_v0 = vshrl.u32 %v12709_v47, 16  ;;  %v13151_v21 = vld [vmem:[%s13068_s25 + $0x68] sm:$0x1f]   ;;  %v12720_v29 = vld [vmem:[%s13068_s25 + $0x20] sm:$0xff]  }
  0x1c   : > { %11945 = vmatprep.mubr.msk.bf16.mxu1 %vm263_vm1, %v12698_v14  ;;  %11959 = vmatprep.mubr.msk.bf16.mxu0 %vm263_vm1, %v621_v36  ;;  %v653_v62 = vsel %vm609_vm2, %v648_v54, %v652_v56  ;;  %v845_v2 = vrot.slane %v843_v58, 1  ;;  %v1061_v5 = vrot.slane %v12713_v63, 1  ;;  %v1062_v6 = vrot.slane %v12714_v61, 1  ;;  %v12726_v33 = vld [vmem:[%s13068_s25 + $0x8] sm:$0xff]   ;;  %v12725_v36 = vld [vmem:[%s13068_s25] sm:$0xfe]  }
  0x1d   : > { %11960 = vmatmul.mubr.msk.bf16.vlgmr.msra.gmra.mrb[4].mxu0 %vm263_vm1, %v629_v43  ;;  %v841_v4 = vor.u32 %v840_v60, %v836_v57  ;;  %v656_v8 = vor.u32 %v654_v0, %v652_v56  ;;  %v851_v9 = vshll.u32 %v12712_v1, 16  ;;  %v847_v11 = vshrl.u32 %v12711_v40, 16  ;;  %v13162_v35 = vld [vmem:[%s13068_s25 + $0x28] sm:$0x1f]   ;;  %v13178_v43 = vld [vmem:[%s16210_s1 + $0x20] sm:$0xf] }
  0x1e   : > { %11986 = vmatpush3.bf16.msra.mxu0 %v1091_v37  ;;  %11963 = vmatprep.mubr.msk.bf16.mxu0 %vm263_vm1, %v637_v48  ;;  %v1063_v13 = vsel %vm1060_vm3, %v1061_v5, %v1062_v6  ;;  %v855_v14 = vshrl.u32 %v12712_v1, 16  ;;  %v859_v15 = vshll.u32 %v12715_v3, 16  ;;  %v1064_v19 = vrot.slane %v12716_v10, 1  ;;  %v12722_v51 = vld [vmem:[%s13068_s25 + $0x40] sm:$0xfe]   ;;  %v12723_v54 = vld [vmem:[%s13068_s25 + $0x48] sm:$0xff]  }
  0x1f   : > { %12624 = vmatprep.subr.msk.bf16.mxu0 %vm282_vm0, %v13114_v42  ;;  %v846_v12 = vsel %vm609_vm2, %v841_v4, %v845_v2  ;;  %v853_v18 = vrot.slane %v851_v9, 1  ;;  %v849_v20 = vor.u32 %v847_v11, %v845_v2  ;;  %v867_v24 = vshll.u32 %v12717_v16, 16  ;;  %v12728_v57 = vld [vmem:[%s13068_s25 + $0x10] sm:$0xff]   ;;  %v12727_v10 = vld [vmem:[%s13068_s25 + $0x58] sm:$0xff]  }
  0x20   : > { %v861_v23 = vrot.slane %v859_v15, 1  ;;  %v1066_v25 = vrot.slane %v12718_v17, 1  ;;  %v1280_v26 = vsel %vm282_vm0, %v13109_v41, 0  ;;  %v863_v27 = vshrl.u32 %v12715_v3, 16  ;;  %v12724_v9 = vld [vmem:[%s13068_s25 + $0x50] sm:$0xff]  }
  0x21   : > { %v854_v30 = vsel %vm609_vm2, %v849_v20, %v853_v18  ;;  %v1065_v31 = vsel %vm1060_vm3, %v1062_v6, %v1064_v19  ;;  %v869_v37 = vrot.slane %v867_v24, 1  ;;  %v1512_v38 = vsel %vm282_vm0, %v13114_v42, 0 }
  0x22   : > { %v1067_v39 = vsel %vm1060_vm3, %v1064_v19, %v1066_v25  ;;  %v865_v40 = vor.u32 %v863_v27, %v861_v23  ;;  %v1068_v44 = vrot.slane %v12720_v29, 1  ;;  %v1449_v45 = vshrl.u32 %v12726_v33, 16  ;;  %v12729_v27 = vld [vmem:[%s13068_s25 + $0x60] sm:$0xff]  }
  0x23   : > { %11946 = vmatmul.mubr.msk.bf16.vlgmr.msra.gmra.mrb[8].mxu1 %vm263_vm1, %v12699_v28  ;;  %v871_v28 = vshrl.u32 %v12717_v16, 16  ;;  %v1452_v46 = vshll.u32 %v12726_v33, 16  ;;  %v1070_v48 = vrot.slane %v13162_v35, 1  ;;  %v1441_v49 = vshrl.u32 %v12725_v36, 16  ;;  %v12733_v16 = vld [vmem:[%s13068_s25 + $0x28] sm:$0x3f]  }
  0x24   : > { %11972 = vmatpush3.bf16.msra.mxu1 %v901_v22  ;;  %11949 = vmatprep.mubr.msk.bf16.mxu1 %vm263_vm1, %v12702_v32  ;;  %v857_v22 = vor.u32 %v855_v14, %v853_v18  ;;  %v875_v32 = vshll.u32 %v13151_v21, 16  ;;  %v1444_v50 = vshll.u32 %v12725_v36, 16  ;;  %v870_v52 = vsel %vm609_vm2, %v865_v40, %v869_v37  ;;  %v10744_v40 = vld [vmem:[%s16210_s1 + $0x28] sm:$0xf] }
  0x25   : > { %12623 = vmatprep.subr.msk.bf16.mxu1 %vm282_vm0, %v13109_v41  ;;  %11964 = vmatmul.mubr.msk.bf16.gmra.mrb[8].mxu0 %vm263_vm1, %v645_v59  ;;  %v13173_v41 = vld [vmem:[%s16210_s1 + $0x1c] sm:$0xf]  ;;  %v873_v42 = vor.u32 %v871_v28, %v869_v37  ;;  %v1454_v56 = vrot.slane %v1452_v46, 2  ;;  %v1071_v59 = vsel %vm1060_vm3, %v1068_v44, %v1070_v48  ;;  %v1443_v60 = vrot.slane %v1441_v49, 1  ;;  %v12734_v49 = vld [vmem:[%s13068_s25 + $0x80] sm:$0xff]  }
  0x26   : > { %11967 = vmatprep.mubr.msk.bf16.mxu0 %vm263_vm1, %v653_v62  ;;  %v862_v34 = vsel %vm609_vm2, %v857_v22, %v861_v23  ;;  %v877_v47 = vrot.slane %v875_v32, 1  ;;  %v1446_v61 = vrot.slane %v1444_v50, 2  ;;  %v12730_v62 = vld [vmem:[%s13068_s25 + $0x18] sm:$0xff]   ;;  %v879_v63 = vshrl.u32 %v13151_v21, 16  ;;  %v12736_v50 = vld [vmem:[%s13068_s25 + $0xc0] sm:$0xff]  }
  0x27   : > { %v1458_v0 = vshrl.u32 %v12728_v57, 16  ;;  %v1461_v1 = vshll.u32 %v12728_v57, 16  ;;  %v1250_v2 = vrot.slane %v12722_v51, 1  ;;  %v1251_v3 = vrot.slane %v12723_v54, 1  ;;  %v12735_v51 = vld [vmem:[%s13068_s25 + $0x88] sm:$0xff]  }
  0x28   : > { %v878_v58 = vsel %vm609_vm2, %v873_v42, %v877_v47  ;;  %v1447_v4 = vor.u32 %v1446_v61, %v1443_v60  ;;  %v1467_v6 = vshrl.u32 %v12730_v62, 16  ;;  %v1253_v19 = vrot.slane %v12724_v9, 1  ;;  %v13258_v60 = vld [vmem:[%s16210_s1 + $0x2c] sm:$0xf]  ;;  %v13265_v61 = vld [vmem:[%s16210_s1 + $0x30] sm:$0xf] }
  0x29   : > { %v1460_v11 = vrot.slane %v1458_v0, 1  ;;  %v1252_v14 = vsel %vm1060_vm3, %v1250_v2, %v1251_v3  ;;  %v1255_v23 = vrot.slane %v12727_v10, 1  ;;  %v1485_v24 = vshrl.u32 %v12733_v16, 16  ;;  %v12750_v0 = vld [vmem:[%s13068_s25 + $0xc8] sm:$0xff]   ;;  %v12741_v2 = vld [vmem:[%s13068_s25 + $0xa0] sm:$0xff]  }
  0x2a   : > { %v1469_v17 = vrot.slane %v1467_v6, 1  ;;  %v1254_v28 = vsel %vm1060_vm3, %v1251_v3, %v1253_v19  ;;  %v1688_v32 = vsel %vm282_vm0, %v13173_v41, 0  ;;  %v1864_v37 = vsel %vm282_vm0, %v13178_v43, 0  ;;  %v12742_v3 = vld [vmem:[%s13068_s25 + $0xd8] sm:$0xff]  }
  0x2b   : > { %11950 = vmatmul.mubr.msk.bf16.gmra.mrb[12].mxu1 %vm263_vm1, %v12704_v53  ;;  %v1069_v53 = vsel %vm1060_vm3, %v1066_v25, %v1068_v44  ;;  %v1488_v25 = vshll.u32 %v12733_v16, 16  ;;  %v1256_v33 = vsel %vm1060_vm3, %v1253_v19, %v1255_v23  ;;  %v1487_v35 = vrot.slane %v1485_v24, 1 }
  0x2c   : > { %11953 = vmatprep.mubr.msk.bf16.mxu1 %vm263_vm1, %v12706_v55  ;;  %v1451_v55 = vrot.slane %v1449_v45, 1  ;;  %v2314_v57 = vsel %vm282_vm0, %v10744_v40, 0  ;;  %v2256_v10 = vshll.u32 %v12750_v0, 16  ;;  %v2260_v24 = vshrl.u32 %v12750_v0, 16 }
  0x2d   : > { %11968 = vmatmul.mubr.msk.bf16.gmra.mrb[12].mxu0 %vm263_vm1, %v656_v8  ;;  %v881_v8 = vor.u32 %v879_v63, %v877_v47  ;;  %v1490_v36 = vrot.slane %v1488_v25, 2  ;;  %v12739_v63 = vld [vmem:[%s13068_s25 + $0x98] sm:$0xff]  }
  0x2e   : > { %11987 = vmatprep.mubr.msk.bf16.mxu0 %vm263_vm1, %v1063_v13  ;;  %v1455_v5 = vor.u32 %v1454_v56, %v1451_v55  ;;  %v12732_v13 = vld [vmem:[%s13068_s25 + $0x20] sm:$0xff]   ;;  %v12740_v55 = vld [vmem:[%s13068_s25 + $0xd0] sm:$0xff]  }
  0x2f   : > { %v1476_v21 = vshrl.u32 %v12732_v13, 16  ;;  %v1479_v22 = vshll.u32 %v12732_v13, 16  ;;  %v1491_v44 = vor.u32 %v1490_v36, %v1487_v35  ;;  %v12746_v56 = vld [vmem:[%s13068_s25 + $0x80] sm:$0xff]   ;;  %v12752_v13 = vld [vmem:[%s13068_s25 + $0xd0] sm:$0xff]  }
  0x30   : > { %v1456_v15 = vsel %vm1439_vm4, %v1447_v4, %v1455_v5  ;;  %v12744_v4 = vld [vmem:[%s13068_s25 + $0xe0] sm:$0xff]  }
  0x33   : > { %11954 = vmatmul.mubr.msk.bf16.gmra.mrb[16].mxu1 %vm263_vm1, %v12708_v7  ;;  %v1470_v7 = vshll.u32 %v12730_v62, 16  ;;  %v2026_v62 = vshll.u32 %v12746_v56, 16 }
  0x34   : > { %11973 = vmatprep.mubr.msk.bf16.mxu1 %vm263_vm1, %v846_v12  ;;  %v1463_v12 = vrot.slane %v1461_v1, 2 }
  0x35   : > { %11988 = vmatmul.mubr.msk.bf16.vlgmr.msra.gmra.mrb[16].mxu0 %vm263_vm1, %v1065_v31  ;;  %v1472_v18 = vrot.slane %v1470_v7, 2  ;;  %v1481_v31 = vrot.slane %v1479_v22, 2  ;;  %v2028_v7 = vrot.slane %v2026_v62, 1 }
  0x36   : > { %12014 = vmatpush3.bf16.msra.mxu0 %v1512_v38  ;;  %11991 = vmatprep.mubr.msk.bf16.mxu0 %vm263_vm1, %v1067_v39  ;;  %v1464_v20 = vor.u32 %v1463_v12, %v1460_v11  ;;  %v10719_v39 = vld [vmem:[%s16210_s1 + $0x24] sm:$0xf]  ;;  %v12748_v11 = vld [vmem:[%s13068_s25 + $0x90] sm:$0xff]   ;;  %v12751_v12 = vld [vmem:[%s13068_s25 + $0x98] sm:$0xff]  }
  0x37   : > { %12626 = vmatprep.subr.msk.bf16.mxu0 %vm282_vm0, %v13178_v43  ;;  %v2089_v54 = vsel %vm282_vm0, %v10719_v39, 0  ;;  %v2039_v19 = vshll.u32 %v12748_v11, 16  ;;  %v2043_v25 = vshrl.u32 %v12748_v11, 16 }
  0x38   : > { %v1465_v29 = vsel %vm1439_vm4, %v1455_v5, %v1464_v20  ;;  %v2024_v5 = vshrl.u32 %v12746_v56, 16  ;;  %v2692_v56 = vsel %vm282_vm0, %v13265_v61, 0 }
  0x3b   : > { %11974 = vmatmul.mubr.msk.bf16.vlgmr.msra.gmra.mrb[20].mxu1 %vm263_vm1, %v854_v30  ;;  %v1478_v30 = vrot.slane %v1476_v21, 1  ;;  %v12745_v21 = vld [vmem:[%s13068_s25 + $0xe8] ss:$0 sps:$4 sm:$0xff]  }
  0x3c   : > { %12000 = vmatpush3.bf16.msra.mxu1 %v1280_v26  ;;  %11977 = vmatprep.mubr.msk.bf16.mxu1 %vm263_vm1, %v862_v34  ;;  %v1473_v26 = vor.u32 %v1472_v18, %v1469_v17  ;;  %v12731_v34 = vld [vmem:[%s13068_s25 + $0x68] sm:$0x1f]   ;;  %v2258_v18 = vrot.slane %v2256_v10, 1 }
  0x3d   : > { %12625 = vmatprep.subr.msk.bf16.mxu1 %vm282_vm0, %v13173_v41  ;;  %11992 = vmatmul.mubr.msk.bf16.gmra.mrb[20].mxu0 %vm263_vm1, %v1069_v53  ;;  %v1257_v41 = vrot.slane %v12729_v27, 1  ;;  %v1482_v43 = vor.u32 %v1481_v31, %v1478_v30  ;;  %v1259_v42 = vrot.slane %v12731_v34, 1  ;;  %v12738_v53 = vld [vmem:[%s13068_s25 + $0xc8] sm:$0xff]   ;;  %v12753_v27 = vld [vmem:[%s13068_s25 + $0xa0] sm:$0xff]   ;;  %v2041_v30 = vrot.slane %v2039_v19, 1  ;;  %v12760_v19 = vld [vmem:[%s13068_s25 + $0x90] sm:$0xff]  }
  0x3e   : > { %11995 = vmatprep.mubr.msk.bf16.mxu0 %vm263_vm1, %v1071_v59  ;;  %v1474_v38 = vsel %vm1439_vm4, %v1464_v20, %v1473_v26  ;;  %v12749_v59 = vld [vmem:[%s13068_s25 + $0xc0] sm:$0xff]   ;;  %v12754_v20 = vld [vmem:[%s13068_s25 + $0xd8] sm:$0xff]   ;;  %v2268_v31 = vshrl.u32 %v12752_v13, 16  ;;  %v2262_v36 = vor.u32 %v2260_v24, %v2258_v18  ;;  %v12762_v10 = vld [vmem:[%s13068_s25 + $0xc8] sm:$0xff]  }
  0x3f   : > { %v1258_v45 = vsel %vm1060_vm3, %v1255_v23, %v1257_v41  ;;  %v1483_v46 = vsel %vm1439_vm4, %v1473_v26, %v1482_v43  ;;  %v1260_v47 = vsel %vm1060_vm3, %v1257_v41, %v1259_v42  ;;  %v2251_v1 = vshll.u32 %v12749_v59, 16  ;;  %v12757_v41 = vld [vmem:[%s13068_s25 + $0xe8] sm:$0x1f]   ;;  %v12765_v24 = vld [vmem:[%s13068_s25 + $0xa0] sm:$0xff]  }
  0x40   : > { %v2047_v23 = vshll.u32 %v12751_v12, 16  ;;  %v2264_v26 = vshll.u32 %v12752_v13, 16 }
  0x41   : > { %v2253_v9 = vrot.slane %v2251_v1, 1 }
  0x42   : > { %v2049_v35 = vrot.slane %v2047_v23, 1 }
  0x43   : > { %11978 = vmatmul.mubr.msk.bf16.gmra.mrb[24].mxu1 %vm263_vm1, %v870_v52  ;;  %v12737_v52 = vld [vmem:[%s13068_s25 + $0x90] sm:$0xff]  }
  0x44   : > { %11981 = vmatprep.mubr.msk.bf16.mxu1 %vm263_vm1, %v878_v58  ;;  %v12747_v58 = vld [vmem:[%s13068_s25 + $0x88] sm:$0xff]  }
  0x45   : > { %11996 = vmatmul.mubr.msk.bf16.gmra.mrb[24].mxu0 %vm263_vm1, %v1070_v48  ;;  %v1492_v48 = vsel %vm1439_vm4, %v1482_v43, %v1491_v44  ;;  %v2031_v6 = vshll.u32 %v12747_v58, 16  ;;  %v2035_v22 = vshrl.u32 %v12747_v58, 16 }
  0x46   : > { %12015 = vmatprep.mubr.msk.bf16.mxu0 %vm263_vm1, %v1456_v15  ;;  %v2029_v15 = vor.u32 %v2028_v7, %v2024_v5 }
  0x47   : > { %v2033_v16 = vrot.slane %v2031_v6, 1  ;;  %v12758_v6 = vld [vmem:[%s13068_s25 + $0x80] sm:$0xfe]  }
  0x48   : > { %v2473_v13 = vrot.slane %v12758_v6, 1 }
  0x49   : > { %v2037_v34 = vor.u32 %v2035_v22, %v2033_v16 }
  0x4b   : > { %11982 = vmatmul.mubr.msk.bf16.gmra.mrb[28].mxu1 %vm263_vm1, %v881_v8  ;;  %v2249_v8 = vshrl.u32 %v12749_v59, 16  ;;  %v10819_v59 = vld [vmem:[%s16210_s1 + $0x34] sm:$0xf] }
  0x4c   : > { %12001 = vmatprep.mubr.msk.bf16.mxu1 %vm263_vm1, %v1252_v14  ;;  %v12743_v14 = vld [vmem:[%s13068_s25 + $0xa8] ss:$0 sps:$4 sm:$0xff]  }
  0x4d   : > { %12016 = vmatmul.mubr.msk.bf16.vlgmr.msra.gmra.mrb[28].mxu0 %vm263_vm1, %v1465_v29  ;;  %v2254_v17 = vor.u32 %v2253_v9, %v2249_v8  ;;  %v12761_v9 = vld [vmem:[%s13068_s25 + $0xc0] sm:$0xfe]  }
  0x4e   : > { %12042 = vmatpush3.bf16.msra.mxu0 %v1864_v37  ;;  %12019 = vmatprep.mubr.msk.bf16.mxu0 %vm263_vm1, %v1474_v38  ;;  %v2045_v37 = vor.u32 %v2043_v25, %v2041_v30  ;;  %v2266_v38 = vrot.slane %v2264_v26, 1  ;;  %v12766_v25 = vld [vmem:[%s13068_s25 + $0xd8] sm:$0xff]   ;;  %v2476_v26 = vrot.slane %v12760_v19, 1  ;;  %v12777_v19 = vld [vmem:[%s13068_s25 + $0xa0] sm:$0xff]  }
  0x4f   : > { %12628 = vmatprep.subr.msk.bf16.mxu0 %vm282_vm0, %v10744_v40  ;;  %v2259_v29 = vsel %vm609_vm2, %v2254_v17, %v2258_v18  ;;  %v12755_v40 = vld [vmem:[%s13068_s25 + $0xa8] sm:$0x1f]  }
  0x50   : > { %v2270_v43 = vor.u32 %v2268_v31, %v2266_v38  ;;  %v2067_v11 = vshrl.u32 %v12755_v40, 16  ;;  %v12768_v31 = vld [vmem:[%s13068_s25 + $0xe0] sm:$0xff]  }
  0x53   : > { %12002 = vmatmul.mubr.msk.bf16.vlgmr.msra.gmra.mrb[32].mxu1 %vm263_vm1, %v1254_v28  ;;  %v2034_v28 = vsel %vm609_vm2, %v2029_v15, %v2033_v16  ;;  %v2662_v15 = vrot.slane %v12761_v9, 1  ;;  %v2663_v16 = vrot.slane %v12762_v10, 1 }
  0x54   : > { %12028 = vmatpush3.bf16.msra.mxu1 %v1688_v32  ;;  %12005 = vmatprep.mubr.msk.bf16.mxu1 %vm263_vm1, %v1256_v33  ;;  %v2272_v32 = vshll.u32 %v12754_v20, 16  ;;  %v12756_v33 = vld [vmem:[%s13068_s25 + $0xe0] sm:$0xff]  }
  0x55   : > { %12627 = vmatprep.subr.msk.bf16.mxu1 %vm282_vm0, %v10719_v39  ;;  %12020 = vmatmul.mubr.msk.bf16.gmra.mrb[32].mxu0 %vm263_vm1, %v1483_v46  ;;  %v2055_v39 = vshll.u32 %v12753_v27, 16  ;;  %v2503_v46 = vsel %vm282_vm0, %v13258_v60, 0  ;;  %v2664_v23 = vsel %vm1060_vm3, %v2662_v15, %v2663_v16 }
  0x56   : > { %12023 = vmatprep.mubr.msk.bf16.mxu0 %vm263_vm1, %v1492_v48  ;;  %v2267_v48 = vsel %vm609_vm2, %v2262_v36, %v2266_v38 }
  0x5b   : > { %12006 = vmatmul.mubr.msk.bf16.gmra.mrb[36].mxu1 %vm263_vm1, %v1258_v45  ;;  %v2042_v45 = vsel %vm609_vm2, %v2037_v34, %v2041_v30  ;;  %v2480_v30 = vrot.slane %v12765_v24, 1  ;;  %v13345_v34 = vld [vmem:[%s13068_s25 + $0xa8] sm:$0x1f]  }
  0x5c   : > { %12009 = vmatprep.mubr.msk.bf16.mxu1 %vm263_vm1, %v1260_v47  ;;  %v2050_v47 = vsel %vm609_vm2, %v2045_v37, %v2049_v35 }
  0x5d   : > { %12024 = vmatmul.mubr.msk.bf16.gmra.mrb[36].mxu0 %vm263_vm1, %v1491_v44  ;;  %v2280_v44 = vshll.u32 %v12756_v33, 16 }
  0x5e   : > { %12043 = vmatprep.mubr.msk.bf16.mxu0 %vm263_vm1, %v12736_v50  ;;  %v2276_v50 = vshrl.u32 %v12754_v20, 16  ;;  %v12763_v20 = vld [vmem:[%s13068_s25 + $0x98] sm:$0xff]  }
  0x5f   : > { %v2282_v58 = vrot.slane %v2280_v44, 1  ;;  %v2669_v44 = vrot.slane %v12768_v31, 1 }
  0x63   : > { %12010 = vmatmul.mubr.msk.bf16.gmra.mrb[40].mxu1 %vm263_vm1, %v1259_v42  ;;  %v2274_v42 = vrot.slane %v2272_v32, 1  ;;  %v2667_v32 = vrot.slane %v12766_v25, 1 }
  0x64   : > { %12029 = vmatprep.mubr.msk.bf16.mxu1 %vm263_vm1, %v12734_v49  ;;  %v2051_v49 = vshrl.u32 %v12751_v12, 16  ;;  %v2292_v12 = vshrl.u32 %v12757_v41, 16 }
  0x65   : > { %12044 = vmatmul.mubr.msk.bf16.vlgmr.msra.gmra.mrb[40].mxu0 %vm263_vm1, %v12738_v53  ;;  %v2284_v53 = vshrl.u32 %v12756_v33, 16  ;;  %v2278_v62 = vor.u32 %v2276_v50, %v2274_v42  ;;  %v12771_v33 = vld [vmem:[%s13068_s25 + $0x88] sm:$0xff]  }
  0x66   : > { %12070 = vmatpush3.bf16.msra.mxu0 %v2314_v57  ;;  %12047 = vmatprep.mubr.msk.bf16.mxu0 %vm263_vm1, %v12740_v55  ;;  %v2057_v55 = vrot.slane %v2055_v39, 1  ;;  %v2275_v57 = vsel %vm609_vm2, %v2270_v43, %v2274_v42  ;;  %v12770_v39 = vld [vmem:[%s13068_s25 + $0x80] sm:$0xfe]  }
  0x67   : > { %12630 = vmatprep.subr.msk.bf16.mxu0 %vm282_vm0, %v13265_v61  ;;  %v2053_v61 = vor.u32 %v2051_v49, %v2049_v35  ;;  %v2286_v1 = vor.u32 %v2284_v53, %v2282_v58  ;;  %v2283_v5 = vsel %vm609_vm2, %v2278_v62, %v2282_v58  ;;  %v13348_v35 = vld [vmem:[%s13068_s25 + $0xe8] sm:$0x1f]   ;;  %v2482_v49 = vrot.slane %v13345_v34, 1 }
  0x68   : > { %v12773_v43 = vld [vmem:[%s13068_s25 + $0x4] sm:$0xfe]   ;;  %v2671_v50 = vrot.slane %v13348_v35, 1  ;;  %v2890_v34 = vshll.u32 %v12777_v19, 16 }
  0x69   : > { %v3083_v53 = vshrl.u32 %v12773_v43, 16  ;;  %v2483_v62 = vsel %vm1060_vm3, %v2480_v30, %v2482_v49 }
  0x6b   : > { %12030 = vmatmul.mubr.msk.bf16.vlgmr.msra.gmra.mrb[44].mxu1 %vm263_vm1, %v12735_v51  ;;  %v2059_v51 = vshrl.u32 %v12753_v27, 16  ;;  %v2923_v27 = vsel %vm282_vm0, %v10819_v59, 0 }
  0x6c   : > { %12056 = vmatpush3.bf16.msra.mxu1 %v2089_v54  ;;  %12033 = vmatprep.mubr.msk.bf16.mxu1 %vm263_vm1, %v12737_v52  ;;  %v2063_v52 = vshll.u32 %v12755_v40, 16  ;;  %v2288_v54 = vshll.u32 %v12757_v41, 16  ;;  %v12774_v40 = vld [vmem:[%s13068_s25 + $0xc] sm:$0xff]  }
  0x6d   : > { %12629 = vmatprep.subr.msk.bf16.mxu1 %vm282_vm0, %v13258_v60  ;;  %12048 = vmatmul.mubr.msk.bf16.gmra.mrb[44].mxu0 %vm263_vm1, %v12742_v3  ;;  %v10832_v60 = vld [vmem:[%s16210_s1 + $0x38] sm:$0xf]  ;;  %v12759_v3 = vld [vmem:[%s13068_s25 + $0x88] sm:$0xff]  }
  0x6e   : > { %12051 = vmatprep.mubr.msk.bf16.mxu0 %vm263_vm1, %v12744_v4  ;;  %v2065_v0 = vrot.slane %v2063_v52, 1  ;;  %v2058_v4 = vsel %vm609_vm2, %v2053_v61, %v2057_v55  ;;  %v3154_v38 = vsel %vm282_vm0, %v10832_v60, 0  ;;  %v2855_v52 = vshll.u32 %v12770_v39, 16  ;;  %v12772_v61 = vld [vmem:[%s13068_s25 + $0x90] sm:$0xff]  }
  0x6f   : > { %v2869_v10 = vshrl.u32 %v12772_v61, 16 }
  0x70   : > { %v2069_v17 = vor.u32 %v2067_v11, %v2065_v0 }
  0x71   : > { %v2871_v24 = vrot.slane %v2869_v10, 1 }
  0x73   : > { %12034 = vmatmul.mubr.msk.bf16.gmra.mrb[48].mxu1 %vm263_vm1, %v12739_v63  ;;  %v2061_v63 = vor.u32 %v2059_v51, %v2057_v55  ;;  %v2852_v51 = vshrl.u32 %v12770_v39, 16  ;;  %v3091_v55 = vshrl.u32 %v12774_v40, 16 }
  0x74   : > { %12037 = vmatprep.mubr.msk.bf16.mxu1 %vm263_vm1, %v12741_v2  ;;  %v2290_v2 = vrot.slane %v2288_v54, 1  ;;  %v3086_v54 = vshll.u32 %v12773_v43, 16 }
  0x75   : > { %12052 = vmatmul.mubr.msk.bf16.gmra.mrb[48].mxu0 %vm263_vm1, %v12745_v21  ;;  %v2066_v7 = vsel %vm609_vm2, %v2061_v63, %v2065_v0  ;;  %v12764_v21 = vld [vmem:[%s13068_s25 + $0xd0] sm:$0xff]   ;;  %v2672_v63 = vsel %vm1060_vm3, %v2669_v44, %v2671_v50  ;;  %v2854_v0 = vrot.slane %v2852_v51, 1  ;;  %v3093_v6 = vrot.slane %v3091_v55, 1 }
  0x76   : > { %12071 = vmatprep.mubr.msk.bf16.mxu0 %vm263_vm1, %v2259_v29  ;;  %v2291_v8 = vsel %vm609_vm2, %v2286_v1, %v2290_v2  ;;  %v2294_v18 = vor.u32 %v2292_v12, %v2290_v2  ;;  %v2665_v29 = vrot.slane %v12764_v21, 1  ;;  %v2857_v1 = vrot.slane %v2855_v52, 2  ;;  %v12775_v2 = vld [vmem:[%s13068_s25 + $0x98] sm:$0xff]  }
  0x77   : > { %v2872_v12 = vshll.u32 %v12772_v61, 16 }
  0x78   : > { %v2666_v37 = vsel %vm1060_vm3, %v2663_v16, %v2665_v29  ;;  %v2668_v42 = vsel %vm1060_vm3, %v2665_v29, %v2667_v32  ;;  %v2858_v11 = vor.u32 %v2857_v1, %v2854_v0 }
  0x79   : > { %v2874_v25 = vrot.slane %v2872_v12, 2 }
  0x7b   : > { %12038 = vmatmul.mubr.msk.bf16.gmra.mrb[52].mxu1 %vm263_vm1, %v12743_v14  ;;  %v2474_v14 = vrot.slane %v12759_v3, 1  ;;  %v12776_v3 = vld [vmem:[%s13068_s25 + $0x14] sm:$0xff]   ;;  %v2875_v39 = vor.u32 %v2874_v25, %v2871_v24 }
  0x7c   : > { %12057 = vmatprep.mubr.msk.bf16.mxu1 %vm263_vm1, %v2034_v28  ;;  %v2478_v28 = vrot.slane %v12763_v20, 1 }
  0x7d   : > { %12072 = vmatmul.mubr.msk.bf16.vlgmr.msra.gmra.mrb[52].mxu0 %vm263_vm1, %v2267_v48  ;;  %v2475_v22 = vsel %vm1060_vm3, %v2473_v13, %v2474_v14  ;;  %v2477_v36 = vsel %vm1060_vm3, %v2474_v14, %v2476_v26  ;;  %v13368_v48 = vld [vmem:[%s16210_s1 + $0x40] sm:$0xf]  ;;  %v3100_v13 = vshrl.u32 %v12776_v3, 16  ;;  %v3103_v14 = vshll.u32 %v12776_v3, 16 }
  0x7e   : > { %12098 = vmatpush3.bf16.msra.mxu0 %v2692_v56  ;;  %12075 = vmatprep.mubr.msk.bf16.mxu0 %vm263_vm1, %v2275_v57  ;;  %v2479_v41 = vsel %vm1060_vm3, %v2476_v26, %v2478_v28  ;;  %v3094_v56 = vshll.u32 %v12774_v40, 16  ;;  %v2481_v58 = vsel %vm1060_vm3, %v2478_v28, %v2480_v30  ;;  %v3575_v51 = vsel %vm282_vm0, %v13368_v48, 0 }
  0x7f   : > { %12632 = vmatprep.subr.msk.bf16.mxu0 %vm282_vm0, %v10832_v60  ;;  %v3102_v26 = vrot.slane %v3100_v13, 1 }
  0x83   : > { %12058 = vmatmul.mubr.msk.bf16.vlgmr.msra.gmra.mrb[56].mxu1 %vm263_vm1, %v2042_v45  ;;  %v2860_v45 = vshrl.u32 %v12771_v33, 16 }
  0x84   : > { %12084 = vmatpush3.bf16.msra.mxu1 %v2503_v46  ;;  %12061 = vmatprep.mubr.msk.bf16.mxu1 %vm263_vm1, %v2050_v47  ;;  %v2863_v46 = vshll.u32 %v12771_v33, 16  ;;  %v13363_v47 = vld [vmem:[%s16210_s1 + $0x3c] sm:$0xf]  ;;  %v2887_v33 = vshrl.u32 %v12777_v19, 16 }
  0x85   : > { %12631 = vmatprep.subr.msk.bf16.mxu1 %vm282_vm0, %v10819_v59  ;;  %12076 = vmatmul.mubr.msk.bf16.gmra.mrb[56].mxu0 %vm263_vm1, %v2283_v5  ;;  %v2862_v57 = vrot.slane %v2860_v45, 1  ;;  %v2670_v59 = vsel %vm1060_vm3, %v2667_v32, %v2669_v44  ;;  %v3088_v5 = vrot.slane %v3086_v54, 2  ;;  %v12781_v32 = vld [vmem:[%s13068_s25 + $0x2c] sm:$0x3f]  }
  0x86   : > { %12079 = vmatprep.mubr.msk.bf16.mxu0 %vm263_vm1, %v2291_v8  ;;  %v2865_v60 = vrot.slane %v2863_v46, 2  ;;  %v12778_v8 = vld [vmem:[%s13068_s25 + $0x1c] sm:$0xff]   ;;  %v3127_v45 = vshrl.u32 %v12781_v32, 16  ;;  %v3130_v46 = vshll.u32 %v12781_v32, 16 }
  0x87   : > { %v3109_v20 = vshrl.u32 %v12778_v8, 16  ;;  %v3112_v21 = vshll.u32 %v12778_v8, 16 }
  0x88   : > { %v2866_v9 = vor.u32 %v2865_v60, %v2862_v57  ;;  %v12782_v60 = vld [vmem:[%s13068_s25 + $0x44] sm:$0xfe]   ;;  %v3129_v61 = vrot.slane %v3127_v45, 1 }
  0x89   : > { %v3111_v35 = vrot.slane %v3109_v20, 1  ;;  %v12785_v20 = vld [vmem:[%s13068_s25 + $0x4] sm:$0xfc]  }
  0x8a   : > { %v2867_v28 = vsel %vm1439_vm4, %v2858_v11, %v2866_v9  ;;  %v12784_v11 = vld [vmem:[%s13068_s25 + $0x54] sm:$0xff]  }
  0x8b   : > { %12062 = vmatmul.mubr.msk.bf16.gmra.mrb[60].mxu1 %vm263_vm1, %v2058_v4  ;;  %v3085_v4 = vrot.slane %v3083_v53, 1  ;;  %v12783_v53 = vld [vmem:[%s13068_s25 + $0x4c] sm:$0xff]  }
  0x8c   : > { %12065 = vmatprep.mubr.msk.bf16.mxu1 %vm263_vm1, %v2066_v7  ;;  %v3096_v7 = vrot.slane %v3094_v56, 2  ;;  %v2876_v56 = vsel %vm1439_vm4, %v2866_v9, %v2875_v39  ;;  %v3322_v0 = vshrl.u32 %v12783_v53, 16  ;;  %v3325_v1 = vshll.u32 %v12783_v53, 16 }
  0x8d   : > { %12080 = vmatmul.mubr.msk.bf16.gmra.mrb[60].mxu0 %vm263_vm1, %v2294_v18  ;;  %v3089_v15 = vor.u32 %v3088_v5, %v3085_v4  ;;  %v2881_v18 = vshll.u32 %v12775_v2, 16  ;;  %v3314_v5 = vshrl.u32 %v12782_v60, 16 }
  0x8e   : > { %12099 = vmatprep.mubr.msk.bf16.mxu0 %vm263_vm1, %v2664_v23  ;;  %v3097_v16 = vor.u32 %v3096_v7, %v3093_v6  ;;  %v12779_v23 = vld [vmem:[%s13068_s25 + $0xa8] sm:$0x3f]   ;;  %v3317_v6 = vshll.u32 %v12782_v60, 16  ;;  %v3324_v9 = vrot.slane %v3322_v0, 1  ;;  %v3327_v10 = vrot.slane %v3325_v1, 2 }
  0x8f   : > { %v2883_v31 = vrot.slane %v2881_v18, 2  ;;  %v13466_v0 = vld [vmem:[%s13068_s25 + $0x4c] sm:$0xff]  }
  0x90   : > { %v3098_v29 = vsel %vm1439_vm4, %v3089_v15, %v3097_v16  ;;  %v3319_v15 = vrot.slane %v3317_v6, 2  ;;  %v10933_v1 = vld [vmem:[%s16210_s1 + $0x4c] sm:$0xf] }
  0x93   : > { %12066 = vmatmul.mubr.msk.bf16.gmra.mrb[64].mxu1 %vm263_vm1, %v2069_v17  ;;  %v2878_v17 = vshrl.u32 %v12775_v2, 16  ;;  %v13420_v2 = vld [vmem:[%s16210_s1 + $0x48] sm:$0xf] }
  0x94   : > { %12085 = vmatprep.mubr.msk.bf16.mxu1 %vm263_vm1, %v2475_v22  ;;  %v12780_v22 = vld [vmem:[%s13068_s25 + $0x24] sm:$0xff]   ;;  %v3996_v53 = vsel %vm282_vm0, %v13420_v2, 0 }
  0x95   : > { %12100 = vmatmul.mubr.msk.bf16.vlgmr.msra.gmra.mrb[64].mxu0 %vm263_vm1, %v2666_v37  ;;  %v2880_v30 = vrot.slane %v2878_v17, 1  ;;  %v2896_v37 = vshrl.u32 %v12779_v23, 16  ;;  %v3121_v43 = vshll.u32 %v12780_v22, 16  ;;  %v12787_v17 = vld [vmem:[%s13068_s25 + $0x5c] sm:$0xff]  }
  0x96   : > { %12126 = vmatpush3.bf16.msra.mxu0 %v3154_v38  ;;  %12103 = vmatprep.mubr.msk.bf16.mxu0 %vm263_vm1, %v2668_v42  ;;  %v3118_v38 = vshrl.u32 %v12780_v22, 16  ;;  %v3385_v42 = vsel %vm282_vm0, %v13363_v47, 0  ;;  %v3334_v22 = vshll.u32 %v12784_v11, 16  ;;  %v3343_v24 = vshll.u32 %v12787_v17, 16 }
  0x97   : > { %12634 = vmatprep.subr.msk.bf16.mxu0 %vm282_vm0, %v13368_v48  ;;  %v2884_v44 = vor.u32 %v2883_v31, %v2880_v30  ;;  %v2898_v54 = vrot.slane %v2896_v37, 1  ;;  %v13413_v48 = vld [vmem:[%s16210_s1 + $0x44] sm:$0xf]  ;;  %v12791_v37 = vld [vmem:[%s13068_s25 + $0x6c] sm:$0x3f]  }
  0x98   : > { %v3120_v55 = vrot.slane %v3118_v38, 1  ;;  %v12789_v30 = vld [vmem:[%s13068_s25 + $0x64] sm:$0xff]   ;;  %v3336_v32 = vrot.slane %v3334_v22, 2  ;;  %v12790_v38 = vld [vmem:[%s13068_s25 + $0x1c] sm:$0xff]   ;;  %v3358_v45 = vshrl.u32 %v12791_v37, 16 }
  0x9b   : > { %12086 = vmatmul.mubr.msk.bf16.vlgmr.msra.gmra.mrb[68].mxu1 %vm263_vm1, %v2477_v36  ;;  %v3114_v36 = vrot.slane %v3112_v21, 2  ;;  %v3331_v21 = vshrl.u32 %v12784_v11, 16 }
  0x9c   : > { %12112 = vmatpush3.bf16.msra.mxu1 %v2923_v27  ;;  %12089 = vmatprep.mubr.msk.bf16.mxu1 %vm263_vm1, %v2479_v41  ;;  %v3105_v27 = vrot.slane %v3103_v14, 2  ;;  %v2899_v41 = vshll.u32 %v12779_v23, 16  ;;  %v3316_v14 = vrot.slane %v3314_v5, 1  ;;  %v3340_v23 = vshrl.u32 %v12787_v17, 16 }
  0x9d   : > { %12633 = vmatprep.subr.msk.bf16.mxu1 %vm282_vm0, %v13363_v47  ;;  %12104 = vmatmul.mubr.msk.bf16.gmra.mrb[68].mxu0 %vm263_vm1, %v2670_v59  ;;  %v3115_v52 = vor.u32 %v3114_v36, %v3111_v35  ;;  %v3123_v59 = vrot.slane %v3121_v43, 2  ;;  %v2885_v47 = vsel %vm1439_vm4, %v2875_v39, %v2884_v44  ;;  %v3333_v31 = vrot.slane %v3331_v21, 1 }
  0x9e   : > { %12107 = vmatprep.mubr.msk.bf16.mxu0 %vm263_vm1, %v2672_v63  ;;  %v3106_v40 = vor.u32 %v3105_v27, %v3102_v26  ;;  %v3320_v25 = vor.u32 %v3319_v15, %v3316_v14  ;;  %v3328_v26 = vor.u32 %v3327_v10, %v3324_v9  ;;  %v3545_v27 = vrot.slane %v12785_v20, 2  ;;  %v12794_v10 = vld [vmem:[%s13068_s25 + $0x44] sm:$0xfc]   ;;  %v12802_v15 = vld [vmem:[%s13068_s25 + $0x1c] sm:$0xff]   ;;  %v12796_v20 = vld [vmem:[%s13068_s25 + $0x54] sm:$0xff]  }
  0x9f   : > { %v3124_v4 = vor.u32 %v3123_v59, %v3120_v55  ;;  %v3360_v59 = vrot.slane %v3358_v45, 1 }
  0xa0   : > { %v3107_v57 = vsel %vm1439_vm4, %v3097_v16, %v3106_v40  ;;  %v3116_v63 = vsel %vm1439_vm4, %v3106_v40, %v3115_v52  ;;  %v12786_v16 = vld [vmem:[%s13068_s25 + $0xc] sm:$0xff]   ;;  %v3329_v35 = vsel %vm1439_vm4, %v3320_v25, %v3328_v26  ;;  %v3349_v40 = vshrl.u32 %v12789_v30, 16 }
  0xa1   : > { %v3125_v13 = vsel %vm1439_vm4, %v3115_v52, %v3124_v4  ;;  %v3951_v25 = vshrl.u32 %v12802_v15, 16 }
  0xa2   : > { %v3351_v52 = vrot.slane %v3349_v40, 1 }
  0xa3   : > { %12090 = vmatmul.mubr.msk.bf16.gmra.mrb[72].mxu1 %vm263_vm1, %v2481_v58  ;;  %v2901_v58 = vrot.slane %v2899_v41, 2  ;;  %v3337_v41 = vor.u32 %v3336_v32, %v3333_v31  ;;  %v13500_v31 = vld [vmem:[%s13068_s25 + $0x64] sm:$0xff]  }
  0xa4   : > { %12093 = vmatprep.mubr.msk.bf16.mxu1 %vm263_vm1, %v2483_v62  ;;  %v3132_v62 = vrot.slane %v3130_v46, 2  ;;  %v3361_v46 = vshll.u32 %v12791_v37, 16  ;;  %v12804_v32 = vld [vmem:[%s13068_s25 + $0x24] sm:$0xff]   ;;  %v3741_v45 = vrot.slane %v13500_v31, 2 }
  0xa5   : > { %12108 = vmatmul.mubr.msk.bf16.gmra.mrb[72].mxu0 %vm263_vm1, %v2671_v50  ;;  %v2892_v50 = vrot.slane %v2890_v34, 2  ;;  %v2902_v7 = vor.u32 %v2901_v58, %v2898_v54  ;;  %v3345_v34 = vrot.slane %v3343_v24, 2  ;;  %v3338_v54 = vsel %vm1439_vm4, %v3328_v26, %v3337_v41  ;;  %v12798_v58 = vld [vmem:[%s13068_s25 + $0xc] sm:$0xff]   ;;  %v13497_v24 = vld [vmem:[%s13068_s25 + $0x5c] sm:$0xff]  }
  0xa6   : > { %12127 = vmatprep.mubr.msk.bf16.mxu0 %vm263_vm1, %v3098_v29  ;;  %v3133_v8 = vor.u32 %v3132_v62, %v3129_v61  ;;  %v12788_v29 = vld [vmem:[%s13068_s25 + $0x14] sm:$0xff]   ;;  %v3363_v60 = vrot.slane %v3361_v46, 2  ;;  %v12797_v62 = vld [vmem:[%s13068_s25 + $0x4] sm:$0xfc]   ;;  %v3954_v26 = vshll.u32 %v12802_v15, 16  ;;  %v3739_v40 = vrot.slane %v13497_v24, 2 }
  0xa7   : > { %v3548_v39 = vrot.slane %v12788_v29, 2  ;;  %v3925_v6 = vshrl.u32 %v12797_v62, 16 }
  0xa8   : > { %v3134_v19 = vsel %vm1439_vm4, %v3124_v4, %v3133_v8  ;;  %v3936_v4 = vshll.u32 %v12798_v58, 16  ;;  %v3364_v5 = vor.u32 %v3363_v60, %v3360_v59 }
  0xaa   : > { %v3938_v14 = vrot.slane %v3936_v4, 3 }
  0xab   : > { %12094 = vmatmul.mubr.msk.bf16.gmra.mrb[76].mxu1 %vm263_vm1, %v2482_v49  ;;  %v2889_v49 = vrot.slane %v2887_v33, 1  ;;  %v3342_v33 = vrot.slane %v3340_v23, 1  ;;  %v3734_v23 = vrot.slane %v12794_v10, 2  ;;  %v12813_v10 = vld [vmem:[%s13068_s25 + $0x64] sm:$0xff]  }
  0xac   : > { %12113 = vmatprep.mubr.msk.bf16.mxu1 %vm263_vm1, %v2867_v28  ;;  %v3546_v28 = vrot.slane %v12786_v16, 2  ;;  %v4194_v24 = vshll.u32 %v12813_v10, 16 }
  0xad   : > { %12128 = vmatmul.mubr.msk.bf16.vlgmr.msra.gmra.mrb[76].mxu0 %vm263_vm1, %v3107_v57  ;;  %v2893_v3 = vor.u32 %v2892_v50, %v2889_v49  ;;  %v3346_v43 = vor.u32 %v3345_v34, %v3342_v33  ;;  %v13452_v49 = vld [vmem:[%s13068_s25 + $0x2c] sm:$0x3f]   ;;  %v3764_v50 = vsel %vm282_vm0, %v13413_v48, 0  ;;  %v3737_v34 = vrot.slane %v12796_v20, 2 }
  0xae   : > { %12154 = vmatpush3.bf16.msra.mxu0 %v3575_v51  ;;  %12131 = vmatprep.mubr.msk.bf16.mxu0 %vm263_vm1, %v3116_v63  ;;  %v3547_v36 = vsel %vm3544_vm5, %v3545_v27, %v3546_v28  ;;  %v3550_v51 = vrot.slane %v12790_v38, 2  ;;  %v3554_v61 = vrot.slane %v13452_v49, 2  ;;  %v12805_v33 = vld [vmem:[%s13068_s25 + $0x2c] sm:$0x7f]   ;;  %v3953_v38 = vrot.slane %v3951_v25, 2 }
  0xaf   : > { %12636 = vmatprep.subr.msk.bf16.mxu0 %vm282_vm0, %v13420_v2  ;;  %v2894_v12 = vsel %vm1439_vm4, %v2884_v44, %v2893_v3  ;;  %v2903_v18 = vsel %vm1439_vm4, %v2893_v3, %v2902_v7  ;;  %v12792_v44 = vld [vmem:[%s13068_s25 + $0x24] sm:$0xff]   ;;  %v3347_v55 = vsel %vm1439_vm4, %v3337_v41, %v3346_v43  ;;  %v3933_v3 = vshrl.u32 %v12798_v58, 16 }
  0xb0   : > { %v3551_v63 = vsel %vm3544_vm5, %v3548_v39, %v3550_v51  ;;  %v3960_v41 = vshrl.u32 %v12804_v32, 16  ;;  %v3969_v46 = vshrl.u32 %v12805_v33, 16  ;;  %v3972_v49 = vshll.u32 %v12805_v33, 16 }
  0xb3   : > { %12114 = vmatmul.mubr.msk.bf16.vlgmr.msra.gmra.mrb[80].mxu1 %vm263_vm1, %v2876_v56  ;;  %v3549_v56 = vsel %vm3544_vm5, %v3546_v28, %v3548_v39  ;;  %v3956_v39 = vrot.slane %v3954_v26, 3  ;;  %v3742_v26 = vsel %vm3544_vm5, %v3739_v40, %v3741_v45 }
  0xb4   : > { %12140 = vmatpush3.bf16.msra.mxu1 %v3385_v42  ;;  %12117 = vmatprep.mubr.msk.bf16.mxu1 %vm263_vm1, %v2885_v47  ;;  %v3352_v42 = vshll.u32 %v12789_v30, 16  ;;  %v3552_v47 = vrot.slane %v12792_v44, 2 }
  0xb5   : > { %12635 = vmatprep.subr.msk.bf16.mxu1 %vm282_vm0, %v13413_v48  ;;  %12132 = vmatmul.mubr.msk.bf16.gmra.mrb[80].mxu0 %vm263_vm1, %v3125_v13  ;;  %v13476_v48 = vld [vmem:[%s16210_s1 + $0x50] sm:$0xf]  ;;  %v3935_v13 = vrot.slane %v3933_v3, 2 }
  0xb6   : > { %12135 = vmatprep.mubr.msk.bf16.mxu0 %vm263_vm1, %v3134_v19  ;;  %v3354_v57 = vrot.slane %v3352_v42, 2  ;;  %v3553_v9 = vsel %vm3544_vm5, %v3550_v51, %v3552_v47  ;;  %v3555_v17 = vsel %vm3544_vm5, %v3552_v47, %v3554_v61  ;;  %v12807_v42 = vld [vmem:[%s13068_s25 + $0x4c] sm:$0xff]   ;;  %v4417_v51 = vsel %vm282_vm0, %v13476_v48, 0  ;;  %v10971_v47 = vld [vmem:[%s16210_s1 + $0x54] sm:$0xf] }
  0xb7   : > { %v3939_v28 = vor.u32 %v3938_v14, %v3935_v13  ;;  %v4167_v58 = vshll.u32 %v12807_v42, 16  ;;  %v13547_v13 = vsel %vm282_vm0, %v10971_v47, 0  ;;  %v13550_v14 = vld [vmem:[%s13068_s25 + $0xc] sm:$0xff]  }
  0xb8   : > { %v3355_v2 = vor.u32 %v3354_v57, %v3351_v52  ;;  %v3957_v52 = vor.u32 %v3956_v39, %v3953_v38  ;;  %v4164_v57 = vshrl.u32 %v12807_v42, 16  ;;  %v4388_v33 = vrot.slane %v13550_v14, 3 }
  0xba   : > { %v3356_v11 = vsel %vm1439_vm4, %v3346_v43, %v3355_v2  ;;  %v3365_v16 = vsel %vm1439_vm4, %v3355_v2, %v3364_v5  ;;  %v3963_v43 = vshll.u32 %v12804_v32, 16 }
  0xbb   : > { %12118 = vmatmul.mubr.msk.bf16.gmra.mrb[84].mxu1 %vm263_vm1, %v2894_v12  ;;  %v3735_v12 = vrot.slane %v13466_v0, 2 }
  0xbc   : > { %12121 = vmatprep.mubr.msk.bf16.mxu1 %vm263_vm1, %v2903_v18  ;;  %v3927_v18 = vrot.slane %v3925_v6, 2  ;;  %v13532_v6 = vrot.slane %v4164_v57, 2 }
  0xbd   : > { %12136 = vmatmul.mubr.msk.bf16.gmra.mrb[84].mxu0 %vm263_vm1, %v3133_v8  ;;  %v12800_v8 = vld [vmem:[%s13068_s25 + $0x14] sm:$0xff]   ;;  %v3738_v59 = vsel %vm3544_vm5, %v3735_v12, %v3737_v34 }
  0xbe   : > { %12155 = vmatprep.mubr.msk.bf16.mxu0 %vm263_vm1, %v3547_v36  ;;  %v3942_v21 = vshrl.u32 %v12800_v8, 16  ;;  %v3945_v22 = vshll.u32 %v12800_v8, 16  ;;  %v3736_v36 = vsel %vm3544_vm5, %v3734_v23, %v3735_v12  ;;  %v12815_v23 = vld [vmem:[%s13068_s25 + $0x6c] sm:$0x7f]  }
  0xbf   : > { %v4200_v42 = vshrl.u32 %v12815_v23, 16  ;;  %v4203_v57 = vshll.u32 %v12815_v23, 16 }
  0xc0   : > { %v3944_v29 = vrot.slane %v3942_v21, 2  ;;  %v3947_v30 = vrot.slane %v3945_v22, 3 }
  0xc2   : > { %v3948_v44 = vor.u32 %v3947_v30, %v3944_v29  ;;  %v4191_v29 = vshrl.u32 %v12813_v10, 16  ;;  %v13576_v30 = vld [vmem:[%s13068_s25 + $0x1c] sm:$0xff]   ;;  %v12822_v10 = vld [vmem:[%s13068_s25 + $0xcc] sm:$0xff]  }
  0xc3   : > { %12122 = vmatmul.mubr.msk.bf16.gmra.mrb[88].mxu1 %vm263_vm1, %v2902_v7  ;;  %v3928_v7 = vshll.u32 %v12797_v62, 16  ;;  %v3974_v62 = vrot.slane %v3972_v49, 3  ;;  %v4392_v49 = vrot.slane %v13576_v30, 3 }
  0xc4   : > { %12141 = vmatprep.mubr.msk.bf16.mxu1 %vm263_vm1, %v3329_v35  ;;  %v4227_v35 = vsel %vm282_vm0, %v10933_v1, 0  ;;  %v3949_v60 = vsel %vm3923_vm6, %v3939_v28, %v3948_v44  ;;  %v3958_v4 = vsel %vm3923_vm6, %v3948_v44, %v3957_v52  ;;  %v12819_v44 = vld [vmem:[%s13068_s25 + $0x8c] sm:$0xff]  }
  0xc5   : > { %12156 = vmatmul.mubr.msk.bf16.vlgmr.msra.gmra.mrb[88].mxu0 %vm263_vm1, %v3549_v56  ;;  %v3930_v19 = vrot.slane %v3928_v7, 3  ;;  %v3965_v56 = vrot.slane %v3963_v43, 3  ;;  %v13535_v7 = vld [vmem:[%s13068_s25 + $0x4] sm:$0xf8]  }
  0xc6   : > { %12182 = vmatpush3.bf16.msra.mxu0 %v3996_v53  ;;  %12159 = vmatprep.mubr.msk.bf16.mxu0 %vm263_vm1, %v3551_v63  ;;  %v13518_v53 = vld [vmem:[%s13068_s25 + $0x6c] sm:$0x3f]  }
  0xc7   : > { %12638 = vmatprep.subr.msk.bf16.mxu0 %vm282_vm0, %v13476_v48  ;;  %v3931_v27 = vor.u32 %v3930_v19, %v3927_v18  ;;  %v3740_v48 = vsel %vm3544_vm5, %v3737_v34, %v3739_v40 }
  0xc9   : > { %v3940_v37 = vsel %vm3923_vm6, %v3931_v27, %v3939_v28  ;;  %v4387_v28 = vrot.slane %v13535_v7, 3 }
  0xcb   : > { %12142 = vmatmul.mubr.msk.bf16.vlgmr.msra.gmra.mrb[92].mxu1 %vm263_vm1, %v3338_v54  ;;  %v12808_v54 = vld [vmem:[%s13068_s25 + $0x54] sm:$0xff]  }
  0xcc   : > { %12168 = vmatpush3.bf16.msra.mxu1 %v3764_v50  ;;  %12145 = vmatprep.mubr.msk.bf16.mxu1 %vm263_vm1, %v3347_v55  ;;  %v12806_v50 = vld [vmem:[%s13068_s25 + $0x44] sm:$0xfc]   ;;  %v3962_v55 = vrot.slane %v3960_v41, 2  ;;  %v4173_v2 = vshrl.u32 %v12808_v54, 16  ;;  %v4176_v3 = vshll.u32 %v12808_v54, 16  ;;  %v13612_v54 = vrot.slane %v4194_v24, 3 }
  0xcd   : > { %12637 = vmatprep.subr.msk.bf16.mxu1 %vm282_vm0, %v10933_v1  ;;  %12160 = vmatmul.mubr.msk.bf16.gmra.mrb[92].mxu0 %vm263_vm1, %v3553_v9  ;;  %v4156_v63 = vshrl.u32 %v12806_v50, 16  ;;  %v4159_v0 = vshll.u32 %v12806_v50, 16  ;;  %v12811_v1 = vld [vmem:[%s13068_s25 + $0x5c] sm:$0xff]   ;;  %v4169_v9 = vrot.slane %v4167_v58, 3 }
  0xce   : > { %12163 = vmatprep.mubr.msk.bf16.mxu0 %vm263_vm1, %v3555_v17  ;;  %v3966_v8 = vor.u32 %v3965_v56, %v3962_v55  ;;  %v4182_v15 = vshrl.u32 %v12811_v1, 16  ;;  %v13560_v19 = vrot.slane %v4173_v2, 2  ;;  %v13562_v20 = vrot.slane %v4176_v3, 3  ;;  %v13615_v55 = vld [vmem:[%s13068_s25 + $0x2c] sm:$0x7f]  }
  0xcf   : > { %v13556_v17 = vrot.slane %v4156_v63, 2  ;;  %v13558_v18 = vrot.slane %v4159_v0, 3  ;;  %v4185_v22 = vshll.u32 %v12811_v1, 16  ;;  %v12818_v56 = vld [vmem:[%s13068_s25 + $0x84] sm:$0xfe]   ;;  %v4588_v63 = vshll.u32 %v12819_v44, 16 }
  0xd0   : > { %v3967_v27 = vsel %vm3923_vm6, %v3957_v52, %v3966_v8  ;;  %v13580_v34 = vrot.slane %v4182_v15, 2  ;;  %v4170_v52 = vor.u32 %v4169_v9, %v13532_v6  ;;  %v13629_v2 = vld [vmem:[%s16210_s1 + $0x5c] sm:$0xf]  ;;  %v4205_v6 = vrot.slane %v4203_v57, 3 }
  0xd1   : > { %v4187_v43 = vrot.slane %v4185_v22, 3  ;;  %v4396_v7 = vrot.slane %v13615_v55, 3  ;;  %v4179_v22 = vor.u32 %v13562_v20, %v13560_v19 }
  0xd3   : > { %12146 = vmatmul.mubr.msk.bf16.gmra.mrb[96].mxu1 %vm263_vm1, %v3356_v11  ;;  %v10996_v11 = vld [vmem:[%s16210_s1 + $0x58] sm:$0xf] }
  0xd4   : > { %12149 = vmatprep.mubr.msk.bf16.mxu1 %vm263_vm1, %v3365_v16  ;;  %v13553_v16 = vld [vmem:[%s13068_s25 + $0x14] sm:$0xff]  }
  0xd5   : > { %12164 = vmatmul.mubr.msk.bf16.gmra.mrb[96].mxu0 %vm263_vm1, %v3554_v61  ;;  %v3971_v61 = vrot.slane %v3969_v46, 2  ;;  %v13603_v46 = vsel %vm282_vm0, %v10996_v11, 0 }
  0xd6   : > { %12183 = vmatprep.mubr.msk.bf16.mxu0 %vm263_vm1, %v3940_v37 }
  0xd7   : > { %v13544_v12 = vor.u32 %v3974_v62, %v3971_v61  ;;  %v12820_v61 = vld [vmem:[%s13068_s25 + $0x94] sm:$0xff]  }
  0xd8   : > { %v4594_v15 = vshrl.u32 %v12820_v61, 16 }
  0xd9   : > { %v3976_v40 = vsel %vm3923_vm6, %v3966_v8, %v13544_v12  ;;  %v4580_v8 = vshll.u32 %v12818_v56, 16 }
  0xdb   : > { %12150 = vmatmul.mubr.msk.bf16.gmra.mrb[100].mxu1 %vm263_vm1, %v3364_v5  ;;  %v3743_v5 = vrot.slane %v13518_v53, 2  ;;  %v13655_v53 = vor.u32 %v4187_v43, %v13580_v34  ;;  %v13659_v23 = vrot.slane %v4580_v8, 2  ;;  %v4819_v34 = vshll.u32 %v12822_v10, 16 }
  0xdc   : > { %12169 = vmatprep.mubr.msk.bf16.mxu1 %vm263_vm1, %v3736_v36  ;;  %v13584_v36 = vld [vmem:[%s13068_s25 + $0x24] sm:$0xff]  }
  0xdd   : > { %12184 = vmatmul.mubr.msk.bf16.vlgmr.msra.gmra.mrb[100].mxu0 %vm263_vm1, %v3949_v60  ;;  %v3744_v39 = vsel %vm3544_vm5, %v3741_v45, %v3743_v5  ;;  %v13600_v45 = vrot.slane %v4191_v29, 2  ;;  %v4394_v58 = vrot.slane %v13584_v36, 3  ;;  %v13620_v60 = vrot.slane %v4200_v42, 2 }
  0xde   : > { %12210 = vmatpush3.bf16.msra.mxu0 %v4417_v51  ;;  %12187 = vmatprep.mubr.msk.bf16.mxu0 %vm263_vm1, %v3958_v4  ;;  %v4162_v51 = vor.u32 %v13558_v18, %v13556_v17  ;;  %v4389_v4 = vsel %vm4386_vm8, %v4387_v28, %v4388_v33  ;;  %v4597_v17 = vshll.u32 %v12820_v61, 16  ;;  %v13648_v18 = vsel %vm282_vm0, %v13629_v2, 0  ;;  %v13703_v61 = vld [vmem:[%s16210_s1 + $0x60] sm:$0xf] }
  0xdf   : > { %12640 = vmatprep.subr.msk.bf16.mxu0 %vm282_vm0, %v10996_v11  ;;  %v13644_v11 = vrot.slane %v4588_v63, 2  ;;  %v4816_v29 = vshrl.u32 %v12822_v10, 16  ;;  %v4189_v42 = vsel %vm3923_vm6, %v4179_v22, %v13655_v53  ;;  %v13716_v63 = vor.u32 %v4205_v6, %v13620_v60  ;;  %v13734_v60 = vld [vmem:[%s13068_s25 + $0xdc] sm:$0xff]  }
  0xe0   : > { %v4171_v1 = vsel %vm3923_vm6, %v4162_v51, %v4170_v52 }
  0xe3   : > { %12170 = vmatmul.mubr.msk.bf16.vlgmr.msra.gmra.mrb[104].mxu1 %vm263_vm1, %v3738_v59 }
  0xe4   : > { %12196 = vmatpush3.bf16.msra.mxu1 %v4227_v35  ;;  %12173 = vmatprep.mubr.msk.bf16.mxu1 %vm263_vm1, %v3740_v48  ;;  %v4390_v35 = vrot.slane %v13553_v16, 3  ;;  %v4577_v48 = vshrl.u32 %v12818_v56, 16  ;;  %v13684_v56 = vrot.slane %v4597_v17, 2  ;;  %v4197_v16 = vor.u32 %v13612_v54, %v13600_v45  ;;  %v13729_v54 = vld [vmem:[%s13068_s25 + $0xa4] sm:$0xff]  }
  0xe5   : > { %12639 = vmatprep.subr.msk.bf16.mxu1 %vm282_vm0, %v10971_v47  ;;  %12188 = vmatmul.mubr.msk.bf16.gmra.mrb[104].mxu0 %vm263_vm1, %v3967_v27  ;;  %v4585_v47 = vshrl.u32 %v12819_v44, 16 }
  0xe6   : > { %v11937_v21 = vpop.f32.mrb[0].mxu1  ;;  %v11933_v38 = vpop.f32.mrb[0].mxu0  ;;  %12191 = vmatprep.mubr.msk.bf16.mxu0 %vm263_vm1, %v3976_v40  ;;  %v4391_v44 = vsel %vm4386_vm8, %v4388_v33, %v4390_v35  ;;  %v4393_v14 = vsel %vm4386_vm8, %v4390_v35, %v4392_v49  ;;  %v13692_v33 = vrot.slane %v4816_v29, 1  ;;  %v13710_v35 = vrot.slane %v4819_v34, 2  ;;  %v13754_v29 = vld [vmem:[%s13068_s25 + $0xe4] sm:$0xff]  }
  0xe7   : > { %373 = vst.msk [vmem:[#allocation2 + $0x30] sm:$0xff] %vm366_vm7, %v11937_v21  ;;  %v336_v25 = vpop.f32.mrb[1].mxu1  ;;  %369 = vst.msk [vmem:[#allocation2 + $0x10] sm:$0xff] %vm366_vm7, %v11933_v38  ;;  %v320_v41 = vpop.f32.mrb[1].mxu0  ;;  %v13636_v9 = vrot.slane %v4585_v47, 1  ;;  %v13669_v38 = vld [vmem:[%s13068_s25 + $0x9c] sm:$0xff]   ;;  %v4207_v30 = vsel %vm3923_vm6, %v4197_v16, %v13716_v63 }
  0xe8   : > { %371 = vst.msk [vmem:[#allocation2 + $0x20] sm:$0xff] %vm366_vm7, %v336_v25  ;;  %v11938_v32 = vpop.f32.mrb[2].mxu1  ;;  %367 = vst.msk [vmem:[#allocation2] sm:$0xff] %vm366_vm7, %v320_v41  ;;  %v11934_v31 = vpop.f32.mrb[2].mxu0  ;;  %v12821_v25 = vld [vmem:[%s13068_s25 + $0xc4] sm:$0xfe]   ;;  %v4180_v41 = vsel %vm3923_vm6, %v4170_v52, %v4179_v22 }
  0xe9   : > { %374 = vst.msk [vmem:[#allocation2 + $0x38] sm:$0xff] %vm366_vm7, %v11938_v32  ;;  %v339_v37 = vpop.f32.mrb[3].mxu1  ;;  %370 = vst.msk [vmem:[#allocation2 + $0x18] sm:$0xff] %vm366_vm7, %v11934_v31  ;;  %v323_v50 = vpop.f32.mrb[3].mxu0  ;;  %v4808_v52 = vshrl.u32 %v12821_v25, 16  ;;  %v4811_v57 = vshll.u32 %v12821_v25, 16  ;;  %v13764_v36 = vor.u32 %v13644_v11, %v13636_v9 }
  0xea   : > { %372 = vst.msk [vmem:[#allocation2 + $0x28] sm:$0xff] %vm366_vm7, %v339_v37  ;;  %368 = vst.msk [vmem:[#allocation2 + $0x8] sm:$0xff] %vm366_vm7, %v323_v50  ;;  %v13666_v37 = vrot.slane %v4594_v15, 1  ;;  %v13695_v47 = vld [vmem:[%s13068_s25 + $0xd4] sm:$0xff]  }
  0xeb   : > { %12174 = vmatmul.mubr.msk.bf16.gmra.mrb[108].mxu1 %vm263_vm1, %v3742_v26  ;;  %v13725_v45 = vrot.slane %v4811_v57, 2  ;;  %v4828_v15 = vshll.u32 %v13695_v47, 16  ;;  %v13800_v57 = vld [vmem:[%s13068_s25 + $0xac] sm:$0x3f]  }
  0xec   : > { %12177 = vmatprep.mubr.msk.bf16.mxu1 %vm263_vm1, %v3744_v39 }
  0xed   : > { %12192 = vmatmul.mubr.msk.bf16.gmra.mrb[108].mxu0 %vm263_vm1, %v13544_v12 }
  0xee   : > { %v11941_v59 = vpop.f32.mrb[4].mxu1  ;;  %v392_v21 = vld [vmem:[#allocation2 + $0x10] sm:$0xff]  ;;  %12211 = vmatprep.mubr.msk.bf16.mxu0 %vm263_vm1, %v4389_v4 }
  0xef   : > { %377 = vst.msk [vmem:[#allocation2 + $0x50] sm:$0xff] %vm366_vm7, %v11941_v59  ;;  %v352_v62 = vpop.f32.mrb[5].mxu1  ;;  %v390_v12 = vld [vmem:[#allocation2] sm:$0xff] }
  0xf0   : > { %375 = vst.msk [vmem:[#allocation2 + $0x40] sm:$0xff] %vm366_vm7, %v352_v62  ;;  %v11942_v0 = vpop.f32.mrb[6].mxu1  ;;  %v393_v27 = vld [vmem:[#allocation2 + $0x18] sm:$0xff]  ;;  %v13662_v28 = vpop.f32.mrb[4].mxu0  ;;  %v4603_v62 = vshrl.u32 %v13669_v38, 16  ;;  %v394_v6 = vld [vmem:[#allocation2 + $0x20] sm:$0xff] }
  0xf1   : > { %v355_v3 = vpop.f32.mrb[7].mxu1  ;;  %v391_v19 = vld [vmem:[#allocation2 + $0x8] sm:$0xff]  ;;  %v13664_v20 = vpop.f32.mrb[5].mxu0  ;;  %v13718_v0 = vrot.slane %v4808_v52, 1  ;;  %v4837_v52 = vshll.u32 %v13734_v60, 16 }
  0xf2   : > { %376 = vst.msk [vmem:[#allocation2 + $0x48] sm:$0xff] %vm366_vm7, %v355_v3  ;;  %v13672_v43 = vpop.f32.mrb[6].mxu0 }
  0xf3   : > { %12178 = vmatmul.mubr.msk.bf16.gmra.mrb[112].mxu1 %vm263_vm1, %v3743_v5  ;;  %v13657_v5 = vrot.slane %v4577_v48, 1  ;;  %v13682_v51 = vpop.f32.mrb[7].mxu0 }
  0xf4   : > { %12197 = vmatprep.mubr.msk.bf16.mxu1 %vm263_vm1, %v4171_v1  ;;  %v396_v1 = vld [vmem:[#allocation2 + $0x30] sm:$0xff] }
  0xf5   : > { %12212 = vmatmul.mubr.msk.bf16.vlgmr.msra.gmra.mrb[112].mxu0 %vm263_vm1, %v4391_v44  ;;  %v4615_v44 = vshll.u32 %v13729_v54, 16 }
  0xf6   : > { %v11947_v26 = vpop.f32.mrb[8].mxu1  ;;  %12238 = vmatpush3.bf16.msra.mxu0 %v13603_v46  ;;  %12215 = vmatprep.mubr.msk.bf16.mxu0 %vm263_vm1, %v4393_v14  ;;  %v4825_v46 = vshrl.u32 %v13695_v47, 16 }
  0xf7   : > { %v534_v32 = vadd.f32 %v11947_v26, %v392_v21  ;;  %v486_v24 = vpop.f32.mrb[9].mxu1  ;;  %12642 = vmatprep.subr.msk.bf16.mxu0 %vm282_vm0, %v13703_v61  ;;  %v397_v21 = vld [vmem:[#allocation2 + $0x38] sm:$0xff]  ;;  %v4395_v26 = vsel %vm4386_vm8, %v4392_v49, %v4394_v58 }
  0xf8   : > { %v532_v39 = vadd.f32 %v486_v24, %v390_v12  ;;  %v11948_v40 = vpop.f32.mrb[10].mxu1  ;;  %v13721_v3 = vpop.f32.mrb[8].mxu0  ;;  %v4198_v12 = vsel %vm3923_vm6, %v13655_v53, %v4197_v16  ;;  %v4827_v11 = vrot.slane %v4825_v46, 1  ;;  %v4843_v16 = vshrl.u32 %v13754_v29, 16 }
  0xf9   : > { %545 = vst.msk [vmem:[#allocation2 + $0x10] sm:$0xff] %vm366_vm7, %v534_v32  ;;  %v535_v31 = vadd.f32 %v11948_v40, %v393_v27  ;;  %v489_v50 = vpop.f32.mrb[11].mxu1  ;;  %v13736_v10 = vpop.f32.mrb[9].mxu0  ;;  %v4397_v27 = vsel %vm4386_vm8, %v4394_v58, %v4396_v7  ;;  %v13770_v40 = vrot.slane %v4603_v62, 1  ;;  %v13807_v62 = vld [vmem:[%s13068_s25 + $0xec] sm:$0x3f]  }
  0xfa   : > { %543 = vst.msk [vmem:[#allocation2] sm:$0xff] %vm366_vm7, %v532_v39  ;;  %v533_v59 = vadd.f32 %v489_v50, %v391_v19  ;;  %v13741_v25 = vpop.f32.mrb[10].mxu0  ;;  %v395_v19 = vld [vmem:[#allocation2 + $0x28] sm:$0xff]  ;;  %v4583_v39 = vor.u32 %v13659_v23, %v13657_v5  ;;  %v4830_v23 = vrot.slane %v4828_v15, 2  ;;  %v13792_v50 = vor.u32 %v13710_v35, %v13692_v33  ;;  %v398_v35 = vld [vmem:[#allocation2 + $0x40] sm:$0xff] }
  0xfb   : > { %546 = vst.msk [vmem:[#allocation2 + $0x18] sm:$0xff] %vm366_vm7, %v535_v31  ;;  %12198 = vmatmul.mubr.msk.bf16.vlgmr.msra.gmra.mrb[116].mxu1 %vm263_vm1, %v4180_v41  ;;  %v4814_v31 = vor.u32 %v13725_v45, %v13718_v0  ;;  %v4852_v55 = vshrl.u32 %v13807_v62, 16 }
  0xfc   : > { %544 = vst.msk [vmem:[#allocation2 + $0x8] sm:$0xff] %vm366_vm7, %v533_v59  ;;  %12224 = vmatpush3.bf16.msra.mxu1 %v13547_v13  ;;  %12201 = vmatprep.mubr.msk.bf16.mxu1 %vm263_vm1, %v4189_v42  ;;  %v4606_v13 = vshll.u32 %v13669_v38, 16  ;;  %v13758_v38 = vpop.f32.mrb[11].mxu0  ;;  %v400_v59 = vld [vmem:[#allocation2 + $0x50] sm:$0xff] }
  0xfd   : > { %12641 = vmatprep.subr.msk.bf16.mxu1 %vm282_vm0, %v13629_v2  ;;  %12216 = vmatmul.mubr.msk.bf16.gmra.mrb[116].mxu0 %vm263_vm1, %v4395_v26  ;;  %v4839_v26 = vrot.slane %v4837_v52, 2 }
  0xfe   : > { %v11951_v48 = vpop.f32.mrb[12].mxu1  ;;  %v13777_v9 = vrot.slane %v4606_v13, 2  ;;  %12219 = vmatprep.mubr.msk.bf16.mxu0 %vm263_vm1, %v4397_v27  ;;  %v4621_v27 = vshrl.u32 %v13800_v57, 16 }
  0xff   : > { %v538_v4 = vadd.f32 %v11951_v48, %v396_v1  ;;  %v502_v8 = vpop.f32.mrb[13].mxu1 }
 0x100   : > { %v568_v2 = vld [vmem:[#allocation2 + $0x10] sm:$0xff]  ;;  %v536_v17 = vadd.f32 %v502_v8, %v394_v6  ;;  %v11952_v22 = vpop.f32.mrb[14].mxu1  ;;  %v13803_v47 = vpop.f32.mrb[12].mxu0  ;;  %v399_v6 = vld [vmem:[#allocation2 + $0x48] sm:$0xff] }
 0x101   : > { %v760_v32 = vadd.f32 %v13662_v28, %v568_v2  ;;  %549 = vst.msk [vmem:[#allocation2 + $0x30] sm:$0xff] %vm366_vm7, %v538_v4  ;;  %v566_v53 = vld [vmem:[#allocation2] sm:$0xff]  ;;  %v539_v24 = vadd.f32 %v11952_v22, %v397_v21  ;;  %v505_v34 = vpop.f32.mrb[15].mxu1  ;;  %v13809_v13 = vpop.f32.mrb[13].mxu0  ;;  %v4592_v2 = vsel %vm1439_vm4, %v4583_v39, %v13764_v36  ;;  %v4823_v21 = vsel %vm1439_vm4, %v4814_v31, %v13792_v50  ;;  %v13854_v39 = vld [vmem:[%s13068_s25 + $0x94] sm:$0xff]  }
 0x102   : > { %v758_v49 = vadd.f32 %v13664_v20, %v566_v53  ;;  %547 = vst.msk [vmem:[#allocation2 + $0x20] sm:$0xff] %vm366_vm7, %v536_v17  ;;  %v569_v58 = vld [vmem:[#allocation2 + $0x18] sm:$0xff]  ;;  %v537_v28 = vadd.f32 %v505_v34, %v395_v19  ;;  %v4834_v20 = vshrl.u32 %v13734_v60, 16  ;;  %v11970_v46 = vpop.f32.mrb[14].mxu0  ;;  %v4600_v17 = vor.u32 %v13684_v56, %v13666_v37 }
 0x103   : > { %771 = vst.msk [vmem:[#allocation2 + $0x10] sm:$0xff] %vm366_vm7, %v760_v32  ;;  %v761_v41 = vadd.f32 %v13672_v43, %v569_v58  ;;  %550 = vst.msk [vmem:[#allocation2 + $0x38] sm:$0xff] %vm366_vm7, %v539_v24  ;;  %v567_v42 = vld [vmem:[#allocation2 + $0x8] sm:$0xff]  ;;  %12202 = vmatmul.mubr.msk.bf16.gmra.mrb[120].mxu1 %vm263_vm1, %v4198_v12  ;;  %v4612_v43 = vshrl.u32 %v13729_v54, 16  ;;  %v4846_v54 = vshll.u32 %v13754_v29, 16  ;;  %v13814_v15 = vpop.f32.mrb[15].mxu0 }
 0x104   : > { %769 = vst.msk [vmem:[#allocation2] sm:$0xff] %vm366_vm7, %v758_v49  ;;  %v759_v5 = vadd.f32 %v13682_v51, %v567_v42  ;;  %548 = vst.msk [vmem:[#allocation2 + $0x28] sm:$0xff] %vm366_vm7, %v537_v28  ;;  %12205 = vmatprep.mubr.msk.bf16.mxu1 %vm263_vm1, %v4207_v30  ;;  %v13796_v51 = vsel %vm282_vm0, %v13703_v61, 0  ;;  %v4836_v61 = vrot.slane %v4834_v20, 1  ;;  %v4617_v56 = vrot.slane %v4615_v44, 2  ;;  %v13851_v28 = vld [vmem:[%s13068_s25 + $0x8c] sm:$0xff]  }
 0x105   : > { %772 = vst.msk [vmem:[#allocation2 + $0x18] sm:$0xff] %vm366_vm7, %v761_v41  ;;  %12220 = vmatmul.mubr.msk.bf16.gmra.mrb[120].mxu0 %vm263_vm1, %v4396_v7  ;;  %v4614_v37 = vrot.slane %v4612_v43, 1  ;;  %v4855_v7 = vshll.u32 %v13807_v62, 16  ;;  %v4845_v24 = vrot.slane %v4843_v16, 1  ;;  %v4848_v19 = vrot.slane %v4846_v54, 2 }
 0x106   : > { %770 = vst.msk [vmem:[#allocation2 + $0x8] sm:$0xff] %vm366_vm7, %v759_v5  ;;  %v11955_v14 = vpop.f32.mrb[16].mxu1  ;;  %12239 = vmatprep.mubr.msk.bf16.mxu0 %vm263_vm1, %v4823_v21  ;;  %v13848_v49 = vor.u32 %v4839_v26, %v4836_v61  ;;  %v4623_v58 = vrot.slane %v4621_v27, 1  ;;  %v13861_v5 = vld [vmem:[%s13068_s25 + $0x84] sm:$0xfc]   ;;  %v5041_v21 = vrot.slane %v13854_v39, 2 }
 0x107   : > { %v542_v33 = vadd.f32 %v11955_v14, %v400_v59  ;;  %v518_v0 = vpop.f32.mrb[17].mxu1  ;;  %v4854_v14 = vrot.slane %v4852_v55, 1  ;;  %v4857_v16 = vrot.slane %v4855_v7, 2  ;;  %v13884_v46 = vld [vmem:[%s13068_s25 + $0xc4] sm:$0xfc]   ;;  %v13930_v55 = vld [vmem:[%s13068_s25 + $0xdc] sm:$0xff]  }
 0x108   : > { %v572_v1 = vld [vmem:[#allocation2 + $0x30] sm:$0xff]  ;;  %v540_v48 = vadd.f32 %v518_v0, %v398_v35  ;;  %v11956_v45 = vpop.f32.mrb[18].mxu1  ;;  %v13846_v30 = vpop.f32.mrb[16].mxu0 }
 0x109   : > { %v764_v60 = vadd.f32 %v13721_v3, %v572_v1  ;;  %553 = vst.msk [vmem:[#allocation2 + $0x50] sm:$0xff] %vm366_vm7, %v542_v33  ;;  %v570_v4 = vld [vmem:[#allocation2 + $0x20] sm:$0xff]  ;;  %v521_v8 = vpop.f32.mrb[19].mxu1 }
 0x10a   : > { %v762_v22 = vadd.f32 %v13736_v10, %v570_v4  ;;  %551 = vst.msk [vmem:[#allocation2 + $0x40] sm:$0xff] %vm366_vm7, %v540_v48  ;;  %v573_v3 = vld [vmem:[#allocation2 + $0x38] sm:$0xff]  ;;  %v541_v12 = vadd.f32 %v521_v8, %v399_v6  ;;  %v4624_v10 = vshll.u32 %v13800_v57, 16  ;;  %v794_v34 = vld [vmem:[#allocation2 + $0x10] sm:$0xff]  ;;  %v4849_v4 = vor.u32 %v4848_v19, %v4845_v24  ;;  %v11096_v6 = vld [vmem:[%s16210_s1 + $0x68] sm:$0xf] }
 0x10b   : > { %775 = vst.msk [vmem:[#allocation2 + $0x30] sm:$0xff] %vm366_vm7, %v764_v60  ;;  %v765_v29 = vadd.f32 %v13741_v25, %v573_v3  ;;  %v571_v32 = vld [vmem:[#allocation2 + $0x28] sm:$0xff]  ;;  %12206 = vmatmul.mubr.msk.bf16.gmra.mrb[124].mxu1 %vm263_vm1, %v13716_v63  ;;  %v4831_v63 = vor.u32 %v4830_v23, %v4827_v11  ;;  %v13843_v25 = vor.u32 %v13777_v9, %v13770_v40  ;;  %v792_v40 = vld [vmem:[#allocation2] sm:$0xff]  ;;  %v13858_v11 = vpop.f32.mrb[17].mxu0 }
 0x10c   : > { %773 = vst.msk [vmem:[#allocation2 + $0x20] sm:$0xff] %vm366_vm7, %v762_v22  ;;  %v763_v53 = vadd.f32 %v13758_v38, %v571_v32  ;;  %552 = vst.msk [vmem:[#allocation2 + $0x48] sm:$0xff] %vm366_vm7, %v541_v12  ;;  %12225 = vmatprep.mubr.msk.bf16.mxu1 %vm263_vm1, %v4592_v2  ;;  %v4601_v9 = vsel %vm1439_vm4, %v13764_v36, %v4600_v17  ;;  %v4626_v20 = vrot.slane %v4624_v10, 2  ;;  %v13864_v23 = vld [vmem:[%s13068_s25 + $0xcc] sm:$0xff]   ;;  %v795_v31 = vld [vmem:[#allocation2 + $0x18] sm:$0xff]  ;;  %v13866_v57 = vpop.f32.mrb[18].mxu0 }
 0x10d   : > { %776 = vst.msk [vmem:[#allocation2 + $0x38] sm:$0xff] %vm366_vm7, %v765_v29  ;;  %v4832_v59 = vsel %vm1439_vm4, %v13792_v50, %v4831_v63  ;;  %v11071_v36 = vld [vmem:[%s16210_s1 + $0x64] sm:$0xf]  ;;  %v793_v0 = vld [vmem:[#allocation2 + $0x8] sm:$0xff]  ;;  %v13875_v1 = vpop.f32.mrb[19].mxu0  ;;  %v4610_v50 = vsel %vm1439_vm4, %v4600_v17, %v13843_v25  ;;  %v4618_v60 = vor.u32 %v4617_v56, %v4614_v37  ;;  %v5039_v17 = vrot.slane %v13851_v28, 2 }
 0x10e   : > { %774 = vst.msk [vmem:[#allocation2 + $0x28] sm:$0xff] %vm366_vm7, %v763_v53  ;;  %v11975_v38 = vpop.f32.mrb[20].mxu1  ;;  %12240 = vmatmul.mubr.msk.bf16.vlgmr.msra.gmra.mrb[124].mxu0 %vm263_vm1, %v4832_v59  ;;  %v13901_v2 = vor.u32 %v4626_v20, %v4623_v58  ;;  %v13907_v22 = vor.u32 %v4857_v16, %v4854_v14  ;;  %v13911_v3 = vsel %vm282_vm0, %v11071_v36, 0  ;;  %v13915_v12 = vld [vmem:[%s13068_s25 + $0xd4] sm:$0xff]   ;;  %v5227_v53 = vrot.slane %v13884_v46, 2 }
 0x10f   : > { %v985_v41 = vadd.f32 %v11975_v38, %v794_v34  ;;  %v937_v42 = vpop.f32.mrb[21].mxu1  ;;  %12266 = vmatpush3.bf16.msra.mxu0 %v13796_v51  ;;  %v13922_v51 = vld [vmem:[%s13068_s25 + $0xa4] sm:$0xff]   ;;  %v4619_v38 = vsel %vm1439_vm4, %v13843_v25, %v4618_v60  ;;  %v5230_v16 = vrot.slane %v13915_v12, 2  ;;  %v14104_v12 = vld [vmem:[%s16210_s1 + $0x70] sm:$0xf] }
 0x110   : > { %v576_v43 = vld [vmem:[#allocation2 + $0x50] sm:$0xff]  ;;  %v983_v44 = vadd.f32 %v937_v42, %v792_v40  ;;  %v11976_v52 = vpop.f32.mrb[22].mxu1  ;;  %v13918_v29 = vpop.f32.mrb[20].mxu0  ;;  %12644 = vmatprep.subr.msk.bf16.mxu0 %vm282_vm0, %v11096_v6  ;;  %v4628_v25 = vsel %vm1439_vm4, %v4618_v60, %v13901_v2 }
 0x111   : > { %v768_v62 = vadd.f32 %v13803_v47, %v576_v43  ;;  %v574_v33 = vld [vmem:[#allocation2 + $0x40] sm:$0xff]  ;;  %996 = vst.msk [vmem:[#allocation2 + $0x10] sm:$0xff] %vm366_vm7, %v985_v41  ;;  %v986_v35 = vadd.f32 %v11976_v52, %v795_v31  ;;  %v940_v61 = vpop.f32.mrb[23].mxu1  ;;  %v4841_v47 = vsel %vm1439_vm4, %v4831_v63, %v13848_v49  ;;  %v13925_v10 = vpop.f32.mrb[21].mxu0  ;;  %v4850_v41 = vsel %vm1439_vm4, %v13848_v49, %v4849_v4  ;;  %v13939_v40 = vld [vmem:[%s13068_s25 + $0xac] sm:$0x3f]  }
 0x112   : > { %v766_v48 = vadd.f32 %v13809_v13, %v574_v33  ;;  %994 = vst.msk [vmem:[#allocation2] sm:$0xff] %vm366_vm7, %v983_v44  ;;  %v984_v45 = vadd.f32 %v940_v61, %v793_v0  ;;  %v13891_v13 = vld [vmem:[%s13068_s25 + $0x9c] sm:$0xff]   ;;  %12243 = vmatprep.mubr.msk.bf16.mxu0 %vm263_vm1, %v4841_v47  ;;  %v798_v26 = vld [vmem:[#allocation2 + $0x30] sm:$0xff]  ;;  %v13934_v58 = vpop.f32.mrb[22].mxu0  ;;  %v4859_v52 = vsel %vm1439_vm4, %v4849_v4, %v13907_v22  ;;  %v13950_v49 = vld [vmem:[%s13068_s25 + $0x84] sm:$0xfc]  }
 0x113   : > { %779 = vst.msk [vmem:[#allocation2 + $0x50] sm:$0xff] %vm366_vm7, %v768_v62  ;;  %v575_v54 = vld [vmem:[#allocation2 + $0x48] sm:$0xff]  ;;  %997 = vst.msk [vmem:[#allocation2 + $0x18] sm:$0xff] %vm366_vm7, %v986_v35  ;;  %12226 = vmatmul.mubr.msk.bf16.vlgmr.msra.gmra.mrb[128].mxu1 %vm263_vm1, %v4601_v9  ;;  %v796_v37 = vld [vmem:[#allocation2 + $0x20] sm:$0xff]  ;;  %v5043_v63 = vrot.slane %v13891_v13, 2  ;;  %v13943_v31 = vpop.f32.mrb[23].mxu0 }
 0x114   : > { %777 = vst.msk [vmem:[#allocation2 + $0x40] sm:$0xff] %vm366_vm7, %v766_v48  ;;  %v767_v8 = vadd.f32 %v13814_v15, %v575_v54  ;;  %995 = vst.msk [vmem:[#allocation2 + $0x8] sm:$0xff] %vm366_vm7, %v984_v45  ;;  %12252 = vmatpush3.bf16.msra.mxu1 %v13648_v18  ;;  %12229 = vmatprep.mubr.msk.bf16.mxu1 %vm263_vm1, %v4610_v50  ;;  %v5038_v15 = vrot.slane %v13861_v5, 2  ;;  %v5228_v18 = vrot.slane %v13864_v23, 2  ;;  %v799_v19 = vld [vmem:[#allocation2 + $0x38] sm:$0xff]  ;;  %v13957_v62 = vld [vmem:[%s13068_s25 + $0x8c] sm:$0xff]  }
 0x115   : > { %12643 = vmatprep.subr.msk.bf16.mxu1 %vm282_vm0, %v11071_v36  ;;  %v797_v43 = vld [vmem:[#allocation2 + $0x28] sm:$0xff]  ;;  %v5045_v36 = vrot.slane %v13922_v51, 2  ;;  %v5232_v0 = vrot.slane %v13930_v55, 2  ;;  %v13981_v45 = vld [vmem:[%s13068_s25 + $0x94] sm:$0xff]   ;;  %v5417_v47 = vshrl.u32 %v13950_v49, 16  ;;  %v5420_v54 = vshll.u32 %v13950_v49, 16 }
 0x116   : > { %778 = vst.msk [vmem:[#allocation2 + $0x48] sm:$0xff] %vm366_vm7, %v767_v8  ;;  %v11979_v27 = vpop.f32.mrb[24].mxu1  ;;  %12244 = vmatmul.mubr.msk.bf16.gmra.mrb[128].mxu0 %vm263_vm1, %v4850_v41  ;;  %v13969_v61 = vld [vmem:[%s13068_s25 + $0xe4] sm:$0xff]   ;;  %v13978_v48 = vld [vmem:[%s13068_s25 + $0xec] sm:$0x3f]   ;;  %v5425_v8 = vshrl.u32 %v13957_v62, 16  ;;  %v5044_v23 = vsel %vm3544_vm5, %v5041_v21, %v5043_v63 }
 0x117   : > { %v989_v32 = vadd.f32 %v11979_v27, %v798_v26  ;;  %v953_v56 = vpop.f32.mrb[25].mxu1  ;;  %12247 = vmatprep.mubr.msk.bf16.mxu0 %vm263_vm1, %v4859_v52  ;;  %v5434_v41 = vshrl.u32 %v13981_v45, 16  ;;  %v5229_v52 = vsel %vm3544_vm5, %v5227_v53, %v5228_v18  ;;  %v14018_v49 = vld [vmem:[%s13068_s25 + $0xcc] sm:$0xff]   ;;  %v5236_v5 = vrot.slane %v13978_v48, 2  ;;  %v14165_v51 = vld [vmem:[%s13068_s25 + $0xe4] sm:$0xff]  }
 0x118   : > { %v1019_v7 = vld [vmem:[#allocation2 + $0x10] sm:$0xff]  ;;  %v987_v24 = vadd.f32 %v953_v56, %v796_v37  ;;  %v11980_v34 = vpop.f32.mrb[26].mxu1  ;;  %v5428_v56 = vshll.u32 %v13957_v62, 16  ;;  %v14035_v62 = vrot.slane %v5420_v54, 3  ;;  %v5656_v54 = vshrl.u32 %v14018_v49, 16 }
 0x119   : > { %v1175_v42 = vadd.f32 %v13846_v30, %v1019_v7  ;;  %1000 = vst.msk [vmem:[#allocation2 + $0x30] sm:$0xff] %vm366_vm7, %v989_v32  ;;  %v1017_v9 = vld [vmem:[#allocation2] sm:$0xff]  ;;  %v990_v20 = vadd.f32 %v11980_v34, %v799_v19  ;;  %v956_v44 = vpop.f32.mrb[27].mxu1 }
 0x11a   : > { %v1173_v30 = vadd.f32 %v13858_v11, %v1017_v9  ;;  %998 = vst.msk [vmem:[#allocation2 + $0x20] sm:$0xff] %vm366_vm7, %v987_v24  ;;  %v1020_v59 = vld [vmem:[#allocation2 + $0x18] sm:$0xff]  ;;  %v988_v14 = vadd.f32 %v956_v44, %v797_v43  ;;  %v13965_v11 = vsel %vm282_vm0, %v11096_v6, 0  ;;  %v802_v60 = vld [vmem:[#allocation2 + $0x50] sm:$0xff]  ;;  %v13992_v6 = vpop.f32.mrb[24].mxu0 }
 0x11b   : > { %1186 = vst.msk [vmem:[#allocation2 + $0x10] sm:$0xff] %vm366_vm7, %v1175_v42  ;;  %v1176_v33 = vadd.f32 %v13866_v57, %v1020_v59  ;;  %1001 = vst.msk [vmem:[#allocation2 + $0x38] sm:$0xff] %vm366_vm7, %v990_v20  ;;  %v1018_v35 = vld [vmem:[#allocation2 + $0x8] sm:$0xff]  ;;  %12230 = vmatmul.mubr.msk.bf16.gmra.mrb[132].mxu1 %vm263_vm1, %v4619_v38  ;;  %v5047_v57 = vrot.slane %v13939_v40, 2  ;;  %v800_v27 = vld [vmem:[#allocation2 + $0x40] sm:$0xff]  ;;  %v13995_v37 = vpop.f32.mrb[25].mxu0 }
 0x11c   : > { %1184 = vst.msk [vmem:[#allocation2] sm:$0xff] %vm366_vm7, %v1173_v30  ;;  %v1174_v50 = vadd.f32 %v13875_v1, %v1018_v35  ;;  %999 = vst.msk [vmem:[#allocation2 + $0x28] sm:$0xff] %vm366_vm7, %v988_v14  ;;  %12233 = vmatprep.mubr.msk.bf16.mxu1 %vm263_vm1, %v4628_v25  ;;  %v13989_v1 = vld [vmem:[%s16210_s1 + $0x6c] sm:$0xf]  ;;  %v13999_v7 = vld [vmem:[%s13068_s25 + $0xc4] sm:$0xfc]   ;;  %v5040_v25 = vsel %vm3544_vm5, %v5038_v15, %v5039_v17 }
 0x11d   : > { %1187 = vst.msk [vmem:[#allocation2 + $0x18] sm:$0xff] %vm366_vm7, %v1176_v33  ;;  %v11998_v38 = vpop.f32.mrb[26].mxu0  ;;  %v801_v20 = vld [vmem:[#allocation2 + $0x48] sm:$0xff]  ;;  %v14025_v15 = vsel %vm282_vm0, %v13989_v1, 0  ;;  %v14037_v33 = vrot.slane %v5425_v8, 2 }
 0x11e   : > { %1185 = vst.msk [vmem:[#allocation2 + $0x8] sm:$0xff] %vm366_vm7, %v1174_v50  ;;  %v11983_v4 = vpop.f32.mrb[28].mxu1  ;;  %v14004_v44 = vpop.f32.mrb[27].mxu0  ;;  %12248 = vmatmul.mubr.msk.bf16.gmra.mrb[132].mxu0 %vm263_vm1, %v13907_v22  ;;  %v5437_v22 = vshll.u32 %v13981_v45, 16  ;;  %v12847_v50 = vld [vmem:[%s13068_s25 + $0x9c] sm:$0xff]  }
 0x11f   : > { %v993_v26 = vadd.f32 %v11983_v4, %v802_v60  ;;  %v969_v32 = vpop.f32.mrb[29].mxu1  ;;  %12267 = vmatprep.mubr.msk.bf16.mxu0 %vm263_vm1, %v5229_v52  ;;  %v5659_v60 = vshll.u32 %v14018_v49, 16  ;;  %v5446_v28 = vshll.u32 %v12847_v50, 16 }
 0x120   : > { %v1023_v24 = vld [vmem:[#allocation2 + $0x30] sm:$0xff]  ;;  %v991_v19 = vadd.f32 %v969_v32, %v800_v27  ;;  %v11984_v34 = vpop.f32.mrb[30].mxu1  ;;  %v14056_v27 = vpop.f32.mrb[28].mxu0 }
 0x121   : > { %v1179_v42 = vadd.f32 %v13918_v29, %v1023_v24  ;;  %1004 = vst.msk [vmem:[#allocation2 + $0x50] sm:$0xff] %vm366_vm7, %v993_v26  ;;  %v1021_v9 = vld [vmem:[#allocation2 + $0x20] sm:$0xff]  ;;  %v972_v43 = vpop.f32.mrb[31].mxu1  ;;  %v5234_v29 = vrot.slane %v13969_v61, 2  ;;  %v14066_v24 = vld [vmem:[%s13068_s25 + $0xd4] sm:$0xff]  }
 0x122   : > { %v1177_v30 = vadd.f32 %v13925_v10, %v1021_v9  ;;  %1002 = vst.msk [vmem:[#allocation2 + $0x40] sm:$0xff] %vm366_vm7, %v991_v19  ;;  %v1024_v59 = vld [vmem:[#allocation2 + $0x38] sm:$0xff]  ;;  %v992_v14 = vadd.f32 %v972_v43, %v801_v20  ;;  %v14033_v10 = vrot.slane %v5417_v47, 2  ;;  %v5648_v47 = vshrl.u32 %v13999_v7, 16  ;;  %v1209_v4 = vld [vmem:[#allocation2 + $0x10] sm:$0xff] }
 0x123   : > { %1190 = vst.msk [vmem:[#allocation2 + $0x30] sm:$0xff] %vm366_vm7, %v1179_v42  ;;  %v1180_v46 = vadd.f32 %v13934_v58, %v1024_v59  ;;  %v1022_v53 = vld [vmem:[#allocation2 + $0x28] sm:$0xff]  ;;  %12234 = vmatmul.mubr.msk.bf16.gmra.mrb[136].mxu1 %vm263_vm1, %v13901_v2  ;;  %v14044_v2 = vrot.slane %v5428_v56, 3  ;;  %v14046_v58 = vrot.slane %v5434_v41, 2  ;;  %v1207_v26 = vld [vmem:[#allocation2] sm:$0xff]  ;;  %v5042_v56 = vsel %vm3544_vm5, %v5039_v17, %v5041_v21 }
 0x124   : > { %1188 = vst.msk [vmem:[#allocation2 + $0x20] sm:$0xff] %vm366_vm7, %v1177_v30  ;;  %v1178_v35 = vadd.f32 %v13943_v31, %v1022_v53  ;;  %1003 = vst.msk [vmem:[#allocation2 + $0x48] sm:$0xff] %vm366_vm7, %v992_v14  ;;  %12253 = vmatprep.mubr.msk.bf16.mxu1 %vm263_vm1, %v5040_v25  ;;  %v5651_v31 = vshll.u32 %v13999_v7, 16  ;;  %v14063_v7 = vpop.f32.mrb[29].mxu0  ;;  %v1210_v38 = vld [vmem:[#allocation2 + $0x18] sm:$0xff]  ;;  %v5231_v9 = vsel %vm3544_vm5, %v5228_v18, %v5230_v16  ;;  %v5443_v20 = vshrl.u32 %v12847_v50, 16 }
 0x125   : > { %1191 = vst.msk [vmem:[#allocation2 + $0x38] sm:$0xff] %vm366_vm7, %v1180_v46  ;;  %v14068_v42 = vpop.f32.mrb[30].mxu0  ;;  %v1208_v52 = vld [vmem:[#allocation2 + $0x8] sm:$0xff]  ;;  %v5233_v18 = vsel %vm3544_vm5, %v5230_v16, %v5232_v0  ;;  %v14091_v14 = vrot.slane %v5437_v22, 3  ;;  %v14093_v46 = vrot.slane %v5648_v47, 2  ;;  %v5661_v53 = vrot.slane %v5659_v60, 3 }
 0x126   : > { %1189 = vst.msk [vmem:[#allocation2 + $0x28] sm:$0xff] %vm366_vm7, %v1178_v35  ;;  %v12003_v8 = vpop.f32.mrb[32].mxu1  ;;  %v14077_v30 = vpop.f32.mrb[31].mxu0  ;;  %12268 = vmatmul.mubr.msk.bf16.vlgmr.msra.gmra.mrb[136].mxu0 %vm263_vm1, %v5231_v9  ;;  %v14099_v21 = vrot.slane %v5651_v31, 3  ;;  %v14111_v35 = vrot.slane %v5443_v20, 2  ;;  %v14114_v22 = vld [vmem:[%s13068_s25 + $0xa4] sm:$0xff]   ;;  %v5237_v55 = vsel %vm3544_vm5, %v5234_v29, %v5236_v5 }
 0x127   : > { %v1364_v45 = vadd.f32 %v12003_v8, %v1209_v4  ;;  %v1316_v32 = vpop.f32.mrb[33].mxu1  ;;  %12294 = vmatpush3.bf16.msra.mxu0 %v13965_v11  ;;  %12271 = vmatprep.mubr.msk.bf16.mxu0 %vm263_vm1, %v5233_v18  ;;  %v14118_v50 = vrot.slane %v5446_v28, 3 }
 0x128   : > { %v1027_v19 = vld [vmem:[#allocation2 + $0x50] sm:$0xff]  ;;  %v1362_v34 = vadd.f32 %v1316_v32, %v1207_v26  ;;  %v12004_v41 = vpop.f32.mrb[34].mxu1  ;;  %v14122_v31 = vpop.f32.mrb[32].mxu0  ;;  %12646 = vmatprep.subr.msk.bf16.mxu0 %vm282_vm0, %v14104_v12  ;;  %v14132_v26 = vld [vmem:[%s13068_s25 + $0xdc] sm:$0xff]  }
 0x129   : > { %v1183_v17 = vadd.f32 %v13992_v6, %v1027_v19  ;;  %v1025_v43 = vld [vmem:[#allocation2 + $0x40] sm:$0xff]  ;;  %1375 = vst.msk [vmem:[#allocation2 + $0x10] sm:$0xff] %vm366_vm7, %v1364_v45  ;;  %v1365_v25 = vadd.f32 %v12004_v41, %v1210_v38  ;;  %v1319_v49 = vpop.f32.mrb[35].mxu1  ;;  %v14129_v8 = vpop.f32.mrb[33].mxu0  ;;  %v5674_v18 = vshrl.u32 %v14132_v26, 16 }
 0x12a   : > { %v1181_v6 = vadd.f32 %v13995_v37, %v1025_v43  ;;  %1373 = vst.msk [vmem:[#allocation2] sm:$0xff] %vm366_vm7, %v1362_v34  ;;  %v1363_v59 = vadd.f32 %v1319_v49, %v1208_v52  ;;  %v5658_v37 = vrot.slane %v5656_v54, 2  ;;  %v5668_v54 = vshll.u32 %v14066_v24, 16  ;;  %v14175_v52 = vld [vmem:[%s13068_s25 + $0xac] sm:$0x7f]  }
 0x12b   : > { %1194 = vst.msk [vmem:[#allocation2 + $0x50] sm:$0xff] %vm366_vm7, %v1183_v17  ;;  %v1026_v39 = vld [vmem:[#allocation2 + $0x48] sm:$0xff]  ;;  %1376 = vst.msk [vmem:[#allocation2 + $0x18] sm:$0xff] %vm366_vm7, %v1365_v25  ;;  %12254 = vmatmul.mubr.msk.bf16.vlgmr.msra.gmra.mrb[140].mxu1 %vm263_vm1, %v5042_v56  ;;  %v1211_v60 = vld [vmem:[#allocation2 + $0x20] sm:$0xff]  ;;  %v5235_v34 = vsel %vm3544_vm5, %v5232_v0, %v5234_v29  ;;  %v5452_v43 = vshrl.u32 %v14114_v22, 16  ;;  %v5455_v25 = vshll.u32 %v14114_v22, 16  ;;  %v5423_v29 = vor.u32 %v14035_v62, %v14033_v10 }
 0x12c   : > { %1192 = vst.msk [vmem:[#allocation2 + $0x40] sm:$0xff] %vm366_vm7, %v1181_v6  ;;  %v1182_v16 = vadd.f32 %v14004_v44, %v1026_v39  ;;  %1374 = vst.msk [vmem:[#allocation2 + $0x8] sm:$0xff] %vm366_vm7, %v1363_v59  ;;  %12280 = vmatpush3.bf16.msra.mxu1 %v13911_v3  ;;  %12257 = vmatprep.mubr.msk.bf16.mxu1 %vm263_vm1, %v5044_v23  ;;  %v5665_v44 = vshrl.u32 %v14066_v24, 16  ;;  %v1213_v3 = vld [vmem:[#allocation2 + $0x30] sm:$0xff]  ;;  %v1214_v56 = vld [vmem:[#allocation2 + $0x38] sm:$0xff]  ;;  %v14139_v24 = vpop.f32.mrb[34].mxu0  ;;  %v5654_v62 = vor.u32 %v14099_v21, %v14093_v46 }
 0x12d   : > { %12645 = vmatprep.subr.msk.bf16.mxu1 %vm282_vm0, %v13989_v1  ;;  %v5046_v1 = vsel %vm3544_vm5, %v5043_v63, %v5045_v36  ;;  %v1212_v20 = vld [vmem:[#allocation2 + $0x28] sm:$0xff]  ;;  %v14148_v13 = vpop.f32.mrb[35].mxu0  ;;  %v5048_v63 = vsel %vm3544_vm5, %v5045_v36, %v5047_v57  ;;  %v5670_v23 = vrot.slane %v5668_v54, 3  ;;  %v14188_v10 = vsel %vm282_vm0, %v14104_v12, 0 }
 0x12e   : > { %1193 = vst.msk [vmem:[#allocation2 + $0x48] sm:$0xff] %vm366_vm7, %v1182_v16  ;;  %v12007_v47 = vpop.f32.mrb[36].mxu1  ;;  %12272 = vmatmul.mubr.msk.bf16.gmra.mrb[140].mxu0 %vm263_vm1, %v5235_v34  ;;  %v5677_v6 = vshll.u32 %v14132_v26, 16  ;;  %v5683_v39 = vshrl.u32 %v14165_v51, 16  ;;  %v5461_v46 = vshrl.u32 %v14175_v52, 16  ;;  %v5464_v54 = vshll.u32 %v14175_v52, 16 }
 0x12f   : > { %v1368_v11 = vadd.f32 %v12007_v47, %v1213_v3  ;;  %v1332_v4 = vpop.f32.mrb[37].mxu1  ;;  %12275 = vmatprep.mubr.msk.bf16.mxu0 %vm263_vm1, %v5237_v55 }
 0x130   : > { %v1398_v45 = vld [vmem:[#allocation2 + $0x10] sm:$0xff]  ;;  %v1366_v32 = vadd.f32 %v1332_v4, %v1211_v60  ;;  %v12008_v19 = vpop.f32.mrb[38].mxu1  ;;  %v14198_v59 = vpop.f32.mrb[36].mxu0 }
 0x131   : > { %v1596_v38 = vadd.f32 %v14056_v27, %v1398_v45  ;;  %1379 = vst.msk [vmem:[#allocation2 + $0x30] sm:$0xff] %vm366_vm7, %v1368_v11  ;;  %v1396_v41 = vld [vmem:[#allocation2] sm:$0xff]  ;;  %v1369_v9 = vadd.f32 %v12008_v19, %v1214_v56  ;;  %v1335_v28 = vpop.f32.mrb[39].mxu1  ;;  %v12853_v11 = vld [vmem:[%s13068_s25 + $0xec] sm:$0x7f]   ;;  %v5440_v56 = vor.u32 %v14091_v14, %v14046_v58  ;;  %v5454_v14 = vrot.slane %v5452_v43, 2 }
 0x132   : > { %v1594_v0 = vadd.f32 %v14063_v7, %v1396_v41  ;;  %1377 = vst.msk [vmem:[#allocation2 + $0x20] sm:$0xff] %vm366_vm7, %v1366_v32  ;;  %v1399_v27 = vld [vmem:[#allocation2 + $0x18] sm:$0xff]  ;;  %v1367_v17 = vadd.f32 %v1335_v28, %v1212_v20  ;;  %v5667_v7 = vrot.slane %v5665_v44, 2  ;;  %v14201_v44 = vpop.f32.mrb[37].mxu0  ;;  %v5676_v41 = vrot.slane %v5674_v18, 2 }
 0x133   : > { %1607 = vst.msk [vmem:[#allocation2 + $0x10] sm:$0xff] %vm366_vm7, %v1596_v38  ;;  %v1597_v36 = vadd.f32 %v14068_v42, %v1399_v27  ;;  %1380 = vst.msk [vmem:[#allocation2 + $0x38] sm:$0xff] %vm366_vm7, %v1369_v9  ;;  %v1397_v61 = vld [vmem:[#allocation2 + $0x8] sm:$0xff]  ;;  %12258 = vmatmul.mubr.msk.bf16.gmra.mrb[144].mxu1 %vm263_vm1, %v5046_v1  ;;  %v14184_v42 = vor.u32 %v14044_v2, %v14037_v33  ;;  %v1217_v33 = vld [vmem:[#allocation2 + $0x50] sm:$0xff]  ;;  %v12026_v3 = vpop.f32.mrb[38].mxu0  ;;  %v14218_v1 = vor.u32 %v14118_v50, %v14111_v35 }
 0x134   : > { %1605 = vst.msk [vmem:[#allocation2] sm:$0xff] %vm366_vm7, %v1594_v0  ;;  %v1595_v49 = vadd.f32 %v14077_v30, %v1397_v61  ;;  %1378 = vst.msk [vmem:[#allocation2 + $0x28] sm:$0xff] %vm366_vm7, %v1367_v17  ;;  %12261 = vmatprep.mubr.msk.bf16.mxu1 %vm263_vm1, %v5048_v63  ;;  %v14193_v30 = vor.u32 %v5661_v53, %v5658_v37  ;;  %v1215_v16 = vld [vmem:[#allocation2 + $0x40] sm:$0xff]  ;;  %v14210_v32 = vpop.f32.mrb[39].mxu0  ;;  %v5679_v9 = vrot.slane %v5677_v6, 3  ;;  %v5457_v35 = vrot.slane %v5455_v25, 3 }
 0x135   : > { %1608 = vst.msk [vmem:[#allocation2 + $0x18] sm:$0xff] %vm366_vm7, %v1597_v36  ;;  %v5432_v47 = vsel %vm3923_vm6, %v5423_v29, %v14184_v42  ;;  %v1216_v26 = vld [vmem:[#allocation2 + $0x48] sm:$0xff]  ;;  %v5686_v50 = vshll.u32 %v14165_v51, 16  ;;  %v5671_v40 = vor.u32 %v5670_v23, %v5667_v7  ;;  %v5692_v48 = vshrl.u32 %v12853_v11, 16 }
 0x136   : > { %1606 = vst.msk [vmem:[#allocation2 + $0x8] sm:$0xff] %vm366_vm7, %v1595_v49  ;;  %v12011_v2 = vpop.f32.mrb[40].mxu1  ;;  %v5663_v19 = vsel %vm3923_vm6, %v5654_v62, %v14193_v30  ;;  %12276 = vmatmul.mubr.msk.bf16.gmra.mrb[144].mxu0 %vm263_vm1, %v5236_v5  ;;  %v5695_v5 = vshll.u32 %v12853_v11, 16  ;;  %v5466_v0 = vrot.slane %v5464_v54, 3  ;;  %v5441_v52 = vsel %vm3923_vm6, %v14184_v42, %v5440_v56 }
 0x137   : > { %v1372_v12 = vadd.f32 %v12011_v2, %v1217_v33  ;;  %v1348_v22 = vpop.f32.mrb[41].mxu1  ;;  %12295 = vmatprep.mubr.msk.bf16.mxu0 %vm263_vm1, %v5663_v19  ;;  %v5688_v51 = vrot.slane %v5686_v50, 3  ;;  %v5450_v23 = vsel %vm3923_vm6, %v5440_v56, %v14218_v1  ;;  %v5672_v62 = vsel %vm3923_vm6, %v14193_v30, %v5671_v40  ;;  %v12857_v19 = vld [vmem:[%s13068_s25 + $0x8] sm:$0xf8]  }
 0x138   : > { %v1402_v21 = vld [vmem:[#allocation2 + $0x30] sm:$0xff]  ;;  %v1370_v37 = vadd.f32 %v1348_v22, %v1215_v16  ;;  %v12012_v53 = vpop.f32.mrb[42].mxu1  ;;  %v14238_v55 = vpop.f32.mrb[40].mxu0  ;;  %v5694_v16 = vrot.slane %v5692_v48, 2  ;;  %v5697_v42 = vrot.slane %v5695_v5, 3 }
 0x139   : > { %v1600_v60 = vadd.f32 %v14122_v31, %v1402_v21  ;;  %1383 = vst.msk [vmem:[#allocation2 + $0x50] sm:$0xff] %vm366_vm7, %v1372_v12  ;;  %v1400_v4 = vld [vmem:[#allocation2 + $0x20] sm:$0xff]  ;;  %v1351_v45 = vpop.f32.mrb[43].mxu1  ;;  %v14242_v25 = vpop.f32.mrb[41].mxu0  ;;  %v5458_v53 = vor.u32 %v5457_v35, %v5454_v14 }
 0x13a   : > { %v1598_v34 = vadd.f32 %v14129_v8, %v1400_v4  ;;  %1381 = vst.msk [vmem:[#allocation2 + $0x40] sm:$0xff] %vm366_vm7, %v1370_v37  ;;  %v1403_v31 = vld [vmem:[#allocation2 + $0x38] sm:$0xff]  ;;  %v1371_v38 = vadd.f32 %v1351_v45, %v1216_v26  ;;  %v1630_v28 = vld [vmem:[#allocation2 + $0x10] sm:$0xff]  ;;  %v14246_v49 = vpop.f32.mrb[42].mxu0  ;;  %v14283_v54 = vor.u32 %v5697_v42, %v5694_v16 }
 0x13b   : > { %1611 = vst.msk [vmem:[#allocation2 + $0x30] sm:$0xff] %vm366_vm7, %v1600_v60  ;;  %v1601_v20 = vadd.f32 %v14139_v24, %v1403_v31  ;;  %v1401_v58 = vld [vmem:[#allocation2 + $0x28] sm:$0xff]  ;;  %12262 = vmatmul.mubr.msk.bf16.gmra.mrb[148].mxu1 %vm263_vm1, %v5047_v57  ;;  %v5463_v57 = vrot.slane %v5461_v46, 2  ;;  %v5685_v24 = vrot.slane %v5683_v39, 2  ;;  %v1628_v17 = vld [vmem:[#allocation2] sm:$0xff]  ;;  %v14254_v12 = vpop.f32.mrb[43].mxu0 }
 0x13c   : > { %1609 = vst.msk [vmem:[#allocation2 + $0x20] sm:$0xff] %vm366_vm7, %v1598_v34  ;;  %v1599_v8 = vadd.f32 %v14148_v13, %v1401_v58  ;;  %1382 = vst.msk [vmem:[#allocation2 + $0x48] sm:$0xff] %vm366_vm7, %v1371_v38  ;;  %12281 = vmatprep.mubr.msk.bf16.mxu1 %vm263_vm1, %v5432_v47  ;;  %v14240_v13 = vor.u32 %v5679_v9, %v5676_v41  ;;  %v1631_v29 = vld [vmem:[#allocation2 + $0x18] sm:$0xff]  ;;  %v14290_v26 = vld [vmem:[%s13068_s25 + $0x8c] sm:$0xff]  }
 0x13d   : > { %1612 = vst.msk [vmem:[#allocation2 + $0x38] sm:$0xff] %vm366_vm7, %v1601_v20  ;;  %v1629_v2 = vld [vmem:[#allocation2 + $0x8] sm:$0xff]  ;;  %v5689_v3 = vor.u32 %v5688_v51, %v5685_v24  ;;  %v14281_v47 = vor.u32 %v5466_v0, %v5463_v57  ;;  %v14300_v34 = vld [vmem:[%s13068_s25 + $0x10] sm:$0xff]   ;;  %v5459_v20 = vsel %vm3923_vm6, %v14218_v1, %v5458_v53 }
 0x13e   : > { %1610 = vst.msk [vmem:[#allocation2 + $0x28] sm:$0xff] %vm366_vm7, %v1599_v8  ;;  %v12031_v63 = vpop.f32.mrb[44].mxu1  ;;  %v5681_v30 = vsel %vm3923_vm6, %v5671_v40, %v14240_v13  ;;  %12296 = vmatmul.mubr.msk.bf16.vlgmr.msra.gmra.mrb[148].mxu0 %vm263_vm1, %v5672_v62  ;;  %v14337_v62 = vld [vmem:[%s13068_s25 + $0x9c] sm:$0xff]  }
 0x13f   : > { %v1772_v27 = vadd.f32 %v12031_v63, %v1630_v28  ;;  %v1724_v43 = vpop.f32.mrb[45].mxu1  ;;  %12322 = vmatpush3.bf16.msra.mxu0 %v14188_v10  ;;  %12299 = vmatprep.mubr.msk.bf16.mxu0 %vm263_vm1, %v5681_v30  ;;  %v5690_v14 = vsel %vm3923_vm6, %v14240_v13, %v5689_v3  ;;  %v5468_v48 = vsel %vm3923_vm6, %v5458_v53, %v14281_v47 }
 0x140   : > { %v1406_v36 = vld [vmem:[#allocation2 + $0x50] sm:$0xff]  ;;  %v1770_v61 = vadd.f32 %v1724_v43, %v1628_v17  ;;  %v12032_v7 = vpop.f32.mrb[46].mxu1  ;;  %v12049_v4 = vpop.f32.mrb[44].mxu0  ;;  %v5699_v5 = vsel %vm3923_vm6, %v5689_v3, %v14283_v54  ;;  %v5879_v17 = vrot.slane %v14290_v26, 3  ;;  %v6067_v43 = vrot.slane %v12857_v19, 3 }
 0x141   : > { %v1604_v18 = vadd.f32 %v14198_v59, %v1406_v36  ;;  %v1404_v6 = vld [vmem:[#allocation2 + $0x40] sm:$0xff]  ;;  %1783 = vst.msk [vmem:[#allocation2 + $0x10] sm:$0xff] %vm366_vm7, %v1772_v27  ;;  %v1773_v33 = vadd.f32 %v12032_v7, %v1631_v29  ;;  %v1727_v39 = vpop.f32.mrb[47].mxu1  ;;  %v14263_v59 = vld [vmem:[%s16210_s1 + $0x74] sm:$0xf]  ;;  %v14296_v56 = vpop.f32.mrb[45].mxu0 }
 0x142   : > { %v1602_v22 = vadd.f32 %v14201_v44, %v1404_v6  ;;  %1781 = vst.msk [vmem:[#allocation2] sm:$0xff] %vm366_vm7, %v1770_v61  ;;  %v1771_v46 = vadd.f32 %v1727_v39, %v1629_v2  ;;  %v14272_v44 = vld [vmem:[%s16210_s1 + $0x78] sm:$0xf]  ;;  %v1634_v11 = vld [vmem:[#allocation2 + $0x30] sm:$0xff]  ;;  %v12050_v58 = vpop.f32.mrb[46].mxu0 }
 0x143   : > { %1615 = vst.msk [vmem:[#allocation2 + $0x50] sm:$0xff] %vm366_vm7, %v1604_v18  ;;  %v1405_v21 = vld [vmem:[#allocation2 + $0x48] sm:$0xff]  ;;  %1784 = vst.msk [vmem:[#allocation2 + $0x18] sm:$0xff] %vm366_vm7, %v1773_v33  ;;  %12282 = vmatmul.mubr.msk.bf16.vlgmr.msra.gmra.mrb[152].mxu1 %vm263_vm1, %v5441_v52  ;;  %12648 = vmatprep.subr.msk.bf16.mxu0 %vm282_vm0, %v14272_v44  ;;  %v1632_v45 = vld [vmem:[#allocation2 + $0x20] sm:$0xff]  ;;  %v1919_v24 = vpop.f32.mrb[47].mxu0 }
 0x144   : > { %1613 = vst.msk [vmem:[#allocation2 + $0x40] sm:$0xff] %vm366_vm7, %v1602_v22  ;;  %v1603_v37 = vadd.f32 %v14210_v32, %v1405_v21  ;;  %1782 = vst.msk [vmem:[#allocation2 + $0x8] sm:$0xff] %vm366_vm7, %v1771_v46  ;;  %12308 = vmatpush3.bf16.msra.mxu1 %v14025_v15  ;;  %12285 = vmatprep.mubr.msk.bf16.mxu1 %vm263_vm1, %v5450_v23  ;;  %v14287_v15 = vld [vmem:[%s13068_s25 + $0x84] sm:$0xf8]   ;;  %v1635_v41 = vld [vmem:[#allocation2 + $0x38] sm:$0xff] }
 0x145   : > { %12647 = vmatprep.subr.msk.bf16.mxu1 %vm282_vm0, %v14263_v59  ;;  %v1633_v40 = vld [vmem:[#allocation2 + $0x28] sm:$0xff]  ;;  %v5878_v27 = vrot.slane %v14287_v15, 3  ;;  %v14332_v29 = vld [vmem:[%s13068_s25 + $0x94] sm:$0xff]  }
 0x146   : > { %1614 = vst.msk [vmem:[#allocation2 + $0x48] sm:$0xff] %vm366_vm7, %v1603_v37  ;;  %v12035_v60 = vpop.f32.mrb[48].mxu1  ;;  %12300 = vmatmul.mubr.msk.bf16.gmra.mrb[152].mxu0 %vm263_vm1, %v5690_v14  ;;  %v14340_v39 = vld [vmem:[%s13068_s25 + $0x18] sm:$0xff]   ;;  %v14352_v37 = vld [vmem:[%s13068_s25 + $0x20] sm:$0xff]   ;;  %v14378_v19 = vld [vmem:[%s13068_s25 + $0x8] sm:$0xf8]  }
 0x147   : > { %v1776_v10 = vadd.f32 %v12035_v60, %v1634_v11  ;;  %v1740_v32 = vpop.f32.mrb[49].mxu1  ;;  %12303 = vmatprep.mubr.msk.bf16.mxu0 %vm263_vm1, %v5699_v5  ;;  %v5880_v30 = vsel %vm4386_vm8, %v5878_v27, %v5879_v17  ;;  %v14357_v60 = vld [vmem:[%s13068_s25 + $0xa4] sm:$0xff]  }
 0x148   : > { %v1806_v31 = vld [vmem:[#allocation2 + $0x10] sm:$0xff]  ;;  %v1774_v38 = vadd.f32 %v1740_v32, %v1632_v45  ;;  %v12036_v9 = vpop.f32.mrb[50].mxu1  ;;  %v14329_v61 = vpop.f32.mrb[48].mxu0  ;;  %v6286_v45 = vsel %vm282_vm0, %v14263_v59, 0  ;;  %v5883_v32 = vrot.slane %v14337_v62, 3  ;;  %v6072_v59 = vrot.slane %v14352_v37, 3 }
 0x149   : > { %v1948_v35 = vadd.f32 %v14238_v55, %v1806_v31  ;;  %1787 = vst.msk [vmem:[#allocation2 + $0x30] sm:$0xff] %vm366_vm7, %v1776_v10  ;;  %v1804_v50 = vld [vmem:[#allocation2] sm:$0xff]  ;;  %v1777_v8 = vadd.f32 %v12036_v9, %v1635_v41  ;;  %v1743_v57 = vpop.f32.mrb[51].mxu1  ;;  %v14334_v23 = vpop.f32.mrb[49].mxu0  ;;  %v5881_v10 = vrot.slane %v14332_v29, 3  ;;  %v14381_v31 = vld [vmem:[%s13068_s25 + $0x10] sm:$0xff]  }
 0x14a   : > { %v1946_v1 = vadd.f32 %v14242_v25, %v1804_v50  ;;  %1785 = vst.msk [vmem:[#allocation2 + $0x20] sm:$0xff] %vm366_vm7, %v1774_v38  ;;  %v1807_v28 = vld [vmem:[#allocation2 + $0x18] sm:$0xff]  ;;  %v1775_v63 = vadd.f32 %v1743_v57, %v1633_v40  ;;  %v6068_v25 = vrot.slane %v14300_v34, 3  ;;  %v1638_v51 = vld [vmem:[#allocation2 + $0x50] sm:$0xff]  ;;  %v12054_v2 = vpop.f32.mrb[50].mxu0  ;;  %v6447_v29 = vshrl.u32 %v14378_v19, 16 }
 0x14b   : > { %1959 = vst.msk [vmem:[#allocation2 + $0x10] sm:$0xff] %vm366_vm7, %v1948_v35  ;;  %v1949_v55 = vadd.f32 %v14246_v49, %v1807_v28  ;;  %1788 = vst.msk [vmem:[#allocation2 + $0x38] sm:$0xff] %vm366_vm7, %v1777_v8  ;;  %v1805_v13 = vld [vmem:[#allocation2 + $0x8] sm:$0xff]  ;;  %12286 = vmatmul.mubr.msk.bf16.gmra.mrb[156].mxu1 %vm263_vm1, %v5459_v20  ;;  %v1636_v52 = vld [vmem:[#allocation2 + $0x40] sm:$0xff]  ;;  %v14343_v46 = vpop.f32.mrb[51].mxu0  ;;  %v5885_v20 = vrot.slane %v14357_v60, 3 }
 0x14c   : > { %1957 = vst.msk [vmem:[#allocation2] sm:$0xff] %vm366_vm7, %v1946_v1  ;;  %v1947_v0 = vadd.f32 %v14254_v12, %v1805_v13  ;;  %1786 = vst.msk [vmem:[#allocation2 + $0x28] sm:$0xff] %vm366_vm7, %v1775_v63  ;;  %12289 = vmatprep.mubr.msk.bf16.mxu1 %vm263_vm1, %v5468_v48  ;;  %v6069_v21 = vsel %vm4386_vm8, %v6067_v43, %v6068_v25  ;;  %v14393_v8 = vld [vmem:[%s13068_s25 + $0x28] sm:$0xff]   ;;  %v14396_v40 = vld [vmem:[%s13068_s25 + $0x30] sm:$0x7f]   ;;  %v5882_v1 = vsel %vm4386_vm8, %v5879_v17, %v5881_v10 }
 0x14d   : > { %1960 = vst.msk [vmem:[#allocation2 + $0x18] sm:$0xff] %vm366_vm7, %v1949_v55  ;;  %v1637_v42 = vld [vmem:[#allocation2 + $0x48] sm:$0xff]  ;;  %v5884_v63 = vsel %vm4386_vm8, %v5881_v10, %v5883_v32  ;;  %v14419_v34 = vld [vmem:[%s16210_s1 + $0x7c] sm:$0xf]  ;;  %v14470_v10 = vrot.slane %v6447_v29, 3 }
 0x14e   : > { %1958 = vst.msk [vmem:[#allocation2 + $0x8] sm:$0xff] %vm366_vm7, %v1947_v0  ;;  %v12039_v36 = vpop.f32.mrb[52].mxu1  ;;  %12304 = vmatmul.mubr.msk.bf16.gmra.mrb[156].mxu0 %vm263_vm1, %v14283_v54  ;;  %v6518_v54 = vsel %vm282_vm0, %v14272_v44, 0  ;;  %v14443_v2 = vld [vmem:[%s13068_s25 + $0x18] sm:$0xff]  }
 0x14f   : > { %v1780_v7 = vadd.f32 %v12039_v36, %v1638_v51  ;;  %v1756_v49 = vpop.f32.mrb[53].mxu1  ;;  %12323 = vmatprep.mubr.msk.bf16.mxu0 %vm263_vm1, %v6069_v21 }
 0x150   : > { %v1810_v18 = vld [vmem:[#allocation2 + $0x30] sm:$0xff]  ;;  %v1778_v6 = vadd.f32 %v1756_v49, %v1636_v52  ;;  %v12040_v33 = vpop.f32.mrb[54].mxu1  ;;  %v14384_v9 = vpop.f32.mrb[52].mxu0  ;;  %v6450_v49 = vshll.u32 %v14378_v19, 16 }
 0x151   : > { %v1952_v12 = vadd.f32 %v12049_v4, %v1810_v18  ;;  %1791 = vst.msk [vmem:[#allocation2 + $0x50] sm:$0xff] %vm366_vm7, %v1780_v7  ;;  %v1808_v16 = vld [vmem:[#allocation2 + $0x20] sm:$0xff]  ;;  %v1759_v22 = vpop.f32.mrb[55].mxu1  ;;  %v14390_v50 = vpop.f32.mrb[53].mxu0  ;;  %v6458_v7 = vshll.u32 %v14381_v31, 16  ;;  %v6074_v33 = vrot.slane %v14393_v8, 3 }
 0x152   : > { %v1950_v53 = vadd.f32 %v14296_v56, %v1808_v16  ;;  %1789 = vst.msk [vmem:[#allocation2 + $0x40] sm:$0xff] %vm366_vm7, %v1778_v6  ;;  %v1811_v3 = vld [vmem:[#allocation2 + $0x38] sm:$0xff]  ;;  %v1779_v11 = vadd.f32 %v1759_v22, %v1637_v42  ;;  %v1982_v38 = vld [vmem:[#allocation2 + $0x10] sm:$0xff]  ;;  %v14401_v28 = vpop.f32.mrb[54].mxu0  ;;  %v14472_v62 = vrot.slane %v6450_v49, 4 }
 0x153   : > { %1963 = vst.msk [vmem:[#allocation2 + $0x30] sm:$0xff] %vm366_vm7, %v1952_v12  ;;  %v1953_v4 = vadd.f32 %v12050_v58, %v1811_v3  ;;  %v1809_v15 = vld [vmem:[#allocation2 + $0x28] sm:$0xff]  ;;  %12290 = vmatmul.mubr.msk.bf16.gmra.mrb[160].mxu1 %vm263_vm1, %v14281_v47  ;;  %v6070_v47 = vrot.slane %v14340_v39, 3  ;;  %v1980_v14 = vld [vmem:[#allocation2] sm:$0xff]  ;;  %v14411_v51 = vpop.f32.mrb[55].mxu0  ;;  %v6076_v39 = vrot.slane %v14396_v40, 3 }
 0x154   : > { %1961 = vst.msk [vmem:[#allocation2 + $0x20] sm:$0xff] %vm366_vm7, %v1950_v53  ;;  %v1951_v56 = vadd.f32 %v1919_v24, %v1809_v15  ;;  %1790 = vst.msk [vmem:[#allocation2 + $0x48] sm:$0xff] %vm366_vm7, %v1779_v11  ;;  %12309 = vmatprep.mubr.msk.bf16.mxu1 %vm263_vm1, %v5880_v30  ;;  %v14388_v58 = vld [vmem:[%s13068_s25 + $0xac] sm:$0x7f]   ;;  %v1983_v48 = vld [vmem:[#allocation2 + $0x18] sm:$0xff]  ;;  %v5886_v30 = vsel %vm4386_vm8, %v5883_v32, %v5885_v20 }
 0x155   : > { %1964 = vst.msk [vmem:[#allocation2 + $0x38] sm:$0xff] %vm366_vm7, %v1953_v4  ;;  %v6071_v55 = vsel %vm4386_vm8, %v6068_v25, %v6070_v47  ;;  %v1981_v43 = vld [vmem:[#allocation2 + $0x8] sm:$0xff]  ;;  %v6073_v17 = vsel %vm4386_vm8, %v6070_v47, %v6072_v59  ;;  %v6455_v25 = vshrl.u32 %v14381_v31, 16  ;;  %v5887_v6 = vrot.slane %v14388_v58, 3  ;;  %v14451_v16 = vld [vmem:[%s13068_s25 + $0x50] sm:$0xff]   ;;  %v14466_v53 = vld [vmem:[%s13068_s25 + $0x20] sm:$0xff]  }
 0x156   : > { %1962 = vst.msk [vmem:[#allocation2 + $0x28] sm:$0xff] %vm366_vm7, %v1951_v56  ;;  %v12059_v41 = vpop.f32.mrb[56].mxu1  ;;  %12324 = vmatmul.mubr.msk.bf16.vlgmr.msra.gmra.mrb[160].mxu0 %vm263_vm1, %v6071_v55  ;;  %v14448_v12 = vld [vmem:[%s13068_s25 + $0x48] sm:$0xf8]   ;;  %v6075_v31 = vsel %vm4386_vm8, %v6072_v59, %v6074_v33  ;;  %v6077_v59 = vsel %vm4386_vm8, %v6074_v33, %v6076_v39  ;;  %v6257_v55 = vrot.slane %v14451_v16, 3 }
 0x157   : > { %v2173_v44 = vadd.f32 %v12059_v41, %v1982_v38  ;;  %v2125_v35 = vpop.f32.mrb[57].mxu1  ;;  %12350 = vmatpush3.bf16.msra.mxu0 %v6518_v54  ;;  %12327 = vmatprep.mubr.msk.bf16.mxu0 %vm263_vm1, %v6073_v17  ;;  %v6457_v42 = vrot.slane %v6455_v25, 3  ;;  %v6464_v38 = vshrl.u32 %v14443_v2, 16  ;;  %v6467_v41 = vshll.u32 %v14443_v2, 16 }
 0x158   : > { %v1814_v57 = vld [vmem:[#allocation2 + $0x50] sm:$0xff]  ;;  %v2171_v24 = vadd.f32 %v2125_v35, %v1980_v14  ;;  %v12060_v5 = vpop.f32.mrb[58].mxu1  ;;  %v14459_v21 = vpop.f32.mrb[56].mxu0  ;;  %v5888_v37 = vsel %vm4386_vm8, %v5885_v20, %v5887_v6  ;;  %v6476_v17 = vshll.u32 %v14466_v53, 16 }
 0x159   : > { %v1956_v13 = vadd.f32 %v14329_v61, %v1814_v57  ;;  %v1812_v0 = vld [vmem:[#allocation2 + $0x40] sm:$0xff]  ;;  %2184 = vst.msk [vmem:[#allocation2 + $0x10] sm:$0xff] %vm366_vm7, %v2173_v44  ;;  %v2174_v27 = vadd.f32 %v12060_v5, %v1983_v48  ;;  %v2128_v26 = vpop.f32.mrb[59].mxu1  ;;  %v14468_v15 = vpop.f32.mrb[57].mxu0 }
 0x15a   : > { %v1954_v36 = vadd.f32 %v14334_v23, %v1812_v0  ;;  %2182 = vst.msk [vmem:[#allocation2] sm:$0xff] %vm366_vm7, %v2171_v24  ;;  %v2172_v61 = vadd.f32 %v2128_v26, %v1981_v43  ;;  %v14434_v23 = vld [vmem:[%s16210_s1 + $0x80] sm:$0xf]  ;;  %v1986_v22 = vld [vmem:[#allocation2 + $0x30] sm:$0xff]  ;;  %v14474_v19 = vpop.f32.mrb[58].mxu0  ;;  %v6453_v43 = vor.u32 %v14472_v62, %v14470_v10 }
 0x15b   : > { %1967 = vst.msk [vmem:[#allocation2 + $0x50] sm:$0xff] %vm366_vm7, %v1956_v13  ;;  %v1813_v52 = vld [vmem:[#allocation2 + $0x48] sm:$0xff]  ;;  %2185 = vst.msk [vmem:[#allocation2 + $0x18] sm:$0xff] %vm366_vm7, %v2174_v27  ;;  %12310 = vmatmul.mubr.msk.bf16.vlgmr.msra.gmra.mrb[164].mxu1 %vm263_vm1, %v5882_v1  ;;  %12650 = vmatprep.subr.msk.bf16.mxu0 %vm282_vm0, %v14434_v23  ;;  %v1984_v11 = vld [vmem:[#allocation2 + $0x20] sm:$0xff]  ;;  %v14483_v24 = vpop.f32.mrb[59].mxu0  ;;  %v6473_v1 = vshrl.u32 %v14466_v53, 16 }
 0x15c   : > { %1965 = vst.msk [vmem:[#allocation2 + $0x40] sm:$0xff] %vm366_vm7, %v1954_v36  ;;  %v1955_v18 = vadd.f32 %v14343_v46, %v1813_v52  ;;  %2183 = vst.msk [vmem:[#allocation2 + $0x8] sm:$0xff] %vm366_vm7, %v2172_v61  ;;  %12336 = vmatpush3.bf16.msra.mxu1 %v6286_v45  ;;  %12313 = vmatprep.mubr.msk.bf16.mxu1 %vm263_vm1, %v5884_v63  ;;  %v6460_v45 = vrot.slane %v6458_v7, 4  ;;  %v1987_v47 = vld [vmem:[#allocation2 + $0x38] sm:$0xff]  ;;  %v14497_v63 = vld [vmem:[%s13068_s25 + $0x28] sm:$0xff]  }
 0x15d   : > { %12649 = vmatprep.subr.msk.bf16.mxu1 %vm282_vm0, %v14419_v34  ;;  %v1985_v8 = vld [vmem:[#allocation2 + $0x28] sm:$0xff]  ;;  %v12877_v0 = vld [vmem:[%s13068_s25 + $0x30] sm:$0xff]   ;;  %v14514_v27 = vld [vmem:[%s13068_s25 + $0x58] sm:$0xff]   ;;  %v6475_v52 = vrot.slane %v6473_v1, 3  ;;  %v6482_v49 = vshrl.u32 %v14497_v63, 16 }
 0x15e   : > { %1966 = vst.msk [vmem:[#allocation2 + $0x48] sm:$0xff] %vm366_vm7, %v1955_v18  ;;  %v12063_v46 = vpop.f32.mrb[60].mxu1  ;;  %12328 = vmatmul.mubr.msk.bf16.gmra.mrb[164].mxu0 %vm263_vm1, %v6075_v31  ;;  %v14518_v26 = vor.u32 %v6460_v45, %v6457_v42  ;;  %v14525_v7 = vld [vmem:[%s13068_s25 + $0x60] sm:$0xff]   ;;  %v6491_v53 = vshrl.u32 %v12877_v0, 16  ;;  %v6478_v31 = vrot.slane %v6476_v17, 4 }
 0x15f   : > { %v2177_v3 = vadd.f32 %v12063_v46, %v1986_v22  ;;  %v2141_v4 = vpop.f32.mrb[61].mxu1  ;;  %12331 = vmatprep.mubr.msk.bf16.mxu0 %vm263_vm1, %v6077_v59  ;;  %v6261_v58 = vrot.slane %v14525_v7, 3 }
 0x160   : > { %v2207_v32 = vld [vmem:[#allocation2 + $0x10] sm:$0xff]  ;;  %v2175_v56 = vadd.f32 %v2141_v4, %v1984_v11  ;;  %v12064_v54 = vpop.f32.mrb[62].mxu1  ;;  %v14522_v29 = vpop.f32.mrb[60].mxu0 }
 0x161   : > { %v2398_v44 = vadd.f32 %v14384_v9, %v2207_v32  ;;  %2188 = vst.msk [vmem:[#allocation2 + $0x30] sm:$0xff] %vm366_vm7, %v2177_v3  ;;  %v2205_v14 = vld [vmem:[#allocation2] sm:$0xff]  ;;  %v2178_v35 = vadd.f32 %v12064_v54, %v1987_v47  ;;  %v2144_v57 = vpop.f32.mrb[63].mxu1  ;;  %v14528_v2 = vpop.f32.mrb[61].mxu0  ;;  %v6494_v3 = vshll.u32 %v12877_v0, 16 }
 0x162   : > { %v2396_v9 = vadd.f32 %v14390_v50, %v2205_v14  ;;  %2186 = vst.msk [vmem:[#allocation2 + $0x20] sm:$0xff] %vm366_vm7, %v2175_v56  ;;  %v2208_v48 = vld [vmem:[#allocation2 + $0x18] sm:$0xff]  ;;  %v2176_v5 = vadd.f32 %v2144_v57, %v1985_v8  ;;  %v6256_v50 = vrot.slane %v14448_v12, 3  ;;  %v1990_v25 = vld [vmem:[#allocation2 + $0x50] sm:$0xff]  ;;  %v12082_v46 = vpop.f32.mrb[62].mxu0  ;;  %v6462_v56 = vsel %vm6445_vm9, %v6453_v43, %v14518_v26 }
 0x163   : > { %2409 = vst.msk [vmem:[#allocation2 + $0x10] sm:$0xff] %vm366_vm7, %v2398_v44  ;;  %v2399_v60 = vadd.f32 %v14401_v28, %v2208_v48  ;;  %2189 = vst.msk [vmem:[#allocation2 + $0x38] sm:$0xff] %vm366_vm7, %v2178_v35  ;;  %v2206_v20 = vld [vmem:[#allocation2 + $0x8] sm:$0xff]  ;;  %12314 = vmatmul.mubr.msk.bf16.gmra.mrb[168].mxu1 %vm263_vm1, %v5886_v30  ;;  %v6466_v28 = vrot.slane %v6464_v38, 3  ;;  %v1988_v61 = vld [vmem:[#allocation2 + $0x40] sm:$0xff]  ;;  %v6485_v30 = vshll.u32 %v14497_v63, 16  ;;  %v14574_v48 = vor.u32 %v6478_v31, %v6475_v52 }
 0x164   : > { %2407 = vst.msk [vmem:[#allocation2] sm:$0xff] %vm366_vm7, %v2396_v9  ;;  %v2397_v13 = vadd.f32 %v14411_v51, %v2206_v20  ;;  %2187 = vst.msk [vmem:[#allocation2 + $0x28] sm:$0xff] %vm366_vm7, %v2176_v5  ;;  %12317 = vmatprep.mubr.msk.bf16.mxu1 %vm263_vm1, %v5888_v37  ;;  %v6469_v51 = vrot.slane %v6467_v41, 4  ;;  %v14533_v45 = vpop.f32.mrb[63].mxu0  ;;  %v6258_v32 = vsel %vm4386_vm8, %v6256_v50, %v6257_v55  ;;  %v14543_v38 = vld [vmem:[%s13068_s25 + $0x48] sm:$0xf8]  }
 0x165   : > { %2410 = vst.msk [vmem:[#allocation2 + $0x18] sm:$0xff] %vm366_vm7, %v2399_v60  ;;  %v1989_v10 = vld [vmem:[#allocation2 + $0x48] sm:$0xff]  ;;  %v6749_v14 = vsel %vm282_vm0, %v14419_v34, 0  ;;  %v6484_v34 = vrot.slane %v6482_v49, 3  ;;  %v6496_v8 = vrot.slane %v6494_v3, 4  ;;  %v14566_v57 = vld [vmem:[%s13068_s25 + $0x50] sm:$0xff]  }
 0x166   : > { %2408 = vst.msk [vmem:[#allocation2 + $0x8] sm:$0xff] %vm366_vm7, %v2397_v13  ;;  %v12067_v36 = vpop.f32.mrb[64].mxu1  ;;  %12332 = vmatmul.mubr.msk.bf16.gmra.mrb[168].mxu0 %vm263_vm1, %v6076_v39  ;;  %v6470_v40 = vor.u32 %v6469_v51, %v6466_v28  ;;  %v6487_v39 = vrot.slane %v6485_v30, 4  ;;  %v14572_v9 = vld [vmem:[%s13068_s25 + $0x68] sm:$0xff]   ;;  %v14580_v20 = vld [vmem:[%s13068_s25 + $0x70] sm:$0x7f]  }
 0x167   : > { %v2181_v18 = vadd.f32 %v12067_v36, %v1990_v25  ;;  %v2157_v33 = vpop.f32.mrb[65].mxu1  ;;  %12351 = vmatprep.mubr.msk.bf16.mxu0 %vm263_vm1, %v6462_v56  ;;  %v6681_v50 = vshll.u32 %v14543_v38, 16  ;;  %v14591_v25 = vld [vmem:[%s13068_s25 + $0x58] sm:$0xff]   ;;  %v14621_v30 = vld [vmem:[%s16210_s1 + $0x88] sm:$0xf]  ;;  %v6263_v3 = vrot.slane %v14572_v9, 3 }
 0x168   : > { %v2211_v12 = vld [vmem:[#allocation2 + $0x30] sm:$0xff]  ;;  %v2179_v42 = vadd.f32 %v2157_v33, %v1988_v61  ;;  %v12068_v22 = vpop.f32.mrb[66].mxu1  ;;  %v14569_v59 = vpop.f32.mrb[64].mxu0  ;;  %v6471_v17 = vsel %vm6445_vm9, %v14518_v26, %v6470_v40 }
 0x169   : > { %v2402_v11 = vadd.f32 %v14459_v21, %v2211_v12  ;;  %2192 = vst.msk [vmem:[#allocation2 + $0x50] sm:$0xff] %vm366_vm7, %v2181_v18  ;;  %v2209_v4 = vld [vmem:[#allocation2 + $0x20] sm:$0xff]  ;;  %v2160_v62 = vpop.f32.mrb[67].mxu1  ;;  %v14577_v60 = vpop.f32.mrb[65].mxu0  ;;  %v6686_v12 = vshrl.u32 %v14566_v57, 16 }
 0x16a   : > { %v2400_v47 = vadd.f32 %v14468_v15, %v2209_v4  ;;  %2190 = vst.msk [vmem:[#allocation2 + $0x40] sm:$0xff] %vm366_vm7, %v2179_v42  ;;  %v2212_v54 = vld [vmem:[#allocation2 + $0x38] sm:$0xff]  ;;  %v2180_v21 = vadd.f32 %v2160_v62, %v1989_v10  ;;  %v6259_v15 = vrot.slane %v14514_v27, 3  ;;  %v14586_v51 = vpop.f32.mrb[66].mxu0  ;;  %v14608_v42 = vld [vmem:[%s16210_s1 + $0x84] sm:$0xf] }
 0x16b   : > { %2413 = vst.msk [vmem:[#allocation2 + $0x30] sm:$0xff] %vm366_vm7, %v2402_v11  ;;  %v2403_v41 = vadd.f32 %v14474_v19, %v2212_v54  ;;  %v2210_v44 = vld [vmem:[#allocation2 + $0x28] sm:$0xff]  ;;  %12318 = vmatmul.mubr.msk.bf16.gmra.mrb[172].mxu1 %vm263_vm1, %v5887_v6  ;;  %v6924_v6 = vsel %vm282_vm0, %v14434_v23, 0  ;;  %v6493_v19 = vrot.slane %v6491_v53, 3  ;;  %v6678_v23 = vshrl.u32 %v14543_v38, 16  ;;  %v2430_v1 = vld [vmem:[#allocation2] sm:$0xff] }
 0x16c   : > { %2411 = vst.msk [vmem:[#allocation2 + $0x20] sm:$0xff] %vm366_vm7, %v2400_v47  ;;  %v2401_v35 = vadd.f32 %v14483_v24, %v2210_v44  ;;  %2191 = vst.msk [vmem:[#allocation2 + $0x48] sm:$0xff] %vm366_vm7, %v2180_v21  ;;  %12337 = vmatprep.mubr.msk.bf16.mxu1 %vm263_vm1, %v6258_v32  ;;  %v2432_v24 = vld [vmem:[#allocation2 + $0x10] sm:$0xff]  ;;  %v2433_v0 = vld [vmem:[#allocation2 + $0x18] sm:$0xff]  ;;  %v6260_v43 = vsel %vm4386_vm8, %v6257_v55, %v6259_v15  ;;  %v14595_v33 = vpop.f32.mrb[67].mxu0  ;;  %v6262_v16 = vsel %vm4386_vm8, %v6259_v15, %v6261_v58 }
 0x16d   : > { %2414 = vst.msk [vmem:[#allocation2 + $0x38] sm:$0xff] %vm366_vm7, %v2403_v41  ;;  %v2431_v49 = vld [vmem:[#allocation2 + $0x8] sm:$0xff]  ;;  %v14611_v22 = vld [vmem:[%s13068_s25 + $0x60] sm:$0xff]   ;;  %v6488_v11 = vor.u32 %v6487_v39, %v6484_v34  ;;  %v6265_v4 = vrot.slane %v14580_v20, 3  ;;  %v14630_v10 = vor.u32 %v6496_v8, %v6493_v19  ;;  %v14632_v62 = vrot.slane %v6678_v23, 3 }
 0x16e   : > { %2412 = vst.msk [vmem:[#allocation2 + $0x28] sm:$0xff] %vm366_vm7, %v2401_v35  ;;  %v12087_v37 = vpop.f32.mrb[68].mxu1  ;;  %12352 = vmatmul.mubr.msk.bf16.vlgmr.msra.gmra.mrb[172].mxu0 %vm263_vm1, %v6471_v17  ;;  %v14637_v47 = vrot.slane %v6681_v50, 4  ;;  %v6695_v54 = vshrl.u32 %v14591_v25, 16  ;;  %v6698_v21 = vshll.u32 %v14591_v25, 16  ;;  %v6688_v15 = vrot.slane %v6686_v12, 3 }
 0x16f   : > { %v2587_v5 = vadd.f32 %v12087_v37, %v2432_v24  ;;  %v2539_v63 = vpop.f32.mrb[69].mxu1  ;;  %12378 = vmatpush3.bf16.msra.mxu0 %v6924_v6  ;;  %v6704_v35 = vshrl.u32 %v14611_v22, 16  ;;  %v6264_v19 = vsel %vm4386_vm8, %v6261_v58, %v6263_v3  ;;  %v6707_v24 = vshll.u32 %v14611_v22, 16  ;;  %v14657_v37 = vld [vmem:[%s13068_s25 + $0x68] sm:$0xff]   ;;  %v12886_v17 = vld [vmem:[%s13068_s25 + $0x70] sm:$0xff]  }
 0x170   : > { %v2215_v13 = vld [vmem:[#allocation2 + $0x50] sm:$0xff]  ;;  %v2585_v28 = vadd.f32 %v2539_v63, %v2430_v1  ;;  %v12088_v27 = vpop.f32.mrb[70].mxu1  ;;  %v14635_v56 = vpop.f32.mrb[68].mxu0  ;;  %12652 = vmatprep.subr.msk.bf16.mxu0 %vm282_vm0, %v14621_v30  ;;  %v6266_v58 = vsel %vm4386_vm8, %v6263_v3, %v6265_v4  ;;  %v6716_v3 = vshll.u32 %v14657_v37, 16 }
 0x171   : > { %v2406_v36 = vadd.f32 %v14522_v29, %v2215_v13  ;;  %v2213_v61 = vld [vmem:[#allocation2 + $0x40] sm:$0xff]  ;;  %2598 = vst.msk [vmem:[#allocation2 + $0x10] sm:$0xff] %vm366_vm7, %v2587_v5  ;;  %v2588_v52 = vadd.f32 %v12088_v27, %v2433_v0  ;;  %v2542_v18 = vpop.f32.mrb[71].mxu1  ;;  %v6480_v29 = vsel %vm6445_vm9, %v6470_v40, %v14574_v48  ;;  %v14645_v44 = vpop.f32.mrb[69].mxu0  ;;  %v6697_v27 = vrot.slane %v6695_v54, 3 }
 0x172   : > { %v2404_v55 = vadd.f32 %v14528_v2, %v2213_v61  ;;  %2596 = vst.msk [vmem:[#allocation2] sm:$0xff] %vm366_vm7, %v2585_v28  ;;  %v2586_v26 = vadd.f32 %v2542_v18, %v2431_v49  ;;  %v6689_v2 = vshll.u32 %v14566_v57, 16  ;;  %12355 = vmatprep.mubr.msk.bf16.mxu0 %vm263_vm1, %v6480_v29  ;;  %v14651_v8 = vpop.f32.mrb[70].mxu0  ;;  %v6489_v57 = vsel %vm6445_vm9, %v14574_v48, %v6488_v11 }
 0x173   : > { %2417 = vst.msk [vmem:[#allocation2 + $0x50] sm:$0xff] %vm366_vm7, %v2406_v36  ;;  %v2214_v46 = vld [vmem:[#allocation2 + $0x48] sm:$0xff]  ;;  %2599 = vst.msk [vmem:[#allocation2 + $0x18] sm:$0xff] %vm366_vm7, %v2588_v52  ;;  %12338 = vmatmul.mubr.msk.bf16.vlgmr.msra.gmra.mrb[176].mxu1 %vm263_vm1, %v6260_v43  ;;  %v2434_v38 = vld [vmem:[#allocation2 + $0x20] sm:$0xff]  ;;  %v2747_v7 = vpop.f32.mrb[71].mxu0  ;;  %v6498_v48 = vsel %vm6445_vm9, %v6488_v11, %v14630_v10  ;;  %v6700_v43 = vrot.slane %v6698_v21, 4 }
 0x174   : > { %2415 = vst.msk [vmem:[#allocation2 + $0x40] sm:$0xff] %vm366_vm7, %v2404_v55  ;;  %v2405_v53 = vadd.f32 %v14533_v45, %v2214_v46  ;;  %2597 = vst.msk [vmem:[#allocation2 + $0x8] sm:$0xff] %vm366_vm7, %v2586_v26  ;;  %12364 = vmatpush3.bf16.msra.mxu1 %v6749_v14  ;;  %12341 = vmatprep.mubr.msk.bf16.mxu1 %vm263_vm1, %v6262_v16  ;;  %v2436_v45 = vld [vmem:[#allocation2 + $0x30] sm:$0xff]  ;;  %v6691_v14 = vrot.slane %v6689_v2, 4  ;;  %v2437_v34 = vld [vmem:[#allocation2 + $0x38] sm:$0xff]  ;;  %v6706_v36 = vrot.slane %v6704_v35, 3 }
 0x175   : > { %12651 = vmatprep.subr.msk.bf16.mxu1 %vm282_vm0, %v14608_v42  ;;  %v2435_v1 = vld [vmem:[#allocation2 + $0x28] sm:$0xff]  ;;  %v6709_v61 = vrot.slane %v6707_v24, 4  ;;  %v6713_v52 = vshrl.u32 %v14657_v37, 16  ;;  %v6722_v11 = vshrl.u32 %v12886_v17, 16 }
 0x176   : > { %2416 = vst.msk [vmem:[#allocation2 + $0x48] sm:$0xff] %vm366_vm7, %v2405_v53  ;;  %v12091_v32 = vpop.f32.mrb[72].mxu1  ;;  %12356 = vmatmul.mubr.msk.bf16.gmra.mrb[176].mxu0 %vm263_vm1, %v6489_v57  ;;  %v14682_v25 = vor.u32 %v6691_v14, %v6688_v15  ;;  %v12881_v55 = vld [vmem:[%s13068_s25 + $0xc] sm:$0xff]  }
 0x177   : > { %v2591_v31 = vadd.f32 %v12091_v32, %v2436_v45  ;;  %v2555_v41 = vpop.f32.mrb[73].mxu1  ;;  %12359 = vmatprep.mubr.msk.bf16.mxu0 %vm263_vm1, %v6498_v48  ;;  %v6715_v20 = vrot.slane %v6713_v52, 3  ;;  %v14719_v57 = vld [vmem:[%s13068_s25 + $0xc] sm:$0xff]  }
 0x178   : > { %v2621_v40 = vld [vmem:[#allocation2 + $0x10] sm:$0xff]  ;;  %v2589_v6 = vadd.f32 %v2555_v41, %v2434_v38  ;;  %v12092_v39 = vpop.f32.mrb[74].mxu1  ;;  %v12109_v16 = vpop.f32.mrb[72].mxu0 }
 0x179   : > { %v2776_v9 = vadd.f32 %v14569_v59, %v2621_v40  ;;  %2602 = vst.msk [vmem:[#allocation2 + $0x30] sm:$0xff] %vm366_vm7, %v2591_v31  ;;  %v2619_v23 = vld [vmem:[#allocation2] sm:$0xff]  ;;  %v2592_v5 = vadd.f32 %v12092_v39, %v2437_v34  ;;  %v2558_v63 = vpop.f32.mrb[75].mxu1  ;;  %v14687_v12 = vpop.f32.mrb[73].mxu0  ;;  %v6701_v40 = vor.u32 %v6700_v43, %v6697_v27 }
 0x17a   : > { %v2774_v50 = vadd.f32 %v14577_v60, %v2619_v23  ;;  %2600 = vst.msk [vmem:[#allocation2 + $0x20] sm:$0xff] %vm366_vm7, %v2589_v6  ;;  %v2622_v59 = vld [vmem:[#allocation2 + $0x18] sm:$0xff]  ;;  %v2590_v13 = vadd.f32 %v2558_v63, %v2435_v1  ;;  %v2440_v49 = vld [vmem:[#allocation2 + $0x50] sm:$0xff]  ;;  %v12110_v53 = vpop.f32.mrb[74].mxu0  ;;  %v6724_v6 = vrot.slane %v6722_v11, 3 }
 0x17b   : > { %2787 = vst.msk [vmem:[#allocation2 + $0x10] sm:$0xff] %vm366_vm7, %v2776_v9  ;;  %v2777_v28 = vadd.f32 %v14586_v51, %v2622_v59  ;;  %2603 = vst.msk [vmem:[#allocation2 + $0x38] sm:$0xff] %vm366_vm7, %v2592_v5  ;;  %v2620_v0 = vld [vmem:[#allocation2 + $0x8] sm:$0xff]  ;;  %12342 = vmatmul.mubr.msk.bf16.gmra.mrb[180].mxu1 %vm263_vm1, %v6264_v19  ;;  %v6684_v51 = vor.u32 %v14637_v47, %v14632_v62  ;;  %v6725_v62 = vshll.u32 %v12886_v17, 16  ;;  %v14692_v21 = vpop.f32.mrb[75].mxu0  ;;  %v12885_v5 = vld [vmem:[%s13068_s25 + $0x1c] sm:$0xff]  }
 0x17c   : > { %2785 = vst.msk [vmem:[#allocation2] sm:$0xff] %vm366_vm7, %v2774_v50  ;;  %v2775_v60 = vadd.f32 %v14595_v33, %v2620_v0  ;;  %2601 = vst.msk [vmem:[#allocation2 + $0x28] sm:$0xff] %vm366_vm7, %v2590_v13  ;;  %12345 = vmatprep.mubr.msk.bf16.mxu1 %vm263_vm1, %v6266_v58  ;;  %v2438_v33 = vld [vmem:[#allocation2 + $0x40] sm:$0xff]  ;;  %v14725_v1 = vld [vmem:[%s13068_s25 + $0x14] sm:$0xff]   ;;  %v6702_v50 = vsel %vm6445_vm9, %v14682_v25, %v6701_v40 }
 0x17d   : > { %2788 = vst.msk [vmem:[#allocation2 + $0x18] sm:$0xff] %vm366_vm7, %v2777_v28  ;;  %v2439_v47 = vld [vmem:[#allocation2 + $0x48] sm:$0xff]  ;;  %v6693_v31 = vsel %vm6445_vm9, %v6684_v51, %v14682_v25  ;;  %v6727_v34 = vrot.slane %v6725_v62, 4  ;;  %v7324_v25 = vsel %vm282_vm0, %v14621_v30, 0  ;;  %v14753_v30 = vld [vmem:[%s16210_s1 + $0x90] sm:$0xf] }
 0x17e   : > { %2786 = vst.msk [vmem:[#allocation2 + $0x8] sm:$0xff] %vm366_vm7, %v2775_v60  ;;  %v12095_v18 = vpop.f32.mrb[76].mxu1  ;;  %12360 = vmatmul.mubr.msk.bf16.gmra.mrb[180].mxu0 %vm263_vm1, %v14630_v10  ;;  %v14712_v10 = vor.u32 %v6709_v61, %v6706_v36  ;;  %v14743_v61 = vld [vmem:[%s16210_s1 + $0x8c] sm:$0xf] }
 0x17f   : > { %v2595_v26 = vadd.f32 %v12095_v18, %v2440_v49  ;;  %v2571_v29 = vpop.f32.mrb[77].mxu1  ;;  %12379 = vmatprep.mubr.msk.bf16.mxu0 %vm263_vm1, %v12881_v55  ;;  %v7261_v49 = vshll.u32 %v14719_v57, 16  ;;  %v14760_v55 = vor.u32 %v6727_v34, %v6724_v6 }
 0x180   : > { %v2625_v22 = vld [vmem:[#allocation2 + $0x30] sm:$0xff]  ;;  %v2593_v46 = vadd.f32 %v2571_v29, %v2438_v33  ;;  %v12096_v2 = vpop.f32.mrb[78].mxu1  ;;  %v6711_v60 = vsel %vm6445_vm9, %v6701_v40, %v14712_v10  ;;  %v7259_v29 = vshrl.u32 %v14719_v57, 16 }
 0x181   : > { %v2780_v45 = vadd.f32 %v14635_v56, %v2625_v22  ;;  %2606 = vst.msk [vmem:[#allocation2 + $0x50] sm:$0xff] %vm366_vm7, %v2595_v26  ;;  %v2623_v32 = vld [vmem:[#allocation2 + $0x20] sm:$0xff]  ;;  %v2574_v54 = vpop.f32.mrb[79].mxu1  ;;  %v12888_v2 = vld [vmem:[%s13068_s25 + $0x2c] sm:$0xff]  }
 0x182   : > { %v2778_v38 = vadd.f32 %v14645_v44, %v2623_v32  ;;  %2604 = vst.msk [vmem:[#allocation2 + $0x40] sm:$0xff] %vm366_vm7, %v2593_v46  ;;  %v2626_v41 = vld [vmem:[#allocation2 + $0x38] sm:$0xff]  ;;  %v2594_v15 = vadd.f32 %v2574_v54, %v2439_v47  ;;  %v7099_v44 = vsel %vm282_vm0, %v14608_v42, 0  ;;  %v2810_v39 = vld [vmem:[#allocation2 + $0x10] sm:$0xff]  ;;  %v12887_v26 = vld [vmem:[%s13068_s25 + $0x24] sm:$0xff]  }
 0x183   : > { %2791 = vst.msk [vmem:[#allocation2 + $0x30] sm:$0xff] %vm366_vm7, %v2780_v45  ;;  %v2781_v56 = vadd.f32 %v14651_v8, %v2626_v41  ;;  %v2624_v14 = vld [vmem:[#allocation2 + $0x28] sm:$0xff]  ;;  %12346 = vmatmul.mubr.msk.bf16.gmra.mrb[184].mxu1 %vm263_vm1, %v6265_v4  ;;  %v6718_v4 = vrot.slane %v6716_v3, 4  ;;  %v12883_v42 = vld [vmem:[%s13068_s25 + $0x14] sm:$0xff]   ;;  %v14716_v8 = vpop.f32.mrb[76].mxu0  ;;  %v2808_v37 = vld [vmem:[#allocation2] sm:$0xff] }
 0x184   : > { %2789 = vst.msk [vmem:[#allocation2 + $0x20] sm:$0xff] %vm366_vm7, %v2778_v38  ;;  %v2779_v35 = vadd.f32 %v2747_v7, %v2624_v14  ;;  %2605 = vst.msk [vmem:[#allocation2 + $0x48] sm:$0xff] %vm366_vm7, %v2594_v15  ;;  %12365 = vmatprep.mubr.msk.bf16.mxu1 %vm263_vm1, %v6693_v31  ;;  %v14721_v23 = vpop.f32.mrb[77].mxu0  ;;  %v2811_v58 = vld [vmem:[#allocation2 + $0x18] sm:$0xff]  ;;  %v7263_v45 = vrot.slane %v7261_v49, 1 }
 0x185   : > { %2792 = vst.msk [vmem:[#allocation2 + $0x38] sm:$0xff] %vm366_vm7, %v2781_v56  ;;  %v14729_v59 = vpop.f32.mrb[78].mxu0  ;;  %v2809_v27 = vld [vmem:[#allocation2 + $0x8] sm:$0xff]  ;;  %v6719_v33 = vor.u32 %v6718_v4, %v6715_v20 }
 0x186   : > { %2790 = vst.msk [vmem:[#allocation2 + $0x28] sm:$0xff] %vm366_vm7, %v2779_v35  ;;  %v12115_v19 = vpop.f32.mrb[80].mxu1  ;;  %v14732_v17 = vpop.f32.mrb[79].mxu0  ;;  %12380 = vmatmul.mubr.msk.bf16.vlgmr.msra.gmra.mrb[184].mxu0 %vm263_vm1, %v12883_v42  ;;  %v14784_v42 = vld [vmem:[%s13068_s25 + $0x1c] sm:$0xff]   ;;  %v7264_v57 = vor.u32 %v7263_v45, %v7259_v29  ;;  %v14825_v29 = vld [vmem:[%s13068_s25 + $0x34] sm:$0x1f]  }
 0x187   : > { %v3007_v24 = vadd.f32 %v12115_v19, %v2810_v39  ;;  %v2959_v9 = vpop.f32.mrb[81].mxu1  ;;  %12406 = vmatpush3.bf16.msra.mxu0 %v7324_v25  ;;  %12383 = vmatprep.mubr.msk.bf16.mxu0 %vm263_vm1, %v12885_v5  ;;  %v6720_v31 = vsel %vm6445_vm9, %v14712_v10, %v6719_v33  ;;  %v6729_v40 = vsel %vm6445_vm9, %v6719_v33, %v14760_v55  ;;  %v14797_v19 = vld [vmem:[%s13068_s25 + $0x24] sm:$0xff]  }
 0x188   : > { %v2629_v63 = vld [vmem:[#allocation2 + $0x50] sm:$0xff]  ;;  %v3005_v7 = vadd.f32 %v2959_v9, %v2808_v37  ;;  %v12116_v48 = vpop.f32.mrb[82].mxu1  ;;  %v12133_v46 = vpop.f32.mrb[80].mxu0  ;;  %12654 = vmatprep.subr.msk.bf16.mxu0 %vm282_vm0, %v14753_v30  ;;  %v7270_v37 = vshrl.u32 %v14725_v1, 16  ;;  %v14846_v45 = vld [vmem:[%s13068_s25 + $0x88] sm:$0xf8]  }
 0x189   : > { %v2784_v13 = vadd.f32 %v12109_v16, %v2629_v63  ;;  %v2627_v28 = vld [vmem:[#allocation2 + $0x40] sm:$0xff]  ;;  %3018 = vst.msk [vmem:[#allocation2 + $0x10] sm:$0xff] %vm366_vm7, %v3007_v24  ;;  %v3008_v0 = vadd.f32 %v12116_v48, %v2811_v58  ;;  %v2962_v43 = vpop.f32.mrb[83].mxu1  ;;  %v14771_v62 = vpop.f32.mrb[81].mxu0  ;;  %v12890_v63 = vld [vmem:[%s13068_s25 + $0x4c] sm:$0xff]  }
 0x18a   : > { %v2782_v51 = vadd.f32 %v14687_v12, %v2627_v28  ;;  %3016 = vst.msk [vmem:[#allocation2] sm:$0xff] %vm366_vm7, %v3005_v7  ;;  %v3006_v36 = vadd.f32 %v2962_v43, %v2809_v27  ;;  %v2814_v16 = vld [vmem:[#allocation2 + $0x30] sm:$0xff]  ;;  %v7266_v12 = vshll.u32 %v14725_v1, 16  ;;  %v12134_v38 = vpop.f32.mrb[82].mxu0  ;;  %v7274_v7 = vshll.u32 %v14784_v42, 16 }
 0x18b   : > { %2795 = vst.msk [vmem:[#allocation2 + $0x50] sm:$0xff] %vm366_vm7, %v2784_v13  ;;  %v2628_v52 = vld [vmem:[#allocation2 + $0x48] sm:$0xff]  ;;  %3019 = vst.msk [vmem:[#allocation2 + $0x18] sm:$0xff] %vm366_vm7, %v3008_v0  ;;  %12366 = vmatmul.mubr.msk.bf16.vlgmr.msra.gmra.mrb[188].mxu1 %vm263_vm1, %v6702_v50  ;;  %v2812_v3 = vld [vmem:[#allocation2 + $0x20] sm:$0xff]  ;;  %v14777_v35 = vpop.f32.mrb[83].mxu0  ;;  %v7282_v43 = vshll.u32 %v14797_v19, 16 }
 0x18c   : > { %2793 = vst.msk [vmem:[#allocation2 + $0x40] sm:$0xff] %vm366_vm7, %v2782_v51  ;;  %v2783_v18 = vadd.f32 %v14692_v21, %v2628_v52  ;;  %3017 = vst.msk [vmem:[#allocation2 + $0x8] sm:$0xff] %vm366_vm7, %v3006_v36  ;;  %12392 = vmatpush3.bf16.msra.mxu1 %v7099_v44  ;;  %12369 = vmatprep.mubr.msk.bf16.mxu1 %vm263_vm1, %v6711_v60  ;;  %v2815_v54 = vld [vmem:[#allocation2 + $0x38] sm:$0xff]  ;;  %v7268_v24 = vrot.slane %v7266_v12, 1  ;;  %v14810_v13 = vld [vmem:[%s13068_s25 + $0x2c] sm:$0xff]   ;;  %v14818_v52 = vsel %vm282_vm0, %v14743_v61, 0 }
 0x18d   : > { %12653 = vmatprep.subr.msk.bf16.mxu1 %vm282_vm0, %v14743_v61  ;;  %v2813_v14 = vld [vmem:[#allocation2 + $0x28] sm:$0xff] }
 0x18e   : > { %2794 = vst.msk [vmem:[#allocation2 + $0x48] sm:$0xff] %vm366_vm7, %v2783_v18  ;;  %v12119_v22 = vpop.f32.mrb[84].mxu1  ;;  %12384 = vmatmul.mubr.msk.bf16.gmra.mrb[188].mxu0 %vm263_vm1, %v12887_v26  ;;  %v7269_v49 = vsel %vm609_vm2, %v7264_v57, %v7268_v24  ;;  %v7278_v26 = vshrl.u32 %v14784_v42, 16  ;;  %v7272_v61 = vor.u32 %v7270_v37, %v7268_v24 }
 0x18f   : > { %v3011_v53 = vadd.f32 %v12119_v22, %v2814_v16  ;;  %v2975_v11 = vpop.f32.mrb[85].mxu1  ;;  %12387 = vmatprep.mubr.msk.bf16.mxu0 %vm263_vm1, %v12888_v2  ;;  %v7290_v2 = vshll.u32 %v14810_v13, 16 }
 0x190   : > { %v3041_v32 = vld [vmem:[#allocation2 + $0x10] sm:$0xff]  ;;  %v3009_v47 = vadd.f32 %v2975_v11, %v2812_v3  ;;  %v12120_v21 = vpop.f32.mrb[86].mxu1  ;;  %v14803_v5 = vpop.f32.mrb[84].mxu0  ;;  %v7284_v3 = vrot.slane %v7282_v43, 1  ;;  %v7286_v11 = vshrl.u32 %v14797_v19, 16  ;;  %v14866_v19 = vld [vmem:[%s13068_s25 + $0x98] sm:$0xff]  }
 0x191   : > { %v3238_v41 = vadd.f32 %v14716_v8, %v3041_v32  ;;  %3022 = vst.msk [vmem:[#allocation2 + $0x30] sm:$0xff] %vm366_vm7, %v3011_v53  ;;  %v3039_v15 = vld [vmem:[#allocation2] sm:$0xff]  ;;  %v3012_v56 = vadd.f32 %v12120_v21, %v2815_v54  ;;  %v2978_v44 = vpop.f32.mrb[87].mxu1  ;;  %v12889_v8 = vld [vmem:[%s13068_s25 + $0x34] ss:$0 sps:$4 sm:$0xff]   ;;  %v14896_v43 = vld [vmem:[%s13068_s25 + $0xd8] sm:$0xff]  }
 0x192   : > { %v3236_v20 = vadd.f32 %v14721_v23, %v3039_v15  ;;  %3020 = vst.msk [vmem:[#allocation2 + $0x20] sm:$0xff] %vm366_vm7, %v3009_v47  ;;  %v3042_v4 = vld [vmem:[#allocation2 + $0x18] sm:$0xff]  ;;  %v3010_v10 = vadd.f32 %v2978_v44, %v2813_v14  ;;  %v2818_v9 = vld [vmem:[#allocation2 + $0x50] sm:$0xff] }
 0x193   : > { %3249 = vst.msk [vmem:[#allocation2 + $0x10] sm:$0xff] %vm366_vm7, %v3238_v41  ;;  %v3239_v6 = vadd.f32 %v14729_v59, %v3042_v4  ;;  %3023 = vst.msk [vmem:[#allocation2 + $0x38] sm:$0xff] %vm366_vm7, %v3012_v56  ;;  %v3040_v34 = vld [vmem:[#allocation2 + $0x8] sm:$0xff]  ;;  %12370 = vmatmul.mubr.msk.bf16.gmra.mrb[192].mxu1 %vm263_vm1, %v6720_v31  ;;  %v2816_v48 = vld [vmem:[#allocation2 + $0x40] sm:$0xff]  ;;  %v14807_v59 = vpop.f32.mrb[85].mxu0  ;;  %v7298_v41 = vshll.u32 %v14825_v29, 16 }
 0x194   : > { %3247 = vst.msk [vmem:[#allocation2] sm:$0xff] %vm366_vm7, %v3236_v20  ;;  %v3237_v39 = vadd.f32 %v14732_v17, %v3040_v34  ;;  %3021 = vst.msk [vmem:[#allocation2 + $0x28] sm:$0xff] %vm366_vm7, %v3010_v10  ;;  %12373 = vmatprep.mubr.msk.bf16.mxu1 %vm263_vm1, %v6729_v40  ;;  %v12138_v1 = vpop.f32.mrb[86].mxu0  ;;  %v14849_v32 = vld [vmem:[%s13068_s25 + $0x90] sm:$0xff]   ;;  %v12894_v31 = vld [vmem:[%s13068_s25 + $0x5c] sm:$0xff]   ;;  %v7292_v40 = vrot.slane %v7290_v2, 1 }
 0x195   : > { %3250 = vst.msk [vmem:[#allocation2 + $0x18] sm:$0xff] %vm366_vm7, %v3239_v6  ;;  %v2817_v51 = vld [vmem:[#allocation2 + $0x48] sm:$0xff]  ;;  %v14814_v25 = vpop.f32.mrb[87].mxu0  ;;  %v11322_v15 = vld [vmem:[%s16210_s1 + $0x94] sm:$0xf] }
 0x196   : > { %3248 = vst.msk [vmem:[#allocation2 + $0x8] sm:$0xff] %vm366_vm7, %v3237_v39  ;;  %v12123_v23 = vpop.f32.mrb[88].mxu1  ;;  %12388 = vmatmul.mubr.msk.bf16.gmra.mrb[192].mxu0 %vm263_vm1, %v12889_v8  ;;  %v7302_v39 = vshrl.u32 %v14825_v29, 16  ;;  %v14893_v1 = vsel %vm282_vm0, %v11322_v15, 0 }
 0x197   : > { %v3015_v58 = vadd.f32 %v12123_v23, %v2818_v9  ;;  %v2991_v50 = vpop.f32.mrb[89].mxu1  ;;  %12407 = vmatprep.mubr.msk.bf16.mxu0 %vm263_vm1, %v7269_v49  ;;  %v7486_v49 = vrot.slane %v14866_v19, 3 }
 0x198   : > { %v3045_v28 = vld [vmem:[#allocation2 + $0x30] sm:$0xff]  ;;  %v3013_v0 = vadd.f32 %v2991_v50, %v2816_v48  ;;  %v12124_v27 = vpop.f32.mrb[90].mxu1  ;;  %v14852_v21 = vpop.f32.mrb[88].mxu0  ;;  %v14879_v50 = vrot.slane %v7298_v41, 1 }
 0x199   : > { %v3242_v17 = vadd.f32 %v12133_v46, %v3045_v28  ;;  %3026 = vst.msk [vmem:[#allocation2 + $0x50] sm:$0xff] %vm366_vm7, %v3015_v58  ;;  %v3043_v60 = vld [vmem:[#allocation2 + $0x20] sm:$0xff]  ;;  %v2994_v36 = vpop.f32.mrb[91].mxu1  ;;  %v14833_v46 = vsel %vm282_vm0, %v14753_v30, 0  ;;  %v12891_v30 = vld [vmem:[%s13068_s25 + $0x54] sm:$0xff]   ;;  %v7483_v27 = vrot.slane %v14846_v45, 3 }
 0x19a   : > { %v3240_v18 = vadd.f32 %v14771_v62, %v3043_v60  ;;  %3024 = vst.msk [vmem:[#allocation2 + $0x40] sm:$0xff] %vm366_vm7, %v3013_v0  ;;  %v3046_v33 = vld [vmem:[#allocation2 + $0x38] sm:$0xff]  ;;  %v3014_v16 = vadd.f32 %v2994_v36, %v2817_v51  ;;  %v7294_v62 = vshrl.u32 %v14810_v13, 16  ;;  %v3272_v47 = vld [vmem:[#allocation2 + $0x10] sm:$0xff]  ;;  %v14882_v13 = vld [vmem:[%s13068_s25 + $0xc8] sm:$0xf8]  }
 0x19b   : > { %3253 = vst.msk [vmem:[#allocation2 + $0x30] sm:$0xff] %vm366_vm7, %v3242_v17  ;;  %v3243_v12 = vadd.f32 %v12134_v38, %v3046_v33  ;;  %v3044_v22 = vld [vmem:[#allocation2 + $0x28] sm:$0xff]  ;;  %12374 = vmatmul.mubr.msk.bf16.gmra.mrb[196].mxu1 %vm263_vm1, %v14760_v55  ;;  %v7276_v55 = vrot.slane %v7274_v7, 1  ;;  %v3270_v14 = vld [vmem:[#allocation2] sm:$0xff]  ;;  %v14874_v7 = vld [vmem:[%s13068_s25 + $0xd0] sm:$0xff]  }
 0x19c   : > { %3251 = vst.msk [vmem:[#allocation2 + $0x20] sm:$0xff] %vm366_vm7, %v3240_v18  ;;  %v3241_v53 = vadd.f32 %v14777_v35, %v3044_v22  ;;  %3025 = vst.msk [vmem:[#allocation2 + $0x48] sm:$0xff] %vm366_vm7, %v3014_v16  ;;  %12393 = vmatprep.mubr.msk.bf16.mxu1 %vm263_vm1, %v12890_v63  ;;  %v14859_v35 = vpop.f32.mrb[89].mxu0  ;;  %v3273_v10 = vld [vmem:[#allocation2 + $0x18] sm:$0xff]  ;;  %v7484_v63 = vrot.slane %v14849_v32, 3  ;;  %v14885_v28 = vld [vmem:[%s13068_s25 + $0xa0] sm:$0xff]   ;;  %v7296_v36 = vor.u32 %v7294_v62, %v7292_v40 }
 0x19d   : > { %3254 = vst.msk [vmem:[#allocation2 + $0x38] sm:$0xff] %vm366_vm7, %v3243_v12  ;;  %v7280_v38 = vor.u32 %v7278_v26, %v7276_v55  ;;  %v14861_v6 = vpop.f32.mrb[90].mxu0  ;;  %v7277_v34 = vsel %vm609_vm2, %v7272_v61, %v7276_v55  ;;  %v3271_v37 = vld [vmem:[#allocation2 + $0x8] sm:$0xff]  ;;  %v11347_v60 = vld [vmem:[%s16210_s1 + $0x98] sm:$0xf]  ;;  %v14911_v18 = vld [vmem:[%s13068_s25 + $0xe0] sm:$0xff]  }
 0x19e   : > { %3252 = vst.msk [vmem:[#allocation2 + $0x28] sm:$0xff] %vm366_vm7, %v3241_v53  ;;  %v12143_v54 = vpop.f32.mrb[92].mxu1  ;;  %v14870_v23 = vpop.f32.mrb[91].mxu0  ;;  %12408 = vmatmul.mubr.msk.bf16.vlgmr.msra.gmra.mrb[196].mxu0 %vm263_vm1, %v7277_v34  ;;  %v14899_v17 = vld [vmem:[%s13068_s25 + $0xa8] sm:$0xff]   ;;  %v14918_v26 = vld [vmem:[%s13068_s25 + $0xb0] sm:$0x7f]  }
 0x19f   : > { %v3469_v56 = vadd.f32 %v12143_v54, %v3272_v47  ;;  %v3421_v44 = vpop.f32.mrb[93].mxu1  ;;  %v12896_v16 = vld [vmem:[%s13068_s25 + $0x64] sm:$0xff]   ;;  %12434 = vmatpush3.bf16.msra.mxu0 %v14833_v46  ;;  %v12898_v22 = vld [vmem:[%s13068_s25 + $0x6c] sm:$0xff]   ;;  %v7488_v41 = vrot.slane %v14885_v28, 3 }
 0x1a0   : > { %v3049_v20 = vld [vmem:[#allocation2 + $0x50] sm:$0xff]  ;;  %v3467_v4 = vadd.f32 %v3421_v44, %v3270_v14  ;;  %v12144_v42 = vpop.f32.mrb[94].mxu1  ;;  %v14921_v12 = vpop.f32.mrb[92].mxu0  ;;  %12656 = vmatprep.subr.msk.bf16.mxu0 %vm282_vm0, %v11347_v60 }
 0x1a1   : > { %v3246_v8 = vadd.f32 %v14803_v5, %v3049_v20  ;;  %v3047_v57 = vld [vmem:[#allocation2 + $0x40] sm:$0xff]  ;;  %3480 = vst.msk [vmem:[#allocation2 + $0x10] sm:$0xff] %vm366_vm7, %v3469_v56  ;;  %v3470_v24 = vadd.f32 %v12144_v42, %v3273_v10  ;;  %v3424_v9 = vpop.f32.mrb[95].mxu1  ;;  %v7285_v5 = vsel %vm609_vm2, %v7280_v38, %v7284_v3  ;;  %v14926_v46 = vpop.f32.mrb[93].mxu0  ;;  %v7672_v38 = vrot.slane %v14882_v13, 3 }
 0x1a2   : > { %v3244_v58 = vadd.f32 %v14807_v59, %v3047_v57  ;;  %3478 = vst.msk [vmem:[#allocation2] sm:$0xff] %vm366_vm7, %v3467_v4  ;;  %v3468_v48 = vadd.f32 %v3424_v9, %v3271_v37  ;;  %v7288_v59 = vor.u32 %v7286_v11, %v7284_v3  ;;  %v3276_v33 = vld [vmem:[#allocation2 + $0x30] sm:$0xff]  ;;  %12411 = vmatprep.mubr.msk.bf16.mxu0 %vm263_vm1, %v7285_v5  ;;  %v14930_v3 = vld [vmem:[%s13068_s25 + $0xe8] sm:$0xff]   ;;  %v14932_v54 = vpop.f32.mrb[94].mxu0  ;;  %v7675_v4 = vrot.slane %v14896_v43, 3 }
 0x1a3   : > { %3257 = vst.msk [vmem:[#allocation2 + $0x50] sm:$0xff] %vm366_vm7, %v3246_v8  ;;  %v3048_v0 = vld [vmem:[#allocation2 + $0x48] sm:$0xff]  ;;  %3481 = vst.msk [vmem:[#allocation2 + $0x18] sm:$0xff] %vm366_vm7, %v3470_v24  ;;  %12394 = vmatmul.mubr.msk.bf16.vlgmr.msra.gmra.mrb[200].mxu1 %vm263_vm1, %v12891_v30  ;;  %v3274_v2 = vld [vmem:[#allocation2 + $0x20] sm:$0xff]  ;;  %v14940_v20 = vpop.f32.mrb[95].mxu0  ;;  %v7490_v10 = vrot.slane %v14899_v17, 3 }
 0x1a4   : > { %3255 = vst.msk [vmem:[#allocation2 + $0x40] sm:$0xff] %vm366_vm7, %v3244_v58  ;;  %v3245_v51 = vadd.f32 %v14814_v25, %v3048_v0  ;;  %3479 = vst.msk [vmem:[#allocation2 + $0x8] sm:$0xff] %vm366_vm7, %v3468_v48  ;;  %12420 = vmatpush3.bf16.msra.mxu1 %v14818_v52  ;;  %12397 = vmatprep.mubr.msk.bf16.mxu1 %vm263_vm1, %v12894_v31  ;;  %v7673_v25 = vrot.slane %v14874_v7, 3  ;;  %v7293_v55 = vsel %vm609_vm2, %v7288_v59, %v7292_v40  ;;  %v3277_v62 = vld [vmem:[#allocation2 + $0x38] sm:$0xff]  ;;  %v12915_v24 = vld [vmem:[%s13068_s25 + $0x90] sm:$0xff]  }
 0x1a5   : > { %12655 = vmatprep.subr.msk.bf16.mxu1 %vm282_vm0, %v11322_v15  ;;  %v7301_v31 = vsel %vm609_vm2, %v7296_v36, %v14879_v50  ;;  %v3275_v44 = vld [vmem:[#allocation2 + $0x28] sm:$0xff]  ;;  %v7677_v57 = vrot.slane %v14911_v18, 3  ;;  %v7492_v9 = vrot.slane %v14918_v26, 3  ;;  %v7679_v58 = vrot.slane %v14930_v3, 3  ;;  %v14959_v48 = vld [vmem:[%s13068_s25 + $0x98] sm:$0xff]  }
 0x1a6   : > { %3256 = vst.msk [vmem:[#allocation2 + $0x48] sm:$0xff] %vm366_vm7, %v3245_v51  ;;  %v12147_v52 = vpop.f32.mrb[96].mxu1  ;;  %12412 = vmatmul.mubr.msk.bf16.gmra.mrb[200].mxu0 %vm263_vm1, %v7293_v55  ;;  %v14969_v13 = vld [vmem:[%s13068_s25 + $0xf0] sm:$0x7f]   ;;  %v14972_v0 = vld [vmem:[%s13068_s25 + $0x88] sm:$0xf8]   ;;  %v7676_v32 = vsel %vm4386_vm8, %v7673_v25, %v7675_v4 }
 0x1a7   : > { %v3473_v61 = vadd.f32 %v12147_v52, %v3276_v33  ;;  %v3437_v53 = vpop.f32.mrb[97].mxu1  ;;  %12415 = vmatprep.mubr.msk.bf16.mxu0 %vm263_vm1, %v7301_v31  ;;  %v7493_v28 = vsel %vm4386_vm8, %v7490_v10, %v7492_v9 }
 0x1a8   : > { %v3503_v11 = vld [vmem:[#allocation2 + $0x10] sm:$0xff]  ;;  %v3471_v30 = vadd.f32 %v3437_v53, %v3274_v2  ;;  %v12148_v47 = vpop.f32.mrb[98].mxu1  ;;  %v14975_v51 = vpop.f32.mrb[96].mxu0  ;;  %v14985_v2 = vld [vmem:[%s16210_s1 + $0x9c] sm:$0xf] }
 0x1a9   : > { %v3659_v15 = vadd.f32 %v14852_v21, %v3503_v11  ;;  %3484 = vst.msk [vmem:[#allocation2 + $0x30] sm:$0xff] %vm366_vm7, %v3473_v61  ;;  %v3501_v56 = vld [vmem:[#allocation2] sm:$0xff]  ;;  %v3474_v14 = vadd.f32 %v12148_v47, %v3277_v62  ;;  %v3440_v40 = vpop.f32.mrb[99].mxu1  ;;  %v14947_v21 = vsel %vm282_vm0, %v11347_v60, 0  ;;  %v14977_v52 = vpop.f32.mrb[97].mxu0  ;;  %v7873_v61 = vshll.u32 %v12915_v24, 16 }
 0x1aa   : > { %v3657_v42 = vadd.f32 %v14859_v35, %v3501_v56  ;;  %3482 = vst.msk [vmem:[#allocation2 + $0x20] sm:$0xff] %vm366_vm7, %v3471_v30  ;;  %v3504_v34 = vld [vmem:[#allocation2 + $0x18] sm:$0xff]  ;;  %v3472_v8 = vadd.f32 %v3440_v40, %v3275_v44  ;;  %v3280_v59 = vld [vmem:[#allocation2 + $0x50] sm:$0xff]  ;;  %v12166_v30 = vpop.f32.mrb[98].mxu0  ;;  %v7879_v62 = vshrl.u32 %v14959_v48, 16  ;;  %v7674_v56 = vsel %vm4386_vm8, %v7672_v38, %v7673_v25 }
 0x1ab   : > { %3670 = vst.msk [vmem:[#allocation2 + $0x10] sm:$0xff] %vm366_vm7, %v3659_v15  ;;  %v3660_v37 = vadd.f32 %v14861_v6, %v3504_v34  ;;  %3485 = vst.msk [vmem:[#allocation2 + $0x38] sm:$0xff] %vm366_vm7, %v3474_v14  ;;  %v3502_v35 = vld [vmem:[#allocation2 + $0x8] sm:$0xff]  ;;  %12398 = vmatmul.mubr.msk.bf16.gmra.mrb[204].mxu1 %vm263_vm1, %v12896_v16  ;;  %v12900_v6 = vld [vmem:[%s13068_s25 + $0x74] ss:$0 sps:$4 sm:$0xff]   ;;  %v7681_v40 = vrot.slane %v14969_v13, 3 }
 0x1ac   : > { %3668 = vst.msk [vmem:[#allocation2] sm:$0xff] %vm366_vm7, %v3657_v42  ;;  %v3658_v5 = vadd.f32 %v14870_v23, %v3502_v35  ;;  %3483 = vst.msk [vmem:[#allocation2 + $0x28] sm:$0xff] %vm366_vm7, %v3472_v8  ;;  %12401 = vmatprep.mubr.msk.bf16.mxu1 %vm263_vm1, %v12898_v22  ;;  %v7870_v23 = vshrl.u32 %v12915_v24, 16  ;;  %v3278_v33 = vld [vmem:[#allocation2 + $0x40] sm:$0xff]  ;;  %v7304_v22 = vor.u32 %v7302_v39, %v14879_v50  ;;  %v14990_v39 = vpop.f32.mrb[99].mxu0  ;;  %v7862_v42 = vshrl.u32 %v14972_v0, 16 }
 0x1ad   : > { %3671 = vst.msk [vmem:[#allocation2 + $0x18] sm:$0xff] %vm366_vm7, %v3660_v37  ;;  %v3279_v15 = vld [vmem:[#allocation2 + $0x48] sm:$0xff]  ;;  %v7485_v50 = vsel %vm4386_vm8, %v7483_v27, %v7484_v63  ;;  %v15011_v34 = vrot.slane %v7873_v61, 4  ;;  %v7882_v24 = vshll.u32 %v14959_v48, 16  ;;  %v15023_v37 = vsel %vm282_vm0, %v14985_v2, 0  ;;  %v12918_v35 = vld [vmem:[%s13068_s25 + $0xd0] sm:$0xff]  }
 0x1ae   : > { %3669 = vst.msk [vmem:[#allocation2 + $0x8] sm:$0xff] %vm366_vm7, %v3658_v5  ;;  %v12151_v60 = vpop.f32.mrb[100].mxu1  ;;  %12416 = vmatmul.mubr.msk.bf16.gmra.mrb[204].mxu0 %vm263_vm1, %v7304_v22  ;;  %v15009_v38 = vrot.slane %v7870_v23, 3  ;;  %v15028_v5 = vld [vmem:[%s13068_s25 + $0xc8] sm:$0xf8]   ;;  %v15043_v22 = vld [vmem:[%s13068_s25 + $0xa0] sm:$0xff]   ;;  %v7682_v18 = vsel %vm4386_vm8, %v7679_v58, %v7681_v40 }
 0x1af   : > { %v3477_v36 = vadd.f32 %v12151_v60, %v3280_v59  ;;  %v3453_v16 = vpop.f32.mrb[101].mxu1  ;;  %12435 = vmatprep.mubr.msk.bf16.mxu0 %vm263_vm1, %v7674_v56  ;;  %v15033_v59 = vrot.slane %v7862_v42, 3  ;;  %v8101_v7 = vshrl.u32 %v12918_v35, 16  ;;  %v15088_v42 = vld [vmem:[%s13068_s25 + $0xd8] sm:$0xff]  }
 0x1b0   : > { %v3507_v53 = vld [vmem:[#allocation2 + $0x30] sm:$0xff]  ;;  %v3475_v55 = vadd.f32 %v3453_v16, %v3278_v33  ;;  %v12152_v11 = vpop.f32.mrb[102].mxu1  ;;  %v7487_v33 = vsel %vm4386_vm8, %v7484_v63, %v7486_v49  ;;  %v7678_v63 = vsel %vm4386_vm8, %v7675_v4, %v7677_v57  ;;  %v8093_v4 = vshrl.u32 %v15028_v5, 16 }
 0x1b1   : > { %v3663_v47 = vadd.f32 %v14921_v12, %v3507_v53  ;;  %3488 = vst.msk [vmem:[#allocation2 + $0x50] sm:$0xff] %vm366_vm7, %v3477_v36  ;;  %v3505_v31 = vld [vmem:[#allocation2 + $0x20] sm:$0xff]  ;;  %v3456_v29 = vpop.f32.mrb[103].mxu1 }
 0x1b2   : > { %v3661_v14 = vadd.f32 %v14926_v46, %v3505_v31  ;;  %3486 = vst.msk [vmem:[#allocation2 + $0x40] sm:$0xff] %vm366_vm7, %v3475_v55  ;;  %v3508_v12 = vld [vmem:[#allocation2 + $0x38] sm:$0xff]  ;;  %v3476_v44 = vadd.f32 %v3456_v29, %v3279_v15  ;;  %v7865_v46 = vshll.u32 %v14972_v0, 16  ;;  %v15031_v0 = vpop.f32.mrb[100].mxu0 }
 0x1b3   : > { %3674 = vst.msk [vmem:[#allocation2 + $0x30] sm:$0xff] %vm366_vm7, %v3663_v47  ;;  %v3664_v45 = vadd.f32 %v14932_v54, %v3508_v12  ;;  %v3506_v27 = vld [vmem:[#allocation2 + $0x28] sm:$0xff]  ;;  %12402 = vmatmul.mubr.msk.bf16.gmra.mrb[208].mxu1 %vm263_vm1, %v12900_v6  ;;  %v15018_v54 = vrot.slane %v7879_v62, 3  ;;  %v3691_v23 = vld [vmem:[#allocation2] sm:$0xff]  ;;  %v15040_v16 = vpop.f32.mrb[101].mxu0  ;;  %v7489_v62 = vsel %vm4386_vm8, %v7486_v49, %v7488_v41 }
 0x1b4   : > { %3672 = vst.msk [vmem:[#allocation2 + $0x20] sm:$0xff] %vm366_vm7, %v3661_v14  ;;  %v3662_v8 = vadd.f32 %v14940_v20, %v3506_v27  ;;  %3487 = vst.msk [vmem:[#allocation2 + $0x48] sm:$0xff] %vm366_vm7, %v3476_v44  ;;  %12421 = vmatprep.mubr.msk.bf16.mxu1 %vm263_vm1, %v7485_v50  ;;  %v3693_v20 = vld [vmem:[#allocation2 + $0x10] sm:$0xff]  ;;  %v3694_v55 = vld [vmem:[#allocation2 + $0x18] sm:$0xff]  ;;  %v15045_v30 = vpop.f32.mrb[102].mxu0  ;;  %v15066_v50 = vrot.slane %v7865_v46, 4 }
 0x1b5   : > { %3675 = vst.msk [vmem:[#allocation2 + $0x38] sm:$0xff] %vm366_vm7, %v3664_v45  ;;  %v3692_v15 = vld [vmem:[#allocation2 + $0x8] sm:$0xff]  ;;  %v15064_v29 = vpop.f32.mrb[103].mxu0  ;;  %v8096_v14 = vshll.u32 %v15028_v5, 16  ;;  %v7888_v44 = vshrl.u32 %v15043_v22, 16  ;;  %v8103_v45 = vrot.slane %v8101_v7, 3 }
 0x1b6   : > { %3673 = vst.msk [vmem:[#allocation2 + $0x28] sm:$0xff] %vm366_vm7, %v3662_v8  ;;  %v12171_v6 = vpop.f32.mrb[104].mxu1  ;;  %12436 = vmatmul.mubr.msk.bf16.vlgmr.msra.gmra.mrb[208].mxu0 %vm263_vm1, %v7676_v32  ;;  %v7891_v27 = vshll.u32 %v15043_v22, 16 }
 0x1b7   : > { %v3848_v60 = vadd.f32 %v12171_v6, %v3693_v20  ;;  %v3800_v36 = vpop.f32.mrb[105].mxu1  ;;  %12462 = vmatpush3.bf16.msra.mxu0 %v14947_v21  ;;  %12439 = vmatprep.mubr.msk.bf16.mxu0 %vm263_vm1, %v7678_v63  ;;  %v7491_v20 = vsel %vm4386_vm8, %v7488_v41, %v7490_v10  ;;  %v7680_v41 = vsel %vm4386_vm8, %v7677_v57, %v7679_v58 }
 0x1b8   : > { %v3511_v61 = vld [vmem:[#allocation2 + $0x50] sm:$0xff]  ;;  %v3846_v53 = vadd.f32 %v3800_v36, %v3691_v23  ;;  %v12172_v11 = vpop.f32.mrb[106].mxu1  ;;  %v15094_v8 = vpop.f32.mrb[104].mxu0  ;;  %v15109_v23 = vrot.slane %v8096_v14, 4  ;;  %v15141_v10 = vor.u32 %v15011_v34, %v15009_v38  ;;  %v7890_v38 = vrot.slane %v7888_v44, 3 }
 0x1b9   : > { %v3667_v47 = vadd.f32 %v14975_v51, %v3511_v61  ;;  %v3509_v31 = vld [vmem:[#allocation2 + $0x40] sm:$0xff]  ;;  %3859 = vst.msk [vmem:[#allocation2 + $0x10] sm:$0xff] %vm366_vm7, %v3848_v60  ;;  %v3849_v19 = vadd.f32 %v12172_v11, %v3694_v55  ;;  %v3803_v49 = vpop.f32.mrb[107].mxu1  ;;  %v8104_v51 = vshll.u32 %v12918_v35, 16  ;;  %v15105_v6 = vpop.f32.mrb[105].mxu0  ;;  %v15107_v60 = vrot.slane %v8093_v4, 3 }
 0x1ba   : > { %v3665_v25 = vadd.f32 %v14977_v52, %v3509_v31  ;;  %3857 = vst.msk [vmem:[#allocation2] sm:$0xff] %vm366_vm7, %v3846_v53  ;;  %v3847_v43 = vadd.f32 %v3803_v49, %v3692_v15  ;;  %v15079_v52 = vld [vmem:[%s16210_s1 + $0xa0] sm:$0xf]  ;;  %v15114_v53 = vpop.f32.mrb[106].mxu0  ;;  %v8110_v55 = vshrl.u32 %v15088_v42, 16  ;;  %v7868_v15 = vor.u32 %v15066_v50, %v15033_v59 }
 0x1bb   : > { %3678 = vst.msk [vmem:[#allocation2 + $0x50] sm:$0xff] %vm366_vm7, %v3667_v47  ;;  %v3510_v56 = vld [vmem:[#allocation2 + $0x48] sm:$0xff]  ;;  %3860 = vst.msk [vmem:[#allocation2 + $0x18] sm:$0xff] %vm366_vm7, %v3849_v19  ;;  %12422 = vmatmul.mubr.msk.bf16.vlgmr.msra.gmra.mrb[212].mxu1 %vm263_vm1, %v7487_v33  ;;  %12658 = vmatprep.subr.msk.bf16.mxu0 %vm282_vm0, %v15079_v52  ;;  %v3695_v35 = vld [vmem:[#allocation2 + $0x20] sm:$0xff]  ;;  %v15132_v31 = vpop.f32.mrb[107].mxu0  ;;  %v7884_v49 = vrot.slane %v7882_v24, 4  ;;  %v8099_v24 = vor.u32 %v15109_v23, %v15107_v60 }
 0x1bc   : > { %3676 = vst.msk [vmem:[#allocation2 + $0x40] sm:$0xff] %vm366_vm7, %v3665_v25  ;;  %v3666_v12 = vadd.f32 %v14990_v39, %v3510_v56  ;;  %3858 = vst.msk [vmem:[#allocation2 + $0x8] sm:$0xff] %vm366_vm7, %v3847_v43  ;;  %12448 = vmatpush3.bf16.msra.mxu1 %v14893_v1  ;;  %12425 = vmatprep.mubr.msk.bf16.mxu1 %vm263_vm1, %v7489_v62  ;;  %v3697_v39 = vld [vmem:[#allocation2 + $0x30] sm:$0xff]  ;;  %v8106_v1 = vrot.slane %v8104_v51, 4  ;;  %v3698_v22 = vld [vmem:[#allocation2 + $0x38] sm:$0xff]  ;;  %v7893_v34 = vrot.slane %v7891_v27, 4 }
 0x1bd   : > { %12657 = vmatprep.subr.msk.bf16.mxu1 %vm282_vm0, %v14985_v2  ;;  %v15112_v2 = vld [vmem:[%s13068_s25 + $0xa8] sm:$0xff]   ;;  %v15128_v11 = vld [vmem:[%s13068_s25 + $0xe0] sm:$0xff]   ;;  %v15169_v25 = vld [vmem:[%s13068_s25 + $0xb0] sm:$0xff]  }
 0x1be   : > { %3677 = vst.msk [vmem:[#allocation2 + $0x48] sm:$0xff] %vm366_vm7, %v3666_v12  ;;  %v12175_v46 = vpop.f32.mrb[108].mxu1  ;;  %v3696_v47 = vld [vmem:[#allocation2 + $0x28] sm:$0xff]  ;;  %12440 = vmatmul.mubr.msk.bf16.gmra.mrb[212].mxu0 %vm263_vm1, %v7680_v41  ;;  %v15162_v59 = vor.u32 %v8106_v1, %v8103_v45  ;;  %v7897_v50 = vshrl.u32 %v15112_v2, 16  ;;  %v7900_v7 = vshll.u32 %v15112_v2, 16  ;;  %v8122_v56 = vshll.u32 %v15128_v11, 16 }
 0x1bf   : > { %v3852_v21 = vadd.f32 %v12175_v46, %v3697_v39  ;;  %v3816_v5 = vpop.f32.mrb[109].mxu1  ;;  %12443 = vmatprep.mubr.msk.bf16.mxu0 %vm263_vm1, %v7682_v18 }
 0x1c0   : > { %v3882_v36 = vld [vmem:[#allocation2 + $0x10] sm:$0xff]  ;;  %v3850_v33 = vadd.f32 %v3816_v5, %v3695_v35  ;;  %v12176_v61 = vpop.f32.mrb[110].mxu1  ;;  %v15172_v51 = vpop.f32.mrb[108].mxu0  ;;  %v7885_v35 = vor.u32 %v7884_v49, %v15018_v54  ;;  %v12924_v5 = vld [vmem:[%s13068_s25 + $0xe8] sm:$0xff]  }
 0x1c1   : > { %v4080_v62 = vadd.f32 %v15031_v0, %v3882_v36  ;;  %3863 = vst.msk [vmem:[#allocation2 + $0x30] sm:$0xff] %vm366_vm7, %v3852_v21  ;;  %v3880_v32 = vld [vmem:[#allocation2] sm:$0xff]  ;;  %v3853_v63 = vadd.f32 %v12176_v61, %v3698_v22  ;;  %v3819_v17 = vpop.f32.mrb[111].mxu1  ;;  %v7877_v21 = vsel %vm6445_vm9, %v7868_v15, %v15141_v10  ;;  %v15187_v22 = vor.u32 %v7893_v34, %v7890_v38 }
 0x1c2   : > { %v4078_v57 = vadd.f32 %v15040_v16, %v3880_v32  ;;  %3861 = vst.msk [vmem:[#allocation2 + $0x20] sm:$0xff] %vm366_vm7, %v3850_v33  ;;  %v3883_v0 = vld [vmem:[#allocation2 + $0x18] sm:$0xff]  ;;  %v3851_v19 = vadd.f32 %v3819_v17, %v3696_v47  ;;  %v8113_v16 = vshll.u32 %v15088_v42, 16  ;;  %v3701_v43 = vld [vmem:[#allocation2 + $0x50] sm:$0xff]  ;;  %v15175_v42 = vpop.f32.mrb[109].mxu0  ;;  %v8108_v33 = vsel %vm6445_vm9, %v8099_v24, %v15162_v59 }
 0x1c3   : > { %4091 = vst.msk [vmem:[#allocation2 + $0x10] sm:$0xff] %vm366_vm7, %v4080_v62  ;;  %v4081_v3 = vadd.f32 %v15045_v30, %v3883_v0  ;;  %3864 = vst.msk [vmem:[#allocation2 + $0x38] sm:$0xff] %vm366_vm7, %v3853_v63  ;;  %v3881_v58 = vld [vmem:[#allocation2 + $0x8] sm:$0xff]  ;;  %12426 = vmatmul.mubr.msk.bf16.gmra.mrb[216].mxu1 %vm263_vm1, %v7491_v20  ;;  %v8112_v30 = vrot.slane %v8110_v55, 3  ;;  %v3699_v12 = vld [vmem:[#allocation2 + $0x40] sm:$0xff]  ;;  %v12194_v1 = vpop.f32.mrb[110].mxu0  ;;  %v7895_v34 = vsel %vm6445_vm9, %v7885_v35, %v15187_v22 }
 0x1c4   : > { %4089 = vst.msk [vmem:[#allocation2] sm:$0xff] %vm366_vm7, %v4078_v57  ;;  %v4079_v48 = vadd.f32 %v15064_v29, %v3881_v58  ;;  %3862 = vst.msk [vmem:[#allocation2 + $0x28] sm:$0xff] %vm366_vm7, %v3851_v19  ;;  %12429 = vmatprep.mubr.msk.bf16.mxu1 %vm263_vm1, %v7493_v28  ;;  %v8119_v29 = vshrl.u32 %v15128_v11, 16  ;;  %v8115_v45 = vrot.slane %v8113_v16, 4  ;;  %v15183_v36 = vpop.f32.mrb[111].mxu0  ;;  %v7906_v61 = vshrl.u32 %v15169_v25, 16 }
 0x1c5   : > { %4092 = vst.msk [vmem:[#allocation2 + $0x18] sm:$0xff] %vm366_vm7, %v4081_v3  ;;  %v3700_v23 = vld [vmem:[#allocation2 + $0x48] sm:$0xff]  ;;  %v12925_v28 = vld [vmem:[%s13068_s25 + $0xf0] sm:$0xff]   ;;  %v8124_v11 = vrot.slane %v8122_v56, 4  ;;  %v7902_v63 = vrot.slane %v7900_v7, 4  ;;  %v7909_v47 = vshll.u32 %v15169_v25, 16  ;;  %v7886_v58 = vsel %vm6445_vm9, %v15141_v10, %v7885_v35 }
 0x1c6   : > { %4090 = vst.msk [vmem:[#allocation2 + $0x8] sm:$0xff] %vm366_vm7, %v4079_v48  ;;  %v12179_v4 = vpop.f32.mrb[112].mxu1  ;;  %v8121_v55 = vrot.slane %v8119_v29, 3  ;;  %12444 = vmatmul.mubr.msk.bf16.gmra.mrb[216].mxu0 %vm263_vm1, %v7681_v40  ;;  %v8116_v26 = vor.u32 %v8115_v45, %v8112_v30  ;;  %v8137_v13 = vshrl.u32 %v12925_v28, 16  ;;  %v8140_v40 = vshll.u32 %v12925_v28, 16 }
 0x1c7   : > { %v3856_v14 = vadd.f32 %v12179_v4, %v3701_v43  ;;  %v3832_v44 = vpop.f32.mrb[113].mxu1  ;;  %12463 = vmatprep.mubr.msk.bf16.mxu0 %vm263_vm1, %v8108_v33  ;;  %v7908_v19 = vrot.slane %v7906_v61, 3  ;;  %v7911_v16 = vrot.slane %v7909_v47, 4  ;;  %v15236_v1 = vld [vmem:[%s16210_s1 + $0xa4] sm:$0xf] }
 0x1c8   : > { %v3886_v27 = vld [vmem:[#allocation2 + $0x30] sm:$0xff]  ;;  %v3854_v39 = vadd.f32 %v3832_v44, %v3699_v12  ;;  %v12180_v46 = vpop.f32.mrb[114].mxu1  ;;  %v15209_v0 = vpop.f32.mrb[112].mxu0  ;;  %v8117_v29 = vsel %vm6445_vm9, %v15162_v59, %v8116_v26  ;;  %v8139_v45 = vrot.slane %v8137_v13, 3  ;;  %v8514_v59 = vsel %vm282_vm0, %v15079_v52, 0 }
 0x1c9   : > { %v4084_v20 = vadd.f32 %v15094_v8, %v3886_v27  ;;  %3867 = vst.msk [vmem:[#allocation2 + $0x50] sm:$0xff] %vm366_vm7, %v3856_v14  ;;  %v3884_v60 = vld [vmem:[#allocation2 + $0x20] sm:$0xff]  ;;  %v3835_v2 = vpop.f32.mrb[115].mxu1  ;;  %v15215_v38 = vpop.f32.mrb[113].mxu0  ;;  %v8142_v27 = vrot.slane %v8140_v40, 4 }
 0x1ca   : > { %v4082_v54 = vadd.f32 %v15105_v6, %v3884_v60  ;;  %3865 = vst.msk [vmem:[#allocation2 + $0x40] sm:$0xff] %vm366_vm7, %v3854_v39  ;;  %v3887_v8 = vld [vmem:[#allocation2 + $0x38] sm:$0xff]  ;;  %v3855_v41 = vadd.f32 %v3835_v2, %v3700_v23  ;;  %v7899_v6 = vrot.slane %v7897_v50, 3  ;;  %v4114_v18 = vld [vmem:[#allocation2 + $0x10] sm:$0xff]  ;;  %v15219_v7 = vpop.f32.mrb[114].mxu0 }
 0x1cb   : > { %4095 = vst.msk [vmem:[#allocation2 + $0x30] sm:$0xff] %vm366_vm7, %v4084_v20  ;;  %v4085_v62 = vadd.f32 %v15114_v53, %v3887_v8  ;;  %v3885_v32 = vld [vmem:[#allocation2 + $0x28] sm:$0xff]  ;;  %12430 = vmatmul.mubr.msk.bf16.gmra.mrb[220].mxu1 %vm263_vm1, %v7492_v9  ;;  %v8128_v9 = vshrl.u32 %v12924_v5, 16  ;;  %v8131_v53 = vshll.u32 %v12924_v5, 16  ;;  %v4112_v49 = vld [vmem:[#allocation2] sm:$0xff]  ;;  %v15225_v44 = vpop.f32.mrb[115].mxu0  ;;  %v15253_v20 = vor.u32 %v7911_v16, %v7908_v19 }
 0x1cc   : > { %4093 = vst.msk [vmem:[#allocation2 + $0x20] sm:$0xff] %vm366_vm7, %v4082_v54  ;;  %v4083_v17 = vadd.f32 %v15132_v31, %v3885_v32  ;;  %3866 = vst.msk [vmem:[#allocation2 + $0x48] sm:$0xff] %vm366_vm7, %v3855_v41  ;;  %12449 = vmatprep.mubr.msk.bf16.mxu1 %vm263_vm1, %v7877_v21  ;;  %v15211_v31 = vor.u32 %v8124_v11, %v8121_v55  ;;  %v4115_v30 = vld [vmem:[#allocation2 + $0x18] sm:$0xff]  ;;  %v15245_v52 = vld [vmem:[%s16210_s1 + $0xa8] sm:$0xf]  ;;  %v7903_v35 = vor.u32 %v7902_v63, %v7899_v6 }
 0x1cd   : > { %4096 = vst.msk [vmem:[#allocation2 + $0x38] sm:$0xff] %vm366_vm7, %v4085_v62  ;;  %v8130_v25 = vrot.slane %v8128_v9, 3  ;;  %v8133_v43 = vrot.slane %v8131_v53, 4  ;;  %v4113_v14 = vld [vmem:[#allocation2 + $0x8] sm:$0xff]  ;;  %v15255_v60 = vor.u32 %v8142_v27, %v8139_v45 }
 0x1ce   : > { %4094 = vst.msk [vmem:[#allocation2 + $0x28] sm:$0xff] %vm366_vm7, %v4083_v17  ;;  %v12199_v57 = vpop.f32.mrb[116].mxu1  ;;  %12464 = vmatmul.mubr.msk.bf16.vlgmr.msra.gmra.mrb[220].mxu0 %vm263_vm1, %v8117_v29  ;;  %v7904_v11 = vsel %vm6445_vm9, %v15187_v22, %v7903_v35  ;;  %v7913_v53 = vsel %vm6445_vm9, %v7903_v35, %v15253_v20  ;;  %v12926_v16 = vld [vmem:[%s13068_s25 + $0x8c] sm:$0xff]  }
 0x1cf   : > { %v4311_v15 = vadd.f32 %v12199_v57, %v4114_v18  ;;  %v4263_v3 = vpop.f32.mrb[117].mxu1  ;;  %v8134_v5 = vor.u32 %v8133_v43, %v8130_v25  ;;  %12490 = vmatpush3.bf16.msra.mxu0 %v8514_v59 }
 0x1d0   : > { %v3890_v48 = vld [vmem:[#allocation2 + $0x50] sm:$0xff]  ;;  %v4309_v24 = vadd.f32 %v4263_v3, %v4112_v49  ;;  %v12200_v50 = vpop.f32.mrb[118].mxu1  ;;  %v12217_v33 = vpop.f32.mrb[116].mxu0  ;;  %12660 = vmatprep.subr.msk.bf16.mxu0 %vm282_vm0, %v15245_v52 }
 0x1d1   : > { %v4088_v4 = vadd.f32 %v15172_v51, %v3890_v48  ;;  %v3888_v10 = vld [vmem:[#allocation2 + $0x40] sm:$0xff]  ;;  %4322 = vst.msk [vmem:[#allocation2 + $0x10] sm:$0xff] %vm366_vm7, %v4311_v15  ;;  %v4312_v56 = vadd.f32 %v12200_v50, %v4115_v30  ;;  %v4266_v12 = vpop.f32.mrb[119].mxu1  ;;  %v8126_v51 = vsel %vm6445_vm9, %v8116_v26, %v15211_v31  ;;  %v4469_v28 = vpop.f32.mrb[117].mxu0  ;;  %v8135_v32 = vsel %vm6445_vm9, %v15211_v31, %v8134_v5 }
 0x1d2   : > { %v4086_v39 = vadd.f32 %v15175_v42, %v3888_v10  ;;  %4320 = vst.msk [vmem:[#allocation2] sm:$0xff] %vm366_vm7, %v4309_v24  ;;  %v4310_v46 = vadd.f32 %v4266_v12, %v4113_v14  ;;  %12467 = vmatprep.mubr.msk.bf16.mxu0 %vm263_vm1, %v8126_v51  ;;  %v4118_v23 = vld [vmem:[#allocation2 + $0x30] sm:$0xff]  ;;  %v12218_v62 = vpop.f32.mrb[118].mxu0  ;;  %v8144_v13 = vsel %vm6445_vm9, %v8134_v5, %v15255_v60 }
 0x1d3   : > { %4099 = vst.msk [vmem:[#allocation2 + $0x50] sm:$0xff] %vm366_vm7, %v4088_v4  ;;  %v3889_v21 = vld [vmem:[#allocation2 + $0x48] sm:$0xff]  ;;  %4323 = vst.msk [vmem:[#allocation2 + $0x18] sm:$0xff] %vm366_vm7, %v4312_v56  ;;  %12450 = vmatmul.mubr.msk.bf16.vlgmr.msra.gmra.mrb[224].mxu1 %vm263_vm1, %v7886_v58  ;;  %v4472_v9 = vpop.f32.mrb[119].mxu0 }
 0x1d4   : > { %4097 = vst.msk [vmem:[#allocation2 + $0x40] sm:$0xff] %vm366_vm7, %v4086_v39  ;;  %v4087_v42 = vadd.f32 %v15183_v36, %v3889_v21  ;;  %4321 = vst.msk [vmem:[#allocation2 + $0x8] sm:$0xff] %vm366_vm7, %v4310_v46  ;;  %12476 = vmatpush3.bf16.msra.mxu1 %v15023_v37  ;;  %12453 = vmatprep.mubr.msk.bf16.mxu1 %vm263_vm1, %v7895_v34  ;;  %v4116_v36 = vld [vmem:[#allocation2 + $0x20] sm:$0xff]  ;;  %v4119_v41 = vld [vmem:[#allocation2 + $0x38] sm:$0xff] }
 0x1d5   : > { %12659 = vmatprep.subr.msk.bf16.mxu1 %vm282_vm0, %v15236_v1  ;;  %v4117_v17 = vld [vmem:[#allocation2 + $0x28] sm:$0xff]  ;;  %v12927_v39 = vld [vmem:[%s13068_s25 + $0x94] sm:$0xff]   ;;  %v12929_v21 = vld [vmem:[%s13068_s25 + $0x9c] sm:$0xff]  }
 0x1d6   : > { %4098 = vst.msk [vmem:[#allocation2 + $0x48] sm:$0xff] %vm366_vm7, %v4087_v42  ;;  %v12203_v2 = vpop.f32.mrb[120].mxu1  ;;  %12468 = vmatmul.mubr.msk.bf16.gmra.mrb[224].mxu0 %vm263_vm1, %v8135_v32  ;;  %v12930_v42 = vld [vmem:[%s13068_s25 + $0xd4] sm:$0xff]  }
 0x1d7   : > { %v4315_v37 = vadd.f32 %v12203_v2, %v4118_v23  ;;  %v4279_v61 = vpop.f32.mrb[121].mxu1  ;;  %12471 = vmatprep.mubr.msk.bf16.mxu0 %vm263_vm1, %v8144_v13  ;;  %v12932_v23 = vld [vmem:[%s13068_s25 + $0xdc] sm:$0xff]   ;;  %v15310_v2 = vld [vmem:[%s13068_s25 + $0x8c] sm:$0xff]  }
 0x1d8   : > { %v4345_v54 = vld [vmem:[#allocation2 + $0x10] sm:$0xff]  ;;  %v4313_v8 = vadd.f32 %v4279_v61, %v4116_v36  ;;  %v12204_v55 = vpop.f32.mrb[122].mxu1  ;;  %v12221_v49 = vpop.f32.mrb[120].mxu0 }
 0x1d9   : > { %v4501_v6 = vadd.f32 %v15209_v0, %v4345_v54  ;;  %4326 = vst.msk [vmem:[#allocation2 + $0x30] sm:$0xff] %vm366_vm7, %v4315_v37  ;;  %v4343_v63 = vld [vmem:[#allocation2] sm:$0xff]  ;;  %v4316_v47 = vadd.f32 %v12204_v55, %v4119_v41  ;;  %v4282_v26 = vpop.f32.mrb[123].mxu1  ;;  %v4485_v34 = vpop.f32.mrb[121].mxu0 }
 0x1da   : > { %v4499_v22 = vadd.f32 %v15215_v38, %v4343_v63  ;;  %4324 = vst.msk [vmem:[#allocation2 + $0x20] sm:$0xff] %vm366_vm7, %v4313_v8  ;;  %v4346_v40 = vld [vmem:[#allocation2 + $0x18] sm:$0xff]  ;;  %v4314_v18 = vadd.f32 %v4282_v26, %v4117_v17  ;;  %v4122_v19 = vld [vmem:[#allocation2 + $0x50] sm:$0xff]  ;;  %v12222_v50 = vpop.f32.mrb[122].mxu0  ;;  %v15331_v26 = vld [vmem:[%s16210_s1 + $0xac] sm:$0xf] }
 0x1db   : > { %4512 = vst.msk [vmem:[#allocation2 + $0x10] sm:$0xff] %vm366_vm7, %v4501_v6  ;;  %v4502_v57 = vadd.f32 %v15219_v7, %v4346_v40  ;;  %4327 = vst.msk [vmem:[#allocation2 + $0x38] sm:$0xff] %vm366_vm7, %v4316_v47  ;;  %v4344_v0 = vld [vmem:[#allocation2 + $0x8] sm:$0xff]  ;;  %12454 = vmatmul.mubr.msk.bf16.gmra.mrb[228].mxu1 %vm263_vm1, %v7904_v11  ;;  %v4120_v58 = vld [vmem:[#allocation2 + $0x40] sm:$0xff]  ;;  %v4488_v10 = vpop.f32.mrb[123].mxu0 }
 0x1dc   : > { %4510 = vst.msk [vmem:[#allocation2] sm:$0xff] %vm366_vm7, %v4499_v22  ;;  %v4500_v31 = vadd.f32 %v15225_v44, %v4344_v0  ;;  %4325 = vst.msk [vmem:[#allocation2 + $0x28] sm:$0xff] %vm366_vm7, %v4314_v18  ;;  %12457 = vmatprep.mubr.msk.bf16.mxu1 %vm263_vm1, %v7913_v53  ;;  %v12928_v7 = vld [vmem:[%s13068_s25 + $0xcc] sm:$0xff]   ;;  %v15326_v17 = vld [vmem:[%s13068_s25 + $0x94] sm:$0xff]   ;;  %v8676_v53 = vshll.u32 %v15310_v2, 16 }
 0x1dd   : > { %4513 = vst.msk [vmem:[#allocation2 + $0x18] sm:$0xff] %vm366_vm7, %v4502_v57  ;;  %v4121_v43 = vld [vmem:[#allocation2 + $0x48] sm:$0xff]  ;;  %v15317_v8 = vld [vmem:[%s13068_s25 + $0x10] sm:$0xff]   ;;  %v15349_v40 = vld [vmem:[%s13068_s25 + $0x18] sm:$0xff]  }
 0x1de   : > { %4511 = vst.msk [vmem:[#allocation2 + $0x8] sm:$0xff] %vm366_vm7, %v4500_v31  ;;  %v12207_v15 = vpop.f32.mrb[124].mxu1  ;;  %12472 = vmatmul.mubr.msk.bf16.gmra.mrb[228].mxu0 %vm263_vm1, %v15255_v60  ;;  %v12931_v22 = vld [vmem:[%s13068_s25 + $0xa4] sm:$0xff]   ;;  %v8901_v18 = vshll.u32 %v15317_v8, 16 }
 0x1df   : > { %v4319_v3 = vadd.f32 %v12207_v15, %v4122_v19  ;;  %v4295_v38 = vpop.f32.mrb[125].mxu1  ;;  %12491 = vmatprep.mubr.msk.bf16.mxu0 %vm263_vm1, %v12928_v7  ;;  %v12933_v19 = vld [vmem:[%s13068_s25 + $0xac] sm:$0xff]   ;;  %v12934_v15 = vld [vmem:[%s13068_s25 + $0xe4] sm:$0xff]  }
 0x1e0   : > { %v4349_v48 = vld [vmem:[#allocation2 + $0x30] sm:$0xff]  ;;  %v4317_v24 = vadd.f32 %v4295_v38, %v4120_v58  ;;  %v12208_v30 = vpop.f32.mrb[126].mxu1 }
 0x1e1   : > { %v4505_v29 = vadd.f32 %v12217_v33, %v4349_v48  ;;  %4330 = vst.msk [vmem:[#allocation2 + $0x50] sm:$0xff] %vm366_vm7, %v4319_v3  ;;  %v4347_v25 = vld [vmem:[#allocation2 + $0x20] sm:$0xff]  ;;  %v4298_v4 = vpop.f32.mrb[127].mxu1  ;;  %v15302_v51 = vpop.f32.mrb[124].mxu0  ;;  %v8678_v48 = vrot.slane %v8676_v53, 1 }
 0x1e2   : > { %v4503_v56 = vadd.f32 %v4469_v28, %v4347_v25  ;;  %4328 = vst.msk [vmem:[#allocation2 + $0x40] sm:$0xff] %vm366_vm7, %v4317_v24  ;;  %v4350_v14 = vld [vmem:[#allocation2 + $0x38] sm:$0xff]  ;;  %v4318_v12 = vadd.f32 %v4298_v4, %v4121_v43  ;;  %v4535_v46 = vld [vmem:[#allocation2 + $0x10] sm:$0xff]  ;;  %v15306_v60 = vpop.f32.mrb[125].mxu0  ;;  %v8739_v28 = vsel %vm282_vm0, %v15236_v1, 0  ;;  %v8964_v1 = vsel %vm282_vm0, %v15245_v52, 0 }
 0x1e3   : > { %4516 = vst.msk [vmem:[#allocation2 + $0x30] sm:$0xff] %vm366_vm7, %v4505_v29  ;;  %v4506_v44 = vadd.f32 %v12218_v62, %v4350_v14  ;;  %v4348_v45 = vld [vmem:[#allocation2 + $0x28] sm:$0xff]  ;;  %12458 = vmatmul.mubr.msk.bf16.gmra.mrb[232].mxu1 %vm263_vm1, %v15253_v20  ;;  %v4533_v5 = vld [vmem:[#allocation2] sm:$0xff]  ;;  %v15314_v54 = vpop.f32.mrb[126].mxu0  ;;  %v15341_v52 = vld [vmem:[%s16210_s1 + $0xb0] sm:$0xf] }
 0x1e4   : > { %4514 = vst.msk [vmem:[#allocation2 + $0x20] sm:$0xff] %vm366_vm7, %v4503_v56  ;;  %v4504_v27 = vadd.f32 %v4472_v9, %v4348_v45  ;;  %4329 = vst.msk [vmem:[#allocation2 + $0x48] sm:$0xff] %vm366_vm7, %v4318_v12  ;;  %12477 = vmatprep.mubr.msk.bf16.mxu1 %vm263_vm1, %v12926_v16  ;;  %v4536_v37 = vld [vmem:[#allocation2 + $0x18] sm:$0xff]  ;;  %v15320_v6 = vpop.f32.mrb[127].mxu0  ;;  %v8674_v16 = vshrl.u32 %v15310_v2, 16  ;;  %v8681_v24 = vshll.u32 %v15326_v17, 16 }
 0x1e5   : > { %4517 = vst.msk [vmem:[#allocation2 + $0x38] sm:$0xff] %vm366_vm7, %v4506_v44  ;;  %v4534_v62 = vld [vmem:[#allocation2 + $0x8] sm:$0xff]  ;;  %v15369_v43 = vld [vmem:[%s13068_s25 + $0x9c] sm:$0xff]   ;;  %v8899_v4 = vshrl.u32 %v15317_v8, 16 }
 0x1e6   : > { %4515 = vst.msk [vmem:[#allocation2 + $0x28] sm:$0xff] %vm366_vm7, %v4504_v27  ;;  %v12227_v59 = vpop.f32.mrb[128].mxu1  ;;  %12492 = vmatmul.mubr.msk.bf16.vlgmr.msra.gmra.mrb[232].mxu0 %vm263_vm1, %v12930_v42  ;;  %v8903_v27 = vrot.slane %v8901_v18, 1  ;;  %v8679_v2 = vor.u32 %v8678_v48, %v8674_v16  ;;  %v15421_v48 = vld [vmem:[%s13068_s25 + $0xac] sm:$0xff]  }
 0x1e7   : > { %v4732_v35 = vadd.f32 %v12227_v59, %v4535_v46  ;;  %v4684_v20 = vpop.f32.mrb[129].mxu1  ;;  %12518 = vmatpush3.bf16.msra.mxu0 %v8964_v1  ;;  %12495 = vmatprep.mubr.msk.bf16.mxu0 %vm263_vm1, %v12932_v23  ;;  %v15394_v23 = vld [vmem:[%s13068_s25 + $0x20] sm:$0xff]  }
 0x1e8   : > { %v4353_v36 = vld [vmem:[#allocation2 + $0x50] sm:$0xff]  ;;  %v4730_v33 = vadd.f32 %v4684_v20, %v4533_v5  ;;  %v12228_v61 = vpop.f32.mrb[130].mxu1  ;;  %12662 = vmatprep.subr.msk.bf16.mxu0 %vm282_vm0, %v15341_v52  ;;  %v8685_v5 = vshrl.u32 %v15326_v17, 16  ;;  %v8914_v18 = vshll.u32 %v15394_v23, 16 }
 0x1e9   : > { %v4509_v41 = vadd.f32 %v12221_v49, %v4353_v36  ;;  %v4351_v55 = vld [vmem:[#allocation2 + $0x40] sm:$0xff]  ;;  %4743 = vst.msk [vmem:[#allocation2 + $0x10] sm:$0xff] %vm366_vm7, %v4732_v35  ;;  %v4733_v11 = vadd.f32 %v12228_v61, %v4536_v37  ;;  %v4687_v32 = vpop.f32.mrb[131].mxu1  ;;  %v15353_v31 = vpop.f32.mrb[128].mxu0  ;;  %v12936_v49 = vld [vmem:[%s13068_s25 + $0xec] sm:$0xff]   ;;  %v8683_v35 = vrot.slane %v8681_v24, 1 }
 0x1ea   : > { %v4507_v63 = vadd.f32 %v4485_v34, %v4351_v55  ;;  %4741 = vst.msk [vmem:[#allocation2] sm:$0xff] %vm366_vm7, %v4730_v33  ;;  %v4731_v47 = vadd.f32 %v4687_v32, %v4534_v62  ;;  %v4539_v57 = vld [vmem:[#allocation2 + $0x30] sm:$0xff]  ;;  %v15362_v34 = vpop.f32.mrb[129].mxu0  ;;  %v8689_v36 = vshll.u32 %v15369_v43, 16  ;;  %v8904_v33 = vor.u32 %v8903_v27, %v8899_v4  ;;  %v15446_v27 = vld [vmem:[%s13068_s25 + $0x38] sm:$0x1f]  }
 0x1eb   : > { %4520 = vst.msk [vmem:[#allocation2 + $0x50] sm:$0xff] %vm366_vm7, %v4509_v41  ;;  %v4352_v9 = vld [vmem:[#allocation2 + $0x48] sm:$0xff]  ;;  %4744 = vst.msk [vmem:[#allocation2 + $0x18] sm:$0xff] %vm366_vm7, %v4733_v11  ;;  %12478 = vmatmul.mubr.msk.bf16.vlgmr.msra.gmra.mrb[236].mxu1 %vm263_vm1, %v12927_v39  ;;  %v4537_v58 = vld [vmem:[#allocation2 + $0x20] sm:$0xff]  ;;  %v15366_v25 = vpop.f32.mrb[130].mxu0  ;;  %v8906_v39 = vshll.u32 %v15349_v40, 16 }
 0x1ec   : > { %4518 = vst.msk [vmem:[#allocation2 + $0x40] sm:$0xff] %vm366_vm7, %v4507_v63  ;;  %v4508_v13 = vadd.f32 %v4488_v10, %v4352_v9  ;;  %4742 = vst.msk [vmem:[#allocation2 + $0x8] sm:$0xff] %vm366_vm7, %v4731_v47  ;;  %12504 = vmatpush3.bf16.msra.mxu1 %v8739_v28  ;;  %12481 = vmatprep.mubr.msk.bf16.mxu1 %vm263_vm1, %v12929_v21  ;;  %v4540_v7 = vld [vmem:[#allocation2 + $0x38] sm:$0xff]  ;;  %v15374_v45 = vpop.f32.mrb[131].mxu0  ;;  %v15403_v41 = vld [vmem:[%s13068_s25 + $0x28] sm:$0xff]   ;;  %v8687_v63 = vor.u32 %v8685_v5, %v8683_v35  ;;  %v8693_v47 = vshrl.u32 %v15369_v43, 16 }
 0x1ed   : > { %12661 = vmatprep.subr.msk.bf16.mxu1 %vm282_vm0, %v15331_v26  ;;  %v4538_v12 = vld [vmem:[#allocation2 + $0x28] sm:$0xff]  ;;  %v8908_v37 = vrot.slane %v8906_v39, 1  ;;  %v8918_v24 = vshrl.u32 %v15394_v23, 16  ;;  %v15433_v43 = vld [vmem:[%s13068_s25 + $0x30] sm:$0xff]  }
 0x1ee   : > { %4519 = vst.msk [vmem:[#allocation2 + $0x48] sm:$0xff] %vm366_vm7, %v4508_v13  ;;  %v12231_v0 = vpop.f32.mrb[132].mxu1  ;;  %12496 = vmatmul.mubr.msk.bf16.gmra.mrb[236].mxu0 %vm263_vm1, %v12934_v15  ;;  %v8910_v13 = vshrl.u32 %v15349_v40, 16 }
 0x1ef   : > { %v4736_v3 = vadd.f32 %v12231_v0, %v4539_v57  ;;  %v4700_v38 = vpop.f32.mrb[133].mxu1  ;;  %12499 = vmatprep.mubr.msk.bf16.mxu0 %vm263_vm1, %v12936_v49  ;;  %v8909_v40 = vsel %vm609_vm2, %v8904_v33, %v8908_v37 }
 0x1f0   : > { %v4766_v30 = vld [vmem:[#allocation2 + $0x10] sm:$0xff]  ;;  %v4734_v50 = vadd.f32 %v4700_v38, %v4537_v58  ;;  %v12232_v29 = vpop.f32.mrb[134].mxu1  ;;  %v8691_v58 = vrot.slane %v8689_v36, 1 }
 0x1f1   : > { %v4963_v10 = vadd.f32 %v15302_v51, %v4766_v30  ;;  %4747 = vst.msk [vmem:[#allocation2 + $0x30] sm:$0xff] %vm366_vm7, %v4736_v3  ;;  %v4764_v56 = vld [vmem:[#allocation2] sm:$0xff]  ;;  %v4737_v14 = vadd.f32 %v12232_v29, %v4540_v7  ;;  %v4703_v44 = vpop.f32.mrb[135].mxu1  ;;  %v15400_v8 = vpop.f32.mrb[132].mxu0  ;;  %v8684_v3 = vsel %vm609_vm2, %v8679_v2, %v8683_v35  ;;  %v8922_v30 = vshll.u32 %v15403_v41, 16 }
 0x1f2   : > { %v4961_v46 = vadd.f32 %v15306_v60, %v4764_v56  ;;  %4745 = vst.msk [vmem:[#allocation2 + $0x20] sm:$0xff] %vm366_vm7, %v4734_v50  ;;  %v4767_v59 = vld [vmem:[#allocation2 + $0x18] sm:$0xff]  ;;  %v4735_v21 = vadd.f32 %v4703_v44, %v4538_v12  ;;  %v15391_v60 = vld [vmem:[%s13068_s25 + $0xa4] sm:$0xff]   ;;  %v4543_v61 = vld [vmem:[#allocation2 + $0x50] sm:$0xff]  ;;  %v15405_v32 = vpop.f32.mrb[133].mxu0  ;;  %v8916_v56 = vrot.slane %v8914_v18, 1 }
 0x1f3   : > { %4974 = vst.msk [vmem:[#allocation2 + $0x10] sm:$0xff] %vm366_vm7, %v4963_v10  ;;  %v4964_v51 = vadd.f32 %v15314_v54, %v4767_v59  ;;  %4748 = vst.msk [vmem:[#allocation2 + $0x38] sm:$0xff] %vm366_vm7, %v4737_v14  ;;  %v4765_v42 = vld [vmem:[#allocation2 + $0x8] sm:$0xff]  ;;  %12482 = vmatmul.mubr.msk.bf16.gmra.mrb[240].mxu1 %vm263_vm1, %v12931_v22  ;;  %v12935_v54 = vld [vmem:[%s13068_s25 + $0xb4] ss:$0 sps:$4 sm:$0xff]   ;;  %v12250_v53 = vpop.f32.mrb[134].mxu0  ;;  %v8692_v14 = vsel %vm609_vm2, %v8687_v63, %v8691_v58 }
 0x1f4   : > { %4972 = vst.msk [vmem:[#allocation2] sm:$0xff] %vm366_vm7, %v4961_v46  ;;  %v4962_v20 = vadd.f32 %v15320_v6, %v4765_v42  ;;  %4746 = vst.msk [vmem:[#allocation2 + $0x28] sm:$0xff] %vm366_vm7, %v4735_v21  ;;  %12485 = vmatprep.mubr.msk.bf16.mxu1 %vm263_vm1, %v12933_v19  ;;  %v4541_v11 = vld [vmem:[#allocation2 + $0x40] sm:$0xff]  ;;  %v12937_v6 = vld [vmem:[%s13068_s25 + $0xf4] ss:$0 sps:$4 sm:$0xff]   ;;  %v8697_v22 = vshll.u32 %v15391_v60, 16 }
 0x1f5   : > { %4975 = vst.msk [vmem:[#allocation2 + $0x18] sm:$0xff] %vm366_vm7, %v4964_v51  ;;  %v4542_v19 = vld [vmem:[#allocation2 + $0x48] sm:$0xff]  ;;  %v15414_v49 = vpop.f32.mrb[135].mxu0  ;;  %v15430_v29 = vld [vmem:[%s13068_s25 + $0xb4] sm:$0x1f]   ;;  %v9189_v12 = vsel %vm282_vm0, %v15331_v26, 0  ;;  %v8920_v51 = vor.u32 %v8918_v24, %v8916_v56 }
 0x1f6   : > { %4973 = vst.msk [vmem:[#allocation2 + $0x8] sm:$0xff] %vm366_vm7, %v4962_v20  ;;  %v12235_v28 = vpop.f32.mrb[136].mxu1  ;;  %12500 = vmatmul.mubr.msk.bf16.gmra.mrb[240].mxu0 %vm263_vm1, %v12937_v6  ;;  %v8699_v10 = vrot.slane %v8697_v22, 1  ;;  %v8701_v44 = vshrl.u32 %v15391_v60, 16  ;;  %v8705_v59 = vshll.u32 %v15421_v48, 16  ;;  %v9378_v21 = vsel %vm282_vm0, %v15341_v52, 0 }
 0x1f7   : > { %v4740_v55 = vadd.f32 %v12235_v28, %v4543_v61  ;;  %v4716_v62 = vpop.f32.mrb[137].mxu1  ;;  %12519 = vmatprep.mubr.msk.bf16.mxu0 %vm263_vm1, %v8909_v40  ;;  %v8924_v42 = vrot.slane %v8922_v30, 1  ;;  %v8709_v60 = vshrl.u32 %v15421_v48, 16  ;;  %v8713_v23 = vshll.u32 %v15430_v29, 16  ;;  %v15477_v18 = vld [vmem:[%s13068_s25 + $0x58] sm:$0xff]  }
 0x1f8   : > { %v4770_v1 = vld [vmem:[#allocation2 + $0x30] sm:$0xff]  ;;  %v4738_v17 = vadd.f32 %v4716_v62, %v4541_v11  ;;  %v12236_v9 = vpop.f32.mrb[138].mxu1  ;;  %v8930_v2 = vshll.u32 %v15433_v43, 16  ;;  %v8938_v53 = vshll.u32 %v15446_v27, 16  ;;  %v8707_v22 = vrot.slane %v8705_v59, 1 }
 0x1f9   : > { %v4967_v57 = vadd.f32 %v15353_v31, %v4770_v1  ;;  %4751 = vst.msk [vmem:[#allocation2 + $0x50] sm:$0xff] %vm366_vm7, %v4740_v55  ;;  %v4768_v0 = vld [vmem:[#allocation2 + $0x20] sm:$0xff]  ;;  %v4719_v15 = vpop.f32.mrb[139].mxu1  ;;  %v15449_v46 = vpop.f32.mrb[136].mxu0  ;;  %v8926_v55 = vshrl.u32 %v15403_v41, 16  ;;  %v15465_v11 = vld [vmem:[%s13068_s25 + $0x50] sm:$0xff]  }
 0x1fa   : > { %v4965_v38 = vadd.f32 %v15362_v34, %v4768_v0  ;;  %4749 = vst.msk [vmem:[#allocation2 + $0x40] sm:$0xff] %vm366_vm7, %v4738_v17  ;;  %v4771_v16 = vld [vmem:[#allocation2 + $0x38] sm:$0xff]  ;;  %v4739_v31 = vadd.f32 %v4719_v15, %v4542_v19  ;;  %v8695_v34 = vor.u32 %v8693_v47, %v8691_v58  ;;  %v15454_v20 = vpop.f32.mrb[137].mxu0  ;;  %v8934_v9 = vshrl.u32 %v15433_v43, 16 }
 0x1fb   : > { %4978 = vst.msk [vmem:[#allocation2 + $0x30] sm:$0xff] %vm366_vm7, %v4967_v57  ;;  %v4968_v50 = vadd.f32 %v15366_v25, %v4771_v16  ;;  %v4769_v7 = vld [vmem:[#allocation2 + $0x28] sm:$0xff]  ;;  %12486 = vmatmul.mubr.msk.bf16.gmra.mrb[244].mxu1 %vm263_vm1, %v12935_v54  ;;  %v8912_v25 = vor.u32 %v8910_v13, %v8908_v37  ;;  %v4995_v26 = vld [vmem:[#allocation2] sm:$0xff]  ;;  %v15459_v28 = vpop.f32.mrb[138].mxu0  ;;  %v8932_v0 = vrot.slane %v8930_v2, 1  ;;  %v8928_v58 = vor.u32 %v8926_v55, %v8924_v42 }
 0x1fc   : > { %4976 = vst.msk [vmem:[#allocation2 + $0x20] sm:$0xff] %vm366_vm7, %v4965_v38  ;;  %v4966_v4 = vadd.f32 %v15374_v45, %v4769_v7  ;;  %4750 = vst.msk [vmem:[#allocation2 + $0x48] sm:$0xff] %vm366_vm7, %v4739_v31  ;;  %12505 = vmatprep.mubr.msk.bf16.mxu1 %vm263_vm1, %v8684_v3  ;;  %v4997_v45 = vld [vmem:[#allocation2 + $0x10] sm:$0xff]  ;;  %v4998_v37 = vld [vmem:[#allocation2 + $0x18] sm:$0xff]  ;;  %v8700_v52 = vsel %vm609_vm2, %v8695_v34, %v8699_v10  ;;  %v15469_v17 = vpop.f32.mrb[139].mxu0  ;;  %v8703_v3 = vor.u32 %v8701_v44, %v8699_v10 }
 0x1fd   : > { %4979 = vst.msk [vmem:[#allocation2 + $0x38] sm:$0xff] %vm366_vm7, %v4968_v50  ;;  %v8917_v54 = vsel %vm609_vm2, %v8912_v25, %v8916_v56  ;;  %v4996_v47 = vld [vmem:[#allocation2 + $0x8] sm:$0xff]  ;;  %v15491_v19 = vld [vmem:[%s16210_s1 + $0xb8] sm:$0xf]  ;;  %v9126_v40 = vshll.u32 %v15465_v11, 16  ;;  %v8711_v38 = vor.u32 %v8709_v60, %v8707_v22  ;;  %v15499_v16 = vrot.slane %v8713_v23, 1 }
 0x1fe   : > { %4977 = vst.msk [vmem:[#allocation2 + $0x28] sm:$0xff] %vm366_vm7, %v4966_v4  ;;  %v12255_v39 = vpop.f32.mrb[140].mxu1  ;;  %12520 = vmatmul.mubr.msk.bf16.vlgmr.msra.gmra.mrb[244].mxu0 %vm263_vm1, %v8917_v54  ;;  %v8936_v31 = vor.u32 %v8934_v9, %v8932_v0  ;;  %v15501_v48 = vrot.slane %v8938_v53, 1  ;;  %v9124_v4 = vshrl.u32 %v15465_v11, 16  ;;  %v9131_v25 = vshll.u32 %v15477_v18, 16  ;;  %v15540_v55 = vld [vmem:[%s13068_s25 + $0x60] sm:$0xff]  }
 0x1ff   : > { %v5152_v35 = vadd.f32 %v12255_v39, %v4997_v45  ;;  %v5104_v5 = vpop.f32.mrb[141].mxu1  ;;  %12546 = vmatpush3.bf16.msra.mxu0 %v9378_v21  ;;  %v8708_v44 = vsel %vm609_vm2, %v8703_v3, %v8707_v22  ;;  %v8933_v39 = vsel %vm609_vm2, %v8928_v58, %v8932_v0  ;;  %v9128_v59 = vrot.slane %v9126_v40, 1  ;;  %v15519_v21 = vld [vmem:[%s13068_s25 + $0x18] sm:$0xff]  }
 0x200   : > { %v4774_v36 = vld [vmem:[#allocation2 + $0x50] sm:$0xff]  ;;  %v5150_v33 = vadd.f32 %v5104_v5, %v4995_v26  ;;  %v12256_v61 = vpop.f32.mrb[142].mxu1  ;;  %12664 = vmatprep.subr.msk.bf16.mxu0 %vm282_vm0, %v15491_v19  ;;  %v8716_v23 = vsel %vm609_vm2, %v8711_v38, %v15499_v16  ;;  %v8941_v2 = vsel %vm609_vm2, %v8936_v31, %v15501_v48  ;;  %v8717_v54 = vshrl.u32 %v15430_v29, 16  ;;  %v15563_v38 = vld [vmem:[%s13068_s25 + $0x20] sm:$0xff]  }
 0x201   : > { %v4971_v62 = vadd.f32 %v15400_v8, %v4774_v36  ;;  %v4772_v6 = vld [vmem:[#allocation2 + $0x40] sm:$0xff]  ;;  %5163 = vst.msk [vmem:[#allocation2 + $0x10] sm:$0xff] %vm366_vm7, %v5152_v35  ;;  %v5153_v63 = vadd.f32 %v12256_v61, %v4998_v37  ;;  %v5107_v1 = vpop.f32.mrb[143].mxu1  ;;  %v8925_v8 = vsel %vm609_vm2, %v8920_v51, %v8924_v42  ;;  %v15504_v30 = vpop.f32.mrb[140].mxu0  ;;  %v12953_v36 = vld [vmem:[%s13068_s25 + $0x10] sm:$0xfe]  }
 0x202   : > { %v4969_v13 = vadd.f32 %v15405_v32, %v4772_v6  ;;  %5161 = vst.msk [vmem:[#allocation2] sm:$0xff] %vm366_vm7, %v5150_v33  ;;  %v5151_v41 = vadd.f32 %v5107_v1, %v4996_v47  ;;  %v15486_v32 = vld [vmem:[%s16210_s1 + $0xb4] sm:$0xf]  ;;  %12523 = vmatprep.mubr.msk.bf16.mxu0 %vm263_vm1, %v8925_v8  ;;  %v15510_v43 = vpop.f32.mrb[141].mxu0  ;;  %v9348_v29 = vrot.slane %v12953_v36, 1  ;;  %v9349_v6 = vrot.slane %v15519_v21, 1 }
 0x203   : > { %4982 = vst.msk [vmem:[#allocation2 + $0x50] sm:$0xff] %vm366_vm7, %v4971_v62  ;;  %v4773_v57 = vld [vmem:[#allocation2 + $0x48] sm:$0xff]  ;;  %5164 = vst.msk [vmem:[#allocation2 + $0x18] sm:$0xff] %vm366_vm7, %v5153_v63  ;;  %12506 = vmatmul.mubr.msk.bf16.vlgmr.msra.gmra.mrb[248].mxu1 %vm263_vm1, %v8692_v14  ;;  %v4999_v7 = vld [vmem:[#allocation2 + $0x20] sm:$0xff]  ;;  %v15515_v45 = vpop.f32.mrb[142].mxu0  ;;  %v9133_v62 = vrot.slane %v9131_v25, 1 }
 0x204   : > { %4980 = vst.msk [vmem:[#allocation2 + $0x40] sm:$0xff] %vm366_vm7, %v4969_v13  ;;  %v4970_v15 = vadd.f32 %v15414_v49, %v4773_v57  ;;  %5162 = vst.msk [vmem:[#allocation2 + $0x8] sm:$0xff] %vm366_vm7, %v5151_v41  ;;  %12532 = vmatpush3.bf16.msra.mxu1 %v9189_v12  ;;  %12509 = vmatprep.mubr.msk.bf16.mxu1 %vm263_vm1, %v8700_v52  ;;  %v5001_v49 = vld [vmem:[#allocation2 + $0x30] sm:$0xff]  ;;  %v5002_v14 = vld [vmem:[#allocation2 + $0x38] sm:$0xff]  ;;  %v15523_v60 = vpop.f32.mrb[143].mxu0  ;;  %v8719_v13 = vor.u32 %v8717_v54, %v15499_v16  ;;  %v9139_v8 = vshll.u32 %v15540_v55, 16 }
 0x205   : > { %12663 = vmatprep.subr.msk.bf16.mxu1 %vm282_vm0, %v15486_v32  ;;  %v5000_v26 = vld [vmem:[#allocation2 + $0x28] sm:$0xff]  ;;  %v9135_v40 = vshrl.u32 %v15477_v18, 16  ;;  %v15566_v31 = vld [vmem:[%s13068_s25 + $0x70] sm:$0xff]   ;;  %v9143_v18 = vshrl.u32 %v15540_v55, 16  ;;  %v15616_v54 = vld [vmem:[%s13068_s25 + $0x38] sm:$0x1f]  }
 0x206   : > { %4981 = vst.msk [vmem:[#allocation2 + $0x48] sm:$0xff] %vm366_vm7, %v4970_v15  ;;  %v12259_v24 = vpop.f32.mrb[144].mxu1  ;;  %12524 = vmatmul.mubr.msk.bf16.gmra.mrb[248].mxu0 %vm263_vm1, %v8933_v39 }
 0x207   : > { %v5156_v50 = vadd.f32 %v12259_v24, %v5001_v49  ;;  %v5120_v34 = vpop.f32.mrb[145].mxu1  ;;  %12527 = vmatprep.mubr.msk.bf16.mxu0 %vm263_vm1, %v8941_v2  ;;  %v15608_v2 = vld [vmem:[%s13068_s25 + $0x30] sm:$0xff]  }
 0x208   : > { %v5186_v10 = vld [vmem:[#allocation2 + $0x10] sm:$0xff]  ;;  %v5154_v56 = vadd.f32 %v5120_v34, %v4999_v7  ;;  %v12260_v12 = vpop.f32.mrb[146].mxu1  ;;  %v9350_v7 = vsel %vm1060_vm3, %v9348_v29, %v9349_v6 }
 0x209   : > { %v5341_v51 = vadd.f32 %v15449_v46, %v5186_v10  ;;  %5167 = vst.msk [vmem:[#allocation2 + $0x30] sm:$0xff] %vm366_vm7, %v5156_v50  ;;  %v5184_v42 = vld [vmem:[#allocation2] sm:$0xff]  ;;  %v5157_v35 = vadd.f32 %v12260_v12, %v5002_v14  ;;  %v5123_v5 = vpop.f32.mrb[147].mxu1  ;;  %v15553_v1 = vpop.f32.mrb[144].mxu0  ;;  %v15580_v10 = vld [vmem:[%s13068_s25 + $0x28] sm:$0xff]   ;;  %v9141_v12 = vrot.slane %v9139_v8, 1 }
 0x20a   : > { %v5339_v33 = vadd.f32 %v15454_v20, %v5184_v42  ;;  %5165 = vst.msk [vmem:[#allocation2 + $0x20] sm:$0xff] %vm366_vm7, %v5154_v56  ;;  %v5187_v46 = vld [vmem:[#allocation2 + $0x18] sm:$0xff]  ;;  %v5155_v37 = vadd.f32 %v5123_v5, %v5000_v26  ;;  %v8942_v20 = vshrl.u32 %v15446_v27, 16  ;;  %v15550_v27 = vld [vmem:[%s13068_s25 + $0x68] sm:$0xff]   ;;  %v5005_v63 = vld [vmem:[#allocation2 + $0x50] sm:$0xff]  ;;  %v15556_v41 = vpop.f32.mrb[145].mxu0 }
 0x20b   : > { %5352 = vst.msk [vmem:[#allocation2 + $0x10] sm:$0xff] %vm366_vm7, %v5341_v51  ;;  %v5342_v61 = vadd.f32 %v15459_v28, %v5187_v46  ;;  %5168 = vst.msk [vmem:[#allocation2 + $0x38] sm:$0xff] %vm366_vm7, %v5157_v35  ;;  %v5185_v52 = vld [vmem:[#allocation2 + $0x8] sm:$0xff]  ;;  %12510 = vmatmul.mubr.msk.bf16.gmra.mrb[252].mxu1 %vm263_vm1, %v8708_v44  ;;  %v9129_v28 = vor.u32 %v9128_v59, %v9124_v4  ;;  %v5003_v9 = vld [vmem:[#allocation2 + $0x40] sm:$0xff]  ;;  %v12278_v3 = vpop.f32.mrb[146].mxu0  ;;  %v9147_v34 = vshll.u32 %v15550_v27, 16 }
 0x20c   : > { %5350 = vst.msk [vmem:[#allocation2] sm:$0xff] %vm366_vm7, %v5339_v33  ;;  %v5340_v11 = vadd.f32 %v15469_v17, %v5185_v52  ;;  %5166 = vst.msk [vmem:[#allocation2 + $0x28] sm:$0xff] %vm366_vm7, %v5155_v37  ;;  %12513 = vmatprep.mubr.msk.bf16.mxu1 %vm263_vm1, %v8716_v23  ;;  %v8944_v22 = vor.u32 %v8942_v20, %v15501_v48  ;;  %v15570_v50 = vpop.f32.mrb[147].mxu0  ;;  %v15588_v44 = vsel %vm282_vm0, %v15486_v32, 0  ;;  %v9351_v59 = vrot.slane %v15563_v38, 1 }
 0x20d   : > { %5353 = vst.msk [vmem:[#allocation2 + $0x18] sm:$0xff] %vm366_vm7, %v5342_v61  ;;  %v9134_v58 = vsel %vm609_vm2, %v9129_v28, %v9133_v62  ;;  %v5004_v49 = vld [vmem:[#allocation2 + $0x48] sm:$0xff]  ;;  %v9155_v51 = vshll.u32 %v15566_v31, 16  ;;  %v9145_v32 = vor.u32 %v9143_v18, %v9141_v12  ;;  %v9149_v42 = vrot.slane %v9147_v34, 1  ;;  %v15646_v38 = vld [vmem:[%s16210_s1 + $0xbc] sm:$0xf] }
 0x20e   : > { %5351 = vst.msk [vmem:[#allocation2 + $0x8] sm:$0xff] %vm366_vm7, %v5340_v11  ;;  %v12263_v47 = vpop.f32.mrb[148].mxu1  ;;  %12528 = vmatmul.mubr.msk.bf16.gmra.mrb[252].mxu0 %vm263_vm1, %v8944_v22  ;;  %v9151_v35 = vshrl.u32 %v15550_v27, 16  ;;  %v9798_v26 = vsel %vm282_vm0, %v15491_v19, 0  ;;  %v9353_v36 = vrot.slane %v15580_v10, 1  ;;  %v9159_v33 = vshrl.u32 %v15566_v31, 16 }
 0x20f   : > { %v5160_v17 = vadd.f32 %v12263_v47, %v5005_v63  ;;  %v5136_v53 = vpop.f32.mrb[149].mxu1  ;;  %12547 = vmatprep.mubr.msk.bf16.mxu0 %vm263_vm1, %v9350_v7  ;;  %v9352_v27 = vsel %vm1060_vm3, %v9349_v6, %v9351_v59  ;;  %v9157_v63 = vrot.slane %v9155_v51, 1  ;;  %v12966_v47 = vld [vmem:[%s13068_s25 + $0x18] sm:$0xff]   ;;  %v15651_v31 = vld [vmem:[%s16210_s1 + $0xc0] sm:$0xf] }
 0x210   : > { %v5190_v57 = vld [vmem:[#allocation2 + $0x30] sm:$0xff]  ;;  %v5158_v0 = vadd.f32 %v5136_v53, %v5003_v9  ;;  %v12264_v15 = vpop.f32.mrb[150].mxu1  ;;  %v9354_v6 = vsel %vm1060_vm3, %v9351_v59, %v9353_v36  ;;  %v15679_v59 = vld [vmem:[%s13068_s25 + $0x58] sm:$0xff]   ;;  %v12967_v51 = vld [vmem:[%s13068_s25 + $0x20] sm:$0xff]  }
 0x211   : > { %v5345_v16 = vadd.f32 %v15504_v30, %v5190_v57  ;;  %5171 = vst.msk [vmem:[#allocation2 + $0x50] sm:$0xff] %vm366_vm7, %v5160_v17  ;;  %v5188_v48 = vld [vmem:[#allocation2 + $0x20] sm:$0xff]  ;;  %v5139_v24 = vpop.f32.mrb[151].mxu1  ;;  %v15605_v23 = vpop.f32.mrb[148].mxu0  ;;  %v9150_v57 = vsel %vm609_vm2, %v9145_v32, %v9149_v42 }
 0x212   : > { %v5343_v4 = vadd.f32 %v15510_v43, %v5188_v48  ;;  %5169 = vst.msk [vmem:[#allocation2 + $0x40] sm:$0xff] %vm366_vm7, %v5158_v0  ;;  %v5191_v30 = vld [vmem:[#allocation2 + $0x38] sm:$0xff]  ;;  %v5159_v25 = vadd.f32 %v5139_v24, %v5004_v49  ;;  %v5375_v5 = vld [vmem:[#allocation2 + $0x10] sm:$0xff]  ;;  %v15612_v52 = vpop.f32.mrb[149].mxu0  ;;  %v9357_v48 = vrot.slane %v15616_v54, 1  ;;  %v9735_v49 = vshrl.u32 %v12966_v47, 16 }
 0x213   : > { %5356 = vst.msk [vmem:[#allocation2 + $0x30] sm:$0xff] %vm366_vm7, %v5345_v16  ;;  %v5346_v56 = vadd.f32 %v15515_v45, %v5191_v30  ;;  %v5189_v14 = vld [vmem:[#allocation2 + $0x28] sm:$0xff]  ;;  %12514 = vmatmul.mubr.msk.bf16.gmra.mrb[0].mxu1 %vm263_vm1, %v8719_v13  ;;  %v15591_v43 = vld [vmem:[%s13068_s25 + $0x78] sm:$0x1f]   ;;  %v9137_v45 = vor.u32 %v9135_v40, %v9133_v62  ;;  %v5373_v37 = vld [vmem:[#allocation2] sm:$0xff]  ;;  %v15619_v29 = vpop.f32.mrb[150].mxu0 }
 0x214   : > { %5354 = vst.msk [vmem:[#allocation2 + $0x20] sm:$0xff] %vm366_vm7, %v5343_v4  ;;  %v5344_v39 = vadd.f32 %v15523_v60, %v5189_v14  ;;  %5170 = vst.msk [vmem:[#allocation2 + $0x48] sm:$0xff] %vm366_vm7, %v5159_v25  ;;  %12533 = vmatprep.mubr.msk.bf16.mxu1 %vm263_vm1, %v9134_v58  ;;  %v9163_v19 = vshll.u32 %v15591_v43, 16  ;;  %v5376_v11 = vld [vmem:[#allocation2 + $0x18] sm:$0xff]  ;;  %v15627_v8 = vpop.f32.mrb[151].mxu0  ;;  %v9153_v58 = vor.u32 %v9151_v35, %v9149_v42  ;;  %v9738_v24 = vshll.u32 %v12966_v47, 16 }
 0x215   : > { %5357 = vst.msk [vmem:[#allocation2 + $0x38] sm:$0xff] %vm366_vm7, %v5346_v56  ;;  %v9142_v62 = vsel %vm609_vm2, %v9137_v45, %v9141_v12  ;;  %v5374_v13 = vld [vmem:[#allocation2 + $0x8] sm:$0xff]  ;;  %v12965_v0 = vld [vmem:[%s13068_s25 + $0x10] sm:$0xfe]   ;;  %v9167_v47 = vshrl.u32 %v15591_v43, 16  ;;  %v9538_v43 = vrot.slane %v15679_v59, 1 }
 0x216   : > { %5355 = vst.msk [vmem:[#allocation2 + $0x28] sm:$0xff] %vm366_vm7, %v5344_v39  ;;  %v12283_v60 = vpop.f32.mrb[152].mxu1  ;;  %12548 = vmatmul.mubr.msk.bf16.vlgmr.msra.gmra.mrb[0].mxu0 %vm263_vm1, %v9352_v27  ;;  %v15641_v40 = vrot.slane %v9163_v19, 1  ;;  %v9727_v7 = vshrl.u32 %v12965_v0, 16  ;;  %v9730_v18 = vshll.u32 %v12965_v0, 16  ;;  %v9158_v14 = vsel %vm609_vm2, %v9153_v58, %v9157_v63  ;;  %v12970_v27 = vld [vmem:[%s13068_s25 + $0x28] sm:$0xff]  }
 0x217   : > { %v5572_v46 = vadd.f32 %v12283_v60, %v5375_v5  ;;  %v5524_v61 = vpop.f32.mrb[153].mxu1  ;;  %12574 = vmatpush3.bf16.msra.mxu0 %v9798_v26  ;;  %12551 = vmatprep.mubr.msk.bf16.mxu0 %vm263_vm1, %v9354_v6  ;;  %v15676_v45 = vld [vmem:[%s13068_s25 + $0x50] sm:$0xfe]   ;;  %v9737_v60 = vrot.slane %v9735_v49, 1  ;;  %v9753_v0 = vshrl.u32 %v12970_v27, 16 }
 0x218   : > { %v5194_v20 = vld [vmem:[#allocation2 + $0x50] sm:$0xff]  ;;  %v5570_v55 = vadd.f32 %v5524_v61, %v5373_v37  ;;  %v12284_v28 = vpop.f32.mrb[154].mxu1  ;;  %12666 = vmatprep.subr.msk.bf16.mxu0 %vm282_vm0, %v15651_v31 }
 0x219   : > { %v5349_v17 = vadd.f32 %v15553_v1, %v5194_v20  ;;  %v5192_v9 = vld [vmem:[#allocation2 + $0x40] sm:$0xff]  ;;  %5583 = vst.msk [vmem:[#allocation2 + $0x10] sm:$0xff] %vm366_vm7, %v5572_v46  ;;  %v5573_v53 = vadd.f32 %v12284_v28, %v5376_v11  ;;  %v5527_v22 = vpop.f32.mrb[155].mxu1  ;;  %v9355_v1 = vrot.slane %v15608_v2, 1  ;;  %v15661_v4 = vpop.f32.mrb[152].mxu0  ;;  %v9740_v2 = vrot.slane %v9738_v24, 2 }
 0x21a   : > { %v5347_v15 = vadd.f32 %v15556_v41, %v5192_v9  ;;  %5581 = vst.msk [vmem:[#allocation2] sm:$0xff] %vm366_vm7, %v5570_v55  ;;  %v5571_v21 = vadd.f32 %v5527_v22, %v5374_v13  ;;  %v9161_v41 = vor.u32 %v9159_v33, %v9157_v63  ;;  %v15668_v12 = vpop.f32.mrb[153].mxu0  ;;  %v9729_v20 = vrot.slane %v9727_v7, 1 }
 0x21b   : > { %5360 = vst.msk [vmem:[#allocation2 + $0x50] sm:$0xff] %vm366_vm7, %v5349_v17  ;;  %v5193_v3 = vld [vmem:[#allocation2 + $0x48] sm:$0xff]  ;;  %5584 = vst.msk [vmem:[#allocation2 + $0x18] sm:$0xff] %vm366_vm7, %v5573_v53  ;;  %12534 = vmatmul.mubr.msk.bf16.vlgmr.msra.gmra.mrb[4].mxu1 %vm263_vm1, %v9142_v62  ;;  %v5377_v25 = vld [vmem:[#allocation2 + $0x20] sm:$0xff]  ;;  %v15682_v5 = vpop.f32.mrb[154].mxu0  ;;  %v9358_v10 = vsel %vm1060_vm3, %v9355_v1, %v9357_v48  ;;  %v9732_v55 = vrot.slane %v9730_v18, 2  ;;  %v15708_v13 = vor.u32 %v9740_v2, %v9737_v60 }
 0x21c   : > { %5358 = vst.msk [vmem:[#allocation2 + $0x40] sm:$0xff] %vm366_vm7, %v5347_v15  ;;  %v5348_v16 = vadd.f32 %v15570_v50, %v5193_v3  ;;  %5582 = vst.msk [vmem:[#allocation2 + $0x8] sm:$0xff] %vm366_vm7, %v5571_v21  ;;  %12560 = vmatpush3.bf16.msra.mxu1 %v15588_v44  ;;  %12537 = vmatprep.mubr.msk.bf16.mxu1 %vm263_vm1, %v9150_v57  ;;  %v5379_v50 = vld [vmem:[#allocation2 + $0x30] sm:$0xff]  ;;  %v9356_v44 = vsel %vm1060_vm3, %v9353_v36, %v9355_v1  ;;  %v5380_v35 = vld [vmem:[#allocation2 + $0x38] sm:$0xff]  ;;  %v15689_v19 = vpop.f32.mrb[155].mxu0  ;;  %v9744_v17 = vshrl.u32 %v12967_v51, 16 }
 0x21d   : > { %12665 = vmatprep.subr.msk.bf16.mxu1 %vm282_vm0, %v15646_v38  ;;  %v9166_v39 = vsel %vm609_vm2, %v9161_v41, %v15641_v40  ;;  %v5378_v37 = vld [vmem:[#allocation2 + $0x28] sm:$0xff]  ;;  %v9733_v53 = vor.u32 %v9732_v55, %v9729_v20  ;;  %v9756_v15 = vshll.u32 %v12970_v27, 16  ;;  %v9169_v3 = vor.u32 %v9167_v47, %v15641_v40  ;;  %v15717_v41 = vld [vmem:[%s13068_s25 + $0x60] sm:$0xff]   ;;  %v15755_v55 = vld [vmem:[%s13068_s25 + $0x70] sm:$0xff]  }
 0x21e   : > { %5359 = vst.msk [vmem:[#allocation2 + $0x48] sm:$0xff] %vm366_vm7, %v5348_v16  ;;  %v12287_v34 = vpop.f32.mrb[156].mxu1  ;;  %12552 = vmatmul.mubr.msk.bf16.gmra.mrb[4].mxu0 %vm263_vm1, %v9356_v44  ;;  %v9746_v16 = vrot.slane %v9744_v17, 1  ;;  %v9540_v2 = vrot.slane %v15717_v41, 1 }
 0x21f   : > { %v5576_v30 = vadd.f32 %v12287_v34, %v5379_v50  ;;  %v5540_v56 = vpop.f32.mrb[157].mxu1  ;;  %12555 = vmatprep.mubr.msk.bf16.mxu0 %vm263_vm1, %v9358_v10  ;;  %v15720_v34 = vld [vmem:[%s13068_s25 + $0x68] sm:$0xff]  }
 0x220   : > { %v5606_v32 = vld [vmem:[#allocation2 + $0x10] sm:$0xff]  ;;  %v5574_v42 = vadd.f32 %v5540_v56, %v5377_v25  ;;  %v12288_v26 = vpop.f32.mrb[158].mxu1 }
 0x221   : > { %v5803_v36 = vadd.f32 %v15605_v23, %v5606_v32  ;;  %5587 = vst.msk [vmem:[#allocation2 + $0x30] sm:$0xff] %vm366_vm7, %v5576_v30  ;;  %v5604_v33 = vld [vmem:[#allocation2] sm:$0xff]  ;;  %v5577_v46 = vadd.f32 %v12288_v26, %v5380_v35  ;;  %v5543_v61 = vpop.f32.mrb[159].mxu1  ;;  %v15711_v57 = vpop.f32.mrb[156].mxu0  ;;  %v12971_v30 = vld [vmem:[%s13068_s25 + $0x30] sm:$0xff]   ;;  %v9755_v35 = vrot.slane %v9753_v0, 1 }
 0x222   : > { %v5801_v11 = vadd.f32 %v15612_v52, %v5604_v33  ;;  %5585 = vst.msk [vmem:[#allocation2 + $0x20] sm:$0xff] %vm366_vm7, %v5574_v42  ;;  %v5607_v28 = vld [vmem:[#allocation2 + $0x18] sm:$0xff]  ;;  %v5575_v62 = vadd.f32 %v5543_v61, %v5378_v37  ;;  %v9747_v52 = vshll.u32 %v12967_v51, 16  ;;  %v5383_v22 = vld [vmem:[#allocation2 + $0x50] sm:$0xff]  ;;  %v15714_v58 = vpop.f32.mrb[157].mxu0  ;;  %v9758_v26 = vrot.slane %v9756_v15, 2 }
 0x223   : > { %5814 = vst.msk [vmem:[#allocation2 + $0x10] sm:$0xff] %vm366_vm7, %v5803_v36  ;;  %v5804_v23 = vadd.f32 %v15619_v29, %v5607_v28  ;;  %5588 = vst.msk [vmem:[#allocation2 + $0x38] sm:$0xff] %vm366_vm7, %v5577_v46  ;;  %v5605_v63 = vld [vmem:[#allocation2 + $0x8] sm:$0xff]  ;;  %12538 = vmatmul.mubr.msk.bf16.gmra.mrb[8].mxu1 %vm263_vm1, %v9158_v14  ;;  %v9537_v29 = vrot.slane %v15676_v45, 1  ;;  %v5381_v6 = vld [vmem:[#allocation2 + $0x40] sm:$0xff]  ;;  %v12306_v50 = vpop.f32.mrb[158].mxu0  ;;  %v9742_v45 = vsel %vm1439_vm4, %v9733_v53, %v15708_v13 }
 0x224   : > { %5812 = vst.msk [vmem:[#allocation2] sm:$0xff] %vm366_vm7, %v5801_v11  ;;  %v5802_v9 = vadd.f32 %v15627_v8, %v5605_v63  ;;  %5586 = vst.msk [vmem:[#allocation2 + $0x28] sm:$0xff] %vm366_vm7, %v5575_v62  ;;  %12541 = vmatprep.mubr.msk.bf16.mxu1 %vm263_vm1, %v9166_v39  ;;  %v9749_v49 = vrot.slane %v9747_v52, 2  ;;  %v15725_v44 = vpop.f32.mrb[159].mxu0  ;;  %v12973_v51 = vld [vmem:[%s13068_s25 + $0x38] sm:$0x3f]   ;;  %v15757_v11 = vor.u32 %v9758_v26, %v9755_v35 }
 0x225   : > { %5815 = vst.msk [vmem:[#allocation2 + $0x18] sm:$0xff] %vm366_vm7, %v5804_v23  ;;  %v5382_v40 = vld [vmem:[#allocation2 + $0x48] sm:$0xff]  ;;  %v9539_v39 = vsel %vm1060_vm3, %v9537_v29, %v9538_v43  ;;  %v9762_v54 = vshrl.u32 %v12971_v30, 16  ;;  %v9765_v33 = vshll.u32 %v12971_v30, 16  ;;  %v9774_v46 = vshll.u32 %v12973_v51, 16  ;;  %v12975_v28 = vld [vmem:[%s13068_s25 + $0x58] sm:$0xff]  }
 0x226   : > { %5813 = vst.msk [vmem:[#allocation2 + $0x8] sm:$0xff] %vm366_vm7, %v5802_v9  ;;  %v12291_v8 = vpop.f32.mrb[160].mxu1  ;;  %12556 = vmatmul.mubr.msk.bf16.gmra.mrb[8].mxu0 %vm263_vm1, %v9357_v48  ;;  %v9771_v48 = vshrl.u32 %v12973_v51, 16  ;;  %v9541_v63 = vsel %vm1060_vm3, %v9538_v43, %v9540_v2  ;;  %v15770_v52 = vld [vmem:[%s13068_s25 + $0x78] sm:$0x1f]   ;;  %v9969_v30 = vshll.u32 %v12975_v28, 16 }
 0x227   : > { %v5580_v21 = vadd.f32 %v12291_v8, %v5383_v22  ;;  %v5556_v1 = vpop.f32.mrb[161].mxu1  ;;  %12575 = vmatprep.mubr.msk.bf16.mxu0 %vm263_vm1, %v9742_v45  ;;  %v15773_v9 = vld [vmem:[%s13068_s25 + $0x50] sm:$0xfe]   ;;  %v9764_v43 = vrot.slane %v9762_v54, 1  ;;  %v9767_v15 = vrot.slane %v9765_v33, 2 }
 0x228   : > { %v5610_v24 = vld [vmem:[#allocation2 + $0x30] sm:$0xff]  ;;  %v5578_v7 = vadd.f32 %v5556_v1, %v5381_v6  ;;  %v12292_v18 = vpop.f32.mrb[162].mxu1  ;;  %v9773_v41 = vrot.slane %v9771_v48, 1  ;;  %v9958_v50 = vshrl.u32 %v15773_v9, 16 }
 0x229   : > { %v5807_v25 = vadd.f32 %v15661_v4, %v5610_v24  ;;  %5591 = vst.msk [vmem:[#allocation2 + $0x50] sm:$0xff] %vm366_vm7, %v5580_v21  ;;  %v5608_v56 = vld [vmem:[#allocation2 + $0x20] sm:$0xff]  ;;  %v5559_v14 = vpop.f32.mrb[163].mxu1  ;;  %v15752_v20 = vpop.f32.mrb[160].mxu0  ;;  %v9966_v18 = vshrl.u32 %v12975_v28, 16 }
 0x22a   : > { %v5805_v32 = vadd.f32 %v15668_v12, %v5608_v56  ;;  %5589 = vst.msk [vmem:[#allocation2 + $0x40] sm:$0xff] %vm366_vm7, %v5578_v7  ;;  %v5611_v4 = vld [vmem:[#allocation2 + $0x38] sm:$0xff]  ;;  %v5579_v42 = vadd.f32 %v5559_v14, %v5382_v40  ;;  %v9750_v12 = vor.u32 %v9749_v49, %v9746_v16  ;;  %v5837_v37 = vld [vmem:[#allocation2 + $0x10] sm:$0xff]  ;;  %v15763_v47 = vpop.f32.mrb[161].mxu0  ;;  %v9776_v16 = vrot.slane %v9774_v46, 2 }
 0x22b   : > { %5818 = vst.msk [vmem:[#allocation2 + $0x30] sm:$0xff] %vm366_vm7, %v5807_v25  ;;  %v5808_v10 = vadd.f32 %v15682_v5, %v5611_v4  ;;  %v5609_v60 = vld [vmem:[#allocation2 + $0x28] sm:$0xff]  ;;  %12542 = vmatmul.mubr.msk.bf16.gmra.mrb[12].mxu1 %vm263_vm1, %v9169_v3  ;;  %v9542_v5 = vrot.slane %v15720_v34, 1  ;;  %v5835_v27 = vld [vmem:[#allocation2] sm:$0xff]  ;;  %v15775_v0 = vpop.f32.mrb[162].mxu0  ;;  %v9544_v25 = vrot.slane %v15755_v55, 1  ;;  %v9768_v56 = vor.u32 %v9767_v15, %v9764_v43 }
 0x22c   : > { %5816 = vst.msk [vmem:[#allocation2 + $0x20] sm:$0xff] %vm366_vm7, %v5805_v32  ;;  %v5806_v36 = vadd.f32 %v15689_v19, %v5609_v60  ;;  %5590 = vst.msk [vmem:[#allocation2 + $0x48] sm:$0xff] %vm366_vm7, %v5579_v42  ;;  %12561 = vmatprep.mubr.msk.bf16.mxu1 %vm263_vm1, %v9539_v39  ;;  %v10029_v19 = vsel %vm282_vm0, %v15646_v38, 0  ;;  %v9751_v17 = vsel %vm1439_vm4, %v15708_v13, %v9750_v12  ;;  %v10218_v38 = vsel %vm282_vm0, %v15651_v31, 0  ;;  %v5838_v22 = vld [vmem:[#allocation2 + $0x18] sm:$0xff]  ;;  %v15782_v3 = vpop.f32.mrb[163].mxu0 }
 0x22d   : > { %5819 = vst.msk [vmem:[#allocation2 + $0x38] sm:$0xff] %vm366_vm7, %v5808_v10  ;;  %v9543_v59 = vsel %vm1060_vm3, %v9540_v2, %v9542_v5  ;;  %v5836_v6 = vld [vmem:[#allocation2 + $0x8] sm:$0xff]  ;;  %v9760_v7 = vsel %vm1439_vm4, %v9750_v12, %v15757_v11  ;;  %v9961_v40 = vshll.u32 %v15773_v9, 16  ;;  %v9546_v14 = vrot.slane %v15770_v52, 1  ;;  %v12976_v32 = vld [vmem:[%s13068_s25 + $0x60] sm:$0xff]   ;;  %v15812_v12 = vld [vmem:[%s13068_s25 + $0x18] sm:$0xff]  }
 0x22e   : > { %5817 = vst.msk [vmem:[#allocation2 + $0x28] sm:$0xff] %vm366_vm7, %v5806_v36  ;;  %v12311_v61 = vpop.f32.mrb[164].mxu1  ;;  %12576 = vmatmul.mubr.msk.bf16.vlgmr.msra.gmra.mrb[12].mxu0 %vm263_vm1, %v9751_v17  ;;  %v15801_v39 = vor.u32 %v9776_v16, %v9773_v41  ;;  %v9968_v4 = vrot.slane %v9966_v18, 1  ;;  %v15809_v60 = vrot.slane %v9958_v50, 1  ;;  %v9971_v2 = vrot.slane %v9969_v30, 2  ;;  %v12980_v55 = vld [vmem:[%s13068_s25 + $0x68] sm:$0xff]  }
 0x22f   : > { %v5992_v62 = vadd.f32 %v12311_v61, %v5837_v37  ;;  %v5944_v23 = vpop.f32.mrb[165].mxu1  ;;  %12602 = vmatpush3.bf16.msra.mxu0 %v10218_v38  ;;  %12579 = vmatprep.mubr.msk.bf16.mxu0 %vm263_vm1, %v9760_v7  ;;  %v9545_v46 = vsel %vm1060_vm3, %v9542_v5, %v9544_v25  ;;  %v9769_v61 = vsel %vm1439_vm4, %v15757_v11, %v9768_v56  ;;  %v12977_v11 = vld [vmem:[%s13068_s25 + $0x10] sm:$0xfc]   ;;  %v12979_v18 = vld [vmem:[%s13068_s25 + $0x20] sm:$0xff]  }
 0x230   : > { %v5614_v29 = vld [vmem:[#allocation2 + $0x50] sm:$0xff]  ;;  %v5990_v53 = vadd.f32 %v5944_v23, %v5835_v27  ;;  %v12312_v8 = vpop.f32.mrb[166].mxu1  ;;  %v9547_v34 = vsel %vm1060_vm3, %v9544_v25, %v9546_v14  ;;  %v9778_v5 = vsel %vm1439_vm4, %v9768_v56, %v15801_v39  ;;  %v9972_v15 = vor.u32 %v9971_v2, %v9968_v4  ;;  %v12984_v2 = vld [vmem:[%s13068_s25 + $0x78] sm:$0x3f]  }
 0x231   : > { %v5811_v13 = vadd.f32 %v15711_v57, %v5614_v29  ;;  %v5612_v21 = vld [vmem:[#allocation2 + $0x40] sm:$0xff]  ;;  %6003 = vst.msk [vmem:[#allocation2 + $0x10] sm:$0xff] %vm366_vm7, %v5992_v62  ;;  %v5993_v31 = vadd.f32 %v12312_v8, %v5838_v22  ;;  %v5947_v1 = vpop.f32.mrb[167].mxu1  ;;  %v15804_v51 = vpop.f32.mrb[164].mxu0  ;;  %v9975_v29 = vshrl.u32 %v12976_v32, 16  ;;  %v9978_v8 = vshll.u32 %v12976_v32, 16 }
 0x232   : > { %v5809_v49 = vadd.f32 %v15714_v58, %v5612_v21  ;;  %6001 = vst.msk [vmem:[#allocation2] sm:$0xff] %vm366_vm7, %v5990_v53  ;;  %v5991_v24 = vadd.f32 %v5947_v1, %v5836_v6  ;;  %v15807_v10 = vpop.f32.mrb[165].mxu0  ;;  %v10189_v21 = vrot.slane %v15812_v12, 2 }
 0x233   : > { %5822 = vst.msk [vmem:[#allocation2 + $0x50] sm:$0xff] %vm366_vm7, %v5811_v13  ;;  %v5613_v57 = vld [vmem:[#allocation2 + $0x48] sm:$0xff]  ;;  %6004 = vst.msk [vmem:[#allocation2 + $0x18] sm:$0xff] %vm366_vm7, %v5993_v31  ;;  %12562 = vmatmul.mubr.msk.bf16.vlgmr.msra.gmra.mrb[16].mxu1 %vm263_vm1, %v9541_v63  ;;  %v5839_v35 = vld [vmem:[#allocation2 + $0x20] sm:$0xff]  ;;  %v15817_v37 = vpop.f32.mrb[166].mxu0  ;;  %v10188_v13 = vrot.slane %v12977_v11, 2 }
 0x234   : > { %5820 = vst.msk [vmem:[#allocation2 + $0x40] sm:$0xff] %vm366_vm7, %v5809_v49  ;;  %v5810_v58 = vadd.f32 %v15725_v44, %v5613_v57  ;;  %6002 = vst.msk [vmem:[#allocation2 + $0x8] sm:$0xff] %vm366_vm7, %v5991_v24  ;;  %12588 = vmatpush3.bf16.msra.mxu1 %v10029_v19  ;;  %12565 = vmatprep.mubr.msk.bf16.mxu1 %vm263_vm1, %v9543_v59  ;;  %v5841_v44 = vld [vmem:[#allocation2 + $0x30] sm:$0xff]  ;;  %v5842_v33 = vld [vmem:[#allocation2 + $0x38] sm:$0xff]  ;;  %v15821_v19 = vrot.slane %v9961_v40, 2  ;;  %v15826_v17 = vpop.f32.mrb[167].mxu0 }
 0x235   : > { %v5840_v23 = vld [vmem:[#allocation2 + $0x28] sm:$0xff]  ;;  %v9984_v59 = vshrl.u32 %v12980_v55, 16  ;;  %v9980_v7 = vrot.slane %v9978_v8, 2  ;;  %v12981_v57 = vld [vmem:[%s13068_s25 + $0x70] sm:$0xff]  }
 0x236   : > { %5821 = vst.msk [vmem:[#allocation2 + $0x48] sm:$0xff] %vm366_vm7, %v5810_v58  ;;  %v12315_v45 = vpop.f32.mrb[168].mxu1  ;;  %12580 = vmatmul.mubr.msk.bf16.gmra.mrb[16].mxu0 %vm263_vm1, %v9769_v61  ;;  %v9964_v43 = vor.u32 %v15821_v19, %v15809_v60  ;;  %v10190_v60 = vsel %vm3544_vm5, %v10188_v13, %v10189_v21  ;;  %v9993_v61 = vshrl.u32 %v12981_v57, 16  ;;  %v9996_v19 = vshll.u32 %v12981_v57, 16 }
 0x237   : > { %v5996_v42 = vadd.f32 %v12315_v45, %v5841_v44  ;;  %v5960_v26 = vpop.f32.mrb[169].mxu1  ;;  %12583 = vmatprep.mubr.msk.bf16.mxu0 %vm263_vm1, %v9778_v5  ;;  %v9986_v56 = vrot.slane %v9984_v59, 1  ;;  %v15858_v44 = vld [vmem:[%s13068_s25 + $0x28] sm:$0xff]  }
 0x238   : > { %v6026_v36 = vld [vmem:[#allocation2 + $0x10] sm:$0xff]  ;;  %v5994_v54 = vadd.f32 %v5960_v26, %v5839_v35  ;;  %v12316_v48 = vpop.f32.mrb[170].mxu1  ;;  %v9973_v26 = vsel %vm1439_vm4, %v9964_v43, %v9972_v15  ;;  %v9995_v11 = vrot.slane %v9993_v61, 1  ;;  %v15901_v43 = vld [vmem:[%s13068_s25 + $0x38] sm:$0x3f]  }
 0x239   : > { %v6181_v28 = vadd.f32 %v15752_v20, %v6026_v36  ;;  %6007 = vst.msk [vmem:[#allocation2 + $0x30] sm:$0xff] %vm366_vm7, %v5996_v42  ;;  %v6024_v62 = vld [vmem:[#allocation2] sm:$0xff]  ;;  %v5997_v27 = vadd.f32 %v12316_v48, %v5842_v33  ;;  %v5963_v63 = vpop.f32.mrb[171].mxu1  ;;  %v15851_v1 = vpop.f32.mrb[168].mxu0 }
 0x23a   : > { %v6179_v38 = vadd.f32 %v15763_v47, %v6024_v62  ;;  %6005 = vst.msk [vmem:[#allocation2 + $0x20] sm:$0xff] %vm366_vm7, %v5994_v54  ;;  %v6027_v20 = vld [vmem:[#allocation2 + $0x18] sm:$0xff]  ;;  %v5995_v9 = vadd.f32 %v5963_v63, %v5840_v23  ;;  %v5845_v31 = vld [vmem:[#allocation2 + $0x50] sm:$0xff]  ;;  %v15853_v24 = vpop.f32.mrb[169].mxu0 }
 0x23b   : > { %6192 = vst.msk [vmem:[#allocation2 + $0x10] sm:$0xff] %vm366_vm7, %v6181_v28  ;;  %v6182_v53 = vadd.f32 %v15775_v0, %v6027_v20  ;;  %6008 = vst.msk [vmem:[#allocation2 + $0x38] sm:$0xff] %vm366_vm7, %v5997_v27  ;;  %v6025_v22 = vld [vmem:[#allocation2 + $0x8] sm:$0xff]  ;;  %12566 = vmatmul.mubr.msk.bf16.gmra.mrb[20].mxu1 %vm263_vm1, %v9545_v46  ;;  %v9987_v0 = vshll.u32 %v12980_v55, 16  ;;  %v5843_v16 = vld [vmem:[#allocation2 + $0x40] sm:$0xff]  ;;  %v12334_v25 = vpop.f32.mrb[170].mxu0 }
 0x23c   : > { %6190 = vst.msk [vmem:[#allocation2] sm:$0xff] %vm366_vm7, %v6179_v38  ;;  %v6180_v47 = vadd.f32 %v15782_v3, %v6025_v22  ;;  %6006 = vst.msk [vmem:[#allocation2 + $0x28] sm:$0xff] %vm366_vm7, %v5995_v9  ;;  %12569 = vmatprep.mubr.msk.bf16.mxu1 %vm263_vm1, %v9547_v34  ;;  %v9977_v3 = vrot.slane %v9975_v29, 1  ;;  %v15862_v35 = vpop.f32.mrb[171].mxu0  ;;  %v10005_v55 = vshll.u32 %v12984_v2, 16  ;;  %v9998_v38 = vrot.slane %v9996_v19, 2 }
 0x23d   : > { %6193 = vst.msk [vmem:[#allocation2 + $0x18] sm:$0xff] %vm366_vm7, %v6182_v53  ;;  %v9989_v40 = vrot.slane %v9987_v0, 2  ;;  %v5844_v4 = vld [vmem:[#allocation2 + $0x48] sm:$0xff]  ;;  %v12983_v20 = vld [vmem:[%s13068_s25 + $0x30] sm:$0xff]  }
 0x23e   : > { %6191 = vst.msk [vmem:[#allocation2 + $0x8] sm:$0xff] %vm366_vm7, %v6180_v47  ;;  %v12319_v6 = vpop.f32.mrb[172].mxu1  ;;  %12584 = vmatmul.mubr.msk.bf16.gmra.mrb[20].mxu0 %vm263_vm1, %v15801_v39  ;;  %v9981_v46 = vor.u32 %v9980_v7, %v9977_v3  ;;  %v10002_v39 = vshrl.u32 %v12984_v2, 16 }
 0x23f   : > { %v6000_v41 = vadd.f32 %v12319_v6, %v5845_v31  ;;  %v5976_v49 = vpop.f32.mrb[173].mxu1  ;;  %12603 = vmatprep.mubr.msk.bf16.mxu0 %vm263_vm1, %v10190_v60  ;;  %v15883_v52 = vor.u32 %v9989_v40, %v9986_v56 }
 0x240   : > { %v6030_v50 = vld [vmem:[#allocation2 + $0x30] sm:$0xff]  ;;  %v5998_v30 = vadd.f32 %v5976_v49, %v5843_v16  ;;  %v12320_v58 = vpop.f32.mrb[174].mxu1  ;;  %v9982_v34 = vsel %vm1439_vm4, %v9972_v15, %v9981_v46 }
 0x241   : > { %v6185_v45 = vadd.f32 %v15804_v51, %v6030_v50  ;;  %6011 = vst.msk [vmem:[#allocation2 + $0x50] sm:$0xff] %vm366_vm7, %v6000_v41  ;;  %v6028_v32 = vld [vmem:[#allocation2 + $0x20] sm:$0xff]  ;;  %v5979_v42 = vpop.f32.mrb[175].mxu1  ;;  %v12353_v27 = vpop.f32.mrb[172].mxu0  ;;  %v9991_v59 = vsel %vm1439_vm4, %v9981_v46, %v15883_v52  ;;  %v10004_v41 = vrot.slane %v10002_v39, 1  ;;  %v10197_v50 = vrot.slane %v15901_v43, 2 }
 0x242   : > { %v6183_v36 = vadd.f32 %v15807_v10, %v6028_v32  ;;  %6009 = vst.msk [vmem:[#allocation2 + $0x40] sm:$0xff] %vm366_vm7, %v5998_v30  ;;  %v6031_v54 = vld [vmem:[#allocation2 + $0x38] sm:$0xff]  ;;  %v5999_v51 = vadd.f32 %v5979_v42, %v5844_v4  ;;  %v6215_v28 = vld [vmem:[#allocation2 + $0x10] sm:$0xff]  ;;  %v15889_v5 = vpop.f32.mrb[173].mxu0 }
 0x243   : > { %6196 = vst.msk [vmem:[#allocation2 + $0x30] sm:$0xff] %vm366_vm7, %v6185_v45  ;;  %v6186_v33 = vadd.f32 %v15817_v37, %v6031_v54  ;;  %v6029_v48 = vld [vmem:[#allocation2 + $0x28] sm:$0xff]  ;;  %12570 = vmatmul.mubr.msk.bf16.gmra.mrb[24].mxu1 %vm263_vm1, %v9546_v14  ;;  %v10191_v37 = vrot.slane %v12979_v18, 2  ;;  %v10193_v14 = vrot.slane %v15858_v44, 2  ;;  %v6213_v63 = vld [vmem:[#allocation2] sm:$0xff]  ;;  %v12354_v8 = vpop.f32.mrb[174].mxu0  ;;  %v9999_v18 = vor.u32 %v9998_v38, %v9995_v11 }
 0x244   : > { %6194 = vst.msk [vmem:[#allocation2 + $0x20] sm:$0xff] %vm366_vm7, %v6183_v36  ;;  %v6184_v10 = vadd.f32 %v15826_v17, %v6029_v48  ;;  %6010 = vst.msk [vmem:[#allocation2 + $0x48] sm:$0xff] %vm366_vm7, %v5999_v51  ;;  %12589 = vmatprep.mubr.msk.bf16.mxu1 %vm263_vm1, %v9973_v26  ;;  %v6216_v53 = vld [vmem:[#allocation2 + $0x18] sm:$0xff]  ;;  %v6557_v12 = vpop.f32.mrb[175].mxu0 }
 0x245   : > { %6197 = vst.msk [vmem:[#allocation2 + $0x38] sm:$0xff] %vm366_vm7, %v6186_v33  ;;  %v10192_v47 = vsel %vm3544_vm5, %v10189_v21, %v10191_v37  ;;  %v10194_v0 = vsel %vm3544_vm5, %v10191_v37, %v10193_v14  ;;  %v6214_v6 = vld [vmem:[#allocation2 + $0x8] sm:$0xff]  ;;  %v10007_v21 = vrot.slane %v10005_v55, 2  ;;  %v10000_v60 = vsel %vm1439_vm4, %v15883_v52, %v9999_v18 }
 0x246   : > { %6195 = vst.msk [vmem:[#allocation2 + $0x28] sm:$0xff] %vm366_vm7, %v6184_v10  ;;  %v12339_v62 = vpop.f32.mrb[176].mxu1  ;;  %12604 = vmatmul.mubr.msk.bf16.vlgmr.msra.gmra.mrb[24].mxu0 %vm263_vm1, %v10192_v47 }
 0x247   : > { %v6370_v23 = vadd.f32 %v12339_v62, %v6215_v28  ;;  %v6322_v17 = vpop.f32.mrb[177].mxu1  ;;  %12607 = vmatprep.mubr.msk.bf16.mxu0 %vm263_vm1, %v10194_v0  ;;  %v15916_v57 = vor.u32 %v10007_v21, %v10004_v41 }
 0x248   : > { %v6034_v9 = vld [vmem:[#allocation2 + $0x50] sm:$0xff]  ;;  %v6368_v29 = vadd.f32 %v6322_v17, %v6213_v63  ;;  %v12340_v22 = vpop.f32.mrb[178].mxu1 }
 0x249   : > { %v6189_v15 = vadd.f32 %v15851_v1, %v6034_v9  ;;  %v6032_v13 = vld [vmem:[#allocation2 + $0x40] sm:$0xff]  ;;  %6381 = vst.msk [vmem:[#allocation2 + $0x10] sm:$0xff] %vm366_vm7, %v6370_v23  ;;  %v6371_v31 = vadd.f32 %v12340_v22, %v6216_v53  ;;  %v6325_v3 = vpop.f32.mrb[179].mxu1  ;;  %v12357_v25 = vpop.f32.mrb[176].mxu0  ;;  %v10009_v19 = vsel %vm1439_vm4, %v9999_v18, %v15916_v57 }
 0x24a   : > { %v6187_v16 = vadd.f32 %v15853_v24, %v6032_v13  ;;  %6379 = vst.msk [vmem:[#allocation2] sm:$0xff] %vm366_vm7, %v6368_v29  ;;  %v6369_v49 = vadd.f32 %v6325_v3, %v6214_v6  ;;  %v10195_v24 = vrot.slane %v12983_v20, 2  ;;  %v6219_v30 = vld [vmem:[#allocation2 + $0x30] sm:$0xff]  ;;  %v6570_v32 = vpop.f32.mrb[177].mxu0 }
 0x24b   : > { %6200 = vst.msk [vmem:[#allocation2 + $0x50] sm:$0xff] %vm366_vm7, %v6189_v15  ;;  %v6033_v7 = vld [vmem:[#allocation2 + $0x48] sm:$0xff]  ;;  %6382 = vst.msk [vmem:[#allocation2 + $0x18] sm:$0xff] %vm366_vm7, %v6371_v31  ;;  %12590 = vmatmul.mubr.msk.bf16.vlgmr.msra.gmra.mrb[28].mxu1 %vm263_vm1, %v9982_v34  ;;  %v6217_v40 = vld [vmem:[#allocation2 + $0x20] sm:$0xff]  ;;  %v12358_v2 = vpop.f32.mrb[178].mxu0 }
 0x24c   : > { %6198 = vst.msk [vmem:[#allocation2 + $0x40] sm:$0xff] %vm366_vm7, %v6187_v16  ;;  %v6188_v1 = vadd.f32 %v15862_v35, %v6033_v7  ;;  %6380 = vst.msk [vmem:[#allocation2 + $0x8] sm:$0xff] %vm366_vm7, %v6369_v49  ;;  %12593 = vmatprep.mubr.msk.bf16.mxu1 %vm263_vm1, %v9991_v59  ;;  %v6220_v35 = vld [vmem:[#allocation2 + $0x38] sm:$0xff]  ;;  %v10196_v36 = vsel %vm3544_vm5, %v10193_v14, %v10195_v24  ;;  %v6573_v61 = vpop.f32.mrb[179].mxu0  ;;  %v10198_v10 = vsel %vm3544_vm5, %v10195_v24, %v10197_v50 }
 0x24d   : > { %v6218_v48 = vld [vmem:[#allocation2 + $0x28] sm:$0xff] }
 0x24e   : > { %6199 = vst.msk [vmem:[#allocation2 + $0x48] sm:$0xff] %vm366_vm7, %v6188_v1  ;;  %v12343_v58 = vpop.f32.mrb[180].mxu1  ;;  %12608 = vmatmul.mubr.msk.bf16.gmra.mrb[28].mxu0 %vm263_vm1, %v10196_v36 }
 0x24f   : > { %v6374_v56 = vadd.f32 %v12343_v58, %v6219_v30  ;;  %v6338_v45 = vpop.f32.mrb[181].mxu1  ;;  %12611 = vmatprep.mubr.msk.bf16.mxu0 %vm263_vm1, %v10198_v10 }
 0x250   : > { %v6404_v4 = vld [vmem:[#allocation2 + $0x10] sm:$0xff]  ;;  %v6372_v42 = vadd.f32 %v6338_v45, %v6217_v40  ;;  %v12344_v26 = vpop.f32.mrb[182].mxu1 }
 0x251   : > { %v6602_v54 = vadd.f32 %v12353_v27, %v6404_v4  ;;  %6385 = vst.msk [vmem:[#allocation2 + $0x30] sm:$0xff] %vm366_vm7, %v6374_v56  ;;  %v6402_v51 = vld [vmem:[#allocation2] sm:$0xff]  ;;  %v6375_v33 = vadd.f32 %v12344_v26, %v6220_v35  ;;  %v6341_v46 = vpop.f32.mrb[183].mxu1  ;;  %v12361_v27 = vpop.f32.mrb[180].mxu0 }
 0x252   : > { %v6600_v37 = vadd.f32 %v15889_v5, %v6402_v51  ;;  %6383 = vst.msk [vmem:[#allocation2 + $0x20] sm:$0xff] %vm366_vm7, %v6372_v42  ;;  %v6405_v44 = vld [vmem:[#allocation2 + $0x18] sm:$0xff]  ;;  %v6373_v52 = vadd.f32 %v6341_v46, %v6218_v48  ;;  %v6223_v28 = vld [vmem:[#allocation2 + $0x50] sm:$0xff]  ;;  %v6586_v34 = vpop.f32.mrb[181].mxu0 }
 0x253   : > { %6613 = vst.msk [vmem:[#allocation2 + $0x10] sm:$0xff] %vm366_vm7, %v6602_v54  ;;  %v6603_v14 = vadd.f32 %v12354_v8, %v6405_v44  ;;  %6386 = vst.msk [vmem:[#allocation2 + $0x38] sm:$0xff] %vm366_vm7, %v6375_v33  ;;  %v6403_v39 = vld [vmem:[#allocation2 + $0x8] sm:$0xff]  ;;  %12594 = vmatmul.mubr.msk.bf16.gmra.mrb[32].mxu1 %vm263_vm1, %v10000_v60  ;;  %v6221_v63 = vld [vmem:[#allocation2 + $0x40] sm:$0xff]  ;;  %v12362_v20 = vpop.f32.mrb[182].mxu0 }
 0x254   : > { %6611 = vst.msk [vmem:[#allocation2] sm:$0xff] %vm366_vm7, %v6600_v37  ;;  %v6601_v55 = vadd.f32 %v6557_v12, %v6403_v39  ;;  %6384 = vst.msk [vmem:[#allocation2 + $0x28] sm:$0xff] %vm366_vm7, %v6373_v52  ;;  %12597 = vmatprep.mubr.msk.bf16.mxu1 %vm263_vm1, %v10009_v19  ;;  %v6589_v8 = vpop.f32.mrb[183].mxu0 }
 0x255   : > { %6614 = vst.msk [vmem:[#allocation2 + $0x18] sm:$0xff] %vm366_vm7, %v6603_v14  ;;  %v6222_v53 = vld [vmem:[#allocation2 + $0x48] sm:$0xff] }
 0x256   : > { %6612 = vst.msk [vmem:[#allocation2 + $0x8] sm:$0xff] %vm366_vm7, %v6601_v55  ;;  %v12347_v62 = vpop.f32.mrb[184].mxu1  ;;  %12612 = vmatmul.mubr.msk.bf16.gmra.mrb[32].mxu0 %vm263_vm1, %v10197_v50 }
 0x257   : > { %v6378_v23 = vadd.f32 %v12347_v62, %v6223_v28  ;;  %v6354_v17 = vpop.f32.mrb[185].mxu1 }
 0x258   : > { %v6408_v5 = vld [vmem:[#allocation2 + $0x30] sm:$0xff]  ;;  %v6376_v11 = vadd.f32 %v6354_v17, %v6221_v63  ;;  %v12348_v38 = vpop.f32.mrb[186].mxu1 }
 0x259   : > { %v6606_v9 = vadd.f32 %v12357_v25, %v6408_v5  ;;  %6389 = vst.msk [vmem:[#allocation2 + $0x50] sm:$0xff] %vm366_vm7, %v6378_v23  ;;  %v6406_v29 = vld [vmem:[#allocation2 + $0x20] sm:$0xff]  ;;  %v6357_v22 = vpop.f32.mrb[187].mxu1  ;;  %v12381_v12 = vpop.f32.mrb[184].mxu0 }
 0x25a   : > { %v6604_v47 = vadd.f32 %v6570_v32, %v6406_v29  ;;  %6387 = vst.msk [vmem:[#allocation2 + $0x40] sm:$0xff] %vm366_vm7, %v6376_v11  ;;  %v6409_v59 = vld [vmem:[#allocation2 + $0x38] sm:$0xff]  ;;  %v6377_v0 = vadd.f32 %v6357_v22, %v6222_v53  ;;  %v6636_v6 = vld [vmem:[#allocation2 + $0x10] sm:$0xff]  ;;  %v6960_v49 = vpop.f32.mrb[185].mxu0 }
 0x25b   : > { %6617 = vst.msk [vmem:[#allocation2 + $0x30] sm:$0xff] %vm366_vm7, %v6606_v9  ;;  %v6607_v15 = vadd.f32 %v12358_v2, %v6409_v59  ;;  %v6407_v13 = vld [vmem:[#allocation2 + $0x28] sm:$0xff]  ;;  %12598 = vmatmul.mubr.msk.bf16.gmra.mrb[36].mxu1 %vm263_vm1, %v15916_v57  ;;  %v6634_v21 = vld [vmem:[#allocation2] sm:$0xff]  ;;  %v12382_v24 = vpop.f32.mrb[186].mxu0 }
 0x25c   : > { %6615 = vst.msk [vmem:[#allocation2 + $0x20] sm:$0xff] %vm366_vm7, %v6604_v47  ;;  %v6605_v31 = vadd.f32 %v6573_v61, %v6407_v13  ;;  %6388 = vst.msk [vmem:[#allocation2 + $0x48] sm:$0xff] %vm366_vm7, %v6377_v0  ;;  %v6637_v1 = vld [vmem:[#allocation2 + $0x18] sm:$0xff]  ;;  %v6963_v56 = vpop.f32.mrb[187].mxu0 }
 0x25d   : > { %6618 = vst.msk [vmem:[#allocation2 + $0x38] sm:$0xff] %vm366_vm7, %v6607_v15  ;;  %v6635_v58 = vld [vmem:[#allocation2 + $0x8] sm:$0xff] }
 0x25e   : > { %6616 = vst.msk [vmem:[#allocation2 + $0x28] sm:$0xff] %vm366_vm7, %v6605_v31  ;;  %v12367_v3 = vpop.f32.mrb[188].mxu1 }
 0x25f   : > { %v6833_v41 = vadd.f32 %v12367_v3, %v6636_v6  ;;  %v6785_v16 = vpop.f32.mrb[189].mxu1 }
 0x260   : > { %v6412_v7 = vld [vmem:[#allocation2 + $0x50] sm:$0xff]  ;;  %v6831_v43 = vadd.f32 %v6785_v16, %v6634_v21  ;;  %v12368_v18 = vpop.f32.mrb[190].mxu1 }
 0x261   : > { %v6610_v57 = vadd.f32 %v12361_v27, %v6412_v7  ;;  %v6410_v50 = vld [vmem:[#allocation2 + $0x40] sm:$0xff]  ;;  %6844 = vst.msk [vmem:[#allocation2 + $0x10] sm:$0xff] %vm366_vm7, %v6833_v41  ;;  %v6834_v30 = vadd.f32 %v12368_v18, %v6637_v1  ;;  %v6788_v25 = vpop.f32.mrb[191].mxu1  ;;  %v12385_v26 = vpop.f32.mrb[188].mxu0 }
 0x262   : > { %v6608_v40 = vadd.f32 %v6586_v34, %v6410_v50  ;;  %6842 = vst.msk [vmem:[#allocation2] sm:$0xff] %vm366_vm7, %v6831_v43  ;;  %v6832_v45 = vadd.f32 %v6788_v25, %v6635_v58  ;;  %v6640_v42 = vld [vmem:[#allocation2 + $0x30] sm:$0xff]  ;;  %v6976_v54 = vpop.f32.mrb[189].mxu0 }
 0x263   : > { %6621 = vst.msk [vmem:[#allocation2 + $0x50] sm:$0xff] %vm366_vm7, %v6610_v57  ;;  %v6411_v32 = vld [vmem:[#allocation2 + $0x48] sm:$0xff]  ;;  %6845 = vst.msk [vmem:[#allocation2 + $0x18] sm:$0xff] %vm366_vm7, %v6834_v30  ;;  %v6638_v2 = vld [vmem:[#allocation2 + $0x20] sm:$0xff]  ;;  %v12386_v61 = vpop.f32.mrb[190].mxu0 }
 0x264   : > { %6619 = vst.msk [vmem:[#allocation2 + $0x40] sm:$0xff] %vm366_vm7, %v6608_v40  ;;  %v6609_v4 = vadd.f32 %v6589_v8, %v6411_v32  ;;  %6843 = vst.msk [vmem:[#allocation2 + $0x8] sm:$0xff] %vm366_vm7, %v6832_v45  ;;  %v6641_v48 = vld [vmem:[#allocation2 + $0x38] sm:$0xff]  ;;  %v6979_v14 = vpop.f32.mrb[191].mxu0 }
 0x265   : > { %v6639_v44 = vld [vmem:[#allocation2 + $0x28] sm:$0xff] }
 0x266   : > { %6620 = vst.msk [vmem:[#allocation2 + $0x48] sm:$0xff] %vm366_vm7, %v6609_v4  ;;  %v12371_v35 = vpop.f32.mrb[192].mxu1 }
 0x267   : > { %v6837_v60 = vadd.f32 %v12371_v35, %v6640_v42  ;;  %v6801_v36 = vpop.f32.mrb[193].mxu1 }
 0x268   : > { %v6866_v51 = vld [vmem:[#allocation2 + $0x10] sm:$0xff]  ;;  %v6835_v33 = vadd.f32 %v6801_v36, %v6638_v2  ;;  %v12372_v46 = vpop.f32.mrb[194].mxu1 }
 0x269   : > { %v7008_v19 = vadd.f32 %v12381_v12, %v6866_v51  ;;  %6848 = vst.msk [vmem:[#allocation2 + $0x30] sm:$0xff] %vm366_vm7, %v6837_v60  ;;  %v6864_v10 = vld [vmem:[#allocation2] sm:$0xff]  ;;  %v6838_v37 = vadd.f32 %v12372_v46, %v6641_v48  ;;  %v6804_v52 = vpop.f32.mrb[195].mxu1  ;;  %v12389_v34 = vpop.f32.mrb[192].mxu0 }
 0x26a   : > { %v7006_v39 = vadd.f32 %v6960_v49, %v6864_v10  ;;  %6846 = vst.msk [vmem:[#allocation2 + $0x20] sm:$0xff] %vm366_vm7, %v6835_v33  ;;  %v6867_v55 = vld [vmem:[#allocation2 + $0x18] sm:$0xff]  ;;  %v6836_v28 = vadd.f32 %v6804_v52, %v6639_v44  ;;  %v6644_v63 = vld [vmem:[#allocation2 + $0x50] sm:$0xff]  ;;  %v6992_v20 = vpop.f32.mrb[193].mxu0 }
 0x26b   : > { %7019 = vst.msk [vmem:[#allocation2 + $0x10] sm:$0xff] %vm366_vm7, %v7008_v19  ;;  %v7009_v62 = vadd.f32 %v12382_v24, %v6867_v55  ;;  %6849 = vst.msk [vmem:[#allocation2 + $0x38] sm:$0xff] %vm366_vm7, %v6838_v37  ;;  %v6865_v27 = vld [vmem:[#allocation2 + $0x8] sm:$0xff]  ;;  %v6642_v11 = vld [vmem:[#allocation2 + $0x40] sm:$0xff]  ;;  %v12390_v22 = vpop.f32.mrb[194].mxu0 }
 0x26c   : > { %7017 = vst.msk [vmem:[#allocation2] sm:$0xff] %vm366_vm7, %v7006_v39  ;;  %v7007_v23 = vadd.f32 %v6963_v56, %v6865_v27  ;;  %6847 = vst.msk [vmem:[#allocation2 + $0x28] sm:$0xff] %vm366_vm7, %v6836_v28  ;;  %v6995_v15 = vpop.f32.mrb[195].mxu0 }
 0x26d   : > { %7020 = vst.msk [vmem:[#allocation2 + $0x18] sm:$0xff] %vm366_vm7, %v7009_v62  ;;  %v6643_v59 = vld [vmem:[#allocation2 + $0x48] sm:$0xff] }
 0x26e   : > { %7018 = vst.msk [vmem:[#allocation2 + $0x8] sm:$0xff] %vm366_vm7, %v7007_v23  ;;  %v12375_v17 = vpop.f32.mrb[196].mxu1 }
 0x26f   : > { %v6841_v5 = vadd.f32 %v12375_v17, %v6644_v63  ;;  %v6817_v38 = vpop.f32.mrb[197].mxu1 }
 0x270   : > { %v6870_v9 = vld [vmem:[#allocation2 + $0x30] sm:$0xff]  ;;  %v6839_v29 = vadd.f32 %v6817_v38, %v6642_v11  ;;  %v12376_v53 = vpop.f32.mrb[198].mxu1 }
 0x271   : > { %v7012_v8 = vadd.f32 %v12385_v26, %v6870_v9  ;;  %6852 = vst.msk [vmem:[#allocation2 + $0x50] sm:$0xff] %vm366_vm7, %v6841_v5  ;;  %v6868_v47 = vld [vmem:[#allocation2 + $0x20] sm:$0xff]  ;;  %v6820_v0 = vpop.f32.mrb[199].mxu1  ;;  %v12409_v49 = vpop.f32.mrb[196].mxu0 }
 0x272   : > { %v7010_v13 = vadd.f32 %v6976_v54, %v6868_v47  ;;  %6850 = vst.msk [vmem:[#allocation2 + $0x40] sm:$0xff] %vm366_vm7, %v6839_v29  ;;  %v6871_v31 = vld [vmem:[#allocation2 + $0x38] sm:$0xff]  ;;  %v6840_v6 = vadd.f32 %v6820_v0, %v6643_v59  ;;  %v7041_v21 = vld [vmem:[#allocation2 + $0x10] sm:$0xff]  ;;  %v7360_v18 = vpop.f32.mrb[197].mxu0 }
 0x273   : > { %7023 = vst.msk [vmem:[#allocation2 + $0x30] sm:$0xff] %vm366_vm7, %v7012_v8  ;;  %v7013_v3 = vadd.f32 %v12386_v61, %v6871_v31  ;;  %v6869_v12 = vld [vmem:[#allocation2 + $0x28] sm:$0xff]  ;;  %v7039_v43 = vld [vmem:[#allocation2] sm:$0xff]  ;;  %v12410_v58 = vpop.f32.mrb[198].mxu0 }
 0x274   : > { %7021 = vst.msk [vmem:[#allocation2 + $0x20] sm:$0xff] %vm366_vm7, %v7010_v13  ;;  %v7011_v41 = vadd.f32 %v6979_v14, %v6869_v12  ;;  %6851 = vst.msk [vmem:[#allocation2 + $0x48] sm:$0xff] %vm366_vm7, %v6840_v6  ;;  %v7042_v50 = vld [vmem:[#allocation2 + $0x18] sm:$0xff]  ;;  %v7363_v4 = vpop.f32.mrb[199].mxu0 }
 0x275   : > { %7024 = vst.msk [vmem:[#allocation2 + $0x38] sm:$0xff] %vm366_vm7, %v7013_v3  ;;  %v7040_v45 = vld [vmem:[#allocation2 + $0x8] sm:$0xff] }
 0x276   : > { %7022 = vst.msk [vmem:[#allocation2 + $0x28] sm:$0xff] %vm366_vm7, %v7011_v41  ;;  %v12395_v16 = vpop.f32.mrb[200].mxu1 }
 0x277   : > { %v7183_v7 = vadd.f32 %v12395_v16, %v7041_v21  ;;  %v7135_v1 = vpop.f32.mrb[201].mxu1 }
 0x278   : > { %v6874_v24 = vld [vmem:[#allocation2 + $0x50] sm:$0xff]  ;;  %v7181_v57 = vadd.f32 %v7135_v1, %v7039_v43  ;;  %v12396_v30 = vpop.f32.mrb[202].mxu1 }
 0x279   : > { %v7016_v25 = vadd.f32 %v12389_v34, %v6874_v24  ;;  %v6872_v56 = vld [vmem:[#allocation2 + $0x40] sm:$0xff]  ;;  %7194 = vst.msk [vmem:[#allocation2 + $0x10] sm:$0xff] %vm366_vm7, %v7183_v7  ;;  %v7184_v40 = vadd.f32 %v12396_v30, %v7042_v50  ;;  %v7138_v32 = vpop.f32.mrb[203].mxu1  ;;  %v12413_v54 = vpop.f32.mrb[200].mxu0 }
 0x27a   : > { %v7014_v42 = vadd.f32 %v6992_v20, %v6872_v56  ;;  %7192 = vst.msk [vmem:[#allocation2] sm:$0xff] %vm366_vm7, %v7181_v57  ;;  %v7182_v35 = vadd.f32 %v7138_v32, %v7040_v45  ;;  %v7045_v2 = vld [vmem:[#allocation2 + $0x30] sm:$0xff]  ;;  %v7376_v46 = vpop.f32.mrb[201].mxu0 }
 0x27b   : > { %7027 = vst.msk [vmem:[#allocation2 + $0x50] sm:$0xff] %vm366_vm7, %v7016_v25  ;;  %v6873_v26 = vld [vmem:[#allocation2 + $0x48] sm:$0xff]  ;;  %7195 = vst.msk [vmem:[#allocation2 + $0x18] sm:$0xff] %vm366_vm7, %v7184_v40  ;;  %v7043_v33 = vld [vmem:[#allocation2 + $0x20] sm:$0xff]  ;;  %v12414_v44 = vpop.f32.mrb[202].mxu0 }
 0x27c   : > { %7025 = vst.msk [vmem:[#allocation2 + $0x40] sm:$0xff] %vm366_vm7, %v7014_v42  ;;  %v7015_v60 = vadd.f32 %v6995_v15, %v6873_v26  ;;  %7193 = vst.msk [vmem:[#allocation2 + $0x8] sm:$0xff] %vm366_vm7, %v7182_v35  ;;  %v7046_v10 = vld [vmem:[#allocation2 + $0x38] sm:$0xff]  ;;  %v7379_v62 = vpop.f32.mrb[203].mxu0 }
 0x27d   : > { %v7044_v55 = vld [vmem:[#allocation2 + $0x28] sm:$0xff] }
 0x27e   : > { %7026 = vst.msk [vmem:[#allocation2 + $0x48] sm:$0xff] %vm366_vm7, %v7015_v60  ;;  %v12399_v36 = vpop.f32.mrb[204].mxu1 }
 0x27f   : > { %v7187_v51 = vadd.f32 %v12399_v36, %v7045_v2  ;;  %v7151_v48 = vpop.f32.mrb[205].mxu1 }
 0x280   : > { %v7217_v61 = vld [vmem:[#allocation2 + $0x10] sm:$0xff]  ;;  %v7185_v19 = vadd.f32 %v7151_v48, %v7043_v33  ;;  %v12400_v37 = vpop.f32.mrb[206].mxu1 }
 0x281   : > { %v7408_v52 = vadd.f32 %v12409_v49, %v7217_v61  ;;  %7198 = vst.msk [vmem:[#allocation2 + $0x30] sm:$0xff] %vm366_vm7, %v7187_v51  ;;  %v7215_v14 = vld [vmem:[#allocation2] sm:$0xff]  ;;  %v7188_v39 = vadd.f32 %v12400_v37, %v7046_v10  ;;  %v7154_v28 = vpop.f32.mrb[207].mxu1  ;;  %v12417_v20 = vpop.f32.mrb[204].mxu0 }
 0x282   : > { %v7406_v27 = vadd.f32 %v7360_v18, %v7215_v14  ;;  %7196 = vst.msk [vmem:[#allocation2 + $0x20] sm:$0xff] %vm366_vm7, %v7185_v19  ;;  %v7218_v23 = vld [vmem:[#allocation2 + $0x18] sm:$0xff]  ;;  %v7186_v63 = vadd.f32 %v7154_v28, %v7044_v55  ;;  %v7049_v11 = vld [vmem:[#allocation2 + $0x50] sm:$0xff]  ;;  %v7392_v22 = vpop.f32.mrb[205].mxu0 }
 0x283   : > { %7419 = vst.msk [vmem:[#allocation2 + $0x10] sm:$0xff] %vm366_vm7, %v7408_v52  ;;  %v7409_v17 = vadd.f32 %v12410_v58, %v7218_v23  ;;  %7199 = vst.msk [vmem:[#allocation2 + $0x38] sm:$0xff] %vm366_vm7, %v7188_v39  ;;  %v7216_v34 = vld [vmem:[#allocation2 + $0x8] sm:$0xff]  ;;  %v7047_v29 = vld [vmem:[#allocation2 + $0x40] sm:$0xff]  ;;  %v12418_v0 = vpop.f32.mrb[206].mxu0 }
 0x284   : > { %7417 = vst.msk [vmem:[#allocation2] sm:$0xff] %vm366_vm7, %v7406_v27  ;;  %v7407_v5 = vadd.f32 %v7363_v4, %v7216_v34  ;;  %7197 = vst.msk [vmem:[#allocation2 + $0x28] sm:$0xff] %vm366_vm7, %v7186_v63  ;;  %v7395_v3 = vpop.f32.mrb[207].mxu0 }
 0x285   : > { %7420 = vst.msk [vmem:[#allocation2 + $0x18] sm:$0xff] %vm366_vm7, %v7409_v17  ;;  %v7048_v31 = vld [vmem:[#allocation2 + $0x48] sm:$0xff] }
 0x286   : > { %7418 = vst.msk [vmem:[#allocation2 + $0x8] sm:$0xff] %vm366_vm7, %v7407_v5  ;;  %v12403_v38 = vpop.f32.mrb[208].mxu1 }
 0x287   : > { %v7191_v9 = vadd.f32 %v12403_v38, %v7049_v11  ;;  %v7167_v53 = vpop.f32.mrb[209].mxu1 }
 0x288   : > { %v7221_v8 = vld [vmem:[#allocation2 + $0x30] sm:$0xff]  ;;  %v7189_v47 = vadd.f32 %v7167_v53, %v7047_v29  ;;  %v12404_v59 = vpop.f32.mrb[210].mxu1 }
 0x289   : > { %v7412_v15 = vadd.f32 %v12413_v54, %v7221_v8  ;;  %7202 = vst.msk [vmem:[#allocation2 + $0x50] sm:$0xff] %vm366_vm7, %v7191_v9  ;;  %v7219_v13 = vld [vmem:[#allocation2 + $0x20] sm:$0xff]  ;;  %v7170_v6 = vpop.f32.mrb[211].mxu1  ;;  %v12437_v18 = vpop.f32.mrb[208].mxu0 }
 0x28a   : > { %v7410_v12 = vadd.f32 %v7376_v46, %v7219_v13  ;;  %7200 = vst.msk [vmem:[#allocation2 + $0x40] sm:$0xff] %vm366_vm7, %v7189_v47  ;;  %v7222_v41 = vld [vmem:[#allocation2 + $0x38] sm:$0xff]  ;;  %v7190_v21 = vadd.f32 %v7170_v6, %v7048_v31  ;;  %v7442_v43 = vld [vmem:[#allocation2 + $0x10] sm:$0xff]  ;;  %v7738_v30 = vpop.f32.mrb[209].mxu0 }
 0x28b   : > { %7423 = vst.msk [vmem:[#allocation2 + $0x30] sm:$0xff] %vm366_vm7, %v7412_v15  ;;  %v7413_v16 = vadd.f32 %v12414_v44, %v7222_v41  ;;  %v7220_v49 = vld [vmem:[#allocation2 + $0x28] sm:$0xff]  ;;  %v7440_v57 = vld [vmem:[#allocation2] sm:$0xff]  ;;  %v12438_v45 = vpop.f32.mrb[210].mxu0 }
 0x28c   : > { %7421 = vst.msk [vmem:[#allocation2 + $0x20] sm:$0xff] %vm366_vm7, %v7410_v12  ;;  %v7411_v7 = vadd.f32 %v7379_v62, %v7220_v49  ;;  %7201 = vst.msk [vmem:[#allocation2 + $0x48] sm:$0xff] %vm366_vm7, %v7190_v21  ;;  %v7443_v56 = vld [vmem:[#allocation2 + $0x18] sm:$0xff]  ;;  %v7741_v60 = vpop.f32.mrb[211].mxu0 }
 0x28d   : > { %7424 = vst.msk [vmem:[#allocation2 + $0x38] sm:$0xff] %vm366_vm7, %v7413_v16  ;;  %v7441_v35 = vld [vmem:[#allocation2 + $0x8] sm:$0xff] }
 0x28e   : > { %7422 = vst.msk [vmem:[#allocation2 + $0x28] sm:$0xff] %vm366_vm7, %v7411_v7  ;;  %v12423_v1 = vpop.f32.mrb[212].mxu1 }
 0x28f   : > { %v7597_v24 = vadd.f32 %v12423_v1, %v7442_v43  ;;  %v7549_v50 = vpop.f32.mrb[213].mxu1 }
 0x290   : > { %v7225_v58 = vld [vmem:[#allocation2 + $0x50] sm:$0xff]  ;;  %v7595_v25 = vadd.f32 %v7549_v50, %v7440_v57  ;;  %v12424_v40 = vpop.f32.mrb[214].mxu1 }
 0x291   : > { %v7416_v32 = vadd.f32 %v12417_v20, %v7225_v58  ;;  %v7223_v4 = vld [vmem:[#allocation2 + $0x40] sm:$0xff]  ;;  %7608 = vst.msk [vmem:[#allocation2 + $0x10] sm:$0xff] %vm366_vm7, %v7597_v24  ;;  %v7598_v42 = vadd.f32 %v12424_v40, %v7443_v56  ;;  %v7552_v26 = vpop.f32.mrb[215].mxu1  ;;  %v12441_v46 = vpop.f32.mrb[212].mxu0 }
 0x292   : > { %v7414_v2 = vadd.f32 %v7392_v22, %v7223_v4  ;;  %7606 = vst.msk [vmem:[#allocation2] sm:$0xff] %vm366_vm7, %v7595_v25  ;;  %v7596_v36 = vadd.f32 %v7552_v26, %v7441_v35  ;;  %v7446_v33 = vld [vmem:[#allocation2 + $0x30] sm:$0xff]  ;;  %v7754_v37 = vpop.f32.mrb[213].mxu0 }
 0x293   : > { %7427 = vst.msk [vmem:[#allocation2 + $0x50] sm:$0xff] %vm366_vm7, %v7416_v32  ;;  %v7224_v54 = vld [vmem:[#allocation2 + $0x48] sm:$0xff]  ;;  %7609 = vst.msk [vmem:[#allocation2 + $0x18] sm:$0xff] %vm366_vm7, %v7598_v42  ;;  %v7444_v19 = vld [vmem:[#allocation2 + $0x20] sm:$0xff]  ;;  %v12442_v55 = vpop.f32.mrb[214].mxu0 }
 0x294   : > { %7425 = vst.msk [vmem:[#allocation2 + $0x40] sm:$0xff] %vm366_vm7, %v7414_v2  ;;  %v7415_v51 = vadd.f32 %v7395_v3, %v7224_v54  ;;  %7607 = vst.msk [vmem:[#allocation2 + $0x8] sm:$0xff] %vm366_vm7, %v7596_v36  ;;  %v7447_v14 = vld [vmem:[#allocation2 + $0x38] sm:$0xff]  ;;  %v7757_v17 = vpop.f32.mrb[215].mxu0 }
 0x295   : > { %v7445_v23 = vld [vmem:[#allocation2 + $0x28] sm:$0xff] }
 0x296   : > { %7426 = vst.msk [vmem:[#allocation2 + $0x48] sm:$0xff] %vm366_vm7, %v7415_v51  ;;  %v12427_v48 = vpop.f32.mrb[216].mxu1 }
 0x297   : > { %v7601_v61 = vadd.f32 %v12427_v48, %v7446_v33  ;;  %v7565_v10 = vpop.f32.mrb[217].mxu1 }
 0x298   : > { %v7631_v44 = vld [vmem:[#allocation2 + $0x10] sm:$0xff]  ;;  %v7599_v52 = vadd.f32 %v7565_v10, %v7444_v19  ;;  %v12428_v39 = vpop.f32.mrb[218].mxu1 }
 0x299   : > { %v7786_v28 = vadd.f32 %v12437_v18, %v7631_v44  ;;  %7612 = vst.msk [vmem:[#allocation2 + $0x30] sm:$0xff] %vm366_vm7, %v7601_v61  ;;  %v7629_v62 = vld [vmem:[#allocation2] sm:$0xff]  ;;  %v7602_v27 = vadd.f32 %v12428_v39, %v7447_v14  ;;  %v7568_v63 = vpop.f32.mrb[219].mxu1  ;;  %v12445_v22 = vpop.f32.mrb[216].mxu0 }
 0x29a   : > { %v7784_v34 = vadd.f32 %v7738_v30, %v7629_v62  ;;  %7610 = vst.msk [vmem:[#allocation2 + $0x20] sm:$0xff] %vm366_vm7, %v7599_v52  ;;  %v7632_v5 = vld [vmem:[#allocation2 + $0x18] sm:$0xff]  ;;  %v7600_v11 = vadd.f32 %v7568_v63, %v7445_v23  ;;  %v7450_v29 = vld [vmem:[#allocation2 + $0x50] sm:$0xff]  ;;  %v7770_v0 = vpop.f32.mrb[217].mxu0 }
 0x29b   : > { %7797 = vst.msk [vmem:[#allocation2 + $0x10] sm:$0xff] %vm366_vm7, %v7786_v28  ;;  %v7787_v38 = vadd.f32 %v12438_v45, %v7632_v5  ;;  %7613 = vst.msk [vmem:[#allocation2 + $0x38] sm:$0xff] %vm366_vm7, %v7602_v27  ;;  %v7630_v20 = vld [vmem:[#allocation2 + $0x8] sm:$0xff]  ;;  %v7448_v47 = vld [vmem:[#allocation2 + $0x40] sm:$0xff]  ;;  %v12446_v6 = vpop.f32.mrb[218].mxu0 }
 0x29c   : > { %7795 = vst.msk [vmem:[#allocation2] sm:$0xff] %vm366_vm7, %v7784_v34  ;;  %v7785_v9 = vadd.f32 %v7741_v60, %v7630_v20  ;;  %7611 = vst.msk [vmem:[#allocation2 + $0x28] sm:$0xff] %vm366_vm7, %v7600_v11  ;;  %v7773_v16 = vpop.f32.mrb[219].mxu0 }
 0x29d   : > { %7798 = vst.msk [vmem:[#allocation2 + $0x18] sm:$0xff] %vm366_vm7, %v7787_v38  ;;  %v7449_v41 = vld [vmem:[#allocation2 + $0x48] sm:$0xff] }
 0x29e   : > { %7796 = vst.msk [vmem:[#allocation2 + $0x8] sm:$0xff] %vm366_vm7, %v7785_v9  ;;  %v12431_v53 = vpop.f32.mrb[220].mxu1 }
 0x29f   : > { %v7605_v8 = vadd.f32 %v12431_v53, %v7450_v29  ;;  %v7581_v59 = vpop.f32.mrb[221].mxu1 }
 0x2a0   : > { %v7635_v15 = vld [vmem:[#allocation2 + $0x30] sm:$0xff]  ;;  %v7603_v13 = vadd.f32 %v7581_v59, %v7448_v47  ;;  %v12432_v31 = vpop.f32.mrb[222].mxu1 }
 0x2a1   : > { %v7790_v3 = vadd.f32 %v12441_v46, %v7635_v15  ;;  %7616 = vst.msk [vmem:[#allocation2 + $0x50] sm:$0xff] %vm366_vm7, %v7605_v8  ;;  %v7633_v12 = vld [vmem:[#allocation2 + $0x20] sm:$0xff]  ;;  %v7584_v21 = vpop.f32.mrb[223].mxu1  ;;  %v12465_v30 = vpop.f32.mrb[220].mxu0 }
 0x2a2   : > { %v7788_v49 = vadd.f32 %v7754_v37, %v7633_v12  ;;  %7614 = vst.msk [vmem:[#allocation2 + $0x40] sm:$0xff] %vm366_vm7, %v7603_v13  ;;  %v7636_v7 = vld [vmem:[#allocation2 + $0x38] sm:$0xff]  ;;  %v7604_v43 = vadd.f32 %v7584_v21, %v7449_v41  ;;  %v7820_v57 = vld [vmem:[#allocation2 + $0x10] sm:$0xff]  ;;  %v8200_v40 = vpop.f32.mrb[221].mxu0 }
 0x2a3   : > { %7801 = vst.msk [vmem:[#allocation2 + $0x30] sm:$0xff] %vm366_vm7, %v7790_v3  ;;  %v7791_v1 = vadd.f32 %v12442_v55, %v7636_v7  ;;  %v7634_v18 = vld [vmem:[#allocation2 + $0x28] sm:$0xff]  ;;  %v7818_v25 = vld [vmem:[#allocation2] sm:$0xff]  ;;  %v12466_v35 = vpop.f32.mrb[222].mxu0 }
 0x2a4   : > { %7799 = vst.msk [vmem:[#allocation2 + $0x20] sm:$0xff] %vm366_vm7, %v7788_v49  ;;  %v7789_v24 = vadd.f32 %v7757_v17, %v7634_v18  ;;  %7615 = vst.msk [vmem:[#allocation2 + $0x48] sm:$0xff] %vm366_vm7, %v7604_v43  ;;  %v7821_v4 = vld [vmem:[#allocation2 + $0x18] sm:$0xff]  ;;  %v8203_v51 = vpop.f32.mrb[223].mxu0 }
 0x2a5   : > { %7802 = vst.msk [vmem:[#allocation2 + $0x38] sm:$0xff] %vm366_vm7, %v7791_v1  ;;  %v7819_v36 = vld [vmem:[#allocation2 + $0x8] sm:$0xff] }
 0x2a6   : > { %7800 = vst.msk [vmem:[#allocation2 + $0x28] sm:$0xff] %vm366_vm7, %v7789_v24  ;;  %v12451_v50 = vpop.f32.mrb[224].mxu1 }
 0x2a7   : > { %v8017_v58 = vadd.f32 %v12451_v50, %v7820_v57  ;;  %v7969_v56 = vpop.f32.mrb[225].mxu1 }
 0x2a8   : > { %v7639_v45 = vld [vmem:[#allocation2 + $0x50] sm:$0xff]  ;;  %v8015_v32 = vadd.f32 %v7969_v56, %v7818_v25  ;;  %v12452_v42 = vpop.f32.mrb[226].mxu1 }
 0x2a9   : > { %v7794_v26 = vadd.f32 %v12445_v22, %v7639_v45  ;;  %v7637_v60 = vld [vmem:[#allocation2 + $0x40] sm:$0xff]  ;;  %8028 = vst.msk [vmem:[#allocation2 + $0x10] sm:$0xff] %vm366_vm7, %v8017_v58  ;;  %v8018_v2 = vadd.f32 %v12452_v42, %v7821_v4  ;;  %v7972_v54 = vpop.f32.mrb[227].mxu1  ;;  %v12469_v37 = vpop.f32.mrb[224].mxu0 }
 0x2aa   : > { %v7792_v33 = vadd.f32 %v7770_v0, %v7637_v60  ;;  %8026 = vst.msk [vmem:[#allocation2] sm:$0xff] %vm366_vm7, %v8015_v32  ;;  %v8016_v48 = vadd.f32 %v7972_v54, %v7819_v36  ;;  %v7824_v19 = vld [vmem:[#allocation2 + $0x30] sm:$0xff]  ;;  %v8216_v39 = vpop.f32.mrb[225].mxu0 }
 0x2ab   : > { %7805 = vst.msk [vmem:[#allocation2 + $0x50] sm:$0xff] %vm366_vm7, %v7794_v26  ;;  %v7638_v46 = vld [vmem:[#allocation2 + $0x48] sm:$0xff]  ;;  %8029 = vst.msk [vmem:[#allocation2 + $0x18] sm:$0xff] %vm366_vm7, %v8018_v2  ;;  %v7822_v52 = vld [vmem:[#allocation2 + $0x20] sm:$0xff]  ;;  %v12470_v23 = vpop.f32.mrb[226].mxu0 }
 0x2ac   : > { %7803 = vst.msk [vmem:[#allocation2 + $0x40] sm:$0xff] %vm366_vm7, %v7792_v33  ;;  %v7793_v61 = vadd.f32 %v7773_v16, %v7638_v46  ;;  %8027 = vst.msk [vmem:[#allocation2 + $0x8] sm:$0xff] %vm366_vm7, %v8016_v48  ;;  %v7825_v62 = vld [vmem:[#allocation2 + $0x38] sm:$0xff]  ;;  %v8219_v38 = vpop.f32.mrb[227].mxu0 }
 0x2ad   : > { %v7823_v5 = vld [vmem:[#allocation2 + $0x28] sm:$0xff] }
 0x2ae   : > { %7804 = vst.msk [vmem:[#allocation2 + $0x48] sm:$0xff] %vm366_vm7, %v7793_v61  ;;  %v12455_v10 = vpop.f32.mrb[228].mxu1 }
 0x2af   : > { %v8021_v44 = vadd.f32 %v12455_v10, %v7824_v19  ;;  %v7985_v14 = vpop.f32.mrb[229].mxu1 }
 0x2b0   : > { %v8051_v55 = vld [vmem:[#allocation2 + $0x10] sm:$0xff]  ;;  %v8019_v28 = vadd.f32 %v7985_v14, %v7822_v52  ;;  %v12456_v27 = vpop.f32.mrb[230].mxu1 }
 0x2b1   : > { %v8248_v63 = vadd.f32 %v12465_v30, %v8051_v55  ;;  %8032 = vst.msk [vmem:[#allocation2 + $0x30] sm:$0xff] %vm366_vm7, %v8021_v44  ;;  %v8049_v17 = vld [vmem:[#allocation2] sm:$0xff]  ;;  %v8022_v34 = vadd.f32 %v12456_v27, %v7825_v62  ;;  %v7988_v11 = vpop.f32.mrb[231].mxu1  ;;  %v12473_v0 = vpop.f32.mrb[228].mxu0 }
 0x2b2   : > { %v8246_v20 = vadd.f32 %v8200_v40, %v8049_v17  ;;  %8030 = vst.msk [vmem:[#allocation2 + $0x20] sm:$0xff] %vm366_vm7, %v8019_v28  ;;  %v8052_v9 = vld [vmem:[#allocation2 + $0x18] sm:$0xff]  ;;  %v8020_v29 = vadd.f32 %v7988_v11, %v7823_v5  ;;  %v7828_v47 = vld [vmem:[#allocation2 + $0x50] sm:$0xff]  ;;  %v8232_v6 = vpop.f32.mrb[229].mxu0 }
 0x2b3   : > { %8259 = vst.msk [vmem:[#allocation2 + $0x10] sm:$0xff] %vm366_vm7, %v8248_v63  ;;  %v8249_v53 = vadd.f32 %v12466_v35, %v8052_v9  ;;  %8033 = vst.msk [vmem:[#allocation2 + $0x38] sm:$0xff] %vm366_vm7, %v8022_v34  ;;  %v8050_v22 = vld [vmem:[#allocation2 + $0x8] sm:$0xff]  ;;  %v7826_v13 = vld [vmem:[#allocation2 + $0x40] sm:$0xff]  ;;  %v12474_v21 = vpop.f32.mrb[230].mxu0 }
 0x2b4   : > { %8257 = vst.msk [vmem:[#allocation2] sm:$0xff] %vm366_vm7, %v8246_v20  ;;  %v8247_v8 = vadd.f32 %v8203_v51, %v8050_v22  ;;  %8031 = vst.msk [vmem:[#allocation2 + $0x28] sm:$0xff] %vm366_vm7, %v8020_v29  ;;  %v8235_v1 = vpop.f32.mrb[231].mxu0 }
 0x2b5   : > { %8260 = vst.msk [vmem:[#allocation2 + $0x18] sm:$0xff] %vm366_vm7, %v8249_v53  ;;  %v7827_v7 = vld [vmem:[#allocation2 + $0x48] sm:$0xff] }
 0x2b6   : > { %8258 = vst.msk [vmem:[#allocation2 + $0x8] sm:$0xff] %vm366_vm7, %v8247_v8  ;;  %v12459_v59 = vpop.f32.mrb[232].mxu1 }
 0x2b7   : > { %v8025_v15 = vadd.f32 %v12459_v59, %v7828_v47  ;;  %v8001_v31 = vpop.f32.mrb[233].mxu1 }
 0x2b8   : > { %v8055_v3 = vld [vmem:[#allocation2 + $0x30] sm:$0xff]  ;;  %v8023_v12 = vadd.f32 %v8001_v31, %v7826_v13  ;;  %v12460_v41 = vpop.f32.mrb[234].mxu1 }
 0x2b9   : > { %v8252_v16 = vadd.f32 %v12469_v37, %v8055_v3  ;;  %8036 = vst.msk [vmem:[#allocation2 + $0x50] sm:$0xff] %vm366_vm7, %v8025_v15  ;;  %v8053_v49 = vld [vmem:[#allocation2 + $0x20] sm:$0xff]  ;;  %v8004_v43 = vpop.f32.mrb[235].mxu1  ;;  %v12493_v40 = vpop.f32.mrb[232].mxu0 }
 0x2ba   : > { %v8250_v18 = vadd.f32 %v8216_v39, %v8053_v49  ;;  %8034 = vst.msk [vmem:[#allocation2 + $0x40] sm:$0xff] %vm366_vm7, %v8023_v12  ;;  %v8056_v24 = vld [vmem:[#allocation2 + $0x38] sm:$0xff]  ;;  %v8024_v57 = vadd.f32 %v8004_v43, %v7827_v7  ;;  %v8281_v25 = vld [vmem:[#allocation2 + $0x10] sm:$0xff]  ;;  %v8550_v42 = vpop.f32.mrb[233].mxu0 }
 0x2bb   : > { %8263 = vst.msk [vmem:[#allocation2 + $0x30] sm:$0xff] %vm366_vm7, %v8252_v16  ;;  %v8253_v50 = vadd.f32 %v12470_v23, %v8056_v24  ;;  %v8054_v30 = vld [vmem:[#allocation2 + $0x28] sm:$0xff]  ;;  %v8279_v32 = vld [vmem:[#allocation2] sm:$0xff]  ;;  %v12494_v36 = vpop.f32.mrb[234].mxu0 }
 0x2bc   : > { %8261 = vst.msk [vmem:[#allocation2 + $0x20] sm:$0xff] %vm366_vm7, %v8250_v18  ;;  %v8251_v58 = vadd.f32 %v8219_v38, %v8054_v30  ;;  %8035 = vst.msk [vmem:[#allocation2 + $0x48] sm:$0xff] %vm366_vm7, %v8024_v57  ;;  %v8282_v60 = vld [vmem:[#allocation2 + $0x18] sm:$0xff]  ;;  %v8553_v61 = vpop.f32.mrb[235].mxu0 }
 0x2bd   : > { %8264 = vst.msk [vmem:[#allocation2 + $0x38] sm:$0xff] %vm366_vm7, %v8253_v50  ;;  %v8280_v48 = vld [vmem:[#allocation2 + $0x8] sm:$0xff] }
 0x2be   : > { %8262 = vst.msk [vmem:[#allocation2 + $0x28] sm:$0xff] %vm366_vm7, %v8251_v58  ;;  %v12479_v56 = vpop.f32.mrb[236].mxu1 }
 0x2bf   : > { %v8423_v45 = vadd.f32 %v12479_v56, %v8281_v25  ;;  %v8375_v4 = vpop.f32.mrb[237].mxu1 }
 0x2c0   : > { %v8059_v35 = vld [vmem:[#allocation2 + $0x50] sm:$0xff]  ;;  %v8421_v26 = vadd.f32 %v8375_v4, %v8279_v32  ;;  %v12480_v2 = vpop.f32.mrb[238].mxu1 }
 0x2c1   : > { %v8256_v54 = vadd.f32 %v12473_v0, %v8059_v35  ;;  %v8057_v51 = vld [vmem:[#allocation2 + $0x40] sm:$0xff]  ;;  %8434 = vst.msk [vmem:[#allocation2 + $0x10] sm:$0xff] %vm366_vm7, %v8423_v45  ;;  %v8424_v33 = vadd.f32 %v12480_v2, %v8282_v60  ;;  %v8378_v46 = vpop.f32.mrb[239].mxu1  ;;  %v12497_v39 = vpop.f32.mrb[236].mxu0 }
 0x2c2   : > { %v8254_v19 = vadd.f32 %v8232_v6, %v8057_v51  ;;  %8432 = vst.msk [vmem:[#allocation2] sm:$0xff] %vm366_vm7, %v8421_v26  ;;  %v8422_v10 = vadd.f32 %v8378_v46, %v8280_v48  ;;  %v8285_v52 = vld [vmem:[#allocation2 + $0x30] sm:$0xff]  ;;  %v8566_v27 = vpop.f32.mrb[237].mxu0 }
 0x2c3   : > { %8267 = vst.msk [vmem:[#allocation2 + $0x50] sm:$0xff] %vm366_vm7, %v8256_v54  ;;  %v8058_v37 = vld [vmem:[#allocation2 + $0x48] sm:$0xff]  ;;  %8435 = vst.msk [vmem:[#allocation2 + $0x18] sm:$0xff] %vm366_vm7, %v8424_v33  ;;  %v8283_v28 = vld [vmem:[#allocation2 + $0x20] sm:$0xff]  ;;  %v12498_v5 = vpop.f32.mrb[238].mxu0 }
 0x2c4   : > { %8265 = vst.msk [vmem:[#allocation2 + $0x40] sm:$0xff] %vm366_vm7, %v8254_v19  ;;  %v8255_v44 = vadd.f32 %v8235_v1, %v8058_v37  ;;  %8433 = vst.msk [vmem:[#allocation2 + $0x8] sm:$0xff] %vm366_vm7, %v8422_v10  ;;  %v8286_v17 = vld [vmem:[#allocation2 + $0x38] sm:$0xff]  ;;  %v8569_v53 = vpop.f32.mrb[239].mxu0 }
 0x2c5   : > { %v8284_v9 = vld [vmem:[#allocation2 + $0x28] sm:$0xff] }
 0x2c6   : > { %8266 = vst.msk [vmem:[#allocation2 + $0x48] sm:$0xff] %vm366_vm7, %v8255_v44  ;;  %v12483_v14 = vpop.f32.mrb[240].mxu1 }
 0x2c7   : > { %v8427_v55 = vadd.f32 %v12483_v14, %v8285_v52  ;;  %v8391_v62 = vpop.f32.mrb[241].mxu1 }
 0x2c8   : > { %v8456_v23 = vld [vmem:[#allocation2 + $0x10] sm:$0xff]  ;;  %v8425_v63 = vadd.f32 %v8391_v62, %v8283_v28  ;;  %v12484_v34 = vpop.f32.mrb[242].mxu1 }
 0x2c9   : > { %v8598_v11 = vadd.f32 %v12493_v40, %v8456_v23  ;;  %8438 = vst.msk [vmem:[#allocation2 + $0x30] sm:$0xff] %vm366_vm7, %v8427_v55  ;;  %v8454_v38 = vld [vmem:[#allocation2] sm:$0xff]  ;;  %v8428_v20 = vadd.f32 %v12484_v34, %v8286_v17  ;;  %v8394_v29 = vpop.f32.mrb[243].mxu1  ;;  %v12501_v6 = vpop.f32.mrb[240].mxu0 }
 0x2ca   : > { %v8596_v22 = vadd.f32 %v8550_v42, %v8454_v38  ;;  %8436 = vst.msk [vmem:[#allocation2 + $0x20] sm:$0xff] %vm366_vm7, %v8425_v63  ;;  %v8457_v8 = vld [vmem:[#allocation2 + $0x18] sm:$0xff]  ;;  %v8426_v47 = vadd.f32 %v8394_v29, %v8284_v9  ;;  %v8289_v13 = vld [vmem:[#allocation2 + $0x50] sm:$0xff]  ;;  %v8582_v21 = vpop.f32.mrb[241].mxu0 }
 0x2cb   : > { %8609 = vst.msk [vmem:[#allocation2 + $0x10] sm:$0xff] %vm366_vm7, %v8598_v11  ;;  %v8599_v59 = vadd.f32 %v12494_v36, %v8457_v8  ;;  %8439 = vst.msk [vmem:[#allocation2 + $0x38] sm:$0xff] %vm366_vm7, %v8428_v20  ;;  %v8455_v0 = vld [vmem:[#allocation2 + $0x8] sm:$0xff]  ;;  %v8287_v12 = vld [vmem:[#allocation2 + $0x40] sm:$0xff]  ;;  %v12502_v43 = vpop.f32.mrb[242].mxu0 }
 0x2cc   : > { %8607 = vst.msk [vmem:[#allocation2] sm:$0xff] %vm366_vm7, %v8596_v22  ;;  %v8597_v15 = vadd.f32 %v8553_v61, %v8455_v0  ;;  %8437 = vst.msk [vmem:[#allocation2 + $0x28] sm:$0xff] %vm366_vm7, %v8426_v47  ;;  %v8585_v50 = vpop.f32.mrb[243].mxu0 }
 0x2cd   : > { %8610 = vst.msk [vmem:[#allocation2 + $0x18] sm:$0xff] %vm366_vm7, %v8599_v59  ;;  %v8288_v24 = vld [vmem:[#allocation2 + $0x48] sm:$0xff] }
 0x2ce   : > { %8608 = vst.msk [vmem:[#allocation2 + $0x8] sm:$0xff] %vm366_vm7, %v8597_v15  ;;  %v12487_v31 = vpop.f32.mrb[244].mxu1 }
 0x2cf   : > { %v8431_v3 = vadd.f32 %v12487_v31, %v8289_v13  ;;  %v8407_v41 = vpop.f32.mrb[245].mxu1 }
 0x2d0   : > { %v8460_v16 = vld [vmem:[#allocation2 + $0x30] sm:$0xff]  ;;  %v8429_v49 = vadd.f32 %v8407_v41, %v8287_v12  ;;  %v12488_v7 = vpop.f32.mrb[246].mxu1 }
 0x2d1   : > { %v8602_v1 = vadd.f32 %v12497_v39, %v8460_v16  ;;  %8442 = vst.msk [vmem:[#allocation2 + $0x50] sm:$0xff] %vm366_vm7, %v8431_v3  ;;  %v8458_v18 = vld [vmem:[#allocation2 + $0x20] sm:$0xff]  ;;  %v8410_v57 = vpop.f32.mrb[247].mxu1  ;;  %v12521_v42 = vpop.f32.mrb[244].mxu0 }
 0x2d2   : > { %v8600_v30 = vadd.f32 %v8566_v27, %v8458_v18  ;;  %8440 = vst.msk [vmem:[#allocation2 + $0x40] sm:$0xff] %vm366_vm7, %v8429_v49  ;;  %v8461_v58 = vld [vmem:[#allocation2 + $0x38] sm:$0xff]  ;;  %v8430_v25 = vadd.f32 %v8410_v57, %v8288_v24  ;;  %v8632_v32 = vld [vmem:[#allocation2 + $0x10] sm:$0xff]  ;;  %v9000_v2 = vpop.f32.mrb[245].mxu0 }
 0x2d3   : > { %8613 = vst.msk [vmem:[#allocation2 + $0x30] sm:$0xff] %vm366_vm7, %v8602_v1  ;;  %v8603_v56 = vadd.f32 %v12498_v5, %v8461_v58  ;;  %v8459_v40 = vld [vmem:[#allocation2 + $0x28] sm:$0xff]  ;;  %v8630_v26 = vld [vmem:[#allocation2] sm:$0xff]  ;;  %v12522_v48 = vpop.f32.mrb[246].mxu0 }
 0x2d4   : > { %8611 = vst.msk [vmem:[#allocation2 + $0x20] sm:$0xff] %vm366_vm7, %v8600_v30  ;;  %v8601_v45 = vadd.f32 %v8569_v53, %v8459_v40  ;;  %8441 = vst.msk [vmem:[#allocation2 + $0x48] sm:$0xff] %vm366_vm7, %v8430_v25  ;;  %v8633_v51 = vld [vmem:[#allocation2 + $0x18] sm:$0xff]  ;;  %v9003_v44 = vpop.f32.mrb[247].mxu0 }
 0x2d5   : > { %8614 = vst.msk [vmem:[#allocation2 + $0x38] sm:$0xff] %vm366_vm7, %v8603_v56  ;;  %v8631_v10 = vld [vmem:[#allocation2 + $0x8] sm:$0xff] }
 0x2d6   : > { %8612 = vst.msk [vmem:[#allocation2 + $0x28] sm:$0xff] %vm366_vm7, %v8601_v45  ;;  %v12507_v4 = vpop.f32.mrb[248].mxu1 }
 0x2d7   : > { %v8823_v35 = vadd.f32 %v12507_v4, %v8632_v32  ;;  %v8775_v60 = vpop.f32.mrb[249].mxu1 }
 0x2d8   : > { %v8464_v36 = vld [vmem:[#allocation2 + $0x50] sm:$0xff]  ;;  %v8821_v54 = vadd.f32 %v8775_v60, %v8630_v26  ;;  %v12508_v33 = vpop.f32.mrb[250].mxu1 }
 0x2d9   : > { %v8606_v46 = vadd.f32 %v12501_v6, %v8464_v36  ;;  %v8462_v61 = vld [vmem:[#allocation2 + $0x40] sm:$0xff]  ;;  %8834 = vst.msk [vmem:[#allocation2 + $0x10] sm:$0xff] %vm366_vm7, %v8823_v35  ;;  %v8824_v19 = vadd.f32 %v12508_v33, %v8633_v51  ;;  %v8778_v37 = vpop.f32.mrb[251].mxu1  ;;  %v12525_v27 = vpop.f32.mrb[248].mxu0 }
 0x2da   : > { %v8604_v52 = vadd.f32 %v8582_v21, %v8462_v61  ;;  %8832 = vst.msk [vmem:[#allocation2] sm:$0xff] %vm366_vm7, %v8821_v54  ;;  %v8822_v14 = vadd.f32 %v8778_v37, %v8631_v10  ;;  %v8636_v28 = vld [vmem:[#allocation2 + $0x30] sm:$0xff]  ;;  %v9016_v34 = vpop.f32.mrb[249].mxu0 }
 0x2db   : > { %8617 = vst.msk [vmem:[#allocation2 + $0x50] sm:$0xff] %vm366_vm7, %v8606_v46  ;;  %v8463_v39 = vld [vmem:[#allocation2 + $0x48] sm:$0xff]  ;;  %8835 = vst.msk [vmem:[#allocation2 + $0x18] sm:$0xff] %vm366_vm7, %v8824_v19  ;;  %v8634_v63 = vld [vmem:[#allocation2 + $0x20] sm:$0xff]  ;;  %v12526_v9 = vpop.f32.mrb[250].mxu0 }
 0x2dc   : > { %8615 = vst.msk [vmem:[#allocation2 + $0x40] sm:$0xff] %vm366_vm7, %v8604_v52  ;;  %v8605_v55 = vadd.f32 %v8585_v50, %v8463_v39  ;;  %8833 = vst.msk [vmem:[#allocation2 + $0x8] sm:$0xff] %vm366_vm7, %v8822_v14  ;;  %v8637_v38 = vld [vmem:[#allocation2 + $0x38] sm:$0xff]  ;;  %v9019_v59 = vpop.f32.mrb[251].mxu0 }
 0x2dd   : > { %v8635_v8 = vld [vmem:[#allocation2 + $0x28] sm:$0xff] }
 0x2de   : > { %8616 = vst.msk [vmem:[#allocation2 + $0x48] sm:$0xff] %vm366_vm7, %v8605_v55  ;;  %v12511_v62 = vpop.f32.mrb[252].mxu1 }
 0x2df   : > { %v8827_v23 = vadd.f32 %v12511_v62, %v8636_v28  ;;  %v8791_v17 = vpop.f32.mrb[253].mxu1 }
 0x2e0   : > { %v8857_v5 = vld [vmem:[#allocation2 + $0x10] sm:$0xff]  ;;  %v8825_v11 = vadd.f32 %v8791_v17, %v8634_v63  ;;  %v12512_v20 = vpop.f32.mrb[254].mxu1 }
 0x2e1   : > { %v9048_v29 = vadd.f32 %v12521_v42, %v8857_v5  ;;  %8838 = vst.msk [vmem:[#allocation2 + $0x30] sm:$0xff] %vm366_vm7, %v8827_v23  ;;  %v8855_v53 = vld [vmem:[#allocation2] sm:$0xff]  ;;  %v8828_v22 = vadd.f32 %v12512_v20, %v8637_v38  ;;  %v8794_v47 = vpop.f32.mrb[255].mxu1  ;;  %v12529_v21 = vpop.f32.mrb[252].mxu0 }
 0x2e2   : > { %v9046_v0 = vadd.f32 %v9000_v2, %v8855_v53  ;;  %8836 = vst.msk [vmem:[#allocation2 + $0x20] sm:$0xff] %vm366_vm7, %v8825_v11  ;;  %v8858_v15 = vld [vmem:[#allocation2 + $0x18] sm:$0xff]  ;;  %v8826_v13 = vadd.f32 %v8794_v47, %v8635_v8  ;;  %v8640_v12 = vld [vmem:[#allocation2 + $0x50] sm:$0xff]  ;;  %v9032_v43 = vpop.f32.mrb[253].mxu0 }
 0x2e3   : > { %9059 = vst.msk [vmem:[#allocation2 + $0x10] sm:$0xff] %vm366_vm7, %v9048_v29  ;;  %v9049_v31 = vadd.f32 %v12522_v48, %v8858_v15  ;;  %8839 = vst.msk [vmem:[#allocation2 + $0x38] sm:$0xff] %vm366_vm7, %v8828_v22  ;;  %v8856_v6 = vld [vmem:[#allocation2 + $0x8] sm:$0xff]  ;;  %v8638_v49 = vld [vmem:[#allocation2 + $0x40] sm:$0xff]  ;;  %v12530_v57 = vpop.f32.mrb[254].mxu0 }
 0x2e4   : > { %9057 = vst.msk [vmem:[#allocation2] sm:$0xff] %vm366_vm7, %v9046_v0  ;;  %v9047_v3 = vadd.f32 %v9003_v44, %v8856_v6  ;;  %8837 = vst.msk [vmem:[#allocation2 + $0x28] sm:$0xff] %vm366_vm7, %v8826_v13  ;;  %v9035_v56 = vpop.f32.mrb[255].mxu0 }
 0x2e5   : > { %9060 = vst.msk [vmem:[#allocation2 + $0x18] sm:$0xff] %vm366_vm7, %v9049_v31  ;;  %v8639_v58 = vld [vmem:[#allocation2 + $0x48] sm:$0xff] }
 0x2e6   : > { %9058 = vst.msk [vmem:[#allocation2 + $0x8] sm:$0xff] %vm366_vm7, %v9047_v3  ;;  %v12515_v41 = vpop.f32.mrb[0].mxu1 }
 0x2e7   : > { %v8831_v16 = vadd.f32 %v12515_v41, %v8640_v12  ;;  %v8807_v7 = vpop.f32.mrb[1].mxu1 }
 0x2e8   : > { %v8861_v1 = vld [vmem:[#allocation2 + $0x30] sm:$0xff]  ;;  %v8829_v18 = vadd.f32 %v8807_v7, %v8638_v49  ;;  %v12516_v24 = vpop.f32.mrb[2].mxu1 }
 0x2e9   : > { %v9052_v50 = vadd.f32 %v12525_v27, %v8861_v1  ;;  %8842 = vst.msk [vmem:[#allocation2 + $0x50] sm:$0xff] %vm366_vm7, %v8831_v16  ;;  %v8859_v30 = vld [vmem:[#allocation2 + $0x20] sm:$0xff]  ;;  %v8810_v25 = vpop.f32.mrb[3].mxu1  ;;  %v12549_v2 = vpop.f32.mrb[0].mxu0 }
 0x2ea   : > { %v9050_v40 = vadd.f32 %v9016_v34, %v8859_v30  ;;  %8840 = vst.msk [vmem:[#allocation2 + $0x40] sm:$0xff] %vm366_vm7, %v8829_v18  ;;  %v8862_v45 = vld [vmem:[#allocation2 + $0x38] sm:$0xff]  ;;  %v8830_v32 = vadd.f32 %v8810_v25, %v8639_v58  ;;  %v9082_v26 = vld [vmem:[#allocation2 + $0x10] sm:$0xff]  ;;  %v9414_v33 = vpop.f32.mrb[1].mxu0 }
 0x2eb   : > { %9063 = vst.msk [vmem:[#allocation2 + $0x30] sm:$0xff] %vm366_vm7, %v9052_v50  ;;  %v9053_v4 = vadd.f32 %v12526_v9, %v8862_v45  ;;  %v8860_v42 = vld [vmem:[#allocation2 + $0x28] sm:$0xff]  ;;  %v9080_v54 = vld [vmem:[#allocation2] sm:$0xff]  ;;  %v12550_v10 = vpop.f32.mrb[2].mxu0 }
 0x2ec   : > { %9061 = vst.msk [vmem:[#allocation2 + $0x20] sm:$0xff] %vm366_vm7, %v9050_v40  ;;  %v9051_v35 = vadd.f32 %v9019_v59, %v8860_v42  ;;  %8841 = vst.msk [vmem:[#allocation2 + $0x48] sm:$0xff] %vm366_vm7, %v8830_v32  ;;  %v9083_v61 = vld [vmem:[#allocation2 + $0x18] sm:$0xff]  ;;  %v9417_v55 = vpop.f32.mrb[3].mxu0 }
 0x2ed   : > { %9064 = vst.msk [vmem:[#allocation2 + $0x38] sm:$0xff] %vm366_vm7, %v9053_v4  ;;  %v9081_v14 = vld [vmem:[#allocation2 + $0x8] sm:$0xff] }
 0x2ee   : > { %9062 = vst.msk [vmem:[#allocation2 + $0x28] sm:$0xff] %vm366_vm7, %v9051_v35  ;;  %v12535_v60 = vpop.f32.mrb[4].mxu1 }
 0x2ef   : > { %v9273_v36 = vadd.f32 %v12535_v60, %v9082_v26  ;;  %v9225_v51 = vpop.f32.mrb[5].mxu1 }
 0x2f0   : > { %v8865_v48 = vld [vmem:[#allocation2 + $0x50] sm:$0xff]  ;;  %v9271_v46 = vadd.f32 %v9225_v51, %v9080_v54  ;;  %v12536_v19 = vpop.f32.mrb[6].mxu1 }
 0x2f1   : > { %v9056_v37 = vadd.f32 %v12529_v21, %v8865_v48  ;;  %v8863_v44 = vld [vmem:[#allocation2 + $0x40] sm:$0xff]  ;;  %9284 = vst.msk [vmem:[#allocation2 + $0x10] sm:$0xff] %vm366_vm7, %v9273_v36  ;;  %v9274_v52 = vadd.f32 %v12536_v19, %v9083_v61  ;;  %v9228_v39 = vpop.f32.mrb[7].mxu1  ;;  %v12553_v34 = vpop.f32.mrb[4].mxu0 }
 0x2f2   : > { %v9054_v28 = vadd.f32 %v9032_v43, %v8863_v44  ;;  %9282 = vst.msk [vmem:[#allocation2] sm:$0xff] %vm366_vm7, %v9271_v46  ;;  %v9272_v62 = vadd.f32 %v9228_v39, %v9081_v14  ;;  %v9086_v63 = vld [vmem:[#allocation2 + $0x30] sm:$0xff]  ;;  %v9430_v20 = vpop.f32.mrb[5].mxu0 }
 0x2f3   : > { %9067 = vst.msk [vmem:[#allocation2 + $0x50] sm:$0xff] %vm366_vm7, %v9056_v37  ;;  %v8864_v27 = vld [vmem:[#allocation2 + $0x48] sm:$0xff]  ;;  %9285 = vst.msk [vmem:[#allocation2 + $0x18] sm:$0xff] %vm366_vm7, %v9274_v52  ;;  %v9084_v11 = vld [vmem:[#allocation2 + $0x20] sm:$0xff]  ;;  %v12554_v8 = vpop.f32.mrb[6].mxu0 }
 0x2f4   : > { %9065 = vst.msk [vmem:[#allocation2 + $0x40] sm:$0xff] %vm366_vm7, %v9054_v28  ;;  %v9055_v23 = vadd.f32 %v9035_v56, %v8864_v27  ;;  %9283 = vst.msk [vmem:[#allocation2 + $0x8] sm:$0xff] %vm366_vm7, %v9272_v62  ;;  %v9087_v53 = vld [vmem:[#allocation2 + $0x38] sm:$0xff]  ;;  %v9433_v31 = vpop.f32.mrb[7].mxu0 }
 0x2f5   : > { %v9085_v15 = vld [vmem:[#allocation2 + $0x28] sm:$0xff] }
 0x2f6   : > { %9066 = vst.msk [vmem:[#allocation2 + $0x48] sm:$0xff] %vm366_vm7, %v9055_v23  ;;  %v12539_v17 = vpop.f32.mrb[8].mxu1 }
 0x2f7   : > { %v9277_v5 = vadd.f32 %v12539_v17, %v9086_v63  ;;  %v9241_v38 = vpop.f32.mrb[9].mxu1 }
 0x2f8   : > { %v9307_v9 = vld [vmem:[#allocation2 + $0x10] sm:$0xff]  ;;  %v9275_v29 = vadd.f32 %v9241_v38, %v9084_v11  ;;  %v12540_v22 = vpop.f32.mrb[10].mxu1 }
 0x2f9   : > { %v9462_v47 = vadd.f32 %v12549_v2, %v9307_v9  ;;  %9288 = vst.msk [vmem:[#allocation2 + $0x30] sm:$0xff] %vm366_vm7, %v9277_v5  ;;  %v9305_v59 = vld [vmem:[#allocation2] sm:$0xff]  ;;  %v9278_v0 = vadd.f32 %v12540_v22, %v9087_v53  ;;  %v9244_v13 = vpop.f32.mrb[11].mxu1  ;;  %v12557_v43 = vpop.f32.mrb[8].mxu0 }
 0x2fa   : > { %v9460_v6 = vadd.f32 %v9414_v33, %v9305_v59  ;;  %9286 = vst.msk [vmem:[#allocation2 + $0x20] sm:$0xff] %vm366_vm7, %v9275_v29  ;;  %v9308_v3 = vld [vmem:[#allocation2 + $0x18] sm:$0xff]  ;;  %v9276_v12 = vadd.f32 %v9244_v13, %v9085_v15  ;;  %v9090_v49 = vld [vmem:[#allocation2 + $0x50] sm:$0xff]  ;;  %v9446_v57 = vpop.f32.mrb[9].mxu0 }
 0x2fb   : > { %9473 = vst.msk [vmem:[#allocation2 + $0x10] sm:$0xff] %vm366_vm7, %v9462_v47  ;;  %v9463_v41 = vadd.f32 %v12550_v10, %v9308_v3  ;;  %9289 = vst.msk [vmem:[#allocation2 + $0x38] sm:$0xff] %vm366_vm7, %v9278_v0  ;;  %v9306_v21 = vld [vmem:[#allocation2 + $0x8] sm:$0xff]  ;;  %v9088_v18 = vld [vmem:[#allocation2 + $0x40] sm:$0xff]  ;;  %v12558_v25 = vpop.f32.mrb[10].mxu0 }
 0x2fc   : > { %9471 = vst.msk [vmem:[#allocation2] sm:$0xff] %vm366_vm7, %v9460_v6  ;;  %v9461_v16 = vadd.f32 %v9417_v55, %v9306_v21  ;;  %9287 = vst.msk [vmem:[#allocation2 + $0x28] sm:$0xff] %vm366_vm7, %v9276_v12  ;;  %v9449_v4 = vpop.f32.mrb[11].mxu0 }
 0x2fd   : > { %9474 = vst.msk [vmem:[#allocation2 + $0x18] sm:$0xff] %vm366_vm7, %v9463_v41  ;;  %v9089_v45 = vld [vmem:[#allocation2 + $0x48] sm:$0xff] }
 0x2fe   : > { %9472 = vst.msk [vmem:[#allocation2 + $0x8] sm:$0xff] %vm366_vm7, %v9461_v16  ;;  %v12543_v7 = vpop.f32.mrb[12].mxu1 }
 0x2ff   : > { %v9281_v1 = vadd.f32 %v12543_v7, %v9090_v49  ;;  %v9257_v24 = vpop.f32.mrb[13].mxu1 }
 0x300   : > { %v9311_v50 = vld [vmem:[#allocation2 + $0x30] sm:$0xff]  ;;  %v9279_v30 = vadd.f32 %v9257_v24, %v9088_v18  ;;  %v12544_v58 = vpop.f32.mrb[14].mxu1 }
 0x301   : > { %v9466_v56 = vadd.f32 %v12553_v34, %v9311_v50  ;;  %9292 = vst.msk [vmem:[#allocation2 + $0x50] sm:$0xff] %vm366_vm7, %v9281_v1  ;;  %v9309_v40 = vld [vmem:[#allocation2 + $0x20] sm:$0xff]  ;;  %v9260_v32 = vpop.f32.mrb[15].mxu1  ;;  %v12577_v33 = vpop.f32.mrb[12].mxu0 }
 0x302   : > { %v9464_v42 = vadd.f32 %v9430_v20, %v9309_v40  ;;  %9290 = vst.msk [vmem:[#allocation2 + $0x40] sm:$0xff] %vm366_vm7, %v9279_v30  ;;  %v9312_v35 = vld [vmem:[#allocation2 + $0x38] sm:$0xff]  ;;  %v9280_v26 = vadd.f32 %v9260_v32, %v9089_v45  ;;  %v9496_v54 = vld [vmem:[#allocation2 + $0x10] sm:$0xff]  ;;  %v9834_v19 = vpop.f32.mrb[13].mxu0 }
 0x303   : > { %9477 = vst.msk [vmem:[#allocation2 + $0x30] sm:$0xff] %vm366_vm7, %v9466_v56  ;;  %v9467_v60 = vadd.f32 %v12554_v8, %v9312_v35  ;;  %v9310_v2 = vld [vmem:[#allocation2 + $0x28] sm:$0xff]  ;;  %v9494_v46 = vld [vmem:[#allocation2] sm:$0xff]  ;;  %v12578_v14 = vpop.f32.mrb[14].mxu0 }
 0x304   : > { %9475 = vst.msk [vmem:[#allocation2 + $0x20] sm:$0xff] %vm366_vm7, %v9464_v42  ;;  %v9465_v36 = vadd.f32 %v9433_v31, %v9310_v2  ;;  %9291 = vst.msk [vmem:[#allocation2 + $0x48] sm:$0xff] %vm366_vm7, %v9280_v26  ;;  %v9497_v44 = vld [vmem:[#allocation2 + $0x18] sm:$0xff]  ;;  %v9837_v23 = vpop.f32.mrb[15].mxu0 }
 0x305   : > { %9478 = vst.msk [vmem:[#allocation2 + $0x38] sm:$0xff] %vm366_vm7, %v9467_v60  ;;  %v9495_v62 = vld [vmem:[#allocation2 + $0x8] sm:$0xff] }
 0x306   : > { %9476 = vst.msk [vmem:[#allocation2 + $0x28] sm:$0xff] %vm366_vm7, %v9465_v36  ;;  %v12563_v51 = vpop.f32.mrb[16].mxu1 }
 0x307   : > { %v9651_v48 = vadd.f32 %v12563_v51, %v9496_v54  ;;  %v9603_v61 = vpop.f32.mrb[17].mxu1 }
 0x308   : > { %v9315_v10 = vld [vmem:[#allocation2 + $0x50] sm:$0xff]  ;;  %v9649_v37 = vadd.f32 %v9603_v61, %v9494_v46  ;;  %v12564_v52 = vpop.f32.mrb[18].mxu1 }
 0x309   : > { %v9470_v39 = vadd.f32 %v12557_v43, %v9315_v10  ;;  %v9313_v55 = vld [vmem:[#allocation2 + $0x40] sm:$0xff]  ;;  %9662 = vst.msk [vmem:[#allocation2 + $0x10] sm:$0xff] %vm366_vm7, %v9651_v48  ;;  %v9652_v28 = vadd.f32 %v12564_v52, %v9497_v44  ;;  %v9606_v27 = vpop.f32.mrb[19].mxu1  ;;  %v12581_v20 = vpop.f32.mrb[16].mxu0 }
 0x30a   : > { %v9468_v63 = vadd.f32 %v9446_v57, %v9313_v55  ;;  %9660 = vst.msk [vmem:[#allocation2] sm:$0xff] %vm366_vm7, %v9649_v37  ;;  %v9650_v17 = vadd.f32 %v9606_v27, %v9495_v62  ;;  %v9500_v11 = vld [vmem:[#allocation2 + $0x30] sm:$0xff]  ;;  %v9850_v22 = vpop.f32.mrb[17].mxu0 }
 0x30b   : > { %9481 = vst.msk [vmem:[#allocation2 + $0x50] sm:$0xff] %vm366_vm7, %v9470_v39  ;;  %v9314_v34 = vld [vmem:[#allocation2 + $0x48] sm:$0xff]  ;;  %9663 = vst.msk [vmem:[#allocation2 + $0x18] sm:$0xff] %vm366_vm7, %v9652_v28  ;;  %v9498_v29 = vld [vmem:[#allocation2 + $0x20] sm:$0xff]  ;;  %v12582_v15 = vpop.f32.mrb[18].mxu0 }
 0x30c   : > { %9479 = vst.msk [vmem:[#allocation2 + $0x40] sm:$0xff] %vm366_vm7, %v9468_v63  ;;  %v9469_v5 = vadd.f32 %v9449_v4, %v9314_v34  ;;  %9661 = vst.msk [vmem:[#allocation2 + $0x8] sm:$0xff] %vm366_vm7, %v9650_v17  ;;  %v9501_v59 = vld [vmem:[#allocation2 + $0x38] sm:$0xff]  ;;  %v9853_v41 = vpop.f32.mrb[19].mxu0 }
 0x30d   : > { %v9499_v3 = vld [vmem:[#allocation2 + $0x28] sm:$0xff] }
 0x30e   : > { %9480 = vst.msk [vmem:[#allocation2 + $0x48] sm:$0xff] %vm366_vm7, %v9469_v5  ;;  %v12567_v38 = vpop.f32.mrb[20].mxu1 }
 0x30f   : > { %v9655_v9 = vadd.f32 %v12567_v38, %v9500_v11  ;;  %v9619_v53 = vpop.f32.mrb[21].mxu1 }
 0x310   : > { %v9685_v8 = vld [vmem:[#allocation2 + $0x10] sm:$0xff]  ;;  %v9653_v47 = vadd.f32 %v9619_v53, %v9498_v29  ;;  %v12568_v0 = vpop.f32.mrb[22].mxu1 }
 0x311   : > { %v9882_v13 = vadd.f32 %v12577_v33, %v9685_v8  ;;  %9666 = vst.msk [vmem:[#allocation2 + $0x30] sm:$0xff] %vm366_vm7, %v9655_v9  ;;  %v9683_v31 = vld [vmem:[#allocation2] sm:$0xff]  ;;  %v9656_v6 = vadd.f32 %v12568_v0, %v9501_v59  ;;  %v9622_v12 = vpop.f32.mrb[23].mxu1  ;;  %v12585_v57 = vpop.f32.mrb[20].mxu0 }
 0x312   : > { %v9880_v21 = vadd.f32 %v9834_v19, %v9683_v31  ;;  %9664 = vst.msk [vmem:[#allocation2 + $0x20] sm:$0xff] %vm366_vm7, %v9653_v47  ;;  %v9686_v16 = vld [vmem:[#allocation2 + $0x18] sm:$0xff]  ;;  %v9654_v49 = vadd.f32 %v9622_v12, %v9499_v3  ;;  %v9504_v18 = vld [vmem:[#allocation2 + $0x50] sm:$0xff]  ;;  %v9866_v25 = vpop.f32.mrb[21].mxu0 }
 0x313   : > { %9893 = vst.msk [vmem:[#allocation2 + $0x10] sm:$0xff] %vm366_vm7, %v9882_v13  ;;  %v9883_v7 = vadd.f32 %v12578_v14, %v9686_v16  ;;  %9667 = vst.msk [vmem:[#allocation2 + $0x38] sm:$0xff] %vm366_vm7, %v9656_v6  ;;  %v9684_v43 = vld [vmem:[#allocation2 + $0x8] sm:$0xff]  ;;  %v9502_v30 = vld [vmem:[#allocation2 + $0x40] sm:$0xff]  ;;  %v12586_v32 = vpop.f32.mrb[22].mxu0 }
 0x314   : > { %9891 = vst.msk [vmem:[#allocation2] sm:$0xff] %vm366_vm7, %v9880_v21  ;;  %v9881_v1 = vadd.f32 %v9837_v23, %v9684_v43  ;;  %9665 = vst.msk [vmem:[#allocation2 + $0x28] sm:$0xff] %vm366_vm7, %v9654_v49  ;;  %v9869_v60 = vpop.f32.mrb[23].mxu0 }
 0x315   : > { %9894 = vst.msk [vmem:[#allocation2 + $0x18] sm:$0xff] %vm366_vm7, %v9883_v7  ;;  %v9503_v35 = vld [vmem:[#allocation2 + $0x48] sm:$0xff] }
 0x316   : > { %9892 = vst.msk [vmem:[#allocation2 + $0x8] sm:$0xff] %vm366_vm7, %v9881_v1  ;;  %v12571_v24 = vpop.f32.mrb[24].mxu1 }
 0x317   : > { %v9659_v50 = vadd.f32 %v12571_v24, %v9504_v18  ;;  %v9635_v58 = vpop.f32.mrb[25].mxu1 }
 0x318   : > { %v9689_v56 = vld [vmem:[#allocation2 + $0x30] sm:$0xff]  ;;  %v9657_v40 = vadd.f32 %v9635_v58, %v9502_v30  ;;  %v12572_v45 = vpop.f32.mrb[26].mxu1 }
 0x319   : > { %v9886_v4 = vadd.f32 %v12581_v20, %v9689_v56  ;;  %9670 = vst.msk [vmem:[#allocation2 + $0x50] sm:$0xff] %vm366_vm7, %v9659_v50  ;;  %v9687_v42 = vld [vmem:[#allocation2 + $0x20] sm:$0xff]  ;;  %v9638_v26 = vpop.f32.mrb[27].mxu1  ;;  %v12605_v19 = vpop.f32.mrb[24].mxu0 }
 0x31a   : > { %v9884_v2 = vadd.f32 %v9850_v22, %v9687_v42  ;;  %9668 = vst.msk [vmem:[#allocation2 + $0x40] sm:$0xff] %vm366_vm7, %v9657_v40  ;;  %v9690_v36 = vld [vmem:[#allocation2 + $0x38] sm:$0xff]  ;;  %v9658_v54 = vadd.f32 %v9638_v26, %v9503_v35  ;;  %v9916_v46 = vld [vmem:[#allocation2 + $0x10] sm:$0xff]  ;;  %v10254_v52 = vpop.f32.mrb[25].mxu0 }
 0x31b   : > { %9897 = vst.msk [vmem:[#allocation2 + $0x30] sm:$0xff] %vm366_vm7, %v9886_v4  ;;  %v9887_v51 = vadd.f32 %v12582_v15, %v9690_v36  ;;  %v9688_v33 = vld [vmem:[#allocation2 + $0x28] sm:$0xff]  ;;  %v9914_v37 = vld [vmem:[#allocation2] sm:$0xff]  ;;  %v12606_v62 = vpop.f32.mrb[26].mxu0 }
 0x31c   : > { %9895 = vst.msk [vmem:[#allocation2 + $0x20] sm:$0xff] %vm366_vm7, %v9884_v2  ;;  %v9885_v48 = vadd.f32 %v9853_v41, %v9688_v33  ;;  %9669 = vst.msk [vmem:[#allocation2 + $0x48] sm:$0xff] %vm366_vm7, %v9658_v54  ;;  %v9917_v55 = vld [vmem:[#allocation2 + $0x18] sm:$0xff]  ;;  %v10257_v5 = vpop.f32.mrb[27].mxu0  ;;  %v16149_v4 = vld [vmem:[%s16211_s2] ss:$0 sm:$0xff] }
 0x31d   : > { %9898 = vst.msk [vmem:[#allocation2 + $0x38] sm:$0xff] %vm366_vm7, %v9887_v51  ;;  %v9915_v17 = vld [vmem:[#allocation2 + $0x8] sm:$0xff] }
 0x31e   : > { %9896 = vst.msk [vmem:[#allocation2 + $0x28] sm:$0xff] %vm366_vm7, %v9885_v48  ;;  %v12591_v61 = vpop.f32.mrb[28].mxu1 }
 0x31f   : > { %v10113_v10 = vadd.f32 %v12591_v61, %v9916_v46  ;;  %v10065_v44 = vpop.f32.mrb[29].mxu1 }
 0x320   : > { %v9693_v14 = vld [vmem:[#allocation2 + $0x50] sm:$0xff]  ;;  %v10111_v39 = vadd.f32 %v10065_v44, %v9914_v37  ;;  %v12592_v28 = vpop.f32.mrb[30].mxu1 }
 0x321   : > { %v9890_v27 = vadd.f32 %v12585_v57, %v9693_v14  ;;  %v9691_v23 = vld [vmem:[#allocation2 + $0x40] sm:$0xff]  ;;  %10124 = vst.msk [vmem:[#allocation2 + $0x10] sm:$0xff] %vm366_vm7, %v10113_v10  ;;  %v10114_v63 = vadd.f32 %v12592_v28, %v9917_v55  ;;  %v10068_v34 = vpop.f32.mrb[31].mxu1  ;;  %v12609_v22 = vpop.f32.mrb[28].mxu0 }
 0x322   : > { %v9888_v11 = vadd.f32 %v9866_v25, %v9691_v23  ;;  %10122 = vst.msk [vmem:[#allocation2] sm:$0xff] %vm366_vm7, %v10111_v39  ;;  %v10112_v38 = vadd.f32 %v10068_v34, %v9915_v17  ;;  %v9920_v29 = vld [vmem:[#allocation2 + $0x30] sm:$0xff]  ;;  %v10270_v0 = vpop.f32.mrb[29].mxu0 }
 0x323   : > { %9901 = vst.msk [vmem:[#allocation2 + $0x50] sm:$0xff] %vm366_vm7, %v9890_v27  ;;  %v9692_v20 = vld [vmem:[#allocation2 + $0x48] sm:$0xff]  ;;  %10125 = vst.msk [vmem:[#allocation2 + $0x18] sm:$0xff] %vm366_vm7, %v10114_v63  ;;  %v9918_v47 = vld [vmem:[#allocation2 + $0x20] sm:$0xff]  ;;  %v12610_v3 = vpop.f32.mrb[30].mxu0 }
 0x324   : > { %9899 = vst.msk [vmem:[#allocation2 + $0x40] sm:$0xff] %vm366_vm7, %v9888_v11  ;;  %v9889_v9 = vadd.f32 %v9869_v60, %v9692_v20  ;;  %10123 = vst.msk [vmem:[#allocation2 + $0x8] sm:$0xff] %vm366_vm7, %v10112_v38  ;;  %v9921_v31 = vld [vmem:[#allocation2 + $0x38] sm:$0xff]  ;;  %v10273_v7 = vpop.f32.mrb[31].mxu0 }
 0x325   : > { %v9919_v16 = vld [vmem:[#allocation2 + $0x28] sm:$0xff] }
 0x326   : > { %9900 = vst.msk [vmem:[#allocation2 + $0x48] sm:$0xff] %vm366_vm7, %v9889_v9  ;;  %v12595_v53 = vpop.f32.mrb[32].mxu1 }
 0x327   : > { %v10117_v8 = vadd.f32 %v12595_v53, %v9920_v29  ;;  %v10081_v59 = vpop.f32.mrb[33].mxu1 }
 0x328   : > { %v10147_v15 = vld [vmem:[#allocation2 + $0x10] sm:$0xff]  ;;  %v10115_v13 = vadd.f32 %v10081_v59, %v9918_v47  ;;  %v12596_v6 = vpop.f32.mrb[34].mxu1 }
 0x329   : > { %v10302_v12 = vadd.f32 %v12605_v19, %v10147_v15  ;;  %10128 = vst.msk [vmem:[#allocation2 + $0x30] sm:$0xff] %vm366_vm7, %v10117_v8  ;;  %v10145_v41 = vld [vmem:[#allocation2] sm:$0xff]  ;;  %v10118_v21 = vadd.f32 %v12596_v6, %v9921_v31  ;;  %v10084_v49 = vpop.f32.mrb[35].mxu1  ;;  %v12613_v25 = vpop.f32.mrb[32].mxu0 }
 0x32a   : > { %v10300_v43 = vadd.f32 %v10254_v52, %v10145_v41  ;;  %10126 = vst.msk [vmem:[#allocation2 + $0x20] sm:$0xff] %vm366_vm7, %v10115_v13  ;;  %v10148_v1 = vld [vmem:[#allocation2 + $0x18] sm:$0xff]  ;;  %v10116_v18 = vadd.f32 %v10084_v49, %v9919_v16  ;;  %v9924_v30 = vld [vmem:[#allocation2 + $0x50] sm:$0xff]  ;;  %v10286_v32 = vpop.f32.mrb[33].mxu0 }
 0x32b   : > { %10313 = vst.msk [vmem:[#allocation2 + $0x10] sm:$0xff] %vm366_vm7, %v10302_v12  ;;  %v10303_v24 = vadd.f32 %v12606_v62, %v10148_v1  ;;  %10129 = vst.msk [vmem:[#allocation2 + $0x38] sm:$0xff] %vm366_vm7, %v10118_v21  ;;  %v10146_v57 = vld [vmem:[#allocation2 + $0x8] sm:$0xff]  ;;  %v9922_v40 = vld [vmem:[#allocation2 + $0x40] sm:$0xff]  ;;  %v12614_v60 = vpop.f32.mrb[34].mxu0 }
 0x32c   : > { %10311 = vst.msk [vmem:[#allocation2] sm:$0xff] %vm366_vm7, %v10300_v43  ;;  %v10301_v50 = vadd.f32 %v10257_v5, %v10146_v57  ;;  %10127 = vst.msk [vmem:[#allocation2 + $0x28] sm:$0xff] %vm366_vm7, %v10116_v18  ;;  %v10289_v33 = vpop.f32.mrb[35].mxu0 }
 0x32d   : > { %10314 = vst.msk [vmem:[#allocation2 + $0x18] sm:$0xff] %vm366_vm7, %v10303_v24  ;;  %v9923_v54 = vld [vmem:[#allocation2 + $0x48] sm:$0xff] }
 0x32e   : > { %10312 = vst.msk [vmem:[#allocation2 + $0x8] sm:$0xff] %vm366_vm7, %v10301_v50  ;;  %v12599_v58 = vpop.f32.mrb[36].mxu1 }
 0x32f   : > { %v10121_v56 = vadd.f32 %v12599_v58, %v9924_v30  ;;  %v10097_v45 = vpop.f32.mrb[37].mxu1 }
 0x330   : > { %v10151_v42 = vld [vmem:[#allocation2 + $0x30] sm:$0xff]  ;;  %v10119_v35 = vadd.f32 %v10097_v45, %v9922_v40  ;;  %v12600_v26 = vpop.f32.mrb[38].mxu1 }
 0x331   : > { %v10306_v2 = vadd.f32 %v12609_v22, %v10151_v42  ;;  %10132 = vst.msk [vmem:[#allocation2 + $0x50] sm:$0xff] %vm366_vm7, %v10121_v56  ;;  %v10149_v36 = vld [vmem:[#allocation2 + $0x20] sm:$0xff]  ;;  %v10100_v51 = vpop.f32.mrb[39].mxu1 }
 0x332   : > { %v10324_v48 = vld [vmem:[#allocation2 + $0x10] sm:$0xff]  ;;  %v10304_v46 = vadd.f32 %v10270_v0, %v10149_v36  ;;  %10130 = vst.msk [vmem:[#allocation2 + $0x40] sm:$0xff] %vm366_vm7, %v10119_v35  ;;  %v10152_v61 = vld [vmem:[#allocation2 + $0x38] sm:$0xff]  ;;  %v10120_v19 = vadd.f32 %v10100_v51, %v9923_v54 }
 0x333   : > { %v10342_v10 = vadd.f32 %v16149_v4, %v10324_v48  ;;  %v10322_v37 = vld [vmem:[#allocation2] sm:$0xff]  ;;  %10317 = vst.msk [vmem:[#allocation2 + $0x30] sm:$0xff] %vm366_vm7, %v10306_v2  ;;  %v10307_v44 = vadd.f32 %v12610_v3, %v10152_v61  ;;  %v10150_v52 = vld [vmem:[#allocation2 + $0x28] sm:$0xff] }
 0x334   : > { %v10340_v14 = vadd.f32 %v16149_v4, %v10322_v37  ;;  %v10325_v39 = vld [vmem:[#allocation2 + $0x18] sm:$0xff]  ;;  %10315 = vst.msk [vmem:[#allocation2 + $0x20] sm:$0xff] %vm366_vm7, %v10304_v46  ;;  %v10305_v55 = vadd.f32 %v10273_v7, %v10150_v52  ;;  %10131 = vst.msk [vmem:[#allocation2 + $0x48] sm:$0xff] %vm366_vm7, %v10120_v19 }
 0x335   : > { %v10353_v28 = vmax.f32 %v10342_v10, 0.0  ;;  %v10343_v62 = vadd.f32 %v16149_v4, %v10325_v39  ;;  %v10323_v27 = vld [vmem:[#allocation2 + $0x8] sm:$0xff]  ;;  %10318 = vst.msk [vmem:[#allocation2 + $0x38] sm:$0xff] %vm366_vm7, %v10307_v44 }
 0x336   : > { %v10351_v23 = vmax.f32 %v10340_v14, 0.0  ;;  %v10341_v63 = vadd.f32 %v16149_v4, %v10323_v27  ;;  %10316 = vst.msk [vmem:[#allocation2 + $0x28] sm:$0xff] %vm366_vm7, %v10305_v55 }
 0x337   : > { %v11577_v17 = vpack.c.bf16 %v10353_v28, %v10353_v28  ;;  %v10354_v34 = vmax.f32 %v10343_v62, 0.0 }
 0x338   : > { %v11575_v5 = vpack.c.bf16 %v10351_v23, %v10351_v23  ;;  %v10352_v11 = vmax.f32 %v10341_v63, 0.0  ;;  %v10155_v38 = vld [vmem:[#allocation2 + $0x50] sm:$0xff] }
 0x339   : > { %10410 = vst.msk [vmem:[%s16164_s6 + $0x8] sm:$0xf] %vm10407_vm10, %v11577_v17  ;;  %v11578_v20 = vpack.c.bf16 %v10354_v34, %v10354_v34  ;;  %v10310_v9 = vadd.f32 %v12613_v25, %v10155_v38  ;;  %v10153_v29 = vld [vmem:[#allocation2 + $0x40] sm:$0xff] }
 0x33a   : > { %10408 = vst.msk [vmem:[%s16164_s6] sm:$0xf] %vm10407_vm10, %v11575_v5  ;;  %v11576_v53 = vpack.c.bf16 %v10352_v11, %v10352_v11  ;;  %v10328_v22 = vld [vmem:[#allocation2 + $0x30] sm:$0xff]  ;;  %v10308_v8 = vadd.f32 %v10286_v32, %v10153_v29 }
 0x33b   : > { %10411 = vst.msk [vmem:[%s16164_s6 + $0xc] sm:$0xf] %vm10407_vm10, %v11578_v20  ;;  %v10346_v47 = vadd.f32 %v16149_v4, %v10328_v22  ;;  %v10326_v59 = vld [vmem:[#allocation2 + $0x20] sm:$0xff]  ;;  %v10154_v0 = vld [vmem:[#allocation2 + $0x48] sm:$0xff] }
 0x33c   : > { %10321 = vst.msk [vmem:[#allocation2 + $0x50] sm:$0xff] %vm366_vm7, %v10310_v9  ;;  %v10344_v15 = vadd.f32 %v16149_v4, %v10326_v59  ;;  %v10329_v13 = vld [vmem:[#allocation2 + $0x38] sm:$0xff]  ;;  %10319 = vst.msk [vmem:[#allocation2 + $0x40] sm:$0xff] %vm366_vm7, %v10308_v8  ;;  %v10309_v31 = vadd.f32 %v10289_v33, %v10154_v0 }
 0x33d   : > { %10409 = vst.msk [vmem:[%s16164_s6 + $0x4] sm:$0xf] %vm10407_vm10, %v11576_v53  ;;  %v10357_v6 = vmax.f32 %v10346_v47, 0.0  ;;  %v10347_v3 = vadd.f32 %v16149_v4, %v10329_v13  ;;  %v10327_v12 = vld [vmem:[#allocation2 + $0x28] sm:$0xff] }
 0x33e   : > { %v10355_v41 = vmax.f32 %v10344_v15, 0.0  ;;  %v10345_v21 = vadd.f32 %v16149_v4, %v10327_v12  ;;  %10320 = vst.msk [vmem:[#allocation2 + $0x48] sm:$0xff] %vm366_vm7, %v10309_v31 }
 0x33f   : > { %v11581_v16 = vpack.c.bf16 %v10357_v6, %v10357_v6  ;;  %v10358_v49 = vmax.f32 %v10347_v3, 0.0 }
 0x340   : > { %v11579_v7 = vpack.c.bf16 %v10355_v41, %v10355_v41  ;;  %v10356_v43 = vmax.f32 %v10345_v21, 0.0 }
 0x341   : > { %10414 = vst.msk [vmem:[%s16164_s6 + $0x18] sm:$0xf] %vm10407_vm10, %v11581_v16  ;;  %v11582_v1 = vpack.c.bf16 %v10358_v49, %v10358_v49 }
 0x342   : > { %10412 = vst.msk [vmem:[%s16164_s6 + $0x10] sm:$0xf] %vm10407_vm10, %v11579_v7  ;;  %v11580_v18 = vpack.c.bf16 %v10356_v43, %v10356_v43 }
 0x343   : > { %v10332_v24 = vld [vmem:[#allocation2 + $0x50] sm:$0xff]  ;;  %10415 = vst.msk [vmem:[%s16164_s6 + $0x1c] sm:$0xf] %vm10407_vm10, %v11582_v1  ;;  %v10330_v50 = vld [vmem:[#allocation2 + $0x40] sm:$0xff] }
 0x344   : > { %v10350_v57 = vadd.f32 %v16149_v4, %v10332_v24  ;;  %10413 = vst.msk [vmem:[%s16164_s6 + $0x14] sm:$0xf] %vm10407_vm10, %v11580_v18  ;;  %v10348_v30 = vadd.f32 %v16149_v4, %v10330_v50 }
 0x345   : > { %v10331_v25 = vld [vmem:[#allocation2 + $0x48] sm:$0xff] }
 0x346   : > { %v10361_v58 = vmax.f32 %v10350_v57, 0.0  ;;  %v10359_v56 = vmax.f32 %v10348_v30, 0.0  ;;  %v10349_v40 = vadd.f32 %v16149_v4, %v10331_v25 }
 0x348   : > { %v11585_v45 = vpack.c.bf16 %v10361_v58, %v10361_v58  ;;  %v11583_v32 = vpack.c.bf16 %v10359_v56, %v10359_v56  ;;  %v10360_v42 = vmax.f32 %v10349_v40, 0.0 }
 0x34a   : > { %10418 = vst.msk [vmem:[%s16164_s6 + $0x28] sm:$0xf] %vm10407_vm10, %v11585_v45  ;;  %10416 = vst.msk [vmem:[%s16164_s6 + $0x20] sm:$0xf] %vm10407_vm10, %v11583_v32  ;;  %v11584_v35 = vpack.c.bf16 %v10360_v42, %v10360_v42 }
 0x34c   : > { %10417 = vst.msk [vmem:[%s16164_s6 + $0x24] sm:$0xf] %vm10407_vm10, %v11584_v35 }
 0x34d PF: > { %s13_s14 = sadd.s32 1, %s13008_s14   ;;  %s16213_s12 = smov %s13004_s13 }
 0x34e   : > { %p10_p5 = scmp.ge.s32.totalorder %s13_s14, 4   ;;  %s16214_s13 = smov %s16216_s15 }
 0x350   :  { %12 = sbr.rel (!%p10_p5) target bundleno = 2 (0x2), region = 119 }

</bundles_post_ra>
